<compile_context>
chip_gen: v5e
topology: v5e:2x2
jax: 0.10.0
libtpu: 0.0.40
codegen_flags: <defaults>
</compile_context>

<pallas_src>
import jax
import jax.numpy as jnp
from jax.experimental import pallas as pl
from jax.experimental.pallas import tpu as pltpu


def _conv1x1_kernel(w_ref, x_ref, o_ref):
    # One bf16 MXU matmul per K-chunk, accumulated in f32 directly into the
    # resident output block (out_spec index is constant across the K axis).
    k = pl.program_id(0)
    part = jnp.dot(w_ref[...], x_ref[...], preferred_element_type=jnp.float32)

    @pl.when(k == 0)
    def _():
        o_ref[...] = part

    @pl.when(k != 0)
    def _():
        o_ref[...] = o_ref[...] + part


def conv2d_1x1(x_nchw, w_oihw, *, tk=512):
    """Bias-free 1x1 conv, stride 1, as a K-streamed Pallas matmul kernel.

    x_nchw: (N, C_in, H, W) float32
    w_oihw: (C_out, C_in, 1, 1) float32
    returns (N, C_out, H, W) float32
    """
    N, C_in, H, W = x_nchw.shape
    C_out = w_oihw.shape[0]
    assert w_oihw.shape == (C_out, C_in, 1, 1)
    M = N * H * W

    # bf16 inputs (halves HBM traffic, single-pass MXU); f32 accumulation/out.
    w2d = w_oihw.reshape(C_out, C_in).astype(jnp.bfloat16)
    if N == 1:
        # Free view for the spec shape (N == 1): (C_in, M) with no transpose.
        x2d = x_nchw.reshape(C_in, M).astype(jnp.bfloat16)
    else:
        # TODO(synk): general-N path keeps one transpose; spec shape has N == 1.
        x2d = jnp.transpose(x_nchw, (1, 0, 2, 3)).reshape(C_in, M).astype(jnp.bfloat16)

    # Stream the reduction (C_in) in tk-sized chunks so the activation DMA of
    # chunk k+1 overlaps the dot on chunk k (matters most on v5e HBM).
    if C_in % tk != 0 or tk % 128 != 0:
        tk = C_in
    grid = (C_in // tk,)

    cost = pl.CostEstimate(
        flops=2 * M * C_in * C_out,
        transcendentals=0,
        bytes_accessed=(M * C_in * 2) + (C_in * C_out * 2) + (M * C_out * 4),
    )

    out = pl.pallas_call(
        _conv1x1_kernel,
        out_shape=jax.ShapeDtypeStruct((C_out, M), jnp.float32),
        grid_spec=pltpu.PrefetchScalarGridSpec(
            num_scalar_prefetch=0,
            grid=grid,
            in_specs=[
                # weight K-chunk: (256, tk) -> divisible by (8, 128)
                pl.BlockSpec((C_out, tk), lambda k: (0, k)),
                # activation K-chunk: (tk, M); last dim is the full M extent
                pl.BlockSpec((tk, M), lambda k: (k, 0)),
            ],
            # output: one full (C_out, M) block, resident across the K axis
            out_specs=pl.BlockSpec((C_out, M), lambda k: (0, 0)),
        ),
        compiler_params=pltpu.CompilerParams(
            dimension_semantics=("arbitrary",),
        ),
        cost_estimate=cost,
    )(w2d, x2d)

    # (C_out, M) -> (N, C_out, H, W); free reshape for N == 1.
    if N == 1:
        return out.reshape(1, C_out, H, W)
    return jnp.transpose(out.reshape(C_out, N, H, W), (1, 0, 2, 3))


if __name__ == "__main__":
    key = jax.random.PRNGKey(0)
    kx, kw = jax.random.split(key)

    # Shapes implied by the module: Conv2d(1024, 256, 1x1, bias=False) applied
    # to an input of (1, 1024, 28, 28).
    x = jax.random.normal(kx, (1, 1024, 28, 28), dtype=jnp.float32)
    w = jax.random.normal(kw, (256, 1024, 1, 1), dtype=jnp.float32) * 0.02

    y = jax.jit(conv2d_1x1)(x, w)
    y = jax.block_until_ready(y)
    assert y.shape == (1, 256, 28, 28), y.shape
    assert y.dtype == jnp.float32, y.dtype

    # Tight check: reference computed from the same bf16-rounded operands
    # (isolates the kernel from the deliberate bf16 input cast).
    x_r = x.astype(jnp.bfloat16).astype(jnp.float32)
    w_r = w.reshape(256, 1024).astype(jnp.bfloat16).astype(jnp.float32)
    y_ref_bf16in = jnp.einsum(
        "nchw,oc->nohw", x_r, w_r, precision=jax.lax.Precision.HIGHEST
    )
    assert jnp.allclose(y, y_ref_bf16in, atol=2e-3, rtol=2e-3), \
        "mismatch vs bf16-rounded reference"

    # Loose sanity check against the true f32 reference (covers the bf16
    # input-cast error with K = 1024).
    y_ref_f32 = jnp.einsum(
        "nchw,oc->nohw", x, w.reshape(256, 1024),
        precision=jax.lax.Precision.HIGHEST,
    )
    assert jnp.allclose(y, y_ref_f32, atol=5e-2, rtol=5e-2), \
        "mismatch vs f32 reference"

    print("KERNEL_OK")
</pallas_src>

<mosaic_0001>
module attributes {stable_mosaic.version = 11 : i64} {
  func.func @_conv1x1_kernel(%arg0: i32, %arg1: memref<256x512xbf16, #tpu.memory_space<vmem>>, %arg2: memref<512x784xbf16, #tpu.memory_space<vmem>>, %arg3: memref<256x784xf32, #tpu.memory_space<vmem>>) attributes {dimension_semantics = [#tpu.dimension_semantics<arbitrary>], iteration_bounds = array<i64: 2>, scalar_prefetch = 0 : i64, scratch_operands = 0 : i64, tpu.core_type = #tpu.core_type<tc>, window_params = [{transform_indices = @transform_0, window_bounds = array<i64: 256, 512>}, {transform_indices = @transform_1, window_bounds = array<i64: 512, 784>}, {pipeline_mode = #tpu.pipeline_mode<synchronous>, transform_indices = @transform_2, window_bounds = array<i64: 256, 784>}]} {
    %c0 = arith.constant 0 : index
    %c0_0 = arith.constant 0 : index
    %0 = vector.load %arg1[%c0, %c0_0] : memref<256x512xbf16, #tpu.memory_space<vmem>>, vector<256x512xbf16>
    %c0_1 = arith.constant 0 : index
    %c0_2 = arith.constant 0 : index
    %1 = vector.load %arg2[%c0_1, %c0_2] : memref<512x784xbf16, #tpu.memory_space<vmem>>, vector<512x784xbf16>
    %cst = arith.constant dense<0.000000e+00> : vector<256x784xf32>
    %2 = tpu.matmul %0, %1, %cst {dimension_numbers = #tpu.dot_dimension_numbers<[1], [0], [0], [1], [0, 0, 1, 1], [], []>} : vector<256x512xbf16>, vector<512x784xbf16>, vector<256x784xf32> -> vector<256x784xf32>
    %c0_i32 = arith.constant 0 : i32
    %3 = arith.cmpi eq, %arg0, %c0_i32 : i32
    %4 = arith.extui %3 : i1 to i32
    %c0_i32_3 = arith.constant 0 : i32
    %5 = arith.cmpi ne, %4, %c0_i32_3 : i32
    scf.if %5 {
      %c0_6 = arith.constant 0 : index
      %c0_7 = arith.constant 0 : index
      %9 = vector.load %arg3[%c0_6, %c0_7] : memref<256x784xf32, #tpu.memory_space<vmem>>, vector<256x784xf32>
      tpu.vector_store %arg3[%c0_6, %c0_7], %2 {strides = array<i32>} : memref<256x784xf32, #tpu.memory_space<vmem>>, vector<256x784xf32>,
    } else {
    }
    %c0_i32_4 = arith.constant 0 : i32
    %6 = arith.cmpi ne, %arg0, %c0_i32_4 : i32
    %7 = arith.extui %6 : i1 to i32
    %c0_i32_5 = arith.constant 0 : i32
    %8 = arith.cmpi ne, %7, %c0_i32_5 : i32
    scf.if %8 {
      %c0_6 = arith.constant 0 : index
      %c0_7 = arith.constant 0 : index
      %9 = vector.load %arg3[%c0_6, %c0_7] : memref<256x784xf32, #tpu.memory_space<vmem>>, vector<256x784xf32>
      %10 = arith.addf %9, %2 : vector<256x784xf32>
      %c0_8 = arith.constant 0 : index
      %c0_9 = arith.constant 0 : index
      %11 = vector.load %arg3[%c0_8, %c0_9] : memref<256x784xf32, #tpu.memory_space<vmem>>, vector<256x784xf32>
      tpu.vector_store %arg3[%c0_8, %c0_9], %10 {strides = array<i32>} : memref<256x784xf32, #tpu.memory_space<vmem>>, vector<256x784xf32>,
    } else {
    }
    return
  }
  func.func @transform_0(%arg0: i32) -> (i32, i32) {
    %c0_i32 = arith.constant 0 : i32
    %c0_i32_0 = arith.constant 0 : i32
    return %c0_i32, %arg0 : i32, i32
  }
  func.func @transform_1(%arg0: i32) -> (i32, i32) {
    %c0_i32 = arith.constant 0 : i32
    %c0_i32_0 = arith.constant 0 : i32
    return %arg0, %c0_i32 : i32, i32
  }
  func.func @transform_2(%arg0: i32) -> (i32, i32) {
    %c0_i32 = arith.constant 0 : i32
    %c0_i32_0 = arith.constant 0 : i32
    %c0_i32_1 = arith.constant 0 : i32
    return %c0_i32, %c0_i32_0 : i32, i32
  }
}

</mosaic_0001>

<bundles_post_ra>
// kernel: conv2d_1x1.1
= control target key start
LH: loop header
LB: loop body
LE: loop exit
PB: predicated region body
PF: predicated region fallthrough
CT: control target
= control target key end

     0   :  { %s7056_s9 = smov 0   ;;  %s7058_s10 = smov 0   ;;  %s11378_s0 = inlined_call_operand.vmem [shape: bf16[256,1024], index: 0, kind: input, shape index: {}]   ;;  %s11379_s1 = inlined_call_operand.vmem [shape: bf16[1024,784], index: 1, kind: input, shape index: {}]   ;;  %s11380_s2 = inlined_call_operand.vmem [shape: f32[256,784], index: 2, kind: output, shape index: {}]  }
   0x1   :  { %s7060_s11 = smov 0  }
   0x2 LB: > { %s7072_s12 = sadd.s32 4294967295, %s7039_s11   ;;  %s7075_s13 = sadd.s32 1, %s7039_s11   ;;  %s7039_s11 = sphi %s7060_s11, %s12090_s11   ;;  %s7035_s10 = sphi %s7058_s10, %s12089_s10   ;;  %s7031_s9 = sphi %s7056_s9, %s12088_s9  }
   0x3   : > { %s16_s14 = ssub.s32 %s7039_s11, %s7075_s13  ;;  %s19_s15 = sadd.s32 1, %s7035_s10 }
   0x4   : > { %p17_p0 = scmp.eq.s32.totalorder %s16_s14, 0  ;;  %p26_p1 = scmp.ne.s32.totalorder %s7035_s10, %s7031_s9 }
   0x5   : > { %p27_p2 = scmp.eq.s32.totalorder %s7039_s11, 0  ;;  %p5539_p4 = scmp.ge.s32.totalorder %s7039_s11, 2 }
   0x6   : > { %s7084_s16 = scalar_select %p17_p0, %s7035_s10, %s19_s15  }
   0x7   : > { %p28_p3 = por %p27_p2, %p26_p1  ;;  %99 = sbr.rel (%p5539_p4) target bundleno = 80 (0x50), region = 16 }
   0xc   : > { %102 = sbr.rel (!%p28_p3) target bundleno = 80 (0x50), region = 20  ;;  %s104_s17 = sand.u32 (%p28_p3), 1, %s7035_s10  }
   0xd   : > { %s6703_s18 = sshll.u32 (%p28_p3), %s7039_s11, 4  ;;  %s5540_s19 = sshll.u32 (%p28_p3), %s104_s17, 9 }
   0xe   : > { %s7092_s22 = scalar_lea.vmem (%p28_p3), %s11378_s0, %s6703_s18  ;;  %s7097_s23 = scalar_lea.vmem (%p28_p3), [#allocation2], %s5540_s19 }
   0xf   : > { %v122_v0 = vld [vmem:[%s7092_s22] sm:$0xff] (%p28_p3)  ;;  %v124_v1 = vld [vmem:[%s7092_s22 + $0x8] sm:$0xff] (%p28_p3) }
  0x10   : > { %v126_v2 = vld [vmem:[%s7092_s22 + $0x20] sm:$0xff] (%p28_p3)  ;;  %123 = vst [vmem:[%s7097_s23] sm:$0xff] (%p28_p3), %v122_v0  ;;  %v128_v3 = vld [vmem:[%s7092_s22 + $0x28] sm:$0xff] (%p28_p3) }
  0x11   : > { %125 = vst [vmem:[%s7097_s23 + $0x8] sm:$0xff] %v124_v1  ;;  %v130_v4 = vld [vmem:[%s7092_s22 + $0x40] sm:$0xff]  ;;  %v132_v5 = vld [vmem:[%s7092_s22 + $0x48] sm:$0xff] }
  0x12   : > { %127 = vst [vmem:[%s7097_s23 + $0x10] sm:$0xff] %v126_v2  ;;  %v134_v6 = vld [vmem:[%s7092_s22 + $0x60] sm:$0xff]  ;;  %v136_v7 = vld [vmem:[%s7092_s22 + $0x68] sm:$0xff] }
  0x13   : > { %129 = vst [vmem:[%s7097_s23 + $0x18] sm:$0xff] %v128_v3  ;;  %v138_v8 = vld [vmem:[%s7092_s22 + $0x80] sm:$0xff]  ;;  %v140_v9 = vld [vmem:[%s7092_s22 + $0x88] sm:$0xff] }
  0x14   : > { %131 = vst [vmem:[%s7097_s23 + $0x20] sm:$0xff] %v130_v4  ;;  %v142_v10 = vld [vmem:[%s7092_s22 + $0xa0] sm:$0xff]  ;;  %v144_v11 = vld [vmem:[%s7092_s22 + $0xa8] sm:$0xff] }
  0x15   : > { %133 = vst [vmem:[%s7097_s23 + $0x28] sm:$0xff] %v132_v5  ;;  %v146_v12 = vld [vmem:[%s7092_s22 + $0xc0] sm:$0xff]  ;;  %v148_v13 = vld [vmem:[%s7092_s22 + $0xc8] sm:$0xff] }
  0x16   : > { %135 = vst [vmem:[%s7097_s23 + $0x30] sm:$0xff] %v134_v6  ;;  %v150_v14 = vld [vmem:[%s7092_s22 + $0xe0] sm:$0xff]  ;;  %v152_v15 = vld [vmem:[%s7092_s22 + $0xe8] sm:$0xff] }
  0x17   : > { %137 = vst [vmem:[%s7097_s23 + $0x38] sm:$0xff] %v136_v7  ;;  %v154_v16 = vld [vmem:[%s7092_s22 + $0x100] sm:$0xff]  ;;  %v156_v17 = vld [vmem:[%s7092_s22 + $0x108] sm:$0xff] }
  0x18   : > { %139 = vst [vmem:[%s7097_s23 + $0x40] sm:$0xff] %v138_v8  ;;  %v158_v18 = vld [vmem:[%s7092_s22 + $0x120] sm:$0xff]  ;;  %v160_v19 = vld [vmem:[%s7092_s22 + $0x128] sm:$0xff] }
  0x19   : > { %141 = vst [vmem:[%s7097_s23 + $0x48] sm:$0xff] %v140_v9  ;;  %v162_v20 = vld [vmem:[%s7092_s22 + $0x140] sm:$0xff]  ;;  %v164_v21 = vld [vmem:[%s7092_s22 + $0x148] sm:$0xff] }
  0x1a   : > { %143 = vst [vmem:[%s7097_s23 + $0x50] sm:$0xff] %v142_v10  ;;  %v166_v22 = vld [vmem:[%s7092_s22 + $0x160] sm:$0xff]  ;;  %v168_v23 = vld [vmem:[%s7092_s22 + $0x168] sm:$0xff] }
  0x1b   : > { %145 = vst [vmem:[%s7097_s23 + $0x58] sm:$0xff] %v144_v11  ;;  %v170_v24 = vld [vmem:[%s7092_s22 + $0x180] sm:$0xff]  ;;  %v172_v25 = vld [vmem:[%s7092_s22 + $0x188] sm:$0xff] }
  0x1c   : > { %147 = vst [vmem:[%s7097_s23 + $0x60] sm:$0xff] %v146_v12  ;;  %v174_v26 = vld [vmem:[%s7092_s22 + $0x1a0] sm:$0xff]  ;;  %v176_v27 = vld [vmem:[%s7092_s22 + $0x1a8] sm:$0xff] }
  0x1d   : > { %149 = vst [vmem:[%s7097_s23 + $0x68] sm:$0xff] %v148_v13  ;;  %v178_v28 = vld [vmem:[%s7092_s22 + $0x1c0] sm:$0xff]  ;;  %v180_v29 = vld [vmem:[%s7092_s22 + $0x1c8] sm:$0xff] }
  0x1e   : > { %151 = vst [vmem:[%s7097_s23 + $0x70] sm:$0xff] %v150_v14  ;;  %v182_v30 = vld [vmem:[%s7092_s22 + $0x1e0] sm:$0xff]  ;;  %v184_v31 = vld [vmem:[%s7092_s22 + $0x1e8] sm:$0xff] }
  0x1f   : > { %153 = vst [vmem:[%s7097_s23 + $0x78] sm:$0xff] %v152_v15  ;;  %v186_v32 = vld [vmem:[%s7092_s22 + $0x200] sm:$0xff]  ;;  %v188_v33 = vld [vmem:[%s7092_s22 + $0x208] sm:$0xff] }
  0x20   : > { %155 = vst [vmem:[%s7097_s23 + $0x80] sm:$0xff] %v154_v16  ;;  %v190_v34 = vld [vmem:[%s7092_s22 + $0x220] sm:$0xff]  ;;  %v192_v35 = vld [vmem:[%s7092_s22 + $0x228] sm:$0xff] }
  0x21   : > { %157 = vst [vmem:[%s7097_s23 + $0x88] sm:$0xff] %v156_v17  ;;  %v194_v36 = vld [vmem:[%s7092_s22 + $0x240] sm:$0xff]  ;;  %v196_v37 = vld [vmem:[%s7092_s22 + $0x248] sm:$0xff] }
  0x22   : > { %159 = vst [vmem:[%s7097_s23 + $0x90] sm:$0xff] %v158_v18  ;;  %v198_v38 = vld [vmem:[%s7092_s22 + $0x260] sm:$0xff]  ;;  %v200_v39 = vld [vmem:[%s7092_s22 + $0x268] sm:$0xff] }
  0x23   : > { %161 = vst [vmem:[%s7097_s23 + $0x98] sm:$0xff] %v160_v19  ;;  %v202_v40 = vld [vmem:[%s7092_s22 + $0x280] sm:$0xff]  ;;  %v204_v41 = vld [vmem:[%s7092_s22 + $0x288] sm:$0xff] }
  0x24   : > { %163 = vst [vmem:[%s7097_s23 + $0xa0] sm:$0xff] %v162_v20  ;;  %v206_v42 = vld [vmem:[%s7092_s22 + $0x2a0] sm:$0xff]  ;;  %v208_v43 = vld [vmem:[%s7092_s22 + $0x2a8] sm:$0xff] }
  0x25   : > { %165 = vst [vmem:[%s7097_s23 + $0xa8] sm:$0xff] %v164_v21  ;;  %v210_v44 = vld [vmem:[%s7092_s22 + $0x2c0] sm:$0xff]  ;;  %v212_v45 = vld [vmem:[%s7092_s22 + $0x2c8] sm:$0xff] }
  0x26   : > { %167 = vst [vmem:[%s7097_s23 + $0xb0] sm:$0xff] %v166_v22  ;;  %v214_v46 = vld [vmem:[%s7092_s22 + $0x2e0] sm:$0xff]  ;;  %v216_v47 = vld [vmem:[%s7092_s22 + $0x2e8] sm:$0xff] }
  0x27   : > { %169 = vst [vmem:[%s7097_s23 + $0xb8] sm:$0xff] %v168_v23  ;;  %v218_v48 = vld [vmem:[%s7092_s22 + $0x300] sm:$0xff]  ;;  %v220_v49 = vld [vmem:[%s7092_s22 + $0x308] sm:$0xff] }
  0x28   : > { %171 = vst [vmem:[%s7097_s23 + $0xc0] sm:$0xff] %v170_v24  ;;  %v222_v50 = vld [vmem:[%s7092_s22 + $0x320] sm:$0xff]  ;;  %v224_v51 = vld [vmem:[%s7092_s22 + $0x328] sm:$0xff] }
  0x29   : > { %173 = vst [vmem:[%s7097_s23 + $0xc8] sm:$0xff] %v172_v25  ;;  %v226_v52 = vld [vmem:[%s7092_s22 + $0x340] sm:$0xff]  ;;  %v228_v53 = vld [vmem:[%s7092_s22 + $0x348] sm:$0xff] }
  0x2a   : > { %175 = vst [vmem:[%s7097_s23 + $0xd0] sm:$0xff] %v174_v26  ;;  %v230_v54 = vld [vmem:[%s7092_s22 + $0x360] sm:$0xff]  ;;  %v232_v55 = vld [vmem:[%s7092_s22 + $0x368] sm:$0xff] }
  0x2b   : > { %177 = vst [vmem:[%s7097_s23 + $0xd8] sm:$0xff] %v176_v27  ;;  %v234_v56 = vld [vmem:[%s7092_s22 + $0x380] sm:$0xff]  ;;  %v236_v57 = vld [vmem:[%s7092_s22 + $0x388] sm:$0xff] }
  0x2c   : > { %179 = vst [vmem:[%s7097_s23 + $0xe0] sm:$0xff] %v178_v28  ;;  %v238_v58 = vld [vmem:[%s7092_s22 + $0x3a0] sm:$0xff]  ;;  %v240_v59 = vld [vmem:[%s7092_s22 + $0x3a8] sm:$0xff] }
  0x2d   : > { %181 = vst [vmem:[%s7097_s23 + $0xe8] sm:$0xff] %v180_v29  ;;  %v242_v60 = vld [vmem:[%s7092_s22 + $0x3c0] sm:$0xff]  ;;  %v244_v61 = vld [vmem:[%s7092_s22 + $0x3c8] sm:$0xff] }
  0x2e   : > { %183 = vst [vmem:[%s7097_s23 + $0xf0] sm:$0xff] %v182_v30  ;;  %v246_v62 = vld [vmem:[%s7092_s22 + $0x3e0] sm:$0xff]  ;;  %v248_v63 = vld [vmem:[%s7092_s22 + $0x3e8] sm:$0xff] }
  0x2f   : > { %185 = vst [vmem:[%s7097_s23 + $0xf8] sm:$0xff] %v184_v31 }
  0x30   : > { %187 = vst [vmem:[%s7097_s23 + $0x100] sm:$0xff] %v186_v32 }
  0x31   : > { %189 = vst [vmem:[%s7097_s23 + $0x108] sm:$0xff] %v188_v33 }
  0x32   : > { %191 = vst [vmem:[%s7097_s23 + $0x110] sm:$0xff] %v190_v34 }
  0x33   : > { %193 = vst [vmem:[%s7097_s23 + $0x118] sm:$0xff] %v192_v35 }
  0x34   : > { %195 = vst [vmem:[%s7097_s23 + $0x120] sm:$0xff] %v194_v36 }
  0x35   : > { %197 = vst [vmem:[%s7097_s23 + $0x128] sm:$0xff] %v196_v37 }
  0x36   : > { %199 = vst [vmem:[%s7097_s23 + $0x130] sm:$0xff] %v198_v38 }
  0x37   : > { %201 = vst [vmem:[%s7097_s23 + $0x138] sm:$0xff] %v200_v39 }
  0x38   : > { %203 = vst [vmem:[%s7097_s23 + $0x140] sm:$0xff] %v202_v40 }
  0x39   : > { %205 = vst [vmem:[%s7097_s23 + $0x148] sm:$0xff] %v204_v41 }
  0x3a   : > { %207 = vst [vmem:[%s7097_s23 + $0x150] sm:$0xff] %v206_v42 }
  0x3b   : > { %209 = vst [vmem:[%s7097_s23 + $0x158] sm:$0xff] %v208_v43 }
  0x3c   : > { %211 = vst [vmem:[%s7097_s23 + $0x160] sm:$0xff] %v210_v44 }
  0x3d   : > { %213 = vst [vmem:[%s7097_s23 + $0x168] sm:$0xff] %v212_v45 }
  0x3e   : > { %215 = vst [vmem:[%s7097_s23 + $0x170] sm:$0xff] %v214_v46 }
  0x3f   : > { %217 = vst [vmem:[%s7097_s23 + $0x178] sm:$0xff] %v216_v47 }
  0x40   : > { %219 = vst [vmem:[%s7097_s23 + $0x180] sm:$0xff] %v218_v48 }
  0x41   : > { %221 = vst [vmem:[%s7097_s23 + $0x188] sm:$0xff] %v220_v49 }
  0x42   : > { %223 = vst [vmem:[%s7097_s23 + $0x190] sm:$0xff] %v222_v50 }
  0x43   : > { %225 = vst [vmem:[%s7097_s23 + $0x198] sm:$0xff] %v224_v51 }
  0x44   : > { %227 = vst [vmem:[%s7097_s23 + $0x1a0] sm:$0xff] %v226_v52 }
  0x45   : > { %229 = vst [vmem:[%s7097_s23 + $0x1a8] sm:$0xff] %v228_v53 }
  0x46   : > { %231 = vst [vmem:[%s7097_s23 + $0x1b0] sm:$0xff] %v230_v54 }
  0x47   : > { %233 = vst [vmem:[%s7097_s23 + $0x1b8] sm:$0xff] %v232_v55 }
  0x48   : > { %235 = vst [vmem:[%s7097_s23 + $0x1c0] sm:$0xff] %v234_v56 }
  0x49   : > { %237 = vst [vmem:[%s7097_s23 + $0x1c8] sm:$0xff] %v236_v57 }
  0x4a   : > { %239 = vst [vmem:[%s7097_s23 + $0x1d0] sm:$0xff] %v238_v58 }
  0x4b   : > { %241 = vst [vmem:[%s7097_s23 + $0x1d8] sm:$0xff] %v240_v59 }
  0x4c   : > { %243 = vst [vmem:[%s7097_s23 + $0x1e0] sm:$0xff] %v242_v60 }
  0x4d   : > { %245 = vst [vmem:[%s7097_s23 + $0x1e8] sm:$0xff] %v244_v61 }
  0x4e   : > { %247 = vst [vmem:[%s7097_s23 + $0x1f0] sm:$0xff] %v246_v62 }
  0x4f   : > { %249 = vst [vmem:[%s7097_s23 + $0x1f8] sm:$0xff] %v248_v63 }
  0x50 PF: > { %p5543_p5 = scmp.ge.s32.totalorder %s7039_s11, 1  ;;  %p264_p6 = scmp.lt.s32.totalorder %s7039_s11, 3 }
  0x52   : > { %p265_p7 = pnand %p5543_p5, %p264_p6 }
  0x54   : > { %268 = sbr.rel (%p265_p7) target bundleno = 2510 (0x9ce), region = 47 }
  0x59   : > { %s5545_s24 = sshll.u32 %s7072_s12, 6  ;;  %s271_s29 = sand.u32 1, %s7031_s9  }
  0x5a   : > { %p295_p8 = scmp.lt.s32.totalorder %s5545_s24, 127  ;;  %s7273_s30 = sshll.u32 %s271_s29, 9 }
  0x5b   : > { %s7300_s3 = scalar_lea.vmem [#allocation2], %s7273_s30  ;;  %p6699_p9 = scmp.ne.s32.totalorder %s7072_s12, 0 }
  0x5c   : > { %s12092_s24 = smov (!%p295_p8, %s5545_s24), 127 }
  0x5d   : > { %s6992_s25 = smul.u32 28, %s12092_s24 }
  0x5f   : > { %s7230_s28 = scalar_lea.vmem %s11379_s1, %s6992_s25 }
  0x60   : > { %v6001_v0 = vld [vmem:[%s7230_s28 + $0x188] sm:$0xf]  ;;  %v6820_v1 = vld [vmem:[%s7230_s28 + $0x1a0] sm:$0xf0]  ;;  %v5973_v11 = vld [vmem:[%s7230_s28 + $0x150] sm:$0xf] }
  0x61   : > { %v6225_v2 = vld [vmem:[%s7230_s28 + $0x348] sm:$0xf]  ;;  %v6002_v3 = vor.u32 %v6820_v1, %v6001_v0  ;;  %v6876_v4 = vld [vmem:[%s7230_s28 + $0x360] sm:$0xf0]  ;;  %v6813_v13 = vld [vmem:[%s7230_s28 + $0x168] sm:$0xf0] }
  0x62   : > { %v6449_v5 = vld [vmem:[%s7230_s28 + $0x508] sm:$0xf]  ;;  %v6932_v6 = vld [vmem:[%s7230_s28 + $0x520] sm:$0xf0]  ;;  %v6226_v7 = vor.u32 %v6876_v4, %v6225_v2  ;;  %v6197_v14 = vld [vmem:[%s7230_s28 + $0x310] sm:$0xf]  ;;  %v5974_v16 = vor.u32 %v6813_v13, %v5973_v11 }
  0x63   : > { %v6450_v8 = vor.u32 %v6932_v6, %v6449_v5  ;;  %v6673_v9 = vld [vmem:[%s7230_s28 + $0x6c8] sm:$0xf]  ;;  %v6988_v10 = vld [vmem:[%s7230_s28 + $0x6e0] sm:$0xf0]  ;;  %2093 = vmatpush.bf16.msra.mxu0 %v6002_v3  ;;  %v6869_v15 = vld [vmem:[%s7230_s28 + $0x328] sm:$0xf0] }
  0x64   : > { %v6674_v12 = vor.u32 %v6988_v10, %v6673_v9  ;;  %2182 = vmatpush.bf16.msra.mxu1 %v6226_v7  ;;  %v6198_v17 = vor.u32 %v6869_v15, %v6197_v14  ;;  %v6421_v18 = vld [vmem:[%s7230_s28 + $0x4d0] sm:$0xf]  ;;  %v6925_v19 = vld [vmem:[%s7230_s28 + $0x4e8] sm:$0xf0]  ;;  %v5945_v23 = vld [vmem:[%s7230_s28 + $0x118] sm:$0xf] }
  0x65   : > { %2271 = vmatpush.bf16.msra.mxu2 %v6450_v8  ;;  %v6645_v20 = vld [vmem:[%s7230_s28 + $0x690] sm:$0xf]  ;;  %v6422_v21 = vor.u32 %v6925_v19, %v6421_v18  ;;  %v6981_v22 = vld [vmem:[%s7230_s28 + $0x6a8] sm:$0xf0]  ;;  %v6806_v24 = vld [vmem:[%s7230_s28 + $0x130] sm:$0xf0] }
  0x66   : > { %2360 = vmatpush.bf16.msra.mxu3 %v6674_v12  ;;  %v6646_v25 = vor.u32 %v6981_v22, %v6645_v20  ;;  %v6169_v26 = vld [vmem:[%s7230_s28 + $0x2d8] sm:$0xf]  ;;  %v6862_v27 = vld [vmem:[%s7230_s28 + $0x2f0] sm:$0xf0]  ;;  %v5946_v29 = vor.u32 %v6806_v24, %v5945_v23  ;;  %v5917_v35 = vld [vmem:[%s7230_s28 + $0xe0] sm:$0xf] }
  0x67   : > { %v6393_v28 = vld [vmem:[%s7230_s28 + $0x498] sm:$0xf]  ;;  %2094 = vmatpush.bf16.msra.mxu0 %v5974_v16  ;;  %v6918_v30 = vld [vmem:[%s7230_s28 + $0x4b0] sm:$0xf0]  ;;  %v6170_v33 = vor.u32 %v6862_v27, %v6169_v26  ;;  %v6799_v36 = vld [vmem:[%s7230_s28 + $0xf8] sm:$0xf0] }
  0x68   : > { %v6617_v31 = vld [vmem:[%s7230_s28 + $0x658] sm:$0xf]  ;;  %v6974_v32 = vld [vmem:[%s7230_s28 + $0x670] sm:$0xf0]  ;;  %2183 = vmatpush.bf16.msra.mxu1 %v6198_v17  ;;  %v6394_v34 = vor.u32 %v6918_v30, %v6393_v28  ;;  %v6141_v37 = vld [vmem:[%s7230_s28 + $0x2a0] sm:$0xf]  ;;  %v5918_v44 = vor.u32 %v6799_v36, %v5917_v35 }
  0x69   : > { %2272 = vmatpush.bf16.msra.mxu2 %v6422_v21  ;;  %v6618_v38 = vor.u32 %v6974_v32, %v6617_v31  ;;  %v6855_v39 = vld [vmem:[%s7230_s28 + $0x2b8] sm:$0xf0]  ;;  %v6365_v40 = vld [vmem:[%s7230_s28 + $0x460] sm:$0xf]  ;;  %v5889_v47 = vld [vmem:[%s7230_s28 + $0xa8] sm:$0xf] }
  0x6a   : > { %2361 = vmatpush.bf16.msra.mxu3 %v6646_v25  ;;  %v6911_v41 = vld [vmem:[%s7230_s28 + $0x478] sm:$0xf0]  ;;  %v6589_v42 = vld [vmem:[%s7230_s28 + $0x620] sm:$0xf]  ;;  %v6142_v45 = vor.u32 %v6855_v39, %v6141_v37  ;;  %v6792_v48 = vld [vmem:[%s7230_s28 + $0xc0] sm:$0xf0] }
  0x6b   : > { %v6967_v43 = vld [vmem:[%s7230_s28 + $0x638] sm:$0xf0]  ;;  %2095 = vmatpush.bf16.msra.mxu0 %v5946_v29  ;;  %v6366_v46 = vor.u32 %v6911_v41, %v6365_v40  ;;  %v6113_v49 = vld [vmem:[%s7230_s28 + $0x268] sm:$0xf]  ;;  %v6848_v51 = vld [vmem:[%s7230_s28 + $0x280] sm:$0xf0]  ;;  %v5890_v56 = vor.u32 %v6792_v48, %v5889_v47 }
  0x6c   : > { %2184 = vmatpush.bf16.msra.mxu1 %v6170_v33  ;;  %v6590_v50 = vor.u32 %v6967_v43, %v6589_v42  ;;  %v6337_v52 = vld [vmem:[%s7230_s28 + $0x428] sm:$0xf]  ;;  %v6904_v53 = vld [vmem:[%s7230_s28 + $0x440] sm:$0xf0]  ;;  %v6114_v57 = vor.u32 %v6848_v51, %v6113_v49  ;;  %v5861_v59 = vld [vmem:[%s7230_s28 + $0x70] sm:$0xf] }
  0x6d   : > { %2273 = vmatpush.bf16.msra.mxu2 %v6394_v34  ;;  %v6561_v54 = vld [vmem:[%s7230_s28 + $0x5e8] sm:$0xf]  ;;  %v6960_v55 = vld [vmem:[%s7230_s28 + $0x600] sm:$0xf0]  ;;  %v6338_v58 = vor.u32 %v6904_v53, %v6337_v52  ;;  %v6785_v60 = vld [vmem:[%s7230_s28 + $0x88] sm:$0xf0] }
  0x6e   : > { %2362 = vmatpush.bf16.msra.mxu3 %v6618_v38  ;;  %v6085_v61 = vld [vmem:[%s7230_s28 + $0x230] sm:$0xf]  ;;  %v6562_v62 = vor.u32 %v6960_v55, %v6561_v54  ;;  %v6841_v63 = vld [vmem:[%s7230_s28 + $0x248] sm:$0xf0]  ;;  %v5862_v4 = vor.u32 %v6785_v60, %v5861_v59  ;;  %v5833_v7 = vld [vmem:[%s7230_s28 + $0x38] sm:$0xf] }
  0x6f   : > { %2096 = vmatpush.bf16.msra.mxu0 %v5918_v44  ;;  %v6309_v0 = vld [vmem:[%s7230_s28 + $0x3f0] sm:$0xf]  ;;  %v6897_v1 = vld [vmem:[%s7230_s28 + $0x408] sm:$0xf0]  ;;  %v6086_v5 = vor.u32 %v6841_v63, %v6085_v61  ;;  %v6778_v8 = vld [vmem:[%s7230_s28 + $0x50] sm:$0xf0] }
  0x70   : > { %2185 = vmatpush.bf16.msra.mxu1 %v6142_v45  ;;  %v6533_v2 = vld [vmem:[%s7230_s28 + $0x5b0] sm:$0xf]  ;;  %v6953_v3 = vld [vmem:[%s7230_s28 + $0x5c8] sm:$0xf0]  ;;  %v6310_v6 = vor.u32 %v6897_v1, %v6309_v0  ;;  %v6057_v9 = vld [vmem:[%s7230_s28 + $0x1f8] sm:$0xf]  ;;  %v5834_v17 = vor.u32 %v6778_v8, %v5833_v7 }
  0x71   : > { %2274 = vmatpush.bf16.msra.mxu2 %v6366_v46  ;;  %v6534_v10 = vor.u32 %v6953_v3, %v6533_v2  ;;  %v6834_v11 = vld [vmem:[%s7230_s28 + $0x210] sm:$0xf0]  ;;  %v6281_v12 = vld [vmem:[%s7230_s28 + $0x3b8] sm:$0xf]  ;;  %v5805_v16 = vld [vmem:[%s7230_s28] sm:$0xf] }
  0x72   : > { %2363 = vmatpush.bf16.msra.mxu3 %v6590_v50  ;;  %v6890_v13 = vld [vmem:[%s7230_s28 + $0x3d0] sm:$0xf0]  ;;  %v6505_v14 = vld [vmem:[%s7230_s28 + $0x578] sm:$0xf]  ;;  %v6771_v18 = vld [vmem:[%s7230_s28 + $0x18] sm:$0xf0]  ;;  %v6058_v21 = vor.u32 %v6834_v11, %v6057_v9 }
  0x73   : > { %2097 = vmatpush.bf16.msra.mxu0 %v5890_v56  ;;  %v6946_v15 = vld [vmem:[%s7230_s28 + $0x590] sm:$0xf0]  ;;  %v6029_v19 = vld [vmem:[%s7230_s28 + $0x1c0] sm:$0xf]  ;;  %v6827_v20 = vld [vmem:[%s7230_s28 + $0x1d8] sm:$0xf0]  ;;  %v6282_v22 = vor.u32 %v6890_v13, %v6281_v12  ;;  %v5806_v33 = vor.u32 %v6771_v18, %v5805_v16 }
  0x74   : > { %2186 = vmatpush.bf16.msra.mxu1 %v6114_v57  ;;  %v6253_v23 = vld [vmem:[%s7230_s28 + $0x380] sm:$0xf]  ;;  %v6883_v24 = vld [vmem:[%s7230_s28 + $0x398] sm:$0xf0]  ;;  %v6506_v26 = vor.u32 %v6946_v15, %v6505_v14  ;;  %v6706_v29 = vld [vmem:[%s7300_s3 + $0xc] sm:$0xf0]  ;;  %v6030_v37 = vor.u32 %v6827_v20, %v6029_v19 }
  0x75   : > { %2275 = vmatpush.bf16.msra.mxu2 %v6338_v58  ;;  %v6477_v25 = vld [vmem:[%s7230_s28 + $0x540] sm:$0xf]  ;;  %v6939_v27 = vld [vmem:[%s7230_s28 + $0x558] sm:$0xf0]  ;;  %v6704_v30 = vld [vmem:[%s7300_s3 + $0x4] sm:$0xf]  ;;  %v6254_v38 = vor.u32 %v6883_v24, %v6253_v23 }
  0x76   : > { %2364 = vmatpush.bf16.msra.mxu3 %v6562_v62  ;;  %v5549_v28 = vld [vmem:[%s7300_s3] sm:$0xf]  ;;  %v6929_v31 = vld [vmem:[%s7230_s28 + $0x50c] sm:$0xf]  ;;  %v6451_v32 = vld [vmem:[%s7230_s28 + $0x524] sm:$0xf0]  ;;  %v6478_v42 = vor.u32 %v6939_v27, %v6477_v25 }
  0x77   : > { %2098 = vmatpush.bf16.msra.mxu0 %v5862_v4  ;;  %v5551_v34 = vld [vmem:[%s7300_s3 + $0x10] sm:$0xf0]  ;;  %v6985_v35 = vld [vmem:[%s7230_s28 + $0x6cc] sm:$0xf]  ;;  %v6675_v36 = vld [vmem:[%s7230_s28 + $0x6e4] sm:$0xf0]  ;;  %v6454_v44 = vor.u32 %v6929_v31, %v6451_v32  ;;  %v7316_v47 = vor.u32 %v6706_v29, %v5549_v28 }
  0x78   : > { %2187 = vmatpush.bf16.msra.mxu1 %v6086_v5  ;;  %v5557_v39 = vld [vmem:[%s7300_s3 + $0x8] sm:$0xf]  ;;  %v6707_v40 = vld [vmem:[%s7300_s3 + $0x14] sm:$0xf0]  ;;  %v6705_v41 = vld [vmem:[%s7300_s3 + $0xc] sm:$0xf]  ;;  %v6678_v48 = vor.u32 %v6985_v35, %v6675_v36  ;;  %v7320_v51 = vor.u32 %v6704_v30, %v5551_v34 }
  0x79   : > { %2276 = vmatpush.bf16.msra.mxu2 %v6310_v6  ;;  %v5559_v43 = vld [vmem:[%s7300_s3 + $0x18] sm:$0xf0]  ;;  %v6817_v45 = vld [vmem:[%s7230_s28 + $0x18c] sm:$0xf]  ;;  %v6003_v46 = vld [vmem:[%s7230_s28 + $0x1a4] sm:$0xf0]  ;;  %v7322_v52 = vor.u32 %v6707_v40, %v5557_v39 }
  0x7a   : > { %2365 = vmatpush.bf16.msra.mxu3 %v6534_v10  ;;  %v6873_v49 = vld [vmem:[%s7230_s28 + $0x34c] sm:$0xf]  ;;  %v6227_v50 = vld [vmem:[%s7230_s28 + $0x364] sm:$0xf0]  ;;  %v7324_v53 = vor.u32 %v6705_v41, %v5559_v43  ;;  %v6006_v54 = vor.u32 %v6817_v45, %v6003_v46  ;;  %v6922_v56 = vld [vmem:[%s7230_s28 + $0x4d4] sm:$0xf] }
  0x7b   : > { %2099 = vmatpush.bf16.msra.mxu0 %v5834_v17  ;;  %11422 = vst [vmem:[#allocation3_spill] sm:$0xff] %v7322_v52  ;;  %v6230_v55 = vor.u32 %v6873_v49, %v6227_v50  ;;  %v6423_v57 = vld [vmem:[%s7230_s28 + $0x4ec] sm:$0xf0]  ;;  %v6978_v58 = vld [vmem:[%s7230_s28 + $0x694] sm:$0xf] }
  0x7c   : > { %2188 = vmatpush.bf16.msra.mxu1 %v6058_v21  ;;  %11423 = vst [vmem:[#allocation4_spill] sm:$0xff] %v7324_v53  ;;  %v6426_v59 = vor.u32 %v6922_v56, %v6423_v57  ;;  %v6647_v60 = vld [vmem:[%s7230_s28 + $0x6ac] sm:$0xf0]  ;;  %v6810_v61 = vld [vmem:[%s7230_s28 + $0x154] sm:$0xf] }
  0x7d   : > { %2277 = vmatpush.bf16.msra.mxu2 %v6282_v22  ;;  %v5975_v62 = vld [vmem:[%s7230_s28 + $0x16c] sm:$0xf0]  ;;  %v6650_v63 = vor.u32 %v6978_v58, %v6647_v60  ;;  %v6866_v1 = vld [vmem:[%s7230_s28 + $0x314] sm:$0xf]  ;;  %v5565_v4 = vld [vmem:[%s7300_s3 + $0x20] sm:$0xf] }
  0x7e   : > { %2366 = vmatpush.bf16.msra.mxu3 %v6506_v26  ;;  %v5978_v0 = vor.u32 %v6810_v61, %v5975_v62  ;;  %v6199_v2 = vld [vmem:[%s7230_s28 + $0x32c] sm:$0xf0]  ;;  %v6708_v6 = vld [vmem:[%s7300_s3 + $0x24] sm:$0xf]  ;;  %v5567_v7 = vld [vmem:[%s7300_s3 + $0x30] sm:$0xf0] }
  0x7f   : > { %2100 = vmatpush.bf16.msra.mxu0 %v5806_v33  ;;  %v6202_v3 = vor.u32 %v6866_v1, %v6199_v2  ;;  %v6710_v5 = vld [vmem:[%s7300_s3 + $0x2c] sm:$0xf0]  ;;  %v5573_v8 = vld [vmem:[%s7300_s3 + $0x28] sm:$0xf]  ;;  %v6711_v9 = vld [vmem:[%s7300_s3 + $0x34] sm:$0xf0]  ;;  %v7348_v13 = vor.u32 %v6708_v6, %v5567_v7 }
  0x80   : > { %2189 = vmatpush.bf16.msra.mxu1 %v6030_v37  ;;  %v6709_v10 = vld [vmem:[%s7300_s3 + $0x2c] sm:$0xf]  ;;  %v5575_v11 = vld [vmem:[%s7300_s3 + $0x38] sm:$0xf0]  ;;  %v7346_v12 = vor.u32 %v6710_v5, %v5565_v4  ;;  %v7350_v14 = vor.u32 %v6711_v9, %v5573_v8  ;;  %v5581_v16 = vld [vmem:[%s7300_s3 + $0x40] sm:$0xf] }
  0x81   : > { %2278 = vmatpush.bf16.msra.mxu2 %v6254_v38  ;;  %v7352_v15 = vor.u32 %v6709_v10, %v5575_v11  ;;  %v6714_v17 = vld [vmem:[%s7300_s3 + $0x4c] sm:$0xf0]  ;;  %v6712_v18 = vld [vmem:[%s7300_s3 + $0x44] sm:$0xf]  ;;  %v5583_v19 = vld [vmem:[%s7300_s3 + $0x50] sm:$0xf0] }
  0x82   : > { %2367 = vmatpush.bf16.msra.mxu3 %v6478_v42  ;;  %2101 = vmatmul.bf16.vlgmr.msra.gmra.mxu0 %v7316_v47  ;;  %v5589_v20 = vld [vmem:[%s7300_s3 + $0x48] sm:$0xf]  ;;  %v6715_v21 = vld [vmem:[%s7300_s3 + $0x54] sm:$0xf0]  ;;  %v6713_v22 = vld [vmem:[%s7300_s3 + $0x4c] sm:$0xf]  ;;  %v7366_v24 = vor.u32 %v6714_v17, %v5581_v16  ;;  %v7368_v25 = vor.u32 %v6712_v18, %v5583_v19 }
  0x83   : > { %2190 = vmatmul.bf16.vlgmr.msra.gmra.mxu1 %v7320_v51  ;;  %2449 = vmatpush.bf16.msrb.mxu0 %v6006_v54  ;;  %v5591_v23 = vld [vmem:[%s7300_s3 + $0x58] sm:$0xf0]  ;;  %v7370_v26 = vor.u32 %v6715_v21, %v5589_v20  ;;  %v6395_v29 = vld [vmem:[%s7230_s28 + $0x4b4] sm:$0xf0]  ;;  %v5597_v40 = vld [vmem:[%s7300_s3 + $0x60] sm:$0xf] }
  0x84   : > { %2279 = vmatmul.bf16.vlgmr.msra.gmra.mxu2 %v7322_v52  ;;  %2538 = vmatpush.bf16.msrb.mxu1 %v6230_v55  ;;  %v7372_v27 = vor.u32 %v6713_v22, %v5591_v23  ;;  %v6915_v28 = vld [vmem:[%s7230_s28 + $0x49c] sm:$0xf]  ;;  %v6619_v32 = vld [vmem:[%s7230_s28 + $0x674] sm:$0xf0]  ;;  %v6718_v41 = vld [vmem:[%s7300_s3 + $0x6c] sm:$0xf0] }
  0x85   : > { %2627 = vmatpush.bf16.msrb.mxu2 %v6454_v44  ;;  %2368 = vmatmul.bf16.vlgmr.msra.gmra.mxu3 %v7324_v53  ;;  %v6971_v30 = vld [vmem:[%s7230_s28 + $0x65c] sm:$0xf]  ;;  %v6398_v31 = vor.u32 %v6915_v28, %v6395_v29  ;;  %v5947_v34 = vld [vmem:[%s7230_s28 + $0x134] sm:$0xf0]  ;;  %v6716_v42 = vld [vmem:[%s7300_s3 + $0x64] sm:$0xf]  ;;  %v7394_v49 = vor.u32 %v6718_v41, %v5597_v40 }
  0x86   : > { %2716 = vmatpush.bf16.msrb.mxu3 %v6678_v48  ;;  %v6803_v33 = vld [vmem:[%s7230_s28 + $0x11c] sm:$0xf]  ;;  %v6622_v35 = vor.u32 %v6971_v30, %v6619_v32  ;;  %v6171_v38 = vld [vmem:[%s7230_s28 + $0x2f4] sm:$0xf0]  ;;  %v5599_v43 = vld [vmem:[%s7300_s3 + $0x70] sm:$0xf0] }
  0x87   : > { %2450 = vmatpush.bf16.msrb.mxu0 %v5978_v0  ;;  %v5950_v36 = vor.u32 %v6803_v33, %v5947_v34  ;;  %v6859_v37 = vld [vmem:[%s7230_s28 + $0x2dc] sm:$0xf]  ;;  %v5605_v44 = vld [vmem:[%s7300_s3 + $0x68] sm:$0xf]  ;;  %v6719_v45 = vld [vmem:[%s7300_s3 + $0x74] sm:$0xf0]  ;;  %v7396_v50 = vor.u32 %v6716_v42, %v5599_v43 }
  0x88   : > { %2539 = vmatpush.bf16.msrb.mxu1 %v6202_v3  ;;  %v6174_v39 = vor.u32 %v6859_v37, %v6171_v38  ;;  %v6717_v46 = vld [vmem:[%s7300_s3 + $0x6c] sm:$0xf]  ;;  %v5607_v48 = vld [vmem:[%s7300_s3 + $0x78] sm:$0xf0]  ;;  %v7398_v54 = vor.u32 %v6719_v45, %v5605_v44  ;;  %v5613_v56 = vld [vmem:[%s7300_s3 + $0x80] sm:$0xf] }
  0x89   : > { %2628 = vmatpush.bf16.msrb.mxu2 %v6426_v59  ;;  %v7400_v55 = vor.u32 %v6717_v46, %v5607_v48  ;;  %v6722_v57 = vld [vmem:[%s7300_s3 + $0x8c] sm:$0xf0]  ;;  %v6720_v58 = vld [vmem:[%s7300_s3 + $0x84] sm:$0xf]  ;;  %v5615_v59 = vld [vmem:[%s7300_s3 + $0x90] sm:$0xf0] }
  0x8a   : > { %2717 = vmatpush.bf16.msrb.mxu3 %v6650_v63  ;;  %v5621_v60 = vld [vmem:[%s7300_s3 + $0x88] sm:$0xf]  ;;  %v6723_v61 = vld [vmem:[%s7300_s3 + $0x94] sm:$0xf0]  ;;  %v6721_v62 = vld [vmem:[%s7300_s3 + $0x8c] sm:$0xf]  ;;  %v7414_v0 = vor.u32 %v6722_v57, %v5613_v56  ;;  %v7416_v1 = vor.u32 %v6720_v58, %v5615_v59 }
  0x8b   : > { %2451 = vmatpush.bf16.msrb.mxu0 %v5950_v36  ;;  %v5623_v63 = vld [vmem:[%s7300_s3 + $0x98] sm:$0xf0]  ;;  %v7418_v2 = vor.u32 %v6723_v61, %v5621_v60  ;;  %v6908_v4 = vld [vmem:[%s7230_s28 + $0x464] sm:$0xf]  ;;  %v6367_v5 = vld [vmem:[%s7230_s28 + $0x47c] sm:$0xf0] }
  0x8c   : > { %2540 = vmatpush.bf16.msrb.mxu1 %v6174_v39  ;;  %v7420_v3 = vor.u32 %v6721_v62, %v5623_v63  ;;  %v6964_v6 = vld [vmem:[%s7230_s28 + $0x624] sm:$0xf]  ;;  %v6370_v7 = vor.u32 %v6908_v4, %v6367_v5  ;;  %v6591_v8 = vld [vmem:[%s7230_s28 + $0x63c] sm:$0xf0]  ;;  %v6726_v21 = vld [vmem:[%s7300_s3 + $0xac] sm:$0xf0] }
  0x8d   : > { %2629 = vmatpush.bf16.msrb.mxu2 %v6398_v31  ;;  %v6796_v9 = vld [vmem:[%s7230_s28 + $0xe4] sm:$0xf]  ;;  %v5919_v10 = vld [vmem:[%s7230_s28 + $0xfc] sm:$0xf0]  ;;  %v6594_v11 = vor.u32 %v6964_v6, %v6591_v8  ;;  %v5631_v23 = vld [vmem:[%s7300_s3 + $0xb0] sm:$0xf0] }
  0x8e   : > { %2718 = vmatpush.bf16.msrb.mxu3 %v6622_v35  ;;  %v5922_v16 = vor.u32 %v6796_v9, %v5919_v10  ;;  %v6852_v17 = vld [vmem:[%s7230_s28 + $0x2a4] sm:$0xf]  ;;  %v6143_v18 = vld [vmem:[%s7230_s28 + $0x2bc] sm:$0xf0]  ;;  %v5637_v28 = vld [vmem:[%s7300_s3 + $0xa8] sm:$0xf] }
  0x8f   : > { %v6146_v19 = vor.u32 %v6852_v17, %v6143_v18  ;;  %v5629_v20 = vld [vmem:[%s7300_s3 + $0xa0] sm:$0xf]  ;;  %v6724_v22 = vld [vmem:[%s7300_s3 + $0xa4] sm:$0xf]  ;;  %v6727_v29 = vld [vmem:[%s7300_s3 + $0xb4] sm:$0xf0] }
  0x90   : > { %2452 = vmatpush.bf16.msrb.mxu0 %v5922_v16  ;;  %v6725_v30 = vld [vmem:[%s7300_s3 + $0xac] sm:$0xf]  ;;  %v5639_v31 = vld [vmem:[%s7300_s3 + $0xb8] sm:$0xf0]  ;;  %v7442_v32 = vor.u32 %v6726_v21, %v5629_v20  ;;  %v7444_v33 = vor.u32 %v6724_v22, %v5631_v23  ;;  %v7446_v34 = vor.u32 %v6727_v29, %v5637_v28  ;;  %v5645_v36 = vld [vmem:[%s7300_s3 + $0xc0] sm:$0xf] }
  0x91   : > { %2630 = vmatpush.bf16.msrb.mxu2 %v6370_v7  ;;  %2541 = vmatpush.bf16.msrb.mxu1 %v6146_v19  ;;  %v7448_v35 = vor.u32 %v6725_v30, %v5639_v31  ;;  %v6730_v37 = vld [vmem:[%s7300_s3 + $0xcc] sm:$0xf0]  ;;  %v6728_v38 = vld [vmem:[%s7300_s3 + $0xc4] sm:$0xf]  ;;  %v5647_v39 = vld [vmem:[%s7300_s3 + $0xd0] sm:$0xf0] }
  0x92   : > { %2106 = vmatmul.bf16.gmra.mxu0 %v7346_v12  ;;  %2719 = vmatpush.bf16.msrb.mxu3 %v6594_v11  ;;  %v5653_v40 = vld [vmem:[%s7300_s3 + $0xc8] sm:$0xf]  ;;  %v6731_v41 = vld [vmem:[%s7300_s3 + $0xd4] sm:$0xf0]  ;;  %v6729_v42 = vld [vmem:[%s7300_s3 + $0xcc] sm:$0xf]  ;;  %v7462_v44 = vor.u32 %v6730_v37, %v5645_v36  ;;  %v7464_v45 = vor.u32 %v6728_v38, %v5647_v39 }
  0x93   : > { %2195 = vmatmul.bf16.gmra.mxu1 %v7348_v13  ;;  %v5655_v43 = vld [vmem:[%s7300_s3 + $0xd8] sm:$0xf0]  ;;  %v7466_v46 = vor.u32 %v6731_v41, %v5653_v40  ;;  %v6901_v56 = vld [vmem:[%s7230_s28 + $0x42c] sm:$0xf]  ;;  %v6339_v57 = vld [vmem:[%s7230_s28 + $0x444] sm:$0xf0] }
  0x94   : > { %2284 = vmatmul.bf16.gmra.mxu2 %v7350_v14  ;;  %v7468_v48 = vor.u32 %v6729_v42, %v5655_v43  ;;  %v6957_v58 = vld [vmem:[%s7230_s28 + $0x5ec] sm:$0xf]  ;;  %v6342_v59 = vor.u32 %v6901_v56, %v6339_v57  ;;  %v6563_v60 = vld [vmem:[%s7230_s28 + $0x604] sm:$0xf0]  ;;  %v5661_v7 = vld [vmem:[%s7300_s3 + $0xe0] sm:$0xf] }
  0x95   : > { %2373 = vmatmul.bf16.gmra.mxu3 %v7352_v15  ;;  %v6566_v61 = vor.u32 %v6957_v58, %v6563_v60  ;;  %v6789_v62 = vld [vmem:[%s7230_s28 + $0xac] sm:$0xf]  ;;  %v5891_v63 = vld [vmem:[%s7230_s28 + $0xc4] sm:$0xf0]  ;;  %v6734_v8 = vld [vmem:[%s7300_s3 + $0xec] sm:$0xf0] }
  0x96   : > { %2631 = vmatpush.bf16.msrb.mxu2 %v6342_v59  ;;  %v6845_v4 = vld [vmem:[%s7230_s28 + $0x26c] sm:$0xf]  ;;  %v5894_v5 = vor.u32 %v6789_v62, %v5891_v63  ;;  %v6115_v6 = vld [vmem:[%s7230_s28 + $0x284] sm:$0xf0]  ;;  %v6732_v9 = vld [vmem:[%s7300_s3 + $0xe4] sm:$0xf]  ;;  %v7490_v20 = vor.u32 %v6734_v8, %v5661_v7 }
  0x97   : > { %2720 = vmatpush.bf16.msrb.mxu3 %v6566_v61  ;;  %v6118_v10 = vor.u32 %v6845_v4, %v6115_v6  ;;  %v5663_v11 = vld [vmem:[%s7300_s3 + $0xf0] sm:$0xf0]  ;;  %v5669_v16 = vld [vmem:[%s7300_s3 + $0xe8] sm:$0xf]  ;;  %v6735_v17 = vld [vmem:[%s7300_s3 + $0xf4] sm:$0xf0] }
  0x98   : > { %2453 = vmatpush.bf16.msrb.mxu0 %v5894_v5  ;;  %v6733_v18 = vld [vmem:[%s7300_s3 + $0xec] sm:$0xf]  ;;  %v5671_v19 = vld [vmem:[%s7300_s3 + $0xf8] sm:$0xf0]  ;;  %v7492_v21 = vor.u32 %v6732_v9, %v5663_v11  ;;  %v7494_v22 = vor.u32 %v6735_v17, %v5669_v16  ;;  %v5677_v28 = vld [vmem:[%s7300_s3 + $0x100] sm:$0xf] }
  0x99   : > { %2542 = vmatpush.bf16.msrb.mxu1 %v6118_v10  ;;  %v7496_v23 = vor.u32 %v6733_v18, %v5671_v19  ;;  %v6738_v29 = vld [vmem:[%s7300_s3 + $0x10c] sm:$0xf0]  ;;  %v6736_v30 = vld [vmem:[%s7300_s3 + $0x104] sm:$0xf]  ;;  %v5679_v31 = vld [vmem:[%s7300_s3 + $0x110] sm:$0xf0] }
  0x9a   : > { %v5685_v36 = vld [vmem:[%s7300_s3 + $0x108] sm:$0xf]  ;;  %v6739_v37 = vld [vmem:[%s7300_s3 + $0x114] sm:$0xf0]  ;;  %v6737_v38 = vld [vmem:[%s7300_s3 + $0x10c] sm:$0xf]  ;;  %v7510_v40 = vor.u32 %v6738_v29, %v5677_v28  ;;  %v7512_v42 = vor.u32 %v6736_v30, %v5679_v31 }
  0x9b   : > { %v5687_v39 = vld [vmem:[%s7300_s3 + $0x118] sm:$0xf0]  ;;  %v7514_v43 = vor.u32 %v6739_v37, %v5685_v36  ;;  %v6894_v59 = vld [vmem:[%s7230_s28 + $0x3f4] sm:$0xf]  ;;  %v6311_v60 = vld [vmem:[%s7230_s28 + $0x40c] sm:$0xf0] }
  0x9c   : > { %v7516_v57 = vor.u32 %v6737_v38, %v5687_v39  ;;  %v6950_v61 = vld [vmem:[%s7230_s28 + $0x5b4] sm:$0xf]  ;;  %v6314_v62 = vor.u32 %v6894_v59, %v6311_v60  ;;  %v6535_v63 = vld [vmem:[%s7230_s28 + $0x5cc] sm:$0xf0]  ;;  %v5693_v29 = vld [vmem:[%s7300_s3 + $0x120] sm:$0xf] }
  0x9d   : > { %v6538_v5 = vor.u32 %v6950_v61, %v6535_v63  ;;  %v6782_v16 = vld [vmem:[%s7230_s28 + $0x74] sm:$0xf]  ;;  %v5863_v17 = vld [vmem:[%s7230_s28 + $0x8c] sm:$0xf0]  ;;  %v6740_v31 = vld [vmem:[%s7300_s3 + $0x124] sm:$0xf] }
  0x9e   : > { %2632 = vmatpush.bf16.msrb.mxu2 %v6314_v62  ;;  %v6838_v18 = vld [vmem:[%s7230_s28 + $0x234] sm:$0xf]  ;;  %v5866_v19 = vor.u32 %v6782_v16, %v5863_v17  ;;  %v6087_v28 = vld [vmem:[%s7230_s28 + $0x24c] sm:$0xf0]  ;;  %v5701_v38 = vld [vmem:[%s7300_s3 + $0x128] sm:$0xf] }
  0x9f   : > { %2721 = vmatpush.bf16.msrb.mxu3 %v6538_v5  ;;  %v6742_v30 = vld [vmem:[%s7300_s3 + $0x12c] sm:$0xf0]  ;;  %v6090_v36 = vor.u32 %v6838_v18, %v6087_v28  ;;  %v5695_v37 = vld [vmem:[%s7300_s3 + $0x130] sm:$0xf0]  ;;  %v6743_v39 = vld [vmem:[%s7300_s3 + $0x134] sm:$0xf0] }
  0xa0   : > { %2454 = vmatpush.bf16.msrb.mxu0 %v5866_v19  ;;  %v7540_v59 = vor.u32 %v6742_v30, %v5693_v29  ;;  %v7542_v63 = vor.u32 %v6740_v31, %v5695_v37  ;;  %v5709_v29 = vld [vmem:[%s7300_s3 + $0x140] sm:$0xf]  ;;  %v6746_v30 = vld [vmem:[%s7300_s3 + $0x14c] sm:$0xf0]  ;;  %v6744_v31 = vld [vmem:[%s7300_s3 + $0x144] sm:$0xf] }
  0xa1   : > { %2543 = vmatpush.bf16.msrb.mxu1 %v6090_v36  ;;  %v5711_v36 = vld [vmem:[%s7300_s3 + $0x150] sm:$0xf0]  ;;  %v5717_v37 = vld [vmem:[%s7300_s3 + $0x148] sm:$0xf] }
  0xa2   : > { %2111 = vmatmul.bf16.gmra.mxu0 %v7366_v24 }
  0xa3   : > { %2200 = vmatmul.bf16.gmra.mxu1 %v7368_v25 }
  0xa4   : > { %2289 = vmatmul.bf16.gmra.mxu2 %v7370_v26 }
  0xa5   : > { %2378 = vmatmul.bf16.gmra.mxu3 %v7372_v27 }
  0xb2   : > { %2116 = vmatmul.bf16.gmra.mxu0 %v7394_v49 }
  0xb3   : > { %2205 = vmatmul.bf16.gmra.mxu1 %v7396_v50 }
  0xb4   : > { %2294 = vmatmul.bf16.gmra.mxu2 %v7398_v54 }
  0xb5   : > { %2383 = vmatmul.bf16.gmra.mxu3 %v7400_v55 }
  0xc2   : > { %2121 = vmatmul.bf16.gmra.mxu0 %v7414_v0 }
  0xc3   : > { %2210 = vmatmul.bf16.gmra.mxu1 %v7416_v1 }
  0xc4   : > { %2299 = vmatmul.bf16.gmra.mxu2 %v7418_v2 }
  0xc5   : > { %2388 = vmatmul.bf16.gmra.mxu3 %v7420_v3 }
  0xd2   : > { %2126 = vmatmul.bf16.gmra.mxu0 %v7442_v32 }
  0xd3   : > { %2215 = vmatmul.bf16.gmra.mxu1 %v7444_v33 }
  0xd4   : > { %2304 = vmatmul.bf16.gmra.mxu2 %v7446_v34 }
  0xd5   : > { %2393 = vmatmul.bf16.gmra.mxu3 %v7448_v35 }
  0xe2   : > { %2131 = vmatmul.bf16.gmra.mxu0 %v7462_v44 }
  0xe3   : > { %2220 = vmatmul.bf16.gmra.mxu1 %v7464_v45 }
  0xe4   : > { %2309 = vmatmul.bf16.gmra.mxu2 %v7466_v46 }
  0xe5   : > { %2398 = vmatmul.bf16.gmra.mxu3 %v7468_v48 }
  0xf2   : > { %2136 = vmatmul.bf16.gmra.mxu0 %v7490_v20 }
  0xf3   : > { %2225 = vmatmul.bf16.gmra.mxu1 %v7492_v21 }
  0xf4   : > { %2314 = vmatmul.bf16.gmra.mxu2 %v7494_v22 }
  0xf5   : > { %2403 = vmatmul.bf16.gmra.mxu3 %v7496_v23 }
  0xff   : > { %v2102_v41 = vpop.f32.mrf.mxu0 }
 0x100   : > { %v2191_v56 = vpop.f32.mrf.mxu1 }
 0x101   : > { %v2192_v58 = vadd.f32 %v2191_v56, %v2102_v41  ;;  %v6741_v41 = vld [vmem:[%s7300_s3 + $0x12c] sm:$0xf]  ;;  %v5703_v56 = vld [vmem:[%s7300_s3 + $0x138] sm:$0xf0] }
 0x102   : > { %2141 = vmatmul.bf16.gmra.mxu0 %v7510_v40 }
 0x103   : > { %2230 = vmatmul.bf16.gmra.mxu1 %v7512_v42 }
 0x104   : > { %2319 = vmatmul.bf16.gmra.mxu2 %v7514_v43 }
 0x105   : > { %2408 = vmatmul.bf16.gmra.mxu3 %v7516_v57 }
 0x107   : > { %v2280_v4 = vpop.f32.mrf.mxu2  ;;  %v2104_v8 = vpop.f32.mrf.mxu0 }
 0x108   : > { %v2281_v6 = vadd.f32 %v2280_v4, %v2192_v58  ;;  %v2369_v7 = vpop.f32.mrf.mxu3  ;;  %v2193_v9 = vpop.f32.mrf.mxu1  ;;  %v7544_v4 = vor.u32 %v6743_v39, %v5701_v38  ;;  %v6747_v38 = vld [vmem:[%s7300_s3 + $0x154] sm:$0xf0]  ;;  %v6745_v39 = vld [vmem:[%s7300_s3 + $0x14c] sm:$0xf] }
 0x109   : > { %v2194_v11 = vadd.f32 %v2193_v9, %v2104_v8 }
 0x10a   : > { %v7526_v10 = vadd.f32 %v2369_v7, %v2281_v6  ;;  %v7546_v6 = vor.u32 %v6741_v41, %v5703_v56  ;;  %v5719_v41 = vld [vmem:[%s7300_s3 + $0x158] sm:$0xf0] }
 0x10c   : > { %11424 = vst [vmem:[#allocation5_spill] sm:$0xff] %v7526_v10  ;;  %v6749_v10 = vld [vmem:[%s7300_s3 + $0x16c] sm:$0xf] }
 0x10f   : > { %v2282_v58 = vpop.f32.mrf.mxu2  ;;  %v2107_v62 = vpop.f32.mrf.mxu0 }
 0x110   : > { %v2283_v60 = vadd.f32 %v2282_v58, %v2194_v11  ;;  %v2371_v61 = vpop.f32.mrf.mxu3  ;;  %v2196_v5 = vpop.f32.mrf.mxu1  ;;  %v7564_v58 = vor.u32 %v6746_v30, %v5709_v29  ;;  %v6943_v29 = vld [vmem:[%s7230_s28 + $0x57c] sm:$0xf] }
 0x111   : > { %v2197_v8 = vadd.f32 %v2196_v5, %v2107_v62  ;;  %v7566_v5 = vor.u32 %v6744_v31, %v5711_v36  ;;  %v6507_v31 = vld [vmem:[%s7230_s28 + $0x594] sm:$0xf0] }
 0x112   : > { %v7548_v7 = vadd.f32 %v2371_v61, %v2283_v60  ;;  %2146 = vmatmul.bf16.gmra.mxu0 %v7540_v59 }
 0x113   : > { %2235 = vmatmul.bf16.gmra.mxu1 %v7542_v63 }
 0x114   : > { %11425 = vst [vmem:[#allocation6_spill] sm:$0xff] %v7548_v7  ;;  %2324 = vmatmul.bf16.gmra.mxu2 %v7544_v4  ;;  %v5733_v7 = vld [vmem:[%s7300_s3 + $0x168] sm:$0xf] }
 0x115   : > { %2413 = vmatmul.bf16.gmra.mxu3 %v7546_v6 }
 0x117   : > { %v2285_v9 = vpop.f32.mrf.mxu2  ;;  %v2109_v17 = vpop.f32.mrf.mxu0 }
 0x118   : > { %v2286_v11 = vadd.f32 %v2285_v9, %v2197_v8  ;;  %v2374_v16 = vpop.f32.mrf.mxu3  ;;  %v2198_v18 = vpop.f32.mrf.mxu1  ;;  %v7568_v8 = vor.u32 %v6747_v38, %v5717_v37  ;;  %v6510_v37 = vor.u32 %v6943_v29, %v6507_v31  ;;  %v6059_v29 = vld [vmem:[%s7230_s28 + $0x214] sm:$0xf0]  ;;  %v5725_v31 = vld [vmem:[%s7300_s3 + $0x160] sm:$0xf] }
 0x119   : > { %v2199_v28 = vadd.f32 %v2198_v18, %v2109_v17  ;;  %v6887_v18 = vld [vmem:[%s7230_s28 + $0x3bc] sm:$0xf] }
 0x11a   : > { %v7554_v19 = vadd.f32 %v2374_v16, %v2286_v11  ;;  %11427 = vst [vmem:[#allocation8_spill] sm:$0xff] %v7568_v8  ;;  %v7570_v11 = vor.u32 %v6745_v39, %v5719_v41  ;;  %2722 = vmatpush.bf16.msrb.mxu3 %v6510_v37  ;;  %v5735_v37 = vld [vmem:[%s7300_s3 + $0x178] sm:$0xf0] }
 0x11c   : > { %11426 = vst [vmem:[#allocation7_spill] sm:$0xff] %v7554_v19  ;;  %v5727_v19 = vld [vmem:[%s7300_s3 + $0x170] sm:$0xf0] }
 0x11d   : > { %11428 = vst [vmem:[#allocation9_spill] sm:$0xff] %v7570_v11 }
 0x11f   : > { %v2287_v56 = vpop.f32.mrf.mxu2  ;;  %v2112_v62 = vpop.f32.mrf.mxu0 }
 0x120   : > { %v2288_v60 = vadd.f32 %v2287_v56, %v2199_v28  ;;  %v2376_v61 = vpop.f32.mrf.mxu3  ;;  %v2201_v9 = vpop.f32.mrf.mxu1  ;;  %v6283_v28 = vld [vmem:[%s7230_s28 + $0x3d4] sm:$0xf0] }
 0x121   : > { %v2202_v17 = vadd.f32 %v2201_v9, %v2112_v62  ;;  %v6286_v30 = vor.u32 %v6887_v18, %v6283_v28  ;;  %v6775_v62 = vld [vmem:[%s7230_s28 + $0x3c] sm:$0xf]  ;;  %v5835_v9 = vld [vmem:[%s7230_s28 + $0x54] sm:$0xf0] }
 0x122   : > { %v7572_v16 = vadd.f32 %v2376_v61, %v2288_v60  ;;  %2151 = vmatmul.bf16.gmra.mxu0 %v7564_v58  ;;  %v6831_v18 = vld [vmem:[%s7230_s28 + $0x1fc] sm:$0xf]  ;;  %v5838_v28 = vor.u32 %v6775_v62, %v5835_v9 }
 0x123   : > { %2240 = vmatmul.bf16.gmra.mxu1 %v7566_v5  ;;  %2633 = vmatpush.bf16.msrb.mxu2 %v6286_v30  ;;  %v6751_v30 = vld [vmem:[%s7300_s3 + $0x174] sm:$0xf0] }
 0x124   : > { %11429 = vst [vmem:[#allocation10_spill] sm:$0xff] %v7572_v16  ;;  %2329 = vmatmul.bf16.gmra.mxu2 %v7568_v8  ;;  %v6062_v16 = vor.u32 %v6831_v18, %v6059_v29  ;;  %2455 = vmatpush.bf16.msrb.mxu0 %v5838_v28  ;;  %v7600_v62 = vor.u32 %v6751_v30, %v5733_v7  ;;  %v6752_v30 = vld [vmem:[%s7300_s3 + $0x184] sm:$0xf] }
 0x125   : > { %2418 = vmatmul.bf16.gmra.mxu3 %v7570_v11  ;;  %v7602_v18 = vor.u32 %v6749_v10, %v5735_v37  ;;  %v5743_v37 = vld [vmem:[%s7300_s3 + $0x190] sm:$0xf0] }
 0x126   : > { %2544 = vmatpush.bf16.msrb.mxu1 %v6062_v16  ;;  %11433 = vst [vmem:[#allocation14_spill] sm:$0xff] %v7600_v62 }
 0x127   : > { %v2290_v36 = vpop.f32.mrf.mxu2  ;;  %v2114_v41 = vpop.f32.mrf.mxu0  ;;  %11434 = vst [vmem:[#allocation15_spill] sm:$0xff] %v7602_v18 }
 0x128   : > { %v2291_v38 = vadd.f32 %v2290_v36, %v2202_v17  ;;  %v2379_v39 = vpop.f32.mrf.mxu3  ;;  %v2203_v56 = vpop.f32.mrf.mxu1  ;;  %v6750_v17 = vld [vmem:[%s7300_s3 + $0x16c] sm:$0xf0]  ;;  %v6748_v36 = vld [vmem:[%s7300_s3 + $0x164] sm:$0xf] }
 0x129   : > { %v2204_v61 = vadd.f32 %v2203_v56, %v2114_v41  ;;  %v7598_v11 = vor.u32 %v6748_v36, %v5727_v19  ;;  %v6754_v36 = vld [vmem:[%s7300_s3 + $0x18c] sm:$0xf0] }
 0x12a   : > { %v7582_v60 = vadd.f32 %v2379_v39, %v2291_v38  ;;  %v7596_v39 = vor.u32 %v6750_v17, %v5725_v31  ;;  %v5741_v17 = vld [vmem:[%s7300_s3 + $0x180] sm:$0xf] }
 0x12b   : > { %11432 = vst [vmem:[#allocation13_spill] sm:$0xff] %v7598_v11 }
 0x12c   : > { %11430 = vst [vmem:[#allocation11_spill] sm:$0xff] %v7582_v60 }
 0x12d   : > { %11431 = vst [vmem:[#allocation12_spill] sm:$0xff] %v7596_v39 }
 0x12f   : > { %v2292_v38 = vpop.f32.mrf.mxu2  ;;  %v2117_v60 = vpop.f32.mrf.mxu0 }
 0x130   : > { %v2293_v41 = vadd.f32 %v2292_v38, %v2204_v61  ;;  %v2381_v56 = vpop.f32.mrf.mxu3  ;;  %v2206_v9 = vpop.f32.mrf.mxu1  ;;  %v5749_v38 = vld [vmem:[%s7300_s3 + $0x188] sm:$0xf] }
 0x131   : > { %v2207_v16 = vadd.f32 %v2206_v9, %v2117_v60  ;;  %v5751_v9 = vld [vmem:[%s7300_s3 + $0x198] sm:$0xf0] }
 0x132   : > { %v7604_v28 = vadd.f32 %v2381_v56, %v2293_v41  ;;  %2156 = vmatmul.bf16.gmra.mxu0 %v7596_v39  ;;  %v6755_v41 = vld [vmem:[%s7300_s3 + $0x194] sm:$0xf0]  ;;  %v6753_v56 = vld [vmem:[%s7300_s3 + $0x18c] sm:$0xf] }
 0x133   : > { %2245 = vmatmul.bf16.gmra.mxu1 %v7598_v11 }
 0x134   : > { %11435 = vst [vmem:[#allocation16_spill] sm:$0xff] %v7604_v28  ;;  %2334 = vmatmul.bf16.gmra.mxu2 %v7600_v62 }
 0x135   : > { %2423 = vmatmul.bf16.gmra.mxu3 %v7602_v18  ;;  %v7620_v18 = vor.u32 %v6754_v36, %v5741_v17  ;;  %v6936_v17 = vld [vmem:[%s7230_s28 + $0x544] sm:$0xf] }
 0x137   : > { %v2295_v7 = vpop.f32.mrf.mxu2  ;;  %v2119_v61 = vpop.f32.mrf.mxu0  ;;  %11437 = vst [vmem:[#allocation18_spill] sm:$0xff] %v7620_v18 }
 0x138   : > { %v2296_v10 = vadd.f32 %v2295_v7, %v2207_v16  ;;  %v2384_v19 = vpop.f32.mrf.mxu3  ;;  %v2208_v29 = vpop.f32.mrf.mxu1 }
 0x139   : > { %v2209_v60 = vadd.f32 %v2208_v29, %v2119_v61  ;;  %v7624_v61 = vor.u32 %v6755_v41, %v5749_v38 }
 0x13a   : > { %v7610_v31 = vadd.f32 %v2384_v19, %v2296_v10  ;;  %v7622_v19 = vor.u32 %v6752_v30, %v5743_v37  ;;  %v6479_v30 = vld [vmem:[%s7230_s28 + $0x55c] sm:$0xf0] }
 0x13b   : > { %11439 = vst [vmem:[#allocation20_spill] sm:$0xff] %v7624_v61  ;;  %v6482_v38 = vor.u32 %v6936_v17, %v6479_v30  ;;  %v6031_v17 = vld [vmem:[%s7230_s28 + $0x1dc] sm:$0xf0] }
 0x13c   : > { %11436 = vst [vmem:[#allocation17_spill] sm:$0xff] %v7610_v31  ;;  %v7626_v31 = vor.u32 %v6753_v56, %v5751_v9  ;;  %v5757_v30 = vld [vmem:[%s7300_s3 + $0x1a0] sm:$0xf] }
 0x13d   : > { %11438 = vst [vmem:[#allocation19_spill] sm:$0xff] %v7622_v19  ;;  %2723 = vmatpush.bf16.msrb.mxu3 %v6482_v38  ;;  %v5767_v38 = vld [vmem:[%s7300_s3 + $0x1b8] sm:$0xf0] }
 0x13e   : > { %11440 = vst [vmem:[#allocation21_spill] sm:$0xff] %v7626_v31 }
 0x13f   : > { %v2297_v28 = vpop.f32.mrf.mxu2  ;;  %v2122_v10 = vpop.f32.mrf.mxu0 }
 0x140   : > { %v2298_v16 = vadd.f32 %v2297_v28, %v2209_v60  ;;  %v2386_v7 = vpop.f32.mrf.mxu3  ;;  %v2211_v29 = vpop.f32.mrf.mxu1  ;;  %v6880_v28 = vld [vmem:[%s7230_s28 + $0x384] sm:$0xf]  ;;  %v6255_v60 = vld [vmem:[%s7230_s28 + $0x39c] sm:$0xf0] }
 0x141   : > { %v2212_v11 = vadd.f32 %v2211_v29, %v2122_v10  ;;  %v6258_v36 = vor.u32 %v6880_v28, %v6255_v60  ;;  %v6768_v29 = vld [vmem:[%s7230_s28 + $0x4] sm:$0xf]  ;;  %v5807_v28 = vld [vmem:[%s7230_s28 + $0x1c] sm:$0xf0] }
 0x142   : > { %v7628_v62 = vadd.f32 %v2386_v7, %v2298_v16  ;;  %2161 = vmatmul.bf16.gmra.mxu0 %v7620_v18  ;;  %v6824_v60 = vld [vmem:[%s7230_s28 + $0x1c4] sm:$0xf]  ;;  %v6757_v18 = vld [vmem:[%s7300_s3 + $0x1ac] sm:$0xf] }
 0x143   : > { %2250 = vmatmul.bf16.gmra.mxu1 %v7622_v19  ;;  %2634 = vmatpush.bf16.msrb.mxu2 %v6258_v36  ;;  %v5765_v19 = vld [vmem:[%s7300_s3 + $0x1a8] sm:$0xf]  ;;  %v6759_v36 = vld [vmem:[%s7300_s3 + $0x1b4] sm:$0xf0] }
 0x144   : > { %11441 = vst [vmem:[#allocation22_spill] sm:$0xff] %v7628_v62  ;;  %2339 = vmatmul.bf16.gmra.mxu2 %v7624_v61  ;;  %v5810_v62 = vor.u32 %v6768_v29, %v5807_v28  ;;  %v5759_v61 = vld [vmem:[%s7300_s3 + $0x1b0] sm:$0xf0]  ;;  %v7656_v29 = vor.u32 %v6759_v36, %v5765_v19  ;;  %v6760_v36 = vld [vmem:[%s7300_s3 + $0x1c4] sm:$0xf] }
 0x145   : > { %2428 = vmatmul.bf16.gmra.mxu3 %v7626_v31  ;;  %v6034_v31 = vor.u32 %v6824_v60, %v6031_v17  ;;  %v7658_v60 = vor.u32 %v6757_v18, %v5767_v38  ;;  %v5775_v38 = vld [vmem:[%s7300_s3 + $0x1d0] sm:$0xf0] }
 0x146   : > { %2456 = vmatpush.bf16.msrb.mxu0 %v5810_v62  ;;  %11445 = vst [vmem:[#allocation26_spill] sm:$0xff] %v7656_v29 }
 0x147   : > { %v2300_v37 = vpop.f32.mrf.mxu2  ;;  %v2124_v9 = vpop.f32.mrf.mxu0  ;;  %2545 = vmatpush.bf16.msrb.mxu1 %v6034_v31  ;;  %11446 = vst [vmem:[#allocation27_spill] sm:$0xff] %v7658_v60 }
 0x148   : > { %v2301_v41 = vadd.f32 %v2300_v37, %v2212_v11  ;;  %v2389_v56 = vpop.f32.mrf.mxu3  ;;  %v2213_v16 = vpop.f32.mrf.mxu1  ;;  %v6758_v11 = vld [vmem:[%s7300_s3 + $0x1ac] sm:$0xf0]  ;;  %v6756_v37 = vld [vmem:[%s7300_s3 + $0x1a4] sm:$0xf] }
 0x149   : > { %v2214_v10 = vadd.f32 %v2213_v16, %v2124_v9  ;;  %v7654_v39 = vor.u32 %v6756_v37, %v5759_v61  ;;  %v6762_v37 = vld [vmem:[%s7300_s3 + $0x1cc] sm:$0xf0] }
 0x14a   : > { %v7638_v7 = vadd.f32 %v2389_v56, %v2301_v41  ;;  %v7652_v56 = vor.u32 %v6758_v11, %v5757_v30  ;;  %v5773_v11 = vld [vmem:[%s7300_s3 + $0x1c0] sm:$0xf] }
 0x14b   : > { %11444 = vst [vmem:[#allocation25_spill] sm:$0xff] %v7654_v39 }
 0x14c   : > { %11442 = vst [vmem:[#allocation23_spill] sm:$0xff] %v7638_v7 }
 0x14d   : > { %11443 = vst [vmem:[#allocation24_spill] sm:$0xff] %v7652_v56 }
 0x14f   : > { %v2302_v41 = vpop.f32.mrf.mxu2  ;;  %v2127_v7 = vpop.f32.mrf.mxu0 }
 0x150   : > { %v2303_v9 = vadd.f32 %v2302_v41, %v2214_v10  ;;  %v2391_v16 = vpop.f32.mrf.mxu3  ;;  %v2216_v28 = vpop.f32.mrf.mxu1  ;;  %v5781_v41 = vld [vmem:[%s7300_s3 + $0x1c8] sm:$0xf] }
 0x151   : > { %v2217_v31 = vadd.f32 %v2216_v28, %v2127_v7  ;;  %v5783_v28 = vld [vmem:[%s7300_s3 + $0x1d8] sm:$0xf0] }
 0x152   : > { %v7660_v62 = vadd.f32 %v2391_v16, %v2303_v9  ;;  %2166 = vmatmul.bf16.gmra.mxu0 %v7652_v56  ;;  %v6763_v9 = vld [vmem:[%s7300_s3 + $0x1d4] sm:$0xf0]  ;;  %v6761_v16 = vld [vmem:[%s7300_s3 + $0x1cc] sm:$0xf] }
 0x153   : > { %2255 = vmatmul.bf16.gmra.mxu1 %v7654_v39 }
 0x154   : > { %11447 = vst [vmem:[#allocation28_spill] sm:$0xff] %v7660_v62  ;;  %2344 = vmatmul.bf16.gmra.mxu2 %v7656_v29 }
 0x155   : > { %2433 = vmatmul.bf16.gmra.mxu3 %v7658_v60  ;;  %v7676_v60 = vor.u32 %v6762_v37, %v5773_v11  ;;  %v6681_v11 = vld [vmem:[%s7230_s28 + $0x6d0] sm:$0xf] }
 0x157   : > { %v2305_v19 = vpop.f32.mrf.mxu2  ;;  %v2129_v10 = vpop.f32.mrf.mxu0  ;;  %11449 = vst [vmem:[#allocation30_spill] sm:$0xff] %v7676_v60 }
 0x158   : > { %v2306_v18 = vadd.f32 %v2305_v19, %v2217_v31  ;;  %v2394_v61 = vpop.f32.mrf.mxu3  ;;  %v2218_v17 = vpop.f32.mrf.mxu1 }
 0x159   : > { %v2219_v7 = vadd.f32 %v2218_v17, %v2129_v10  ;;  %v7680_v10 = vor.u32 %v6763_v9, %v5781_v41 }
 0x15a   : > { %v7666_v30 = vadd.f32 %v2394_v61, %v2306_v18  ;;  %v7678_v61 = vor.u32 %v6760_v36, %v5775_v38  ;;  %v6989_v36 = vld [vmem:[%s7230_s28 + $0x6e8] sm:$0xf0] }
 0x15b   : > { %11451 = vst [vmem:[#allocation32_spill] sm:$0xff] %v7680_v10  ;;  %v6682_v41 = vor.u32 %v6989_v36, %v6681_v11  ;;  %v6877_v11 = vld [vmem:[%s7230_s28 + $0x368] sm:$0xf0]  ;;  %v5789_v36 = vld [vmem:[%s7300_s3 + $0x1e0] sm:$0xf] }
 0x15c   : > { %11448 = vst [vmem:[#allocation29_spill] sm:$0xff] %v7666_v30  ;;  %v7682_v30 = vor.u32 %v6761_v16, %v5783_v28 }
 0x15d   : > { %11450 = vst [vmem:[#allocation31_spill] sm:$0xff] %v7678_v61  ;;  %3072 = vmatpush.bf16.msra.mxu3 %v6682_v41  ;;  %v5799_v41 = vld [vmem:[%s7300_s3 + $0x1f8] sm:$0xf0] }
 0x15e   : > { %11452 = vst [vmem:[#allocation33_spill] sm:$0xff] %v7682_v30 }
 0x15f   : > { %v2307_v62 = vpop.f32.mrf.mxu2  ;;  %v2132_v18 = vpop.f32.mrf.mxu0 }
 0x160   : > { %v2308_v31 = vadd.f32 %v2307_v62, %v2219_v7  ;;  %v2396_v19 = vpop.f32.mrf.mxu3  ;;  %v2221_v17 = vpop.f32.mrf.mxu1  ;;  %v6457_v62 = vld [vmem:[%s7230_s28 + $0x510] sm:$0xf]  ;;  %v6933_v7 = vld [vmem:[%s7230_s28 + $0x528] sm:$0xf0] }
 0x161   : > { %v2222_v39 = vadd.f32 %v2221_v17, %v2132_v18  ;;  %v6458_v37 = vor.u32 %v6933_v7, %v6457_v62  ;;  %v6009_v17 = vld [vmem:[%s7230_s28 + $0x190] sm:$0xf]  ;;  %v6821_v62 = vld [vmem:[%s7230_s28 + $0x1a8] sm:$0xf0] }
 0x162   : > { %v7684_v29 = vadd.f32 %v2396_v19, %v2308_v31  ;;  %2171 = vmatmul.bf16.gmra.mxu0 %v7676_v60  ;;  %v6233_v7 = vld [vmem:[%s7230_s28 + $0x350] sm:$0xf]  ;;  %v6765_v60 = vld [vmem:[%s7300_s3 + $0x1ec] sm:$0xf] }
 0x163   : > { %2260 = vmatmul.bf16.gmra.mxu1 %v7678_v61  ;;  %2983 = vmatpush.bf16.msra.mxu2 %v6458_v37  ;;  %v5797_v61 = vld [vmem:[%s7300_s3 + $0x1e8] sm:$0xf]  ;;  %v6767_v37 = vld [vmem:[%s7300_s3 + $0x1f4] sm:$0xf0]  ;;  %v7714_v8 = vor.u32 %v6765_v60, %v5799_v41 }
 0x164   : > { %11453 = vst [vmem:[#allocation34_spill] sm:$0xff] %v7684_v29  ;;  %2349 = vmatmul.bf16.gmra.mxu2 %v7680_v10  ;;  %v6010_v29 = vor.u32 %v6821_v62, %v6009_v17  ;;  %v5791_v10 = vld [vmem:[%s7300_s3 + $0x1f0] sm:$0xf0]  ;;  %v7712_v17 = vor.u32 %v6767_v37, %v5797_v61 }
 0x165   : > { %2438 = vmatmul.bf16.gmra.mxu3 %v7682_v30  ;;  %v6234_v30 = vor.u32 %v6877_v11, %v6233_v7  ;;  %11455 = vst [vmem:[#allocation36_spill] sm:$0xff] %v7714_v8 }
 0x166   : > { %2805 = vmatpush.bf16.msra.mxu0 %v6010_v29 }
 0x167   : > { %v2310_v38 = vpop.f32.mrf.mxu2  ;;  %v2134_v28 = vpop.f32.mrf.mxu0  ;;  %2894 = vmatpush.bf16.msra.mxu1 %v6234_v30 }
 0x168   : > { %v2311_v9 = vadd.f32 %v2310_v38, %v2222_v39  ;;  %v2399_v16 = vpop.f32.mrf.mxu3  ;;  %v2223_v31 = vpop.f32.mrf.mxu1  ;;  %v6766_v39 = vld [vmem:[%s7300_s3 + $0x1ec] sm:$0xf0]  ;;  %v6764_v38 = vld [vmem:[%s7300_s3 + $0x1e4] sm:$0xf] }
 0x169   : > { %v2224_v18 = vadd.f32 %v2223_v31, %v2134_v28  ;;  %v7710_v56 = vor.u32 %v6764_v38, %v5791_v10 }
 0x16a   : > { %v7694_v19 = vadd.f32 %v2399_v16, %v2311_v9  ;;  %v7708_v16 = vor.u32 %v6766_v39, %v5789_v36 }
 0x16c   : > { %11454 = vst [vmem:[#allocation35_spill] sm:$0xff] %v7694_v19 }
 0x16f   : > { %v2312_v9 = vpop.f32.mrf.mxu2  ;;  %v2137_v19 = vpop.f32.mrf.mxu0 }
 0x170   : > { %v2313_v28 = vadd.f32 %v2312_v9, %v2224_v18  ;;  %v2401_v31 = vpop.f32.mrf.mxu3  ;;  %v2226_v62 = vpop.f32.mrf.mxu1 }
 0x171   : > { %v2227_v11 = vadd.f32 %v2226_v62, %v2137_v19  ;;  %v6926_v62 = vld [vmem:[%s7230_s28 + $0x4f0] sm:$0xf0] }
 0x172   : > { %v7716_v7 = vadd.f32 %v2401_v31, %v2313_v28  ;;  %2176 = vmatmul.bf16.gmra.mxu0 %v7708_v16  ;;  %v6429_v31 = vld [vmem:[%s7230_s28 + $0x4d8] sm:$0xf] }
 0x173   : > { %2265 = vmatmul.bf16.gmra.mxu1 %v7710_v56 }
 0x174   : > { %11456 = vst [vmem:[#allocation37_spill] sm:$0xff] %v7716_v7  ;;  %2354 = vmatmul.bf16.gmra.mxu2 %v7712_v17 }
 0x175   : > { %2443 = vmatmul.bf16.gmra.mxu3 %v7714_v8 }
 0x177   : > { %v2315_v29 = vpop.f32.mrf.mxu2  ;;  %v2139_v61 = vpop.f32.mrf.mxu0 }
 0x178   : > { %v2316_v30 = vadd.f32 %v2315_v29, %v2227_v11  ;;  %v2404_v10 = vpop.f32.mrf.mxu3  ;;  %v2228_v18 = vpop.f32.mrf.mxu1  ;;  %v6653_v11 = vld [vmem:[%s7230_s28 + $0x698] sm:$0xf]  ;;  %v6430_v29 = vor.u32 %v6926_v62, %v6429_v31 }
 0x179   : > { %v2229_v36 = vadd.f32 %v2228_v18, %v2139_v61 }
 0x17a   : > { %v7722_v60 = vadd.f32 %v2404_v10, %v2316_v30  ;;  %v6982_v30 = vld [vmem:[%s7230_s28 + $0x6b0] sm:$0xf0]  ;;  %2984 = vmatpush.bf16.msra.mxu2 %v6430_v29 }
 0x17b   : > { %v6654_v61 = vor.u32 %v6982_v30, %v6653_v11 }
 0x17c   : > { %11457 = vst [vmem:[#allocation38_spill] sm:$0xff] %v7722_v60  ;;  %v6205_v60 = vld [vmem:[%s7230_s28 + $0x318] sm:$0xf] }
 0x17d   : > { %3073 = vmatpush.bf16.msra.mxu3 %v6654_v61 }
 0x17f   : > { %v2317_v19 = vpop.f32.mrf.mxu2  ;;  %v2142_v37 = vpop.f32.mrf.mxu0 }
 0x180   : > { %v2318_v39 = vadd.f32 %v2317_v19, %v2229_v36  ;;  %v2406_v38 = vpop.f32.mrf.mxu3  ;;  %v2231_v41 = vpop.f32.mrf.mxu1 }
 0x181   : > { %v2232_v28 = vadd.f32 %v2231_v41, %v2142_v37  ;;  %v5981_v41 = vld [vmem:[%s7230_s28 + $0x158] sm:$0xf] }
 0x182   : > { %v7724_v9 = vadd.f32 %v2406_v38, %v2318_v39  ;;  %2457 = vmatmul.bf16.vlgmr.msrb.gmra.mxu0 %v7316_v47 }
 0x183   : > { %2546 = vmatmul.bf16.vlgmr.msrb.gmra.mxu1 %v7320_v51 }
 0x184   : > { %11458 = vst [vmem:[#allocation39_spill] sm:$0xff] %v7724_v9  ;;  %2635 = vmatmul.bf16.vlgmr.msrb.gmra.mxu2 %v7322_v52  ;;  %v6814_v9 = vld [vmem:[%s7230_s28 + $0x170] sm:$0xf0] }
 0x185   : > { %2724 = vmatmul.bf16.vlgmr.msrb.gmra.mxu3 %v7324_v53  ;;  %v5982_v7 = vor.u32 %v6814_v9, %v5981_v41  ;;  %v6870_v53 = vld [vmem:[%s7230_s28 + $0x330] sm:$0xf0] }
 0x186   : > { %v6206_v52 = vor.u32 %v6870_v53, %v6205_v60 }
 0x187   : > { %v2320_v10 = vpop.f32.mrf.mxu2  ;;  %v2144_v19 = vpop.f32.mrf.mxu0  ;;  %2806 = vmatpush.bf16.msra.mxu0 %v5982_v7 }
 0x188   : > { %v2321_v18 = vadd.f32 %v2320_v10, %v2232_v28  ;;  %v2409_v36 = vpop.f32.mrf.mxu3  ;;  %v2233_v39 = vpop.f32.mrf.mxu1  ;;  %2895 = vmatpush.bf16.msra.mxu1 %v6206_v52 }
 0x189   : > { %v2234_v37 = vadd.f32 %v2233_v39, %v2144_v19 }
 0x18a   : > { %v7734_v38 = vadd.f32 %v2409_v36, %v2321_v18 }
 0x18c   : > { %11459 = vst [vmem:[#allocation40_spill] sm:$0xff] %v7734_v38 }
 0x18f   : > { %v2322_v31 = vpop.f32.mrf.mxu2  ;;  %v2147_v28 = vpop.f32.mrf.mxu0 }
 0x190   : > { %v2323_v62 = vadd.f32 %v2322_v31, %v2234_v37  ;;  %v2411_v11 = vpop.f32.mrf.mxu3  ;;  %v2236_v30 = vpop.f32.mrf.mxu1 }
 0x191   : > { %v2237_v29 = vadd.f32 %v2236_v30, %v2147_v28  ;;  %v6919_v28 = vld [vmem:[%s7230_s28 + $0x4b8] sm:$0xf0]  ;;  %v6625_v30 = vld [vmem:[%s7230_s28 + $0x660] sm:$0xf] }
 0x192   : > { %v7740_v10 = vadd.f32 %v2411_v11, %v2323_v62  ;;  %2462 = vmatmul.bf16.gmra.mxu0 %v7346_v12  ;;  %v6401_v11 = vld [vmem:[%s7230_s28 + $0x4a0] sm:$0xf] }
 0x193   : > { %2551 = vmatmul.bf16.gmra.mxu1 %v7348_v13 }
 0x194   : > { %11460 = vst [vmem:[#allocation41_spill] sm:$0xff] %v7740_v10  ;;  %2640 = vmatmul.bf16.gmra.mxu2 %v7350_v14  ;;  %v6863_v10 = vld [vmem:[%s7230_s28 + $0x2f8] sm:$0xf0] }
 0x195   : > { %2729 = vmatmul.bf16.gmra.mxu3 %v7352_v15 }
 0x197   : > { %v2325_v9 = vpop.f32.mrf.mxu2  ;;  %v2149_v52 = vpop.f32.mrf.mxu0 }
 0x198   : > { %v2326_v53 = vadd.f32 %v2325_v9, %v2237_v29  ;;  %v2414_v7 = vpop.f32.mrf.mxu3  ;;  %v2238_v60 = vpop.f32.mrf.mxu1  ;;  %v6402_v29 = vor.u32 %v6919_v28, %v6401_v11  ;;  %v6975_v9 = vld [vmem:[%s7230_s28 + $0x678] sm:$0xf0] }
 0x199   : > { %v2239_v18 = vadd.f32 %v2238_v60, %v2149_v52 }
 0x19a   : > { %v7746_v61 = vadd.f32 %v2414_v7, %v2326_v53  ;;  %v6626_v7 = vor.u32 %v6975_v9, %v6625_v30  ;;  %2985 = vmatpush.bf16.msra.mxu2 %v6402_v29 }
 0x19c   : > { %11461 = vst [vmem:[#allocation42_spill] sm:$0xff] %v7746_v61  ;;  %3074 = vmatpush.bf16.msra.mxu3 %v6626_v7 }
 0x19f   : > { %v2327_v36 = vpop.f32.mrf.mxu2  ;;  %v2152_v37 = vpop.f32.mrf.mxu0 }
 0x1a0   : > { %v2328_v19 = vadd.f32 %v2327_v36, %v2239_v18  ;;  %v2416_v39 = vpop.f32.mrf.mxu3  ;;  %v2241_v41 = vpop.f32.mrf.mxu1 }
 0x1a1   : > { %v2242_v62 = vadd.f32 %v2241_v41, %v2152_v37  ;;  %v5953_v37 = vld [vmem:[%s7230_s28 + $0x120] sm:$0xf]  ;;  %v6807_v41 = vld [vmem:[%s7230_s28 + $0x138] sm:$0xf0] }
 0x1a2   : > { %v7748_v31 = vadd.f32 %v2416_v39, %v2328_v19  ;;  %2467 = vmatmul.bf16.gmra.mxu0 %v7366_v24  ;;  %v5954_v61 = vor.u32 %v6807_v41, %v5953_v37 }
 0x1a3   : > { %2556 = vmatmul.bf16.gmra.mxu1 %v7368_v25 }
 0x1a4   : > { %11462 = vst [vmem:[#allocation43_spill] sm:$0xff] %v7748_v31  ;;  %2645 = vmatmul.bf16.gmra.mxu2 %v7370_v26  ;;  %v6177_v31 = vld [vmem:[%s7230_s28 + $0x2e0] sm:$0xf]  ;;  %2807 = vmatpush.bf16.msra.mxu0 %v5954_v61 }
 0x1a5   : > { %2734 = vmatmul.bf16.gmra.mxu3 %v7372_v27  ;;  %v6178_v38 = vor.u32 %v6863_v10, %v6177_v31 }
 0x1a7   : > { %v2330_v53 = vpop.f32.mrf.mxu2  ;;  %v2154_v18 = vpop.f32.mrf.mxu0  ;;  %2896 = vmatpush.bf16.msra.mxu1 %v6178_v38 }
 0x1a8   : > { %v2331_v52 = vadd.f32 %v2330_v53, %v2242_v62  ;;  %v2419_v60 = vpop.f32.mrf.mxu3  ;;  %v2243_v36 = vpop.f32.mrf.mxu1 }
 0x1a9   : > { %v2244_v39 = vadd.f32 %v2243_v36, %v2154_v18 }
 0x1aa   : > { %v7758_v19 = vadd.f32 %v2419_v60, %v2331_v52 }
 0x1ac   : > { %11463 = vst [vmem:[#allocation44_spill] sm:$0xff] %v7758_v19 }
 0x1af   : > { %v2332_v11 = vpop.f32.mrf.mxu2  ;;  %v2157_v62 = vpop.f32.mrf.mxu0 }
 0x1b0   : > { %v2333_v28 = vadd.f32 %v2332_v11, %v2244_v39  ;;  %v2421_v30 = vpop.f32.mrf.mxu3  ;;  %v2246_v9 = vpop.f32.mrf.mxu1 }
 0x1b1   : > { %v2247_v29 = vadd.f32 %v2246_v9, %v2157_v62  ;;  %v6912_v62 = vld [vmem:[%s7230_s28 + $0x480] sm:$0xf0]  ;;  %v6597_v9 = vld [vmem:[%s7230_s28 + $0x628] sm:$0xf] }
 0x1b2   : > { %v7764_v53 = vadd.f32 %v2421_v30, %v2333_v28  ;;  %2472 = vmatmul.bf16.gmra.mxu0 %v7394_v49  ;;  %v6373_v30 = vld [vmem:[%s7230_s28 + $0x468] sm:$0xf] }
 0x1b3   : > { %2561 = vmatmul.bf16.gmra.mxu1 %v7396_v50 }
 0x1b4   : > { %11464 = vst [vmem:[#allocation45_spill] sm:$0xff] %v7764_v53  ;;  %2650 = vmatmul.bf16.gmra.mxu2 %v7398_v54  ;;  %v6856_v53 = vld [vmem:[%s7230_s28 + $0x2c0] sm:$0xf0] }
 0x1b5   : > { %2739 = vmatmul.bf16.gmra.mxu3 %v7400_v55 }
 0x1b7   : > { %v2335_v7 = vpop.f32.mrf.mxu2  ;;  %v2159_v38 = vpop.f32.mrf.mxu0 }
 0x1b8   : > { %v2336_v10 = vadd.f32 %v2335_v7, %v2247_v29  ;;  %v2424_v61 = vpop.f32.mrf.mxu3  ;;  %v2248_v31 = vpop.f32.mrf.mxu1  ;;  %v6374_v29 = vor.u32 %v6912_v62, %v6373_v30  ;;  %v6968_v7 = vld [vmem:[%s7230_s28 + $0x640] sm:$0xf0] }
 0x1b9   : > { %v2249_v60 = vadd.f32 %v2248_v31, %v2159_v38 }
 0x1ba   : > { %v7770_v52 = vadd.f32 %v2424_v61, %v2336_v10  ;;  %v6598_v61 = vor.u32 %v6968_v7, %v6597_v9  ;;  %2986 = vmatpush.bf16.msra.mxu2 %v6374_v29 }
 0x1bc   : > { %11465 = vst [vmem:[#allocation46_spill] sm:$0xff] %v7770_v52  ;;  %3075 = vmatpush.bf16.msra.mxu3 %v6598_v61 }
 0x1bf   : > { %v2337_v18 = vpop.f32.mrf.mxu2  ;;  %v2162_v37 = vpop.f32.mrf.mxu0 }
 0x1c0   : > { %v2338_v36 = vadd.f32 %v2337_v18, %v2249_v60  ;;  %v2426_v39 = vpop.f32.mrf.mxu3  ;;  %v2251_v41 = vpop.f32.mrf.mxu1 }
 0x1c1   : > { %v2252_v28 = vadd.f32 %v2251_v41, %v2162_v37  ;;  %v5925_v37 = vld [vmem:[%s7230_s28 + $0xe8] sm:$0xf]  ;;  %v6800_v41 = vld [vmem:[%s7230_s28 + $0x100] sm:$0xf0] }
 0x1c2   : > { %v7772_v11 = vadd.f32 %v2426_v39, %v2338_v36  ;;  %2477 = vmatmul.bf16.gmra.mxu0 %v7414_v0  ;;  %v5926_v52 = vor.u32 %v6800_v41, %v5925_v37 }
 0x1c3   : > { %2566 = vmatmul.bf16.gmra.mxu1 %v7416_v1 }
 0x1c4   : > { %11466 = vst [vmem:[#allocation47_spill] sm:$0xff] %v7772_v11  ;;  %2655 = vmatmul.bf16.gmra.mxu2 %v7418_v2  ;;  %v6149_v11 = vld [vmem:[%s7230_s28 + $0x2a8] sm:$0xf]  ;;  %2808 = vmatpush.bf16.msra.mxu0 %v5926_v52 }
 0x1c5   : > { %2744 = vmatmul.bf16.gmra.mxu3 %v7420_v3  ;;  %v6150_v19 = vor.u32 %v6856_v53, %v6149_v11 }
 0x1c7   : > { %v2340_v10 = vpop.f32.mrf.mxu2  ;;  %v2164_v60 = vpop.f32.mrf.mxu0  ;;  %2897 = vmatpush.bf16.msra.mxu1 %v6150_v19 }
 0x1c8   : > { %v2341_v38 = vadd.f32 %v2340_v10, %v2252_v28  ;;  %v2429_v31 = vpop.f32.mrf.mxu3  ;;  %v2253_v18 = vpop.f32.mrf.mxu1 }
 0x1c9   : > { %v2254_v39 = vadd.f32 %v2253_v18, %v2164_v60 }
 0x1ca   : > { %v7782_v36 = vadd.f32 %v2429_v31, %v2341_v38 }
 0x1cc   : > { %11467 = vst [vmem:[#allocation48_spill] sm:$0xff] %v7782_v36 }
 0x1cf   : > { %v2342_v30 = vpop.f32.mrf.mxu2  ;;  %v2167_v28 = vpop.f32.mrf.mxu0 }
 0x1d0   : > { %v2343_v62 = vadd.f32 %v2342_v30, %v2254_v39  ;;  %v2431_v9 = vpop.f32.mrf.mxu3  ;;  %v2256_v7 = vpop.f32.mrf.mxu1 }
 0x1d1   : > { %v2257_v29 = vadd.f32 %v2256_v7, %v2167_v28  ;;  %v6905_v28 = vld [vmem:[%s7230_s28 + $0x448] sm:$0xf0]  ;;  %v6569_v7 = vld [vmem:[%s7230_s28 + $0x5f0] sm:$0xf] }
 0x1d2   : > { %v7788_v10 = vadd.f32 %v2431_v9, %v2343_v62  ;;  %2482 = vmatmul.bf16.gmra.mxu0 %v7442_v32  ;;  %v6345_v9 = vld [vmem:[%s7230_s28 + $0x430] sm:$0xf] }
 0x1d3   : > { %2571 = vmatmul.bf16.gmra.mxu1 %v7444_v33 }
 0x1d4   : > { %11468 = vst [vmem:[#allocation49_spill] sm:$0xff] %v7788_v10  ;;  %2660 = vmatmul.bf16.gmra.mxu2 %v7446_v34  ;;  %v6849_v10 = vld [vmem:[%s7230_s28 + $0x288] sm:$0xf0] }
 0x1d5   : > { %2749 = vmatmul.bf16.gmra.mxu3 %v7448_v35 }
 0x1d7   : > { %v2345_v61 = vpop.f32.mrf.mxu2  ;;  %v2169_v19 = vpop.f32.mrf.mxu0 }
 0x1d8   : > { %v2346_v53 = vadd.f32 %v2345_v61, %v2257_v29  ;;  %v2434_v52 = vpop.f32.mrf.mxu3  ;;  %v2258_v11 = vpop.f32.mrf.mxu1  ;;  %v6346_v29 = vor.u32 %v6905_v28, %v6345_v9  ;;  %v6961_v61 = vld [vmem:[%s7230_s28 + $0x608] sm:$0xf0] }
 0x1d9   : > { %v2259_v31 = vadd.f32 %v2258_v11, %v2169_v19 }
 0x1da   : > { %v7794_v38 = vadd.f32 %v2434_v52, %v2346_v53  ;;  %v6570_v52 = vor.u32 %v6961_v61, %v6569_v7  ;;  %2987 = vmatpush.bf16.msra.mxu2 %v6346_v29 }
 0x1dc   : > { %11469 = vst [vmem:[#allocation50_spill] sm:$0xff] %v7794_v38  ;;  %3076 = vmatpush.bf16.msra.mxu3 %v6570_v52 }
 0x1df   : > { %v2347_v60 = vpop.f32.mrf.mxu2  ;;  %v2172_v37 = vpop.f32.mrf.mxu0 }
 0x1e0   : > { %v2348_v18 = vadd.f32 %v2347_v60, %v2259_v31  ;;  %v2436_v39 = vpop.f32.mrf.mxu3  ;;  %v2261_v41 = vpop.f32.mrf.mxu1 }
 0x1e1   : > { %v2262_v62 = vadd.f32 %v2261_v41, %v2172_v37  ;;  %v5897_v37 = vld [vmem:[%s7230_s28 + $0xb0] sm:$0xf]  ;;  %v6793_v41 = vld [vmem:[%s7230_s28 + $0xc8] sm:$0xf0] }
 0x1e2   : > { %v7796_v30 = vadd.f32 %v2436_v39, %v2348_v18  ;;  %2487 = vmatmul.bf16.gmra.mxu0 %v7462_v44  ;;  %v5898_v38 = vor.u32 %v6793_v41, %v5897_v37 }
 0x1e3   : > { %2576 = vmatmul.bf16.gmra.mxu1 %v7464_v45 }
 0x1e4   : > { %11470 = vst [vmem:[#allocation51_spill] sm:$0xff] %v7796_v30  ;;  %2665 = vmatmul.bf16.gmra.mxu2 %v7466_v46  ;;  %v6121_v30 = vld [vmem:[%s7230_s28 + $0x270] sm:$0xf]  ;;  %2809 = vmatpush.bf16.msra.mxu0 %v5898_v38 }
 0x1e5   : > { %2754 = vmatmul.bf16.gmra.mxu3 %v7468_v48  ;;  %v6122_v36 = vor.u32 %v6849_v10, %v6121_v30 }
 0x1e7   : > { %v2350_v53 = vpop.f32.mrf.mxu2  ;;  %v2174_v31 = vpop.f32.mrf.mxu0  ;;  %2898 = vmatpush.bf16.msra.mxu1 %v6122_v36 }
 0x1e8   : > { %v2351_v19 = vadd.f32 %v2350_v53, %v2262_v62  ;;  %v2439_v11 = vpop.f32.mrf.mxu3  ;;  %v2263_v60 = vpop.f32.mrf.mxu1 }
 0x1e9   : > { %v2264_v39 = vadd.f32 %v2263_v60, %v2174_v31 }
 0x1ea   : > { %v7806_v18 = vadd.f32 %v2439_v11, %v2351_v19 }
 0x1ec   : > { %11471 = vst [vmem:[#allocation52_spill] sm:$0xff] %v7806_v18 }
 0x1ef   : > { %v2352_v9 = vpop.f32.mrf.mxu2  ;;  %v2177_v62 = vpop.f32.mrf.mxu0 }
 0x1f0   : > { %v2353_v28 = vadd.f32 %v2352_v9, %v2264_v39  ;;  %v2441_v7 = vpop.f32.mrf.mxu3  ;;  %v2266_v61 = vpop.f32.mrf.mxu1 }
 0x1f1   : > { %v2267_v29 = vadd.f32 %v2266_v61, %v2177_v62  ;;  %v6898_v62 = vld [vmem:[%s7230_s28 + $0x410] sm:$0xf0]  ;;  %v6541_v61 = vld [vmem:[%s7230_s28 + $0x5b8] sm:$0xf] }
 0x1f2   : > { %v7812_v53 = vadd.f32 %v2441_v7, %v2353_v28  ;;  %2492 = vmatmul.bf16.gmra.mxu0 %v7490_v20  ;;  %v6317_v7 = vld [vmem:[%s7230_s28 + $0x3f8] sm:$0xf] }
 0x1f3   : > { %2581 = vmatmul.bf16.gmra.mxu1 %v7492_v21 }
 0x1f4   : > { %11472 = vst [vmem:[#allocation53_spill] sm:$0xff] %v7812_v53  ;;  %2670 = vmatmul.bf16.gmra.mxu2 %v7494_v22  ;;  %v6842_v53 = vld [vmem:[%s7230_s28 + $0x250] sm:$0xf0] }
 0x1f5   : > { %2759 = vmatmul.bf16.gmra.mxu3 %v7496_v23 }
 0x1f7   : > { %v2355_v52 = vpop.f32.mrf.mxu2  ;;  %v2179_v36 = vpop.f32.mrf.mxu0 }
 0x1f8   : > { %v2356_v10 = vadd.f32 %v2355_v52, %v2267_v29  ;;  %v2444_v38 = vpop.f32.mrf.mxu3  ;;  %v2268_v30 = vpop.f32.mrf.mxu1  ;;  %v6318_v29 = vor.u32 %v6898_v62, %v6317_v7  ;;  %v6954_v52 = vld [vmem:[%s7230_s28 + $0x5d0] sm:$0xf0] }
 0x1f9   : > { %v2269_v11 = vadd.f32 %v2268_v30, %v2179_v36 }
 0x1fa   : > { %v7818_v19 = vadd.f32 %v2444_v38, %v2356_v10  ;;  %v6542_v38 = vor.u32 %v6954_v52, %v6541_v61  ;;  %2988 = vmatpush.bf16.msra.mxu2 %v6318_v29 }
 0x1fc   : > { %11473 = vst [vmem:[#allocation54_spill] sm:$0xff] %v7818_v19  ;;  %3077 = vmatpush.bf16.msra.mxu3 %v6542_v38 }
 0x1ff   : > { %v2357_v31 = vpop.f32.mrf.mxu2  ;;  %v2458_v37 = vpop.f32.mrf.mxu0 }
 0x200   : > { %v2358_v60 = vadd.f32 %v2357_v31, %v2269_v11  ;;  %v2446_v39 = vpop.f32.mrf.mxu3  ;;  %v2547_v41 = vpop.f32.mrf.mxu1 }
 0x201   : > { %v2548_v28 = vadd.f32 %v2547_v41, %v2458_v37  ;;  %v5869_v37 = vld [vmem:[%s7230_s28 + $0x78] sm:$0xf]  ;;  %v6786_v41 = vld [vmem:[%s7230_s28 + $0x90] sm:$0xf0] }
 0x202   : > { %v7820_v9 = vadd.f32 %v2446_v39, %v2358_v60  ;;  %2497 = vmatmul.bf16.gmra.mxu0 %v7510_v40  ;;  %v5870_v19 = vor.u32 %v6786_v41, %v5869_v37 }
 0x203   : > { %2586 = vmatmul.bf16.gmra.mxu1 %v7512_v42 }
 0x204   : > { %11474 = vst [vmem:[#allocation55_spill] sm:$0xff] %v7820_v9  ;;  %2675 = vmatmul.bf16.gmra.mxu2 %v7514_v43  ;;  %v6093_v9 = vld [vmem:[%s7230_s28 + $0x238] sm:$0xf]  ;;  %2810 = vmatpush.bf16.msra.mxu0 %v5870_v19 }
 0x205   : > { %2764 = vmatmul.bf16.gmra.mxu3 %v7516_v57  ;;  %v6094_v18 = vor.u32 %v6842_v53, %v6093_v9 }
 0x207   : > { %v2636_v10 = vpop.f32.mrf.mxu2  ;;  %v2460_v11 = vpop.f32.mrf.mxu0  ;;  %2899 = vmatpush.bf16.msra.mxu1 %v6094_v18 }
 0x208   : > { %v2637_v36 = vadd.f32 %v2636_v10, %v2548_v28  ;;  %v2725_v30 = vpop.f32.mrf.mxu3  ;;  %v2549_v31 = vpop.f32.mrf.mxu1 }
 0x209   : > { %v2550_v39 = vadd.f32 %v2549_v31, %v2460_v11 }
 0x20a   : > { %v7830_v60 = vadd.f32 %v2725_v30, %v2637_v36 }
 0x20c   : > { %11475 = vst [vmem:[#allocation56_spill] sm:$0xff] %v7830_v60 }
 0x20f   : > { %v2638_v7 = vpop.f32.mrf.mxu2  ;;  %v2463_v28 = vpop.f32.mrf.mxu0 }
 0x210   : > { %v2639_v62 = vadd.f32 %v2638_v7, %v2550_v39  ;;  %v2727_v61 = vpop.f32.mrf.mxu3  ;;  %v2552_v52 = vpop.f32.mrf.mxu1 }
 0x211   : > { %v2553_v29 = vadd.f32 %v2552_v52, %v2463_v28  ;;  %v11480_v28 = vld [vmem:[#allocation9_spill] sm:$0xff]  ;;  %v6289_v52 = vld [vmem:[%s7230_s28 + $0x3c0] sm:$0xf] }
 0x212   : > { %v7836_v10 = vadd.f32 %v2727_v61, %v2639_v62  ;;  %2502 = vmatmul.bf16.gmra.mxu0 %v7540_v59  ;;  %v11479_v61 = vld [vmem:[#allocation8_spill] sm:$0xff] }
 0x213   : > { %2591 = vmatmul.bf16.gmra.mxu1 %v7542_v63 }
 0x214   : > { %11476 = vst [vmem:[#allocation57_spill] sm:$0xff] %v7836_v10  ;;  %2680 = vmatmul.bf16.gmra.mxu2 %v7544_v4  ;;  %v6065_v10 = vld [vmem:[%s7230_s28 + $0x200] sm:$0xf] }
 0x215   : > { %2769 = vmatmul.bf16.gmra.mxu3 %v7546_v6 }
 0x217   : > { %v2641_v38 = vpop.f32.mrf.mxu2  ;;  %v2465_v18 = vpop.f32.mrf.mxu0 }
 0x218   : > { %v2642_v53 = vadd.f32 %v2641_v38, %v2553_v29  ;;  %v2730_v19 = vpop.f32.mrf.mxu3  ;;  %v2554_v9 = vpop.f32.mrf.mxu1  ;;  %v6891_v29 = vld [vmem:[%s7230_s28 + $0x3d8] sm:$0xf0]  ;;  %v6513_v38 = vld [vmem:[%s7230_s28 + $0x580] sm:$0xf] }
 0x219   : > { %v2555_v30 = vadd.f32 %v2554_v9, %v2465_v18 }
 0x21a   : > { %v7842_v36 = vadd.f32 %v2730_v19, %v2642_v53  ;;  %v6290_v53 = vor.u32 %v6891_v29, %v6289_v52  ;;  %v6947_v19 = vld [vmem:[%s7230_s28 + $0x598] sm:$0xf0] }
 0x21b   : > { %v6514_v9 = vor.u32 %v6947_v19, %v6513_v38 }
 0x21c   : > { %11477 = vst [vmem:[#allocation58_spill] sm:$0xff] %v7842_v36  ;;  %2989 = vmatpush.bf16.msra.mxu2 %v6290_v53  ;;  %v6779_v36 = vld [vmem:[%s7230_s28 + $0x58] sm:$0xf0] }
 0x21d   : > { %3078 = vmatpush.bf16.msra.mxu3 %v6514_v9  ;;  %v11483_v9 = vld [vmem:[#allocation12_spill] sm:$0xff] }
 0x21f   : > { %v2643_v11 = vpop.f32.mrf.mxu2  ;;  %v2468_v37 = vpop.f32.mrf.mxu0 }
 0x220   : > { %v2644_v31 = vadd.f32 %v2643_v11, %v2555_v30  ;;  %v2732_v39 = vpop.f32.mrf.mxu3  ;;  %v2557_v41 = vpop.f32.mrf.mxu1 }
 0x221   : > { %v2558_v62 = vadd.f32 %v2557_v41, %v2468_v37 }
 0x222   : > { %v7844_v7 = vadd.f32 %v2732_v39, %v2644_v31  ;;  %2507 = vmatmul.bf16.gmra.mxu0 %v7564_v58 }
 0x223   : > { %2596 = vmatmul.bf16.gmra.mxu1 %v7566_v5 }
 0x224   : > { %11478 = vst [vmem:[#allocation59_spill] sm:$0xff] %v7844_v7  ;;  %2685 = vmatmul.bf16.gmra.mxu2 %v11479_v61  ;;  %v5841_v7 = vld [vmem:[%s7230_s28 + $0x40] sm:$0xf] }
 0x225   : > { %2774 = vmatmul.bf16.gmra.mxu3 %v11480_v28  ;;  %v5842_v60 = vor.u32 %v6779_v36, %v5841_v7  ;;  %v6835_v28 = vld [vmem:[%s7230_s28 + $0x218] sm:$0xf0] }
 0x226   : > { %v6066_v61 = vor.u32 %v6835_v28, %v6065_v10 }
 0x227   : > { %v2646_v18 = vpop.f32.mrf.mxu2  ;;  %v2470_v31 = vpop.f32.mrf.mxu0  ;;  %2811 = vmatpush.bf16.msra.mxu0 %v5842_v60 }
 0x228   : > { %v2647_v30 = vadd.f32 %v2646_v18, %v2558_v62  ;;  %v2735_v11 = vpop.f32.mrf.mxu3  ;;  %v2559_v39 = vpop.f32.mrf.mxu1  ;;  %2900 = vmatpush.bf16.msra.mxu1 %v6066_v61 }
 0x229   : > { %v2560_v41 = vadd.f32 %v2559_v39, %v2470_v31  ;;  %v11486_v31 = vld [vmem:[#allocation15_spill] sm:$0xff] }
 0x22a   : > { %v7854_v37 = vadd.f32 %v2735_v11, %v2647_v30  ;;  %v11484_v30 = vld [vmem:[#allocation13_spill] sm:$0xff]  ;;  %v11485_v11 = vld [vmem:[#allocation14_spill] sm:$0xff] }
 0x22c   : > { %11481 = vst [vmem:[#allocation60_spill] sm:$0xff] %v7854_v37  ;;  %v11489_v37 = vld [vmem:[#allocation18_spill] sm:$0xff] }
 0x22f   : > { %v2648_v52 = vpop.f32.mrf.mxu2  ;;  %v2473_v62 = vpop.f32.mrf.mxu0 }
 0x230   : > { %v2649_v29 = vadd.f32 %v2648_v52, %v2560_v41  ;;  %v2737_v38 = vpop.f32.mrf.mxu3  ;;  %v2562_v19 = vpop.f32.mrf.mxu1 }
 0x231   : > { %v2563_v53 = vadd.f32 %v2562_v19, %v2473_v62 }
 0x232   : > { %v7860_v18 = vadd.f32 %v2737_v38, %v2649_v29  ;;  %2512 = vmatmul.bf16.gmra.mxu0 %v11483_v9 }
 0x233   : > { %2601 = vmatmul.bf16.gmra.mxu1 %v11484_v30  ;;  %v6828_v30 = vld [vmem:[%s7230_s28 + $0x1e0] sm:$0xf0] }
 0x234   : > { %11482 = vst [vmem:[#allocation61_spill] sm:$0xff] %v7860_v18  ;;  %2690 = vmatmul.bf16.gmra.mxu2 %v11485_v11 }
 0x235   : > { %2779 = vmatmul.bf16.gmra.mxu3 %v11486_v31  ;;  %v11492_v31 = vld [vmem:[#allocation21_spill] sm:$0xff] }
 0x237   : > { %v2651_v36 = vpop.f32.mrf.mxu2  ;;  %v2475_v7 = vpop.f32.mrf.mxu0 }
 0x238   : > { %v2652_v10 = vadd.f32 %v2651_v36, %v2563_v53  ;;  %v2740_v60 = vpop.f32.mrf.mxu3  ;;  %v2564_v61 = vpop.f32.mrf.mxu1  ;;  %v11490_v53 = vld [vmem:[#allocation19_spill] sm:$0xff]  ;;  %v11491_v36 = vld [vmem:[#allocation20_spill] sm:$0xff] }
 0x239   : > { %v2565_v39 = vadd.f32 %v2564_v61, %v2475_v7  ;;  %v6485_v7 = vld [vmem:[%s7230_s28 + $0x548] sm:$0xf] }
 0x23a   : > { %v7866_v28 = vadd.f32 %v2740_v60, %v2652_v10  ;;  %v6261_v10 = vld [vmem:[%s7230_s28 + $0x388] sm:$0xf]  ;;  %v6884_v60 = vld [vmem:[%s7230_s28 + $0x3a0] sm:$0xf0] }
 0x23b   : > { %v6262_v61 = vor.u32 %v6884_v60, %v6261_v10 }
 0x23c   : > { %11487 = vst [vmem:[#allocation62_spill] sm:$0xff] %v7866_v28 }
 0x23d   : > { %2990 = vmatpush.bf16.msra.mxu2 %v6262_v61 }
 0x23f   : > { %v2653_v41 = vpop.f32.mrf.mxu2  ;;  %v2478_v38 = vpop.f32.mrf.mxu0 }
 0x240   : > { %v2654_v52 = vadd.f32 %v2653_v41, %v2565_v39  ;;  %v2742_v29 = vpop.f32.mrf.mxu3  ;;  %v2567_v62 = vpop.f32.mrf.mxu1  ;;  %v6940_v39 = vld [vmem:[%s7230_s28 + $0x560] sm:$0xf0] }
 0x241   : > { %v2568_v18 = vadd.f32 %v2567_v62, %v2478_v38 }
 0x242   : > { %v7868_v19 = vadd.f32 %v2742_v29, %v2654_v52  ;;  %2517 = vmatmul.bf16.gmra.mxu0 %v11489_v37  ;;  %v6486_v52 = vor.u32 %v6940_v39, %v6485_v7  ;;  %v6037_v37 = vld [vmem:[%s7230_s28 + $0x1c8] sm:$0xf] }
 0x243   : > { %2606 = vmatmul.bf16.gmra.mxu1 %v11490_v53  ;;  %v6772_v53 = vld [vmem:[%s7230_s28 + $0x20] sm:$0xf0]  ;;  %v6038_v9 = vor.u32 %v6828_v30, %v6037_v37 }
 0x244   : > { %11488 = vst [vmem:[#allocation63_spill] sm:$0xff] %v7868_v19  ;;  %2695 = vmatmul.bf16.gmra.mxu2 %v11491_v36  ;;  %3079 = vmatpush.bf16.msra.mxu3 %v6486_v52  ;;  %v5813_v36 = vld [vmem:[%s7230_s28 + $0x8] sm:$0xf] }
 0x245   : > { %2784 = vmatmul.bf16.gmra.mxu3 %v11492_v31  ;;  %v5814_v11 = vor.u32 %v6772_v53, %v5813_v36  ;;  %2901 = vmatpush.bf16.msra.mxu1 %v6038_v9  ;;  %v11495_v52 = vld [vmem:[#allocation24_spill] sm:$0xff] }
 0x247   : > { %v2656_v41 = vpop.f32.mrf.mxu2  ;;  %v2480_v62 = vpop.f32.mrf.mxu0  ;;  %2812 = vmatpush.bf16.msra.mxu0 %v5814_v11 }
 0x248   : > { %v2657_v29 = vadd.f32 %v2656_v41, %v2568_v18  ;;  %v2745_v38 = vpop.f32.mrf.mxu3  ;;  %v2569_v19 = vpop.f32.mrf.mxu1 }
 0x249   : > { %v2570_v31 = vadd.f32 %v2569_v19, %v2480_v62  ;;  %v11497_v19 = vld [vmem:[#allocation26_spill] sm:$0xff] }
 0x24a   : > { %v7878_v28 = vadd.f32 %v2745_v38, %v2657_v29  ;;  %v11496_v29 = vld [vmem:[#allocation25_spill] sm:$0xff]  ;;  %v11498_v38 = vld [vmem:[#allocation27_spill] sm:$0xff] }
 0x24c   : > { %11493 = vst [vmem:[#allocation64_spill] sm:$0xff] %v7878_v28  ;;  %v11501_v28 = vld [vmem:[#allocation30_spill] sm:$0xff] }
 0x24f   : > { %v2658_v10 = vpop.f32.mrf.mxu2  ;;  %v2483_v18 = vpop.f32.mrf.mxu0 }
 0x250   : > { %v2659_v60 = vadd.f32 %v2658_v10, %v2570_v31  ;;  %v2747_v7 = vpop.f32.mrf.mxu3  ;;  %v2572_v39 = vpop.f32.mrf.mxu1 }
 0x251   : > { %v2573_v61 = vadd.f32 %v2572_v39, %v2483_v18 }
 0x252   : > { %v7884_v41 = vadd.f32 %v2747_v7, %v2659_v60  ;;  %2522 = vmatmul.bf16.gmra.mxu0 %v11495_v52 }
 0x253   : > { %2611 = vmatmul.bf16.gmra.mxu1 %v11496_v29  ;;  %v6235_v29 = vld [vmem:[%s7230_s28 + $0x36c] sm:$0xf0] }
 0x254   : > { %11494 = vst [vmem:[#allocation65_spill] sm:$0xff] %v7884_v41  ;;  %2700 = vmatmul.bf16.gmra.mxu2 %v11497_v19 }
 0x255   : > { %2789 = vmatmul.bf16.gmra.mxu3 %v11498_v38  ;;  %v11504_v38 = vld [vmem:[#allocation33_spill] sm:$0xff] }
 0x257   : > { %v2661_v53 = vpop.f32.mrf.mxu2  ;;  %v2485_v9 = vpop.f32.mrf.mxu0 }
 0x258   : > { %v2662_v37 = vadd.f32 %v2661_v53, %v2573_v61  ;;  %v2750_v30 = vpop.f32.mrf.mxu3  ;;  %v2574_v11 = vpop.f32.mrf.mxu1  ;;  %v11502_v61 = vld [vmem:[#allocation31_spill] sm:$0xff]  ;;  %v11503_v53 = vld [vmem:[#allocation32_spill] sm:$0xff] }
 0x259   : > { %v2575_v36 = vadd.f32 %v2574_v11, %v2485_v9  ;;  %v6986_v9 = vld [vmem:[%s7230_s28 + $0x6d4] sm:$0xf] }
 0x25a   : > { %v7890_v31 = vadd.f32 %v2750_v30, %v2662_v37  ;;  %v6930_v37 = vld [vmem:[%s7230_s28 + $0x514] sm:$0xf]  ;;  %v6459_v30 = vld [vmem:[%s7230_s28 + $0x52c] sm:$0xf0] }
 0x25b   : > { %v6462_v11 = vor.u32 %v6930_v37, %v6459_v30 }
 0x25c   : > { %11499 = vst [vmem:[#allocation66_spill] sm:$0xff] %v7890_v31 }
 0x25d   : > { %3339 = vmatpush.bf16.msrb.mxu2 %v6462_v11 }
 0x25f   : > { %v2663_v62 = vpop.f32.mrf.mxu2  ;;  %v2488_v7 = vpop.f32.mrf.mxu0 }
 0x260   : > { %v2664_v10 = vadd.f32 %v2663_v62, %v2575_v36  ;;  %v2752_v60 = vpop.f32.mrf.mxu3  ;;  %v2577_v18 = vpop.f32.mrf.mxu1  ;;  %v6683_v36 = vld [vmem:[%s7230_s28 + $0x6ec] sm:$0xf0] }
 0x261   : > { %v2578_v41 = vadd.f32 %v2577_v18, %v2488_v7 }
 0x262   : > { %v7892_v39 = vadd.f32 %v2752_v60, %v2664_v10  ;;  %2527 = vmatmul.bf16.gmra.mxu0 %v11501_v28  ;;  %v6686_v10 = vor.u32 %v6986_v9, %v6683_v36  ;;  %v6874_v28 = vld [vmem:[%s7230_s28 + $0x354] sm:$0xf] }
 0x263   : > { %2616 = vmatmul.bf16.gmra.mxu1 %v11502_v61  ;;  %v6011_v61 = vld [vmem:[%s7230_s28 + $0x1ac] sm:$0xf0]  ;;  %v6238_v52 = vor.u32 %v6874_v28, %v6235_v29 }
 0x264   : > { %11500 = vst [vmem:[#allocation67_spill] sm:$0xff] %v7892_v39  ;;  %2705 = vmatmul.bf16.gmra.mxu2 %v11503_v53  ;;  %3428 = vmatpush.bf16.msrb.mxu3 %v6686_v10  ;;  %v6818_v53 = vld [vmem:[%s7230_s28 + $0x194] sm:$0xf] }
 0x265   : > { %2794 = vmatmul.bf16.gmra.mxu3 %v11504_v38  ;;  %v6014_v19 = vor.u32 %v6818_v53, %v6011_v61  ;;  %3250 = vmatpush.bf16.msrb.mxu1 %v6238_v52 }
 0x267   : > { %v2666_v62 = vpop.f32.mrf.mxu2  ;;  %v2490_v18 = vpop.f32.mrf.mxu0  ;;  %3161 = vmatpush.bf16.msrb.mxu0 %v6014_v19 }
 0x268   : > { %v2667_v60 = vadd.f32 %v2666_v62, %v2578_v41  ;;  %v2755_v7 = vpop.f32.mrf.mxu3  ;;  %v2579_v39 = vpop.f32.mrf.mxu1 }
 0x269   : > { %v2580_v38 = vadd.f32 %v2579_v39, %v2490_v18 }
 0x26a   : > { %v7902_v31 = vadd.f32 %v2755_v7, %v2667_v60 }
 0x26c   : > { %11505 = vst [vmem:[#allocation68_spill] sm:$0xff] %v7902_v31 }
 0x26f   : > { %v2668_v37 = vpop.f32.mrf.mxu2  ;;  %v2493_v41 = vpop.f32.mrf.mxu0 }
 0x270   : > { %v2669_v30 = vadd.f32 %v2668_v37, %v2580_v38  ;;  %v2757_v9 = vpop.f32.mrf.mxu3  ;;  %v2582_v36 = vpop.f32.mrf.mxu1 }
 0x271   : > { %v2583_v11 = vadd.f32 %v2582_v36, %v2493_v41  ;;  %v11510_v41 = vld [vmem:[#allocation4_spill] sm:$0xff]  ;;  %v6923_v36 = vld [vmem:[%s7230_s28 + $0x4dc] sm:$0xf] }
 0x272   : > { %v7908_v62 = vadd.f32 %v2757_v9, %v2669_v30  ;;  %2532 = vmatmul.bf16.gmra.mxu0 %v7708_v16  ;;  %v11509_v9 = vld [vmem:[#allocation3_spill] sm:$0xff] }
 0x273   : > { %2621 = vmatmul.bf16.gmra.mxu1 %v7710_v56 }
 0x274   : > { %11506 = vst [vmem:[#allocation69_spill] sm:$0xff] %v7908_v62  ;;  %2710 = vmatmul.bf16.gmra.mxu2 %v7712_v17  ;;  %v6867_v62 = vld [vmem:[%s7230_s28 + $0x31c] sm:$0xf] }
 0x275   : > { %2799 = vmatmul.bf16.gmra.mxu3 %v7714_v8 }
 0x277   : > { %v2671_v39 = vpop.f32.mrf.mxu2  ;;  %v2495_v52 = vpop.f32.mrf.mxu0 }
 0x278   : > { %v2672_v28 = vadd.f32 %v2671_v39, %v2583_v11  ;;  %v2760_v29 = vpop.f32.mrf.mxu3  ;;  %v2584_v19 = vpop.f32.mrf.mxu1  ;;  %v6431_v11 = vld [vmem:[%s7230_s28 + $0x4f4] sm:$0xf0]  ;;  %v6979_v39 = vld [vmem:[%s7230_s28 + $0x69c] sm:$0xf] }
 0x279   : > { %v2585_v61 = vadd.f32 %v2584_v19, %v2495_v52 }
 0x27a   : > { %v7914_v38 = vadd.f32 %v2760_v29, %v2672_v28  ;;  %v6434_v28 = vor.u32 %v6923_v36, %v6431_v11  ;;  %v6655_v29 = vld [vmem:[%s7230_s28 + $0x6b4] sm:$0xf0] }
 0x27b   : > { %v6658_v19 = vor.u32 %v6979_v39, %v6655_v29 }
 0x27c   : > { %11507 = vst [vmem:[#allocation70_spill] sm:$0xff] %v7914_v38  ;;  %3340 = vmatpush.bf16.msrb.mxu2 %v6434_v28  ;;  %v5983_v38 = vld [vmem:[%s7230_s28 + $0x174] sm:$0xf0] }
 0x27d   : > { %3429 = vmatpush.bf16.msrb.mxu3 %v6658_v19 }
 0x27f   : > { %v2673_v53 = vpop.f32.mrf.mxu2  ;;  %v2498_v7 = vpop.f32.mrf.mxu0 }
 0x280   : > { %v2674_v10 = vadd.f32 %v2673_v53, %v2585_v61  ;;  %v2762_v60 = vpop.f32.mrf.mxu3  ;;  %v2587_v18 = vpop.f32.mrf.mxu1 }
 0x281   : > { %v2588_v30 = vadd.f32 %v2587_v18, %v2498_v7 }
 0x282   : > { %v7916_v37 = vadd.f32 %v2762_v60, %v2674_v10  ;;  %2813 = vmatmul.bf16.vlgmr.msra.gmra.mxu0 %v7316_v47 }
 0x283   : > { %2902 = vmatmul.bf16.vlgmr.msra.gmra.mxu1 %v7320_v51 }
 0x284   : > { %11508 = vst [vmem:[#allocation71_spill] sm:$0xff] %v7916_v37  ;;  %2991 = vmatmul.bf16.vlgmr.msra.gmra.mxu2 %v11509_v9  ;;  %v6811_v37 = vld [vmem:[%s7230_s28 + $0x15c] sm:$0xf] }
 0x285   : > { %3080 = vmatmul.bf16.vlgmr.msra.gmra.mxu3 %v11510_v41  ;;  %v5986_v31 = vor.u32 %v6811_v37, %v5983_v38  ;;  %v6207_v41 = vld [vmem:[%s7230_s28 + $0x334] sm:$0xf0] }
 0x286   : > { %v6210_v9 = vor.u32 %v6867_v62, %v6207_v41 }
 0x287   : > { %v2676_v52 = vpop.f32.mrf.mxu2  ;;  %v2500_v10 = vpop.f32.mrf.mxu0  ;;  %3162 = vmatpush.bf16.msrb.mxu0 %v5986_v31 }
 0x288   : > { %v2677_v61 = vadd.f32 %v2676_v52, %v2588_v30  ;;  %v2765_v53 = vpop.f32.mrf.mxu3  ;;  %v2589_v60 = vpop.f32.mrf.mxu1  ;;  %3251 = vmatpush.bf16.msrb.mxu1 %v6210_v9 }
 0x289   : > { %v2590_v18 = vadd.f32 %v2589_v60, %v2500_v10 }
 0x28a   : > { %v7926_v7 = vadd.f32 %v2765_v53, %v2677_v61 }
 0x28c   : > { %11511 = vst [vmem:[#allocation72_spill] sm:$0xff] %v7926_v7 }
 0x28f   : > { %v2678_v36 = vpop.f32.mrf.mxu2  ;;  %v2503_v30 = vpop.f32.mrf.mxu0 }
 0x290   : > { %v2679_v11 = vadd.f32 %v2678_v36, %v2590_v18  ;;  %v2767_v39 = vpop.f32.mrf.mxu3  ;;  %v2592_v29 = vpop.f32.mrf.mxu1 }
 0x291   : > { %v2593_v28 = vadd.f32 %v2592_v29, %v2503_v30  ;;  %v6403_v30 = vld [vmem:[%s7230_s28 + $0x4bc] sm:$0xf0]  ;;  %v6972_v29 = vld [vmem:[%s7230_s28 + $0x664] sm:$0xf] }
 0x292   : > { %v7932_v52 = vadd.f32 %v2767_v39, %v2679_v11  ;;  %2818 = vmatmul.bf16.gmra.mxu0 %v7346_v12  ;;  %v6916_v39 = vld [vmem:[%s7230_s28 + $0x4a4] sm:$0xf] }
 0x293   : > { %2907 = vmatmul.bf16.gmra.mxu1 %v7348_v13 }
 0x294   : > { %11512 = vst [vmem:[#allocation73_spill] sm:$0xff] %v7932_v52  ;;  %2996 = vmatmul.bf16.gmra.mxu2 %v7350_v14  ;;  %v6179_v52 = vld [vmem:[%s7230_s28 + $0x2fc] sm:$0xf0] }
 0x295   : > { %3085 = vmatmul.bf16.gmra.mxu3 %v7352_v15 }
 0x297   : > { %v2681_v38 = vpop.f32.mrf.mxu2  ;;  %v2505_v37 = vpop.f32.mrf.mxu0 }
 0x298   : > { %v2682_v62 = vadd.f32 %v2681_v38, %v2593_v28  ;;  %v2770_v31 = vpop.f32.mrf.mxu3  ;;  %v2594_v9 = vpop.f32.mrf.mxu1  ;;  %v6406_v28 = vor.u32 %v6916_v39, %v6403_v30  ;;  %v6627_v38 = vld [vmem:[%s7230_s28 + $0x67c] sm:$0xf0] }
 0x299   : > { %v2595_v19 = vadd.f32 %v2594_v9, %v2505_v37 }
 0x29a   : > { %v7938_v41 = vadd.f32 %v2770_v31, %v2682_v62  ;;  %v6630_v31 = vor.u32 %v6972_v29, %v6627_v38  ;;  %3341 = vmatpush.bf16.msrb.mxu2 %v6406_v28 }
 0x29c   : > { %11513 = vst [vmem:[#allocation74_spill] sm:$0xff] %v7938_v41  ;;  %3430 = vmatpush.bf16.msrb.mxu3 %v6630_v31 }
 0x29f   : > { %v2683_v61 = vpop.f32.mrf.mxu2  ;;  %v2508_v60 = vpop.f32.mrf.mxu0 }
 0x2a0   : > { %v2684_v53 = vadd.f32 %v2683_v61, %v2595_v19  ;;  %v2772_v10 = vpop.f32.mrf.mxu3  ;;  %v2597_v18 = vpop.f32.mrf.mxu1 }
 0x2a1   : > { %v2598_v11 = vadd.f32 %v2597_v18, %v2508_v60  ;;  %v6804_v60 = vld [vmem:[%s7230_s28 + $0x124] sm:$0xf]  ;;  %v5955_v18 = vld [vmem:[%s7230_s28 + $0x13c] sm:$0xf0] }
 0x2a2   : > { %v7940_v36 = vadd.f32 %v2772_v10, %v2684_v53  ;;  %2823 = vmatmul.bf16.gmra.mxu0 %v7366_v24  ;;  %v5958_v41 = vor.u32 %v6804_v60, %v5955_v18 }
 0x2a3   : > { %2912 = vmatmul.bf16.gmra.mxu1 %v7368_v25 }
 0x2a4   : > { %11514 = vst [vmem:[#allocation75_spill] sm:$0xff] %v7940_v36  ;;  %3001 = vmatmul.bf16.gmra.mxu2 %v7370_v26  ;;  %v6860_v36 = vld [vmem:[%s7230_s28 + $0x2e4] sm:$0xf]  ;;  %3163 = vmatpush.bf16.msrb.mxu0 %v5958_v41 }
 0x2a5   : > { %3090 = vmatmul.bf16.gmra.mxu3 %v7372_v27  ;;  %v6182_v7 = vor.u32 %v6860_v36, %v6179_v52 }
 0x2a7   : > { %v2686_v62 = vpop.f32.mrf.mxu2  ;;  %v2510_v19 = vpop.f32.mrf.mxu0  ;;  %3252 = vmatpush.bf16.msrb.mxu1 %v6182_v7 }
 0x2a8   : > { %v2687_v37 = vadd.f32 %v2686_v62, %v2598_v11  ;;  %v2775_v9 = vpop.f32.mrf.mxu3  ;;  %v2599_v61 = vpop.f32.mrf.mxu1 }
 0x2a9   : > { %v2600_v10 = vadd.f32 %v2599_v61, %v2510_v19 }
 0x2aa   : > { %v7950_v53 = vadd.f32 %v2775_v9, %v2687_v37 }
 0x2ac   : > { %11515 = vst [vmem:[#allocation76_spill] sm:$0xff] %v7950_v53 }
 0x2af   : > { %v2688_v39 = vpop.f32.mrf.mxu2  ;;  %v2513_v11 = vpop.f32.mrf.mxu0 }
 0x2b0   : > { %v2689_v30 = vadd.f32 %v2688_v39, %v2600_v10  ;;  %v2777_v29 = vpop.f32.mrf.mxu3  ;;  %v2602_v38 = vpop.f32.mrf.mxu1 }
 0x2b1   : > { %v2603_v28 = vadd.f32 %v2602_v38, %v2513_v11  ;;  %v6375_v11 = vld [vmem:[%s7230_s28 + $0x484] sm:$0xf0]  ;;  %v6965_v38 = vld [vmem:[%s7230_s28 + $0x62c] sm:$0xf] }
 0x2b2   : > { %v7956_v62 = vadd.f32 %v2777_v29, %v2689_v30  ;;  %2828 = vmatmul.bf16.gmra.mxu0 %v7394_v49  ;;  %v6909_v29 = vld [vmem:[%s7230_s28 + $0x46c] sm:$0xf] }
 0x2b3   : > { %2917 = vmatmul.bf16.gmra.mxu1 %v7396_v50 }
 0x2b4   : > { %11516 = vst [vmem:[#allocation77_spill] sm:$0xff] %v7956_v62  ;;  %3006 = vmatmul.bf16.gmra.mxu2 %v7398_v54  ;;  %v6151_v62 = vld [vmem:[%s7230_s28 + $0x2c4] sm:$0xf0] }
 0x2b5   : > { %3095 = vmatmul.bf16.gmra.mxu3 %v7400_v55 }
 0x2b7   : > { %v2691_v31 = vpop.f32.mrf.mxu2  ;;  %v2515_v7 = vpop.f32.mrf.mxu0 }
 0x2b8   : > { %v2692_v52 = vadd.f32 %v2691_v31, %v2603_v28  ;;  %v2780_v41 = vpop.f32.mrf.mxu3  ;;  %v2604_v36 = vpop.f32.mrf.mxu1  ;;  %v6378_v28 = vor.u32 %v6909_v29, %v6375_v11  ;;  %v6599_v31 = vld [vmem:[%s7230_s28 + $0x644] sm:$0xf0] }
 0x2b9   : > { %v2605_v9 = vadd.f32 %v2604_v36, %v2515_v7 }
 0x2ba   : > { %v7962_v37 = vadd.f32 %v2780_v41, %v2692_v52  ;;  %v6602_v41 = vor.u32 %v6965_v38, %v6599_v31  ;;  %3342 = vmatpush.bf16.msrb.mxu2 %v6378_v28 }
 0x2bc   : > { %11517 = vst [vmem:[#allocation78_spill] sm:$0xff] %v7962_v37  ;;  %3431 = vmatpush.bf16.msrb.mxu3 %v6602_v41 }
 0x2bf   : > { %v2693_v19 = vpop.f32.mrf.mxu2  ;;  %v2518_v60 = vpop.f32.mrf.mxu0 }
 0x2c0   : > { %v2694_v61 = vadd.f32 %v2693_v19, %v2605_v9  ;;  %v2782_v10 = vpop.f32.mrf.mxu3  ;;  %v2607_v18 = vpop.f32.mrf.mxu1 }
 0x2c1   : > { %v2608_v30 = vadd.f32 %v2607_v18, %v2518_v60  ;;  %v6797_v60 = vld [vmem:[%s7230_s28 + $0xec] sm:$0xf]  ;;  %v5927_v18 = vld [vmem:[%s7230_s28 + $0x104] sm:$0xf0] }
 0x2c2   : > { %v7964_v39 = vadd.f32 %v2782_v10, %v2694_v61  ;;  %2833 = vmatmul.bf16.gmra.mxu0 %v7414_v0  ;;  %v5930_v37 = vor.u32 %v6797_v60, %v5927_v18 }
 0x2c3   : > { %2922 = vmatmul.bf16.gmra.mxu1 %v7416_v1 }
 0x2c4   : > { %11518 = vst [vmem:[#allocation79_spill] sm:$0xff] %v7964_v39  ;;  %3011 = vmatmul.bf16.gmra.mxu2 %v7418_v2  ;;  %v6853_v39 = vld [vmem:[%s7230_s28 + $0x2ac] sm:$0xf]  ;;  %3164 = vmatpush.bf16.msrb.mxu0 %v5930_v37 }
 0x2c5   : > { %3100 = vmatmul.bf16.gmra.mxu3 %v7420_v3  ;;  %v6154_v53 = vor.u32 %v6853_v39, %v6151_v62 }
 0x2c7   : > { %v2696_v52 = vpop.f32.mrf.mxu2  ;;  %v2520_v9 = vpop.f32.mrf.mxu0  ;;  %3253 = vmatpush.bf16.msrb.mxu1 %v6154_v53 }
 0x2c8   : > { %v2697_v7 = vadd.f32 %v2696_v52, %v2608_v30  ;;  %v2785_v36 = vpop.f32.mrf.mxu3  ;;  %v2609_v19 = vpop.f32.mrf.mxu1 }
 0x2c9   : > { %v2610_v10 = vadd.f32 %v2609_v19, %v2520_v9 }
 0x2ca   : > { %v7974_v61 = vadd.f32 %v2785_v36, %v2697_v7 }
 0x2cc   : > { %11519 = vst [vmem:[#allocation80_spill] sm:$0xff] %v7974_v61 }
 0x2cf   : > { %v2698_v29 = vpop.f32.mrf.mxu2  ;;  %v2523_v30 = vpop.f32.mrf.mxu0 }
 0x2d0   : > { %v2699_v11 = vadd.f32 %v2698_v29, %v2610_v10  ;;  %v2787_v38 = vpop.f32.mrf.mxu3  ;;  %v2612_v31 = vpop.f32.mrf.mxu1 }
 0x2d1   : > { %v2613_v28 = vadd.f32 %v2612_v31, %v2523_v30  ;;  %v6347_v30 = vld [vmem:[%s7230_s28 + $0x44c] sm:$0xf0]  ;;  %v6958_v31 = vld [vmem:[%s7230_s28 + $0x5f4] sm:$0xf] }
 0x2d2   : > { %v7980_v52 = vadd.f32 %v2787_v38, %v2699_v11  ;;  %2838 = vmatmul.bf16.gmra.mxu0 %v7442_v32  ;;  %v6902_v38 = vld [vmem:[%s7230_s28 + $0x434] sm:$0xf] }
 0x2d3   : > { %2927 = vmatmul.bf16.gmra.mxu1 %v7444_v33 }
 0x2d4   : > { %11520 = vst [vmem:[#allocation81_spill] sm:$0xff] %v7980_v52  ;;  %3016 = vmatmul.bf16.gmra.mxu2 %v7446_v34  ;;  %v6123_v52 = vld [vmem:[%s7230_s28 + $0x28c] sm:$0xf0] }
 0x2d5   : > { %3105 = vmatmul.bf16.gmra.mxu3 %v7448_v35 }
 0x2d7   : > { %v2701_v41 = vpop.f32.mrf.mxu2  ;;  %v2525_v53 = vpop.f32.mrf.mxu0 }
 0x2d8   : > { %v2702_v62 = vadd.f32 %v2701_v41, %v2613_v28  ;;  %v2790_v37 = vpop.f32.mrf.mxu3  ;;  %v2614_v39 = vpop.f32.mrf.mxu1  ;;  %v6350_v28 = vor.u32 %v6902_v38, %v6347_v30  ;;  %v6571_v41 = vld [vmem:[%s7230_s28 + $0x60c] sm:$0xf0] }
 0x2d9   : > { %v2615_v36 = vadd.f32 %v2614_v39, %v2525_v53 }
 0x2da   : > { %v7986_v7 = vadd.f32 %v2790_v37, %v2702_v62  ;;  %v6574_v37 = vor.u32 %v6958_v31, %v6571_v41  ;;  %3343 = vmatpush.bf16.msrb.mxu2 %v6350_v28 }
 0x2dc   : > { %11521 = vst [vmem:[#allocation82_spill] sm:$0xff] %v7986_v7  ;;  %3432 = vmatpush.bf16.msrb.mxu3 %v6574_v37 }
 0x2df   : > { %v2703_v9 = vpop.f32.mrf.mxu2  ;;  %v2528_v60 = vpop.f32.mrf.mxu0 }
 0x2e0   : > { %v2704_v19 = vadd.f32 %v2703_v9, %v2615_v36  ;;  %v2792_v10 = vpop.f32.mrf.mxu3  ;;  %v2617_v18 = vpop.f32.mrf.mxu1 }
 0x2e1   : > { %v2618_v11 = vadd.f32 %v2617_v18, %v2528_v60  ;;  %v6790_v60 = vld [vmem:[%s7230_s28 + $0xb4] sm:$0xf]  ;;  %v5899_v18 = vld [vmem:[%s7230_s28 + $0xcc] sm:$0xf0] }
 0x2e2   : > { %v7988_v29 = vadd.f32 %v2792_v10, %v2704_v19  ;;  %2843 = vmatmul.bf16.gmra.mxu0 %v7462_v44  ;;  %v5902_v7 = vor.u32 %v6790_v60, %v5899_v18 }
 0x2e3   : > { %2932 = vmatmul.bf16.gmra.mxu1 %v7464_v45 }
 0x2e4   : > { %11522 = vst [vmem:[#allocation83_spill] sm:$0xff] %v7988_v29  ;;  %3021 = vmatmul.bf16.gmra.mxu2 %v7466_v46  ;;  %v6846_v29 = vld [vmem:[%s7230_s28 + $0x274] sm:$0xf]  ;;  %3165 = vmatpush.bf16.msrb.mxu0 %v5902_v7 }
 0x2e5   : > { %3110 = vmatmul.bf16.gmra.mxu3 %v7468_v48  ;;  %v6126_v61 = vor.u32 %v6846_v29, %v6123_v52 }
 0x2e7   : > { %v2706_v62 = vpop.f32.mrf.mxu2  ;;  %v2530_v36 = vpop.f32.mrf.mxu0  ;;  %3254 = vmatpush.bf16.msrb.mxu1 %v6126_v61 }
 0x2e8   : > { %v2707_v53 = vadd.f32 %v2706_v62, %v2618_v11  ;;  %v2795_v39 = vpop.f32.mrf.mxu3  ;;  %v2619_v9 = vpop.f32.mrf.mxu1 }
 0x2e9   : > { %v2620_v10 = vadd.f32 %v2619_v9, %v2530_v36 }
 0x2ea   : > { %v7998_v19 = vadd.f32 %v2795_v39, %v2707_v53 }
 0x2ec   : > { %11523 = vst [vmem:[#allocation84_spill] sm:$0xff] %v7998_v19 }
 0x2ef   : > { %v2708_v38 = vpop.f32.mrf.mxu2  ;;  %v2533_v11 = vpop.f32.mrf.mxu0 }
 0x2f0   : > { %v2709_v30 = vadd.f32 %v2708_v38, %v2620_v10  ;;  %v2797_v31 = vpop.f32.mrf.mxu3  ;;  %v2622_v41 = vpop.f32.mrf.mxu1 }
 0x2f1   : > { %v2623_v28 = vadd.f32 %v2622_v41, %v2533_v11  ;;  %v6319_v11 = vld [vmem:[%s7230_s28 + $0x414] sm:$0xf0]  ;;  %v6951_v41 = vld [vmem:[%s7230_s28 + $0x5bc] sm:$0xf] }
 0x2f2   : > { %v8004_v62 = vadd.f32 %v2797_v31, %v2709_v30  ;;  %2848 = vmatmul.bf16.gmra.mxu0 %v7490_v20  ;;  %v6895_v31 = vld [vmem:[%s7230_s28 + $0x3fc] sm:$0xf] }
 0x2f3   : > { %2937 = vmatmul.bf16.gmra.mxu1 %v7492_v21 }
 0x2f4   : > { %11524 = vst [vmem:[#allocation85_spill] sm:$0xff] %v8004_v62  ;;  %3026 = vmatmul.bf16.gmra.mxu2 %v7494_v22  ;;  %v6095_v62 = vld [vmem:[%s7230_s28 + $0x254] sm:$0xf0] }
 0x2f5   : > { %3115 = vmatmul.bf16.gmra.mxu3 %v7496_v23 }
 0x2f7   : > { %v2711_v37 = vpop.f32.mrf.mxu2  ;;  %v2535_v61 = vpop.f32.mrf.mxu0 }
 0x2f8   : > { %v2712_v52 = vadd.f32 %v2711_v37, %v2623_v28  ;;  %v2800_v7 = vpop.f32.mrf.mxu3  ;;  %v2624_v29 = vpop.f32.mrf.mxu1  ;;  %v6322_v28 = vor.u32 %v6895_v31, %v6319_v11  ;;  %v6543_v37 = vld [vmem:[%s7230_s28 + $0x5d4] sm:$0xf0] }
 0x2f9   : > { %v2625_v39 = vadd.f32 %v2624_v29, %v2535_v61 }
 0x2fa   : > { %v8010_v53 = vadd.f32 %v2800_v7, %v2712_v52  ;;  %v6546_v7 = vor.u32 %v6951_v41, %v6543_v37  ;;  %3344 = vmatpush.bf16.msrb.mxu2 %v6322_v28 }
 0x2fc   : > { %11525 = vst [vmem:[#allocation86_spill] sm:$0xff] %v8010_v53  ;;  %3433 = vmatpush.bf16.msrb.mxu3 %v6546_v7 }
 0x2ff   : > { %v2713_v36 = vpop.f32.mrf.mxu2  ;;  %v2814_v60 = vpop.f32.mrf.mxu0 }
 0x300   : > { %v2714_v9 = vadd.f32 %v2713_v36, %v2625_v39  ;;  %v2802_v10 = vpop.f32.mrf.mxu3  ;;  %v2903_v18 = vpop.f32.mrf.mxu1 }
 0x301   : > { %v2904_v30 = vadd.f32 %v2903_v18, %v2814_v60  ;;  %v6783_v60 = vld [vmem:[%s7230_s28 + $0x7c] sm:$0xf]  ;;  %v5871_v18 = vld [vmem:[%s7230_s28 + $0x94] sm:$0xf0] }
 0x302   : > { %v8012_v38 = vadd.f32 %v2802_v10, %v2714_v9  ;;  %2853 = vmatmul.bf16.gmra.mxu0 %v7510_v40  ;;  %v5874_v53 = vor.u32 %v6783_v60, %v5871_v18 }
 0x303   : > { %2942 = vmatmul.bf16.gmra.mxu1 %v7512_v42 }
 0x304   : > { %11526 = vst [vmem:[#allocation87_spill] sm:$0xff] %v8012_v38  ;;  %3031 = vmatmul.bf16.gmra.mxu2 %v7514_v43  ;;  %v6839_v38 = vld [vmem:[%s7230_s28 + $0x23c] sm:$0xf]  ;;  %3166 = vmatpush.bf16.msrb.mxu0 %v5874_v53 }
 0x305   : > { %3120 = vmatmul.bf16.gmra.mxu3 %v7516_v57  ;;  %v6098_v19 = vor.u32 %v6839_v38, %v6095_v62 }
 0x307   : > { %v2992_v52 = vpop.f32.mrf.mxu2  ;;  %v2816_v39 = vpop.f32.mrf.mxu0  ;;  %3255 = vmatpush.bf16.msrb.mxu1 %v6098_v19 }
 0x308   : > { %v2993_v61 = vadd.f32 %v2992_v52, %v2904_v30  ;;  %v3081_v29 = vpop.f32.mrf.mxu3  ;;  %v2905_v36 = vpop.f32.mrf.mxu1 }
 0x309   : > { %v2906_v10 = vadd.f32 %v2905_v36, %v2816_v39 }
 0x30a   : > { %v8022_v9 = vadd.f32 %v3081_v29, %v2993_v61 }
 0x30c   : > { %11527 = vst [vmem:[#allocation88_spill] sm:$0xff] %v8022_v9 }
 0x30f   : > { %v2994_v31 = vpop.f32.mrf.mxu2  ;;  %v2819_v30 = vpop.f32.mrf.mxu0 }
 0x310   : > { %v2995_v11 = vadd.f32 %v2994_v31, %v2906_v10  ;;  %v3083_v41 = vpop.f32.mrf.mxu3  ;;  %v2908_v37 = vpop.f32.mrf.mxu1 }
 0x311   : > { %v2909_v28 = vadd.f32 %v2908_v37, %v2819_v30  ;;  %v11532_v30 = vld [vmem:[#allocation9_spill] sm:$0xff]  ;;  %v6888_v37 = vld [vmem:[%s7230_s28 + $0x3c4] sm:$0xf] }
 0x312   : > { %v8028_v52 = vadd.f32 %v3083_v41, %v2995_v11  ;;  %2858 = vmatmul.bf16.gmra.mxu0 %v7540_v59  ;;  %v11531_v41 = vld [vmem:[#allocation8_spill] sm:$0xff] }
 0x313   : > { %2947 = vmatmul.bf16.gmra.mxu1 %v7542_v63 }
 0x314   : > { %11528 = vst [vmem:[#allocation89_spill] sm:$0xff] %v8028_v52  ;;  %3036 = vmatmul.bf16.gmra.mxu2 %v7544_v4  ;;  %v6832_v52 = vld [vmem:[%s7230_s28 + $0x204] sm:$0xf] }
 0x315   : > { %3125 = vmatmul.bf16.gmra.mxu3 %v7546_v6 }
 0x317   : > { %v2997_v7 = vpop.f32.mrf.mxu2  ;;  %v2821_v19 = vpop.f32.mrf.mxu0 }
 0x318   : > { %v2998_v62 = vadd.f32 %v2997_v7, %v2909_v28  ;;  %v3086_v53 = vpop.f32.mrf.mxu3  ;;  %v2910_v38 = vpop.f32.mrf.mxu1  ;;  %v6291_v28 = vld [vmem:[%s7230_s28 + $0x3dc] sm:$0xf0]  ;;  %v6944_v7 = vld [vmem:[%s7230_s28 + $0x584] sm:$0xf] }
 0x319   : > { %v2911_v29 = vadd.f32 %v2910_v38, %v2821_v19 }
 0x31a   : > { %v8034_v61 = vadd.f32 %v3086_v53, %v2998_v62  ;;  %v6294_v62 = vor.u32 %v6888_v37, %v6291_v28  ;;  %v6515_v53 = vld [vmem:[%s7230_s28 + $0x59c] sm:$0xf0] }
 0x31b   : > { %v6518_v38 = vor.u32 %v6944_v7, %v6515_v53 }
 0x31c   : > { %11529 = vst [vmem:[#allocation90_spill] sm:$0xff] %v8034_v61  ;;  %3345 = vmatpush.bf16.msrb.mxu2 %v6294_v62  ;;  %v5843_v61 = vld [vmem:[%s7230_s28 + $0x5c] sm:$0xf0] }
 0x31d   : > { %3434 = vmatpush.bf16.msrb.mxu3 %v6518_v38  ;;  %v11535_v38 = vld [vmem:[#allocation12_spill] sm:$0xff] }
 0x31f   : > { %v2999_v39 = vpop.f32.mrf.mxu2  ;;  %v2824_v60 = vpop.f32.mrf.mxu0 }
 0x320   : > { %v3000_v36 = vadd.f32 %v2999_v39, %v2911_v29  ;;  %v3088_v10 = vpop.f32.mrf.mxu3  ;;  %v2913_v18 = vpop.f32.mrf.mxu1 }
 0x321   : > { %v2914_v11 = vadd.f32 %v2913_v18, %v2824_v60 }
 0x322   : > { %v8036_v31 = vadd.f32 %v3088_v10, %v3000_v36  ;;  %2863 = vmatmul.bf16.gmra.mxu0 %v7564_v58 }
 0x323   : > { %2952 = vmatmul.bf16.gmra.mxu1 %v7566_v5 }
 0x324   : > { %11530 = vst [vmem:[#allocation91_spill] sm:$0xff] %v8036_v31  ;;  %3041 = vmatmul.bf16.gmra.mxu2 %v11531_v41  ;;  %v6776_v31 = vld [vmem:[%s7230_s28 + $0x44] sm:$0xf] }
 0x325   : > { %3130 = vmatmul.bf16.gmra.mxu3 %v11532_v30  ;;  %v5846_v9 = vor.u32 %v6776_v31, %v5843_v61  ;;  %v6067_v30 = vld [vmem:[%s7230_s28 + $0x21c] sm:$0xf0] }
 0x326   : > { %v6070_v41 = vor.u32 %v6832_v52, %v6067_v30 }
 0x327   : > { %v3002_v19 = vpop.f32.mrf.mxu2  ;;  %v2826_v36 = vpop.f32.mrf.mxu0  ;;  %3167 = vmatpush.bf16.msrb.mxu0 %v5846_v9 }
 0x328   : > { %v3003_v29 = vadd.f32 %v3002_v19, %v2914_v11  ;;  %v3091_v39 = vpop.f32.mrf.mxu3  ;;  %v2915_v10 = vpop.f32.mrf.mxu1  ;;  %3256 = vmatpush.bf16.msrb.mxu1 %v6070_v41 }
 0x329   : > { %v2916_v18 = vadd.f32 %v2915_v10, %v2826_v36  ;;  %v11538_v36 = vld [vmem:[#allocation15_spill] sm:$0xff] }
 0x32a   : > { %v8046_v60 = vadd.f32 %v3091_v39, %v3003_v29  ;;  %v11536_v29 = vld [vmem:[#allocation13_spill] sm:$0xff]  ;;  %v11537_v39 = vld [vmem:[#allocation14_spill] sm:$0xff] }
 0x32c   : > { %11533 = vst [vmem:[#allocation92_spill] sm:$0xff] %v8046_v60  ;;  %v11541_v60 = vld [vmem:[#allocation18_spill] sm:$0xff] }
 0x32f   : > { %v3004_v37 = vpop.f32.mrf.mxu2  ;;  %v2829_v11 = vpop.f32.mrf.mxu0 }
 0x330   : > { %v3005_v28 = vadd.f32 %v3004_v37, %v2916_v18  ;;  %v3093_v7 = vpop.f32.mrf.mxu3  ;;  %v2918_v53 = vpop.f32.mrf.mxu1 }
 0x331   : > { %v2919_v62 = vadd.f32 %v2918_v53, %v2829_v11 }
 0x332   : > { %v8052_v19 = vadd.f32 %v3093_v7, %v3005_v28  ;;  %2868 = vmatmul.bf16.gmra.mxu0 %v11535_v38 }
 0x333   : > { %2957 = vmatmul.bf16.gmra.mxu1 %v11536_v29  ;;  %v6039_v29 = vld [vmem:[%s7230_s28 + $0x1e4] sm:$0xf0] }
 0x334   : > { %11534 = vst [vmem:[#allocation93_spill] sm:$0xff] %v8052_v19  ;;  %3046 = vmatmul.bf16.gmra.mxu2 %v11537_v39 }
 0x335   : > { %3135 = vmatmul.bf16.gmra.mxu3 %v11538_v36  ;;  %v11544_v36 = vld [vmem:[#allocation21_spill] sm:$0xff] }
 0x337   : > { %v3007_v61 = vpop.f32.mrf.mxu2  ;;  %v2831_v31 = vpop.f32.mrf.mxu0 }
 0x338   : > { %v3008_v52 = vadd.f32 %v3007_v61, %v2919_v62  ;;  %v3096_v9 = vpop.f32.mrf.mxu3  ;;  %v2920_v41 = vpop.f32.mrf.mxu1  ;;  %v11542_v62 = vld [vmem:[#allocation19_spill] sm:$0xff]  ;;  %v11543_v61 = vld [vmem:[#allocation20_spill] sm:$0xff] }
 0x339   : > { %v2921_v10 = vadd.f32 %v2920_v41, %v2831_v31  ;;  %v6937_v31 = vld [vmem:[%s7230_s28 + $0x54c] sm:$0xf] }
 0x33a   : > { %v8058_v30 = vadd.f32 %v3096_v9, %v3008_v52  ;;  %v6881_v52 = vld [vmem:[%s7230_s28 + $0x38c] sm:$0xf]  ;;  %v6263_v9 = vld [vmem:[%s7230_s28 + $0x3a4] sm:$0xf0] }
 0x33b   : > { %v6266_v41 = vor.u32 %v6881_v52, %v6263_v9 }
 0x33c   : > { %11539 = vst [vmem:[#allocation94_spill] sm:$0xff] %v8058_v30 }
 0x33d   : > { %3346 = vmatpush.bf16.msrb.mxu2 %v6266_v41 }
 0x33f   : > { %v3009_v18 = vpop.f32.mrf.mxu2  ;;  %v2834_v7 = vpop.f32.mrf.mxu0 }
 0x340   : > { %v3010_v37 = vadd.f32 %v3009_v18, %v2921_v10  ;;  %v3098_v28 = vpop.f32.mrf.mxu3  ;;  %v2923_v11 = vpop.f32.mrf.mxu1  ;;  %v6487_v10 = vld [vmem:[%s7230_s28 + $0x564] sm:$0xf0] }
 0x341   : > { %v2924_v19 = vadd.f32 %v2923_v11, %v2834_v7 }
 0x342   : > { %v8060_v53 = vadd.f32 %v3098_v28, %v3010_v37  ;;  %2873 = vmatmul.bf16.gmra.mxu0 %v11541_v60  ;;  %v6490_v37 = vor.u32 %v6937_v31, %v6487_v10  ;;  %v6825_v60 = vld [vmem:[%s7230_s28 + $0x1cc] sm:$0xf] }
 0x343   : > { %2962 = vmatmul.bf16.gmra.mxu1 %v11542_v62  ;;  %v5815_v62 = vld [vmem:[%s7230_s28 + $0x24] sm:$0xf0]  ;;  %v6042_v38 = vor.u32 %v6825_v60, %v6039_v29 }
 0x344   : > { %11540 = vst [vmem:[#allocation95_spill] sm:$0xff] %v8060_v53  ;;  %3051 = vmatmul.bf16.gmra.mxu2 %v11543_v61  ;;  %3435 = vmatpush.bf16.msrb.mxu3 %v6490_v37  ;;  %v6769_v61 = vld [vmem:[%s7230_s28 + $0xc] sm:$0xf] }
 0x345   : > { %3140 = vmatmul.bf16.gmra.mxu3 %v11544_v36  ;;  %v5818_v39 = vor.u32 %v6769_v61, %v5815_v62  ;;  %3257 = vmatpush.bf16.msrb.mxu1 %v6042_v38  ;;  %v11547_v37 = vld [vmem:[#allocation24_spill] sm:$0xff] }
 0x347   : > { %v3012_v18 = vpop.f32.mrf.mxu2  ;;  %v2836_v11 = vpop.f32.mrf.mxu0  ;;  %3168 = vmatpush.bf16.msrb.mxu0 %v5818_v39 }
 0x348   : > { %v3013_v28 = vadd.f32 %v3012_v18, %v2924_v19  ;;  %v3101_v7 = vpop.f32.mrf.mxu3  ;;  %v2925_v53 = vpop.f32.mrf.mxu1 }
 0x349   : > { %v2926_v36 = vadd.f32 %v2925_v53, %v2836_v11  ;;  %v11549_v53 = vld [vmem:[#allocation26_spill] sm:$0xff] }
 0x34a   : > { %v8070_v30 = vadd.f32 %v3101_v7, %v3013_v28  ;;  %v11548_v28 = vld [vmem:[#allocation25_spill] sm:$0xff]  ;;  %v11550_v7 = vld [vmem:[#allocation27_spill] sm:$0xff] }
 0x34c   : > { %11545 = vst [vmem:[#allocation96_spill] sm:$0xff] %v8070_v30  ;;  %v11553_v30 = vld [vmem:[#allocation30_spill] sm:$0xff] }
 0x34f   : > { %v3014_v52 = vpop.f32.mrf.mxu2  ;;  %v2839_v19 = vpop.f32.mrf.mxu0 }
 0x350   : > { %v3015_v9 = vadd.f32 %v3014_v52, %v2926_v36  ;;  %v3103_v31 = vpop.f32.mrf.mxu3  ;;  %v2928_v10 = vpop.f32.mrf.mxu1 }
 0x351   : > { %v2929_v41 = vadd.f32 %v2928_v10, %v2839_v19 }
 0x352   : > { %v8076_v18 = vadd.f32 %v3103_v31, %v3015_v9  ;;  %2878 = vmatmul.bf16.gmra.mxu0 %v11547_v37 }
 0x353   : > { %2967 = vmatmul.bf16.gmra.mxu1 %v11548_v28  ;;  %v6878_v28 = vld [vmem:[%s7230_s28 + $0x370] sm:$0xf0] }
 0x354   : > { %11546 = vst [vmem:[#allocation97_spill] sm:$0xff] %v8076_v18  ;;  %3056 = vmatmul.bf16.gmra.mxu2 %v11549_v53 }
 0x355   : > { %3145 = vmatmul.bf16.gmra.mxu3 %v11550_v7  ;;  %v11556_v7 = vld [vmem:[#allocation33_spill] sm:$0xff] }
 0x357   : > { %v3017_v62 = vpop.f32.mrf.mxu2  ;;  %v2841_v38 = vpop.f32.mrf.mxu0 }
 0x358   : > { %v3018_v60 = vadd.f32 %v3017_v62, %v2929_v41  ;;  %v3106_v29 = vpop.f32.mrf.mxu3  ;;  %v2930_v39 = vpop.f32.mrf.mxu1  ;;  %v11554_v41 = vld [vmem:[#allocation31_spill] sm:$0xff]  ;;  %v11555_v62 = vld [vmem:[#allocation32_spill] sm:$0xff] }
 0x359   : > { %v2931_v61 = vadd.f32 %v2930_v39, %v2841_v38  ;;  %v6689_v38 = vld [vmem:[%s7230_s28 + $0x6d8] sm:$0xf] }
 0x35a   : > { %v8082_v36 = vadd.f32 %v3106_v29, %v3018_v60  ;;  %v6465_v60 = vld [vmem:[%s7230_s28 + $0x518] sm:$0xf]  ;;  %v6934_v29 = vld [vmem:[%s7230_s28 + $0x530] sm:$0xf0] }
 0x35b   : > { %v6466_v39 = vor.u32 %v6934_v29, %v6465_v60 }
 0x35c   : > { %11551 = vst [vmem:[#allocation98_spill] sm:$0xff] %v8082_v36 }
 0x35d   : > { %3695 = vmatpush.bf16.msra.mxu2 %v6466_v39 }
 0x35f   : > { %v3019_v11 = vpop.f32.mrf.mxu2  ;;  %v2844_v31 = vpop.f32.mrf.mxu0 }
 0x360   : > { %v3020_v52 = vadd.f32 %v3019_v11, %v2931_v61  ;;  %v3108_v9 = vpop.f32.mrf.mxu3  ;;  %v2933_v19 = vpop.f32.mrf.mxu1  ;;  %v6990_v61 = vld [vmem:[%s7230_s28 + $0x6f0] sm:$0xf0] }
 0x361   : > { %v2934_v18 = vadd.f32 %v2933_v19, %v2844_v31 }
 0x362   : > { %v8084_v10 = vadd.f32 %v3108_v9, %v3020_v52  ;;  %2883 = vmatmul.bf16.gmra.mxu0 %v11553_v30  ;;  %v6690_v52 = vor.u32 %v6990_v61, %v6689_v38  ;;  %v6241_v30 = vld [vmem:[%s7230_s28 + $0x358] sm:$0xf] }
 0x363   : > { %2972 = vmatmul.bf16.gmra.mxu1 %v11554_v41  ;;  %v6822_v41 = vld [vmem:[%s7230_s28 + $0x1b0] sm:$0xf0]  ;;  %v6242_v37 = vor.u32 %v6878_v28, %v6241_v30 }
 0x364   : > { %11552 = vst [vmem:[#allocation99_spill] sm:$0xff] %v8084_v10  ;;  %3061 = vmatmul.bf16.gmra.mxu2 %v11555_v62  ;;  %3784 = vmatpush.bf16.msra.mxu3 %v6690_v52  ;;  %v6017_v62 = vld [vmem:[%s7230_s28 + $0x198] sm:$0xf] }
 0x365   : > { %3150 = vmatmul.bf16.gmra.mxu3 %v11556_v7  ;;  %v6018_v53 = vor.u32 %v6822_v41, %v6017_v62  ;;  %3606 = vmatpush.bf16.msra.mxu1 %v6242_v37 }
 0x367   : > { %v3022_v11 = vpop.f32.mrf.mxu2  ;;  %v2846_v19 = vpop.f32.mrf.mxu0  ;;  %3517 = vmatpush.bf16.msra.mxu0 %v6018_v53 }
 0x368   : > { %v3023_v9 = vadd.f32 %v3022_v11, %v2934_v18  ;;  %v3111_v31 = vpop.f32.mrf.mxu3  ;;  %v2935_v10 = vpop.f32.mrf.mxu1 }
 0x369   : > { %v2936_v7 = vadd.f32 %v2935_v10, %v2846_v19 }
 0x36a   : > { %v8094_v36 = vadd.f32 %v3111_v31, %v3023_v9 }
 0x36c   : > { %11557 = vst [vmem:[#allocation100_spill] sm:$0xff] %v8094_v36 }
 0x36f   : > { %v3024_v60 = vpop.f32.mrf.mxu2  ;;  %v2849_v18 = vpop.f32.mrf.mxu0 }
 0x370   : > { %v3025_v29 = vadd.f32 %v3024_v60, %v2936_v7  ;;  %v3113_v38 = vpop.f32.mrf.mxu3  ;;  %v2938_v61 = vpop.f32.mrf.mxu1 }
 0x371   : > { %v2939_v39 = vadd.f32 %v2938_v61, %v2849_v18  ;;  %v11562_v18 = vld [vmem:[#allocation4_spill] sm:$0xff]  ;;  %v6437_v61 = vld [vmem:[%s7230_s28 + $0x4e0] sm:$0xf] }
 0x372   : > { %v8100_v11 = vadd.f32 %v3113_v38, %v3025_v29  ;;  %2888 = vmatmul.bf16.gmra.mxu0 %v7708_v16  ;;  %v11561_v38 = vld [vmem:[#allocation3_spill] sm:$0xff] }
 0x373   : > { %2977 = vmatmul.bf16.gmra.mxu1 %v7710_v56 }
 0x374   : > { %11558 = vst [vmem:[#allocation101_spill] sm:$0xff] %v8100_v11  ;;  %3066 = vmatmul.bf16.gmra.mxu2 %v7712_v17  ;;  %v6213_v11 = vld [vmem:[%s7230_s28 + $0x320] sm:$0xf] }
 0x375   : > { %3155 = vmatmul.bf16.gmra.mxu3 %v7714_v8 }
 0x377   : > { %v3027_v10 = vpop.f32.mrf.mxu2  ;;  %v2851_v37 = vpop.f32.mrf.mxu0 }
 0x378   : > { %v3028_v30 = vadd.f32 %v3027_v10, %v2939_v39  ;;  %v3116_v28 = vpop.f32.mrf.mxu3  ;;  %v2940_v53 = vpop.f32.mrf.mxu1  ;;  %v6927_v39 = vld [vmem:[%s7230_s28 + $0x4f8] sm:$0xf0]  ;;  %v6661_v10 = vld [vmem:[%s7230_s28 + $0x6a0] sm:$0xf] }
 0x379   : > { %v2941_v41 = vadd.f32 %v2940_v53, %v2851_v37 }
 0x37a   : > { %v8106_v7 = vadd.f32 %v3116_v28, %v3028_v30  ;;  %v6438_v30 = vor.u32 %v6927_v39, %v6437_v61  ;;  %v6983_v28 = vld [vmem:[%s7230_s28 + $0x6b8] sm:$0xf0] }
 0x37b   : > { %v6662_v53 = vor.u32 %v6983_v28, %v6661_v10 }
 0x37c   : > { %11559 = vst [vmem:[#allocation102_spill] sm:$0xff] %v8106_v7  ;;  %3696 = vmatpush.bf16.msra.mxu2 %v6438_v30  ;;  %v6815_v7 = vld [vmem:[%s7230_s28 + $0x178] sm:$0xf0] }
 0x37d   : > { %3785 = vmatpush.bf16.msra.mxu3 %v6662_v53 }
 0x37f   : > { %v3029_v62 = vpop.f32.mrf.mxu2  ;;  %v2854_v31 = vpop.f32.mrf.mxu0 }
 0x380   : > { %v3030_v52 = vadd.f32 %v3029_v62, %v2941_v41  ;;  %v3118_v9 = vpop.f32.mrf.mxu3  ;;  %v2943_v19 = vpop.f32.mrf.mxu1 }
 0x381   : > { %v2944_v29 = vadd.f32 %v2943_v19, %v2854_v31 }
 0x382   : > { %v8108_v60 = vadd.f32 %v3118_v9, %v3030_v52  ;;  %3169 = vmatmul.bf16.vlgmr.msrb.gmra.mxu0 %v7316_v47 }
 0x383   : > { %3258 = vmatmul.bf16.vlgmr.msrb.gmra.mxu1 %v7320_v51 }
 0x384   : > { %11560 = vst [vmem:[#allocation103_spill] sm:$0xff] %v8108_v60  ;;  %3347 = vmatmul.bf16.vlgmr.msrb.gmra.mxu2 %v11561_v38  ;;  %v5989_v60 = vld [vmem:[%s7230_s28 + $0x160] sm:$0xf] }
 0x385   : > { %3436 = vmatmul.bf16.vlgmr.msrb.gmra.mxu3 %v11562_v18  ;;  %v5990_v36 = vor.u32 %v6815_v7, %v5989_v60  ;;  %v6871_v18 = vld [vmem:[%s7230_s28 + $0x338] sm:$0xf0] }
 0x386   : > { %v6214_v38 = vor.u32 %v6871_v18, %v6213_v11 }
 0x387   : > { %v3032_v37 = vpop.f32.mrf.mxu2  ;;  %v2856_v52 = vpop.f32.mrf.mxu0  ;;  %3518 = vmatpush.bf16.msra.mxu0 %v5990_v36 }
 0x388   : > { %v3033_v41 = vadd.f32 %v3032_v37, %v2944_v29  ;;  %v3121_v62 = vpop.f32.mrf.mxu3  ;;  %v2945_v9 = vpop.f32.mrf.mxu1  ;;  %3607 = vmatpush.bf16.msra.mxu1 %v6214_v38 }
 0x389   : > { %v2946_v19 = vadd.f32 %v2945_v9, %v2856_v52 }
 0x38a   : > { %v8118_v31 = vadd.f32 %v3121_v62, %v3033_v41 }
 0x38c   : > { %11563 = vst [vmem:[#allocation104_spill] sm:$0xff] %v8118_v31 }
 0x38f   : > { %v3034_v61 = vpop.f32.mrf.mxu2  ;;  %v2859_v29 = vpop.f32.mrf.mxu0 }
 0x390   : > { %v3035_v39 = vadd.f32 %v3034_v61, %v2946_v19  ;;  %v3123_v10 = vpop.f32.mrf.mxu3  ;;  %v2948_v28 = vpop.f32.mrf.mxu1 }
 0x391   : > { %v2949_v30 = vadd.f32 %v2948_v28, %v2859_v29  ;;  %v6920_v29 = vld [vmem:[%s7230_s28 + $0x4c0] sm:$0xf0]  ;;  %v6633_v28 = vld [vmem:[%s7230_s28 + $0x668] sm:$0xf] }
 0x392   : > { %v8124_v37 = vadd.f32 %v3123_v10, %v3035_v39  ;;  %3174 = vmatmul.bf16.gmra.mxu0 %v7346_v12  ;;  %v6409_v10 = vld [vmem:[%s7230_s28 + $0x4a8] sm:$0xf] }
 0x393   : > { %3263 = vmatmul.bf16.gmra.mxu1 %v7348_v13 }
 0x394   : > { %11564 = vst [vmem:[#allocation105_spill] sm:$0xff] %v8124_v37  ;;  %3352 = vmatmul.bf16.gmra.mxu2 %v7350_v14  ;;  %v6864_v37 = vld [vmem:[%s7230_s28 + $0x300] sm:$0xf0] }
 0x395   : > { %3441 = vmatmul.bf16.gmra.mxu3 %v7352_v15 }
 0x397   : > { %v3037_v7 = vpop.f32.mrf.mxu2  ;;  %v2861_v60 = vpop.f32.mrf.mxu0 }
 0x398   : > { %v3038_v11 = vadd.f32 %v3037_v7, %v2949_v30  ;;  %v3126_v36 = vpop.f32.mrf.mxu3  ;;  %v2950_v38 = vpop.f32.mrf.mxu1  ;;  %v6410_v30 = vor.u32 %v6920_v29, %v6409_v10  ;;  %v6976_v7 = vld [vmem:[%s7230_s28 + $0x680] sm:$0xf0] }
 0x399   : > { %v2951_v53 = vadd.f32 %v2950_v38, %v2861_v60 }
 0x39a   : > { %v8130_v18 = vadd.f32 %v3126_v36, %v3038_v11  ;;  %v6634_v36 = vor.u32 %v6976_v7, %v6633_v28  ;;  %3697 = vmatpush.bf16.msra.mxu2 %v6410_v30 }
 0x39c   : > { %11565 = vst [vmem:[#allocation106_spill] sm:$0xff] %v8130_v18  ;;  %3786 = vmatpush.bf16.msra.mxu3 %v6634_v36 }
 0x39f   : > { %v3039_v41 = vpop.f32.mrf.mxu2  ;;  %v2864_v9 = vpop.f32.mrf.mxu0 }
 0x3a0   : > { %v3040_v62 = vadd.f32 %v3039_v41, %v2951_v53  ;;  %v3128_v52 = vpop.f32.mrf.mxu3  ;;  %v2953_v19 = vpop.f32.mrf.mxu1 }
 0x3a1   : > { %v2954_v39 = vadd.f32 %v2953_v19, %v2864_v9  ;;  %v5961_v9 = vld [vmem:[%s7230_s28 + $0x128] sm:$0xf]  ;;  %v6808_v19 = vld [vmem:[%s7230_s28 + $0x140] sm:$0xf0] }
 0x3a2   : > { %v8132_v61 = vadd.f32 %v3128_v52, %v3040_v62  ;;  %3179 = vmatmul.bf16.gmra.mxu0 %v7366_v24  ;;  %v5962_v18 = vor.u32 %v6808_v19, %v5961_v9 }
 0x3a3   : > { %3268 = vmatmul.bf16.gmra.mxu1 %v7368_v25 }
 0x3a4   : > { %11566 = vst [vmem:[#allocation107_spill] sm:$0xff] %v8132_v61  ;;  %3357 = vmatmul.bf16.gmra.mxu2 %v7370_v26  ;;  %v6185_v61 = vld [vmem:[%s7230_s28 + $0x2e8] sm:$0xf]  ;;  %3519 = vmatpush.bf16.msra.mxu0 %v5962_v18 }
 0x3a5   : > { %3446 = vmatmul.bf16.gmra.mxu3 %v7372_v27  ;;  %v6186_v31 = vor.u32 %v6864_v37, %v6185_v61 }
 0x3a7   : > { %v3042_v11 = vpop.f32.mrf.mxu2  ;;  %v2866_v53 = vpop.f32.mrf.mxu0  ;;  %3608 = vmatpush.bf16.msra.mxu1 %v6186_v31 }
 0x3a8   : > { %v3043_v60 = vadd.f32 %v3042_v11, %v2954_v39  ;;  %v3131_v38 = vpop.f32.mrf.mxu3  ;;  %v2955_v41 = vpop.f32.mrf.mxu1 }
 0x3a9   : > { %v2956_v52 = vadd.f32 %v2955_v41, %v2866_v53 }
 0x3aa   : > { %v8142_v62 = vadd.f32 %v3131_v38, %v3043_v60 }
 0x3ac   : > { %11567 = vst [vmem:[#allocation108_spill] sm:$0xff] %v8142_v62 }
 0x3af   : > { %v3044_v10 = vpop.f32.mrf.mxu2  ;;  %v2869_v39 = vpop.f32.mrf.mxu0 }
 0x3b0   : > { %v3045_v29 = vadd.f32 %v3044_v10, %v2956_v52  ;;  %v3133_v28 = vpop.f32.mrf.mxu3  ;;  %v2958_v7 = vpop.f32.mrf.mxu1 }
 0x3b1   : > { %v2959_v30 = vadd.f32 %v2958_v7, %v2869_v39  ;;  %v6913_v39 = vld [vmem:[%s7230_s28 + $0x488] sm:$0xf0]  ;;  %v6605_v7 = vld [vmem:[%s7230_s28 + $0x630] sm:$0xf] }
 0x3b2   : > { %v8148_v11 = vadd.f32 %v3133_v28, %v3045_v29  ;;  %3184 = vmatmul.bf16.gmra.mxu0 %v7394_v49  ;;  %v6381_v28 = vld [vmem:[%s7230_s28 + $0x470] sm:$0xf] }
 0x3b3   : > { %3273 = vmatmul.bf16.gmra.mxu1 %v7396_v50 }
 0x3b4   : > { %11568 = vst [vmem:[#allocation109_spill] sm:$0xff] %v8148_v11  ;;  %3362 = vmatmul.bf16.gmra.mxu2 %v7398_v54  ;;  %v6857_v11 = vld [vmem:[%s7230_s28 + $0x2c8] sm:$0xf0] }
 0x3b5   : > { %3451 = vmatmul.bf16.gmra.mxu3 %v7400_v55 }
 0x3b7   : > { %v3047_v36 = vpop.f32.mrf.mxu2  ;;  %v2871_v31 = vpop.f32.mrf.mxu0 }
 0x3b8   : > { %v3048_v37 = vadd.f32 %v3047_v36, %v2959_v30  ;;  %v3136_v18 = vpop.f32.mrf.mxu3  ;;  %v2960_v61 = vpop.f32.mrf.mxu1  ;;  %v6382_v30 = vor.u32 %v6913_v39, %v6381_v28  ;;  %v6969_v36 = vld [vmem:[%s7230_s28 + $0x648] sm:$0xf0] }
 0x3b9   : > { %v2961_v38 = vadd.f32 %v2960_v61, %v2871_v31 }
 0x3ba   : > { %v8154_v60 = vadd.f32 %v3136_v18, %v3048_v37  ;;  %v6606_v18 = vor.u32 %v6969_v36, %v6605_v7  ;;  %3698 = vmatpush.bf16.msra.mxu2 %v6382_v30 }
 0x3bc   : > { %11569 = vst [vmem:[#allocation110_spill] sm:$0xff] %v8154_v60  ;;  %3787 = vmatpush.bf16.msra.mxu3 %v6606_v18 }
 0x3bf   : > { %v3049_v53 = vpop.f32.mrf.mxu2  ;;  %v2874_v9 = vpop.f32.mrf.mxu0 }
 0x3c0   : > { %v3050_v41 = vadd.f32 %v3049_v53, %v2961_v38  ;;  %v3138_v52 = vpop.f32.mrf.mxu3  ;;  %v2963_v19 = vpop.f32.mrf.mxu1 }
 0x3c1   : > { %v2964_v29 = vadd.f32 %v2963_v19, %v2874_v9  ;;  %v5933_v9 = vld [vmem:[%s7230_s28 + $0xf0] sm:$0xf]  ;;  %v6801_v19 = vld [vmem:[%s7230_s28 + $0x108] sm:$0xf0] }
 0x3c2   : > { %v8156_v10 = vadd.f32 %v3138_v52, %v3050_v41  ;;  %3189 = vmatmul.bf16.gmra.mxu0 %v7414_v0  ;;  %v5934_v60 = vor.u32 %v6801_v19, %v5933_v9 }
 0x3c3   : > { %3278 = vmatmul.bf16.gmra.mxu1 %v7416_v1 }
 0x3c4   : > { %11570 = vst [vmem:[#allocation111_spill] sm:$0xff] %v8156_v10  ;;  %3367 = vmatmul.bf16.gmra.mxu2 %v7418_v2  ;;  %v6157_v10 = vld [vmem:[%s7230_s28 + $0x2b0] sm:$0xf]  ;;  %3520 = vmatpush.bf16.msra.mxu0 %v5934_v60 }
 0x3c5   : > { %3456 = vmatmul.bf16.gmra.mxu3 %v7420_v3  ;;  %v6158_v62 = vor.u32 %v6857_v11, %v6157_v10 }
 0x3c7   : > { %v3052_v37 = vpop.f32.mrf.mxu2  ;;  %v2876_v38 = vpop.f32.mrf.mxu0  ;;  %3609 = vmatpush.bf16.msra.mxu1 %v6158_v62 }
 0x3c8   : > { %v3053_v31 = vadd.f32 %v3052_v37, %v2964_v29  ;;  %v3141_v61 = vpop.f32.mrf.mxu3  ;;  %v2965_v53 = vpop.f32.mrf.mxu1 }
 0x3c9   : > { %v2966_v52 = vadd.f32 %v2965_v53, %v2876_v38 }
 0x3ca   : > { %v8166_v41 = vadd.f32 %v3141_v61, %v3053_v31 }
 0x3cc   : > { %11571 = vst [vmem:[#allocation112_spill] sm:$0xff] %v8166_v41 }
 0x3cf   : > { %v3054_v28 = vpop.f32.mrf.mxu2  ;;  %v2879_v29 = vpop.f32.mrf.mxu0 }
 0x3d0   : > { %v3055_v39 = vadd.f32 %v3054_v28, %v2966_v52  ;;  %v3143_v7 = vpop.f32.mrf.mxu3  ;;  %v2968_v36 = vpop.f32.mrf.mxu1 }
 0x3d1   : > { %v2969_v30 = vadd.f32 %v2968_v36, %v2879_v29  ;;  %v6906_v29 = vld [vmem:[%s7230_s28 + $0x450] sm:$0xf0]  ;;  %v6577_v36 = vld [vmem:[%s7230_s28 + $0x5f8] sm:$0xf] }
 0x3d2   : > { %v8172_v37 = vadd.f32 %v3143_v7, %v3055_v39  ;;  %3194 = vmatmul.bf16.gmra.mxu0 %v7442_v32  ;;  %v6353_v7 = vld [vmem:[%s7230_s28 + $0x438] sm:$0xf] }
 0x3d3   : > { %3283 = vmatmul.bf16.gmra.mxu1 %v7444_v33 }
 0x3d4   : > { %11572 = vst [vmem:[#allocation113_spill] sm:$0xff] %v8172_v37  ;;  %3372 = vmatmul.bf16.gmra.mxu2 %v7446_v34  ;;  %v6850_v37 = vld [vmem:[%s7230_s28 + $0x290] sm:$0xf0] }
 0x3d5   : > { %3461 = vmatmul.bf16.gmra.mxu3 %v7448_v35 }
 0x3d7   : > { %v3057_v18 = vpop.f32.mrf.mxu2  ;;  %v2881_v62 = vpop.f32.mrf.mxu0 }
 0x3d8   : > { %v3058_v11 = vadd.f32 %v3057_v18, %v2969_v30  ;;  %v3146_v60 = vpop.f32.mrf.mxu3  ;;  %v2970_v10 = vpop.f32.mrf.mxu1  ;;  %v6354_v30 = vor.u32 %v6906_v29, %v6353_v7  ;;  %v6962_v18 = vld [vmem:[%s7230_s28 + $0x610] sm:$0xf0] }
 0x3d9   : > { %v2971_v61 = vadd.f32 %v2970_v10, %v2881_v62 }
 0x3da   : > { %v8178_v31 = vadd.f32 %v3146_v60, %v3058_v11  ;;  %v6578_v60 = vor.u32 %v6962_v18, %v6577_v36  ;;  %3699 = vmatpush.bf16.msra.mxu2 %v6354_v30 }
 0x3dc   : > { %11573 = vst [vmem:[#allocation114_spill] sm:$0xff] %v8178_v31  ;;  %3788 = vmatpush.bf16.msra.mxu3 %v6578_v60 }
 0x3df   : > { %v3059_v38 = vpop.f32.mrf.mxu2  ;;  %v2884_v9 = vpop.f32.mrf.mxu0 }
 0x3e0   : > { %v3060_v53 = vadd.f32 %v3059_v38, %v2971_v61  ;;  %v3148_v52 = vpop.f32.mrf.mxu3  ;;  %v2973_v19 = vpop.f32.mrf.mxu1 }
 0x3e1   : > { %v2974_v39 = vadd.f32 %v2973_v19, %v2884_v9  ;;  %v5905_v9 = vld [vmem:[%s7230_s28 + $0xb8] sm:$0xf]  ;;  %v6794_v19 = vld [vmem:[%s7230_s28 + $0xd0] sm:$0xf0] }
 0x3e2   : > { %v8180_v28 = vadd.f32 %v3148_v52, %v3060_v53  ;;  %3199 = vmatmul.bf16.gmra.mxu0 %v7462_v44  ;;  %v5906_v31 = vor.u32 %v6794_v19, %v5905_v9 }
 0x3e3   : > { %3288 = vmatmul.bf16.gmra.mxu1 %v7464_v45 }
 0x3e4   : > { %11574 = vst [vmem:[#allocation115_spill] sm:$0xff] %v8180_v28  ;;  %3377 = vmatmul.bf16.gmra.mxu2 %v7466_v46  ;;  %v6129_v28 = vld [vmem:[%s7230_s28 + $0x278] sm:$0xf]  ;;  %3521 = vmatpush.bf16.msra.mxu0 %v5906_v31 }
 0x3e5   : > { %3466 = vmatmul.bf16.gmra.mxu3 %v7468_v48  ;;  %v6130_v41 = vor.u32 %v6850_v37, %v6129_v28 }
 0x3e7   : > { %v3062_v11 = vpop.f32.mrf.mxu2  ;;  %v2886_v61 = vpop.f32.mrf.mxu0  ;;  %3610 = vmatpush.bf16.msra.mxu1 %v6130_v41 }
 0x3e8   : > { %v3063_v62 = vadd.f32 %v3062_v11, %v2974_v39  ;;  %v3151_v10 = vpop.f32.mrf.mxu3  ;;  %v2975_v38 = vpop.f32.mrf.mxu1 }
 0x3e9   : > { %v2976_v52 = vadd.f32 %v2975_v38, %v2886_v61 }
 0x3ea   : > { %v8190_v53 = vadd.f32 %v3151_v10, %v3063_v62 }
 0x3ec   : > { %11575 = vst [vmem:[#allocation116_spill] sm:$0xff] %v8190_v53 }
 0x3ef   : > { %v3064_v7 = vpop.f32.mrf.mxu2  ;;  %v2889_v39 = vpop.f32.mrf.mxu0 }
 0x3f0   : > { %v3065_v29 = vadd.f32 %v3064_v7, %v2976_v52  ;;  %v3153_v36 = vpop.f32.mrf.mxu3  ;;  %v2978_v18 = vpop.f32.mrf.mxu1 }
 0x3f1   : > { %v2979_v30 = vadd.f32 %v2978_v18, %v2889_v39  ;;  %v6899_v39 = vld [vmem:[%s7230_s28 + $0x418] sm:$0xf0]  ;;  %v6549_v18 = vld [vmem:[%s7230_s28 + $0x5c0] sm:$0xf] }
 0x3f2   : > { %v8196_v11 = vadd.f32 %v3153_v36, %v3065_v29  ;;  %3204 = vmatmul.bf16.gmra.mxu0 %v7490_v20  ;;  %v6325_v36 = vld [vmem:[%s7230_s28 + $0x400] sm:$0xf] }
 0x3f3   : > { %3293 = vmatmul.bf16.gmra.mxu1 %v7492_v21 }
 0x3f4   : > { %11576 = vst [vmem:[#allocation117_spill] sm:$0xff] %v8196_v11  ;;  %3382 = vmatmul.bf16.gmra.mxu2 %v7494_v22  ;;  %v6843_v11 = vld [vmem:[%s7230_s28 + $0x258] sm:$0xf0] }
 0x3f5   : > { %3471 = vmatmul.bf16.gmra.mxu3 %v7496_v23 }
 0x3f7   : > { %v3067_v60 = vpop.f32.mrf.mxu2  ;;  %v2891_v41 = vpop.f32.mrf.mxu0 }
 0x3f8   : > { %v3068_v37 = vadd.f32 %v3067_v60, %v2979_v30  ;;  %v3156_v31 = vpop.f32.mrf.mxu3  ;;  %v2980_v28 = vpop.f32.mrf.mxu1  ;;  %v6326_v30 = vor.u32 %v6899_v39, %v6325_v36  ;;  %v6955_v60 = vld [vmem:[%s7230_s28 + $0x5d8] sm:$0xf0] }
 0x3f9   : > { %v2981_v10 = vadd.f32 %v2980_v28, %v2891_v41 }
 0x3fa   : > { %v8202_v62 = vadd.f32 %v3156_v31, %v3068_v37  ;;  %v6550_v31 = vor.u32 %v6955_v60, %v6549_v18  ;;  %3700 = vmatpush.bf16.msra.mxu2 %v6326_v30 }
 0x3fc   : > { %11577 = vst [vmem:[#allocation118_spill] sm:$0xff] %v8202_v62  ;;  %3789 = vmatpush.bf16.msra.mxu3 %v6550_v31 }
 0x3ff   : > { %v3069_v61 = vpop.f32.mrf.mxu2  ;;  %v3170_v9 = vpop.f32.mrf.mxu0 }
 0x400   : > { %v3070_v38 = vadd.f32 %v3069_v61, %v2981_v10  ;;  %v3158_v52 = vpop.f32.mrf.mxu3  ;;  %v3259_v19 = vpop.f32.mrf.mxu1 }
 0x401   : > { %v3260_v29 = vadd.f32 %v3259_v19, %v3170_v9  ;;  %v5877_v9 = vld [vmem:[%s7230_s28 + $0x80] sm:$0xf]  ;;  %v6787_v19 = vld [vmem:[%s7230_s28 + $0x98] sm:$0xf0] }
 0x402   : > { %v8204_v7 = vadd.f32 %v3158_v52, %v3070_v38  ;;  %3209 = vmatmul.bf16.gmra.mxu0 %v7510_v40  ;;  %v5878_v62 = vor.u32 %v6787_v19, %v5877_v9 }
 0x403   : > { %3298 = vmatmul.bf16.gmra.mxu1 %v7512_v42 }
 0x404   : > { %11578 = vst [vmem:[#allocation119_spill] sm:$0xff] %v8204_v7  ;;  %3387 = vmatmul.bf16.gmra.mxu2 %v7514_v43  ;;  %v6101_v7 = vld [vmem:[%s7230_s28 + $0x240] sm:$0xf]  ;;  %3522 = vmatpush.bf16.msra.mxu0 %v5878_v62 }
 0x405   : > { %3476 = vmatmul.bf16.gmra.mxu3 %v7516_v57  ;;  %v6102_v53 = vor.u32 %v6843_v11, %v6101_v7 }
 0x407   : > { %v3348_v37 = vpop.f32.mrf.mxu2  ;;  %v3172_v10 = vpop.f32.mrf.mxu0  ;;  %3611 = vmatpush.bf16.msra.mxu1 %v6102_v53 }
 0x408   : > { %v3349_v41 = vadd.f32 %v3348_v37, %v3260_v29  ;;  %v3437_v28 = vpop.f32.mrf.mxu3  ;;  %v3261_v61 = vpop.f32.mrf.mxu1 }
 0x409   : > { %v3262_v52 = vadd.f32 %v3261_v61, %v3172_v10 }
 0x40a   : > { %v8214_v38 = vadd.f32 %v3437_v28, %v3349_v41 }
 0x40c   : > { %11579 = vst [vmem:[#allocation120_spill] sm:$0xff] %v8214_v38 }
 0x40f   : > { %v3350_v36 = vpop.f32.mrf.mxu2  ;;  %v3175_v29 = vpop.f32.mrf.mxu0 }
 0x410   : > { %v3351_v39 = vadd.f32 %v3350_v36, %v3262_v52  ;;  %v3439_v18 = vpop.f32.mrf.mxu3  ;;  %v3264_v60 = vpop.f32.mrf.mxu1 }
 0x411   : > { %v3265_v30 = vadd.f32 %v3264_v60, %v3175_v29  ;;  %v11584_v29 = vld [vmem:[#allocation9_spill] sm:$0xff]  ;;  %v6297_v60 = vld [vmem:[%s7230_s28 + $0x3c8] sm:$0xf] }
 0x412   : > { %v8220_v37 = vadd.f32 %v3439_v18, %v3351_v39  ;;  %3214 = vmatmul.bf16.gmra.mxu0 %v7540_v59  ;;  %v11583_v18 = vld [vmem:[#allocation8_spill] sm:$0xff] }
 0x413   : > { %3303 = vmatmul.bf16.gmra.mxu1 %v7542_v63 }
 0x414   : > { %11580 = vst [vmem:[#allocation121_spill] sm:$0xff] %v8220_v37  ;;  %3392 = vmatmul.bf16.gmra.mxu2 %v7544_v4  ;;  %v6073_v37 = vld [vmem:[%s7230_s28 + $0x208] sm:$0xf] }
 0x415   : > { %3481 = vmatmul.bf16.gmra.mxu3 %v7546_v6 }
 0x417   : > { %v3353_v31 = vpop.f32.mrf.mxu2  ;;  %v3177_v53 = vpop.f32.mrf.mxu0 }
 0x418   : > { %v3354_v11 = vadd.f32 %v3353_v31, %v3265_v30  ;;  %v3442_v62 = vpop.f32.mrf.mxu3  ;;  %v3266_v7 = vpop.f32.mrf.mxu1  ;;  %v6892_v30 = vld [vmem:[%s7230_s28 + $0x3e0] sm:$0xf0]  ;;  %v6521_v31 = vld [vmem:[%s7230_s28 + $0x588] sm:$0xf] }
 0x419   : > { %v3267_v28 = vadd.f32 %v3266_v7, %v3177_v53 }
 0x41a   : > { %v8226_v41 = vadd.f32 %v3442_v62, %v3354_v11  ;;  %v6298_v11 = vor.u32 %v6892_v30, %v6297_v60  ;;  %v6948_v62 = vld [vmem:[%s7230_s28 + $0x5a0] sm:$0xf0] }
 0x41b   : > { %v6522_v7 = vor.u32 %v6948_v62, %v6521_v31 }
 0x41c   : > { %11581 = vst [vmem:[#allocation122_spill] sm:$0xff] %v8226_v41  ;;  %3701 = vmatpush.bf16.msra.mxu2 %v6298_v11  ;;  %v6780_v41 = vld [vmem:[%s7230_s28 + $0x60] sm:$0xf0] }
 0x41d   : > { %3790 = vmatpush.bf16.msra.mxu3 %v6522_v7  ;;  %v11587_v7 = vld [vmem:[#allocation12_spill] sm:$0xff] }
 0x41f   : > { %v3355_v10 = vpop.f32.mrf.mxu2  ;;  %v3180_v9 = vpop.f32.mrf.mxu0 }
 0x420   : > { %v3356_v61 = vadd.f32 %v3355_v10, %v3267_v28  ;;  %v3444_v52 = vpop.f32.mrf.mxu3  ;;  %v3269_v19 = vpop.f32.mrf.mxu1 }
 0x421   : > { %v3270_v39 = vadd.f32 %v3269_v19, %v3180_v9 }
 0x422   : > { %v8228_v36 = vadd.f32 %v3444_v52, %v3356_v61  ;;  %3219 = vmatmul.bf16.gmra.mxu0 %v7564_v58 }
 0x423   : > { %3308 = vmatmul.bf16.gmra.mxu1 %v7566_v5 }
 0x424   : > { %11582 = vst [vmem:[#allocation123_spill] sm:$0xff] %v8228_v36  ;;  %3397 = vmatmul.bf16.gmra.mxu2 %v11583_v18  ;;  %v5849_v36 = vld [vmem:[%s7230_s28 + $0x48] sm:$0xf] }
 0x425   : > { %3486 = vmatmul.bf16.gmra.mxu3 %v11584_v29  ;;  %v5850_v38 = vor.u32 %v6780_v41, %v5849_v36  ;;  %v6836_v29 = vld [vmem:[%s7230_s28 + $0x220] sm:$0xf0] }
 0x426   : > { %v6074_v18 = vor.u32 %v6836_v29, %v6073_v37 }
 0x427   : > { %v3358_v53 = vpop.f32.mrf.mxu2  ;;  %v3182_v61 = vpop.f32.mrf.mxu0  ;;  %3523 = vmatpush.bf16.msra.mxu0 %v5850_v38 }
 0x428   : > { %v3359_v28 = vadd.f32 %v3358_v53, %v3270_v39  ;;  %v3447_v10 = vpop.f32.mrf.mxu3  ;;  %v3271_v52 = vpop.f32.mrf.mxu1  ;;  %3612 = vmatpush.bf16.msra.mxu1 %v6074_v18 }
 0x429   : > { %v3272_v19 = vadd.f32 %v3271_v52, %v3182_v61  ;;  %v11590_v61 = vld [vmem:[#allocation15_spill] sm:$0xff] }
 0x42a   : > { %v8238_v9 = vadd.f32 %v3447_v10, %v3359_v28  ;;  %v11588_v28 = vld [vmem:[#allocation13_spill] sm:$0xff]  ;;  %v11589_v10 = vld [vmem:[#allocation14_spill] sm:$0xff] }
 0x42c   : > { %11585 = vst [vmem:[#allocation124_spill] sm:$0xff] %v8238_v9  ;;  %v11593_v9 = vld [vmem:[#allocation18_spill] sm:$0xff] }
 0x42f   : > { %v3360_v60 = vpop.f32.mrf.mxu2  ;;  %v3185_v39 = vpop.f32.mrf.mxu0 }
 0x430   : > { %v3361_v30 = vadd.f32 %v3360_v60, %v3272_v19  ;;  %v3449_v31 = vpop.f32.mrf.mxu3  ;;  %v3274_v62 = vpop.f32.mrf.mxu1 }
 0x431   : > { %v3275_v11 = vadd.f32 %v3274_v62, %v3185_v39 }
 0x432   : > { %v8244_v53 = vadd.f32 %v3449_v31, %v3361_v30  ;;  %3224 = vmatmul.bf16.gmra.mxu0 %v11587_v7 }
 0x433   : > { %3313 = vmatmul.bf16.gmra.mxu1 %v11588_v28  ;;  %v6829_v28 = vld [vmem:[%s7230_s28 + $0x1e8] sm:$0xf0] }
 0x434   : > { %11586 = vst [vmem:[#allocation125_spill] sm:$0xff] %v8244_v53  ;;  %3402 = vmatmul.bf16.gmra.mxu2 %v11589_v10 }
 0x435   : > { %3491 = vmatmul.bf16.gmra.mxu3 %v11590_v61  ;;  %v11596_v61 = vld [vmem:[#allocation21_spill] sm:$0xff] }
 0x437   : > { %v3363_v41 = vpop.f32.mrf.mxu2  ;;  %v3187_v36 = vpop.f32.mrf.mxu0 }
 0x438   : > { %v3364_v37 = vadd.f32 %v3363_v41, %v3275_v11  ;;  %v3452_v38 = vpop.f32.mrf.mxu3  ;;  %v3276_v18 = vpop.f32.mrf.mxu1  ;;  %v11594_v11 = vld [vmem:[#allocation19_spill] sm:$0xff]  ;;  %v11595_v41 = vld [vmem:[#allocation20_spill] sm:$0xff] }
 0x439   : > { %v3277_v52 = vadd.f32 %v3276_v18, %v3187_v36  ;;  %v6493_v36 = vld [vmem:[%s7230_s28 + $0x550] sm:$0xf] }
 0x43a   : > { %v8250_v29 = vadd.f32 %v3452_v38, %v3364_v37  ;;  %v6269_v37 = vld [vmem:[%s7230_s28 + $0x390] sm:$0xf]  ;;  %v6885_v38 = vld [vmem:[%s7230_s28 + $0x3a8] sm:$0xf0] }
 0x43b   : > { %v6270_v18 = vor.u32 %v6885_v38, %v6269_v37 }
 0x43c   : > { %11591 = vst [vmem:[#allocation126_spill] sm:$0xff] %v8250_v29 }
 0x43d   : > { %3702 = vmatpush.bf16.msra.mxu2 %v6270_v18 }
 0x43f   : > { %v3365_v19 = vpop.f32.mrf.mxu2  ;;  %v3190_v31 = vpop.f32.mrf.mxu0 }
 0x440   : > { %v3366_v60 = vadd.f32 %v3365_v19, %v3277_v52  ;;  %v3454_v30 = vpop.f32.mrf.mxu3  ;;  %v3279_v39 = vpop.f32.mrf.mxu1  ;;  %v6941_v52 = vld [vmem:[%s7230_s28 + $0x568] sm:$0xf0] }
 0x441   : > { %v3280_v53 = vadd.f32 %v3279_v39, %v3190_v31 }
 0x442   : > { %v8252_v62 = vadd.f32 %v3454_v30, %v3366_v60  ;;  %3229 = vmatmul.bf16.gmra.mxu0 %v11593_v9  ;;  %v6494_v60 = vor.u32 %v6941_v52, %v6493_v36  ;;  %v6045_v9 = vld [vmem:[%s7230_s28 + $0x1d0] sm:$0xf] }
 0x443   : > { %3318 = vmatmul.bf16.gmra.mxu1 %v11594_v11  ;;  %v6773_v11 = vld [vmem:[%s7230_s28 + $0x28] sm:$0xf0]  ;;  %v6046_v7 = vor.u32 %v6829_v28, %v6045_v9 }
 0x444   : > { %11592 = vst [vmem:[#allocation127_spill] sm:$0xff] %v8252_v62  ;;  %3407 = vmatmul.bf16.gmra.mxu2 %v11595_v41  ;;  %3791 = vmatpush.bf16.msra.mxu3 %v6494_v60  ;;  %v5821_v41 = vld [vmem:[%s7230_s28 + $0x10] sm:$0xf]  ;;  %v11599_v60 = vld [vmem:[#allocation24_spill] sm:$0xff] }
 0x445   : > { %3496 = vmatmul.bf16.gmra.mxu3 %v11596_v61  ;;  %v5822_v10 = vor.u32 %v6773_v11, %v5821_v41  ;;  %3613 = vmatpush.bf16.msra.mxu1 %v6046_v7 }
 0x447   : > { %v3368_v19 = vpop.f32.mrf.mxu2  ;;  %v3192_v39 = vpop.f32.mrf.mxu0  ;;  %3524 = vmatpush.bf16.msra.mxu0 %v5822_v10 }
 0x448   : > { %v3369_v30 = vadd.f32 %v3368_v19, %v3280_v53  ;;  %v3457_v31 = vpop.f32.mrf.mxu3  ;;  %v3281_v62 = vpop.f32.mrf.mxu1 }
 0x449   : > { %v3282_v61 = vadd.f32 %v3281_v62, %v3192_v39  ;;  %v11601_v62 = vld [vmem:[#allocation26_spill] sm:$0xff] }
 0x44a   : > { %v8262_v29 = vadd.f32 %v3457_v31, %v3369_v30  ;;  %v11600_v30 = vld [vmem:[#allocation25_spill] sm:$0xff]  ;;  %v11602_v31 = vld [vmem:[#allocation27_spill] sm:$0xff] }
 0x44c   : > { %11597 = vst [vmem:[#allocation128_spill] sm:$0xff] %v8262_v29  ;;  %v11605_v29 = vld [vmem:[#allocation30_spill] sm:$0xff] }
 0x44f   : > { %v3370_v37 = vpop.f32.mrf.mxu2  ;;  %v3195_v53 = vpop.f32.mrf.mxu0 }
 0x450   : > { %v3371_v38 = vadd.f32 %v3370_v37, %v3282_v61  ;;  %v3459_v36 = vpop.f32.mrf.mxu3  ;;  %v3284_v52 = vpop.f32.mrf.mxu1 }
 0x451   : > { %v3285_v18 = vadd.f32 %v3284_v52, %v3195_v53 }
 0x452   : > { %v8268_v19 = vadd.f32 %v3459_v36, %v3371_v38  ;;  %3234 = vmatmul.bf16.gmra.mxu0 %v11599_v60 }
 0x453   : > { %3323 = vmatmul.bf16.gmra.mxu1 %v11600_v30  ;;  %v6243_v30 = vld [vmem:[%s7230_s28 + $0x374] sm:$0xf0] }
 0x454   : > { %11598 = vst [vmem:[#allocation129_spill] sm:$0xff] %v8268_v19  ;;  %3412 = vmatmul.bf16.gmra.mxu2 %v11601_v62 }
 0x455   : > { %3501 = vmatmul.bf16.gmra.mxu3 %v11602_v31  ;;  %v11608_v31 = vld [vmem:[#allocation33_spill] sm:$0xff] }
 0x457   : > { %v3373_v11 = vpop.f32.mrf.mxu2  ;;  %v3197_v7 = vpop.f32.mrf.mxu0 }
 0x458   : > { %v3374_v9 = vadd.f32 %v3373_v11, %v3285_v18  ;;  %v3462_v28 = vpop.f32.mrf.mxu3  ;;  %v3286_v10 = vpop.f32.mrf.mxu1  ;;  %v11606_v18 = vld [vmem:[#allocation31_spill] sm:$0xff]  ;;  %v11607_v11 = vld [vmem:[#allocation32_spill] sm:$0xff] }
 0x459   : > { %v3287_v41 = vadd.f32 %v3286_v10, %v3197_v7  ;;  %v6987_v7 = vld [vmem:[%s7230_s28 + $0x6dc] sm:$0xf] }
 0x45a   : > { %v8274_v61 = vadd.f32 %v3462_v28, %v3374_v9  ;;  %v6931_v9 = vld [vmem:[%s7230_s28 + $0x51c] sm:$0xf]  ;;  %v6467_v28 = vld [vmem:[%s7230_s28 + $0x534] sm:$0xf0] }
 0x45b   : > { %v6470_v10 = vor.u32 %v6931_v9, %v6467_v28 }
 0x45c   : > { %11603 = vst [vmem:[#allocation130_spill] sm:$0xff] %v8274_v61 }
 0x45d   : > { %4051 = vmatpush.bf16.msrb.mxu2 %v6470_v10 }
 0x45f   : > { %v3375_v39 = vpop.f32.mrf.mxu2  ;;  %v3200_v36 = vpop.f32.mrf.mxu0 }
 0x460   : > { %v3376_v37 = vadd.f32 %v3375_v39, %v3287_v41  ;;  %v3464_v38 = vpop.f32.mrf.mxu3  ;;  %v3289_v53 = vpop.f32.mrf.mxu1  ;;  %v6691_v41 = vld [vmem:[%s7230_s28 + $0x6f4] sm:$0xf0] }
 0x461   : > { %v3290_v19 = vadd.f32 %v3289_v53, %v3200_v36 }
 0x462   : > { %v8276_v52 = vadd.f32 %v3464_v38, %v3376_v37  ;;  %3239 = vmatmul.bf16.gmra.mxu0 %v11605_v29  ;;  %v6694_v37 = vor.u32 %v6987_v7, %v6691_v41  ;;  %v6875_v29 = vld [vmem:[%s7230_s28 + $0x35c] sm:$0xf] }
 0x463   : > { %3328 = vmatmul.bf16.gmra.mxu1 %v11606_v18  ;;  %v6019_v18 = vld [vmem:[%s7230_s28 + $0x1b4] sm:$0xf0]  ;;  %v6246_v60 = vor.u32 %v6875_v29, %v6243_v30 }
 0x464   : > { %11604 = vst [vmem:[#allocation131_spill] sm:$0xff] %v8276_v52  ;;  %3417 = vmatmul.bf16.gmra.mxu2 %v11607_v11  ;;  %4140 = vmatpush.bf16.msrb.mxu3 %v6694_v37  ;;  %v6819_v11 = vld [vmem:[%s7230_s28 + $0x19c] sm:$0xf] }
 0x465   : > { %3506 = vmatmul.bf16.gmra.mxu3 %v11608_v31  ;;  %v6022_v62 = vor.u32 %v6819_v11, %v6019_v18  ;;  %3962 = vmatpush.bf16.msrb.mxu1 %v6246_v60 }
 0x467   : > { %v3378_v39 = vpop.f32.mrf.mxu2  ;;  %v3202_v53 = vpop.f32.mrf.mxu0  ;;  %3873 = vmatpush.bf16.msrb.mxu0 %v6022_v62 }
 0x468   : > { %v3379_v38 = vadd.f32 %v3378_v39, %v3290_v19  ;;  %v3467_v36 = vpop.f32.mrf.mxu3  ;;  %v3291_v52 = vpop.f32.mrf.mxu1 }
 0x469   : > { %v3292_v31 = vadd.f32 %v3291_v52, %v3202_v53 }
 0x46a   : > { %v8286_v61 = vadd.f32 %v3467_v36, %v3379_v38 }
 0x46c   : > { %11609 = vst [vmem:[#allocation132_spill] sm:$0xff] %v8286_v61 }
 0x46f   : > { %v3380_v9 = vpop.f32.mrf.mxu2  ;;  %v3205_v19 = vpop.f32.mrf.mxu0 }
 0x470   : > { %v3381_v28 = vadd.f32 %v3380_v9, %v3292_v31  ;;  %v3469_v7 = vpop.f32.mrf.mxu3  ;;  %v3294_v41 = vpop.f32.mrf.mxu1 }
 0x471   : > { %v3295_v10 = vadd.f32 %v3294_v41, %v3205_v19  ;;  %v11614_v19 = vld [vmem:[#allocation4_spill] sm:$0xff]  ;;  %v6924_v41 = vld [vmem:[%s7230_s28 + $0x4e4] sm:$0xf] }
 0x472   : > { %v8292_v39 = vadd.f32 %v3469_v7, %v3381_v28  ;;  %3244 = vmatmul.bf16.gmra.mxu0 %v7708_v16  ;;  %v11613_v7 = vld [vmem:[#allocation3_spill] sm:$0xff] }
 0x473   : > { %3333 = vmatmul.bf16.gmra.mxu1 %v7710_v56 }
 0x474   : > { %11610 = vst [vmem:[#allocation133_spill] sm:$0xff] %v8292_v39  ;;  %3422 = vmatmul.bf16.gmra.mxu2 %v7712_v17  ;;  %v6868_v39 = vld [vmem:[%s7230_s28 + $0x324] sm:$0xf] }
 0x475   : > { %3511 = vmatmul.bf16.gmra.mxu3 %v7714_v8 }
 0x477   : > { %v3383_v52 = vpop.f32.mrf.mxu2  ;;  %v3207_v60 = vpop.f32.mrf.mxu0 }
 0x478   : > { %v3384_v29 = vadd.f32 %v3383_v52, %v3295_v10  ;;  %v3472_v30 = vpop.f32.mrf.mxu3  ;;  %v3296_v62 = vpop.f32.mrf.mxu1  ;;  %v6439_v10 = vld [vmem:[%s7230_s28 + $0x4fc] sm:$0xf0]  ;;  %v6980_v52 = vld [vmem:[%s7230_s28 + $0x6a4] sm:$0xf] }
 0x479   : > { %v3297_v18 = vadd.f32 %v3296_v62, %v3207_v60 }
 0x47a   : > { %v8298_v31 = vadd.f32 %v3472_v30, %v3384_v29  ;;  %v6442_v29 = vor.u32 %v6924_v41, %v6439_v10  ;;  %v6663_v30 = vld [vmem:[%s7230_s28 + $0x6bc] sm:$0xf0] }
 0x47b   : > { %v6666_v62 = vor.u32 %v6980_v52, %v6663_v30 }
 0x47c   : > { %11611 = vst [vmem:[#allocation134_spill] sm:$0xff] %v8298_v31  ;;  %4052 = vmatpush.bf16.msrb.mxu2 %v6442_v29  ;;  %v5991_v31 = vld [vmem:[%s7230_s28 + $0x17c] sm:$0xf0] }
 0x47d   : > { %4141 = vmatpush.bf16.msrb.mxu3 %v6666_v62 }
 0x47f   : > { %v3385_v11 = vpop.f32.mrf.mxu2  ;;  %v3210_v36 = vpop.f32.mrf.mxu0 }
 0x480   : > { %v3386_v37 = vadd.f32 %v3385_v11, %v3297_v18  ;;  %v3474_v38 = vpop.f32.mrf.mxu3  ;;  %v3299_v53 = vpop.f32.mrf.mxu1 }
 0x481   : > { %v3300_v28 = vadd.f32 %v3299_v53, %v3210_v36 }
 0x482   : > { %v8300_v9 = vadd.f32 %v3474_v38, %v3386_v37  ;;  %3525 = vmatmul.bf16.vlgmr.msra.gmra.mxu0 %v7316_v47 }
 0x483   : > { %3614 = vmatmul.bf16.vlgmr.msra.gmra.mxu1 %v7320_v51 }
 0x484   : > { %11612 = vst [vmem:[#allocation135_spill] sm:$0xff] %v8300_v9  ;;  %3703 = vmatmul.bf16.vlgmr.msra.gmra.mxu2 %v11613_v7  ;;  %v6812_v9 = vld [vmem:[%s7230_s28 + $0x164] sm:$0xf] }
 0x485   : > { %3792 = vmatmul.bf16.vlgmr.msra.gmra.mxu3 %v11614_v19  ;;  %v5994_v61 = vor.u32 %v6812_v9, %v5991_v31  ;;  %v6215_v19 = vld [vmem:[%s7230_s28 + $0x33c] sm:$0xf0] }
 0x486   : > { %v6218_v7 = vor.u32 %v6868_v39, %v6215_v19 }
 0x487   : > { %v3388_v60 = vpop.f32.mrf.mxu2  ;;  %v3212_v37 = vpop.f32.mrf.mxu0  ;;  %3874 = vmatpush.bf16.msrb.mxu0 %v5994_v61 }
 0x488   : > { %v3389_v18 = vadd.f32 %v3388_v60, %v3300_v28  ;;  %v3477_v11 = vpop.f32.mrf.mxu3  ;;  %v3301_v38 = vpop.f32.mrf.mxu1  ;;  %3963 = vmatpush.bf16.msrb.mxu1 %v6218_v7 }
 0x489   : > { %v3302_v53 = vadd.f32 %v3301_v38, %v3212_v37 }
 0x48a   : > { %v8310_v36 = vadd.f32 %v3477_v11, %v3389_v18 }
 0x48c   : > { %11615 = vst [vmem:[#allocation136_spill] sm:$0xff] %v8310_v36 }
 0x48f   : > { %v3390_v41 = vpop.f32.mrf.mxu2  ;;  %v3215_v28 = vpop.f32.mrf.mxu0 }
 0x490   : > { %v3391_v10 = vadd.f32 %v3390_v41, %v3302_v53  ;;  %v3479_v52 = vpop.f32.mrf.mxu3  ;;  %v3304_v30 = vpop.f32.mrf.mxu1 }
 0x491   : > { %v3305_v29 = vadd.f32 %v3304_v30, %v3215_v28  ;;  %v6411_v28 = vld [vmem:[%s7230_s28 + $0x4c4] sm:$0xf0]  ;;  %v6973_v30 = vld [vmem:[%s7230_s28 + $0x66c] sm:$0xf] }
 0x492   : > { %v8316_v60 = vadd.f32 %v3479_v52, %v3391_v10  ;;  %3530 = vmatmul.bf16.gmra.mxu0 %v7346_v12  ;;  %v6917_v52 = vld [vmem:[%s7230_s28 + $0x4ac] sm:$0xf] }
 0x493   : > { %3619 = vmatmul.bf16.gmra.mxu1 %v7348_v13 }
 0x494   : > { %11616 = vst [vmem:[#allocation137_spill] sm:$0xff] %v8316_v60  ;;  %3708 = vmatmul.bf16.gmra.mxu2 %v7350_v14  ;;  %v6187_v60 = vld [vmem:[%s7230_s28 + $0x304] sm:$0xf0] }
 0x495   : > { %3797 = vmatmul.bf16.gmra.mxu3 %v7352_v15 }
 0x497   : > { %v3393_v31 = vpop.f32.mrf.mxu2  ;;  %v3217_v9 = vpop.f32.mrf.mxu0 }
 0x498   : > { %v3394_v39 = vadd.f32 %v3393_v31, %v3305_v29  ;;  %v3482_v61 = vpop.f32.mrf.mxu3  ;;  %v3306_v7 = vpop.f32.mrf.mxu1  ;;  %v6414_v29 = vor.u32 %v6917_v52, %v6411_v28  ;;  %v6635_v31 = vld [vmem:[%s7230_s28 + $0x684] sm:$0xf0] }
 0x499   : > { %v3307_v62 = vadd.f32 %v3306_v7, %v3217_v9 }
 0x49a   : > { %v8322_v19 = vadd.f32 %v3482_v61, %v3394_v39  ;;  %v6638_v61 = vor.u32 %v6973_v30, %v6635_v31  ;;  %4053 = vmatpush.bf16.msrb.mxu2 %v6414_v29 }
 0x49c   : > { %11617 = vst [vmem:[#allocation138_spill] sm:$0xff] %v8322_v19  ;;  %4142 = vmatpush.bf16.msrb.mxu3 %v6638_v61 }
 0x49f   : > { %v3395_v18 = vpop.f32.mrf.mxu2  ;;  %v3220_v38 = vpop.f32.mrf.mxu0 }
 0x4a0   : > { %v3396_v11 = vadd.f32 %v3395_v18, %v3307_v62  ;;  %v3484_v37 = vpop.f32.mrf.mxu3  ;;  %v3309_v53 = vpop.f32.mrf.mxu1 }
 0x4a1   : > { %v3310_v10 = vadd.f32 %v3309_v53, %v3220_v38  ;;  %v6805_v38 = vld [vmem:[%s7230_s28 + $0x12c] sm:$0xf]  ;;  %v5963_v53 = vld [vmem:[%s7230_s28 + $0x144] sm:$0xf0] }
 0x4a2   : > { %v8324_v41 = vadd.f32 %v3484_v37, %v3396_v11  ;;  %3535 = vmatmul.bf16.gmra.mxu0 %v7366_v24  ;;  %v5966_v19 = vor.u32 %v6805_v38, %v5963_v53 }
 0x4a3   : > { %3624 = vmatmul.bf16.gmra.mxu1 %v7368_v25 }
 0x4a4   : > { %11618 = vst [vmem:[#allocation139_spill] sm:$0xff] %v8324_v41  ;;  %3713 = vmatmul.bf16.gmra.mxu2 %v7370_v26  ;;  %v6861_v41 = vld [vmem:[%s7230_s28 + $0x2ec] sm:$0xf]  ;;  %3875 = vmatpush.bf16.msrb.mxu0 %v5966_v19 }
 0x4a5   : > { %3802 = vmatmul.bf16.gmra.mxu3 %v7372_v27  ;;  %v6190_v36 = vor.u32 %v6861_v41, %v6187_v60 }
 0x4a7   : > { %v3398_v39 = vpop.f32.mrf.mxu2  ;;  %v3222_v62 = vpop.f32.mrf.mxu0  ;;  %3964 = vmatpush.bf16.msrb.mxu1 %v6190_v36 }
 0x4a8   : > { %v3399_v9 = vadd.f32 %v3398_v39, %v3310_v10  ;;  %v3487_v7 = vpop.f32.mrf.mxu3  ;;  %v3311_v18 = vpop.f32.mrf.mxu1 }
 0x4a9   : > { %v3312_v37 = vadd.f32 %v3311_v18, %v3222_v62 }
 0x4aa   : > { %v8334_v11 = vadd.f32 %v3487_v7, %v3399_v9 }
 0x4ac   : > { %11619 = vst [vmem:[#allocation140_spill] sm:$0xff] %v8334_v11 }
 0x4af   : > { %v3400_v52 = vpop.f32.mrf.mxu2  ;;  %v3225_v10 = vpop.f32.mrf.mxu0 }
 0x4b0   : > { %v3401_v28 = vadd.f32 %v3400_v52, %v3312_v37  ;;  %v3489_v30 = vpop.f32.mrf.mxu3  ;;  %v3314_v31 = vpop.f32.mrf.mxu1 }
 0x4b1   : > { %v3315_v29 = vadd.f32 %v3314_v31, %v3225_v10  ;;  %v6383_v10 = vld [vmem:[%s7230_s28 + $0x48c] sm:$0xf0]  ;;  %v6966_v31 = vld [vmem:[%s7230_s28 + $0x634] sm:$0xf] }
 0x4b2   : > { %v8340_v39 = vadd.f32 %v3489_v30, %v3401_v28  ;;  %3540 = vmatmul.bf16.gmra.mxu0 %v7394_v49  ;;  %v6910_v30 = vld [vmem:[%s7230_s28 + $0x474] sm:$0xf] }
 0x4b3   : > { %3629 = vmatmul.bf16.gmra.mxu1 %v7396_v50 }
 0x4b4   : > { %11620 = vst [vmem:[#allocation141_spill] sm:$0xff] %v8340_v39  ;;  %3718 = vmatmul.bf16.gmra.mxu2 %v7398_v54  ;;  %v6159_v39 = vld [vmem:[%s7230_s28 + $0x2cc] sm:$0xf0] }
 0x4b5   : > { %3807 = vmatmul.bf16.gmra.mxu3 %v7400_v55 }
 0x4b7   : > { %v3403_v61 = vpop.f32.mrf.mxu2  ;;  %v3227_v36 = vpop.f32.mrf.mxu0 }
 0x4b8   : > { %v3404_v60 = vadd.f32 %v3403_v61, %v3315_v29  ;;  %v3492_v19 = vpop.f32.mrf.mxu3  ;;  %v3316_v41 = vpop.f32.mrf.mxu1  ;;  %v6386_v29 = vor.u32 %v6910_v30, %v6383_v10  ;;  %v6607_v61 = vld [vmem:[%s7230_s28 + $0x64c] sm:$0xf0] }
 0x4b9   : > { %v3317_v7 = vadd.f32 %v3316_v41, %v3227_v36 }
 0x4ba   : > { %v8346_v9 = vadd.f32 %v3492_v19, %v3404_v60  ;;  %v6610_v19 = vor.u32 %v6966_v31, %v6607_v61  ;;  %4054 = vmatpush.bf16.msrb.mxu2 %v6386_v29 }
 0x4bc   : > { %11621 = vst [vmem:[#allocation142_spill] sm:$0xff] %v8346_v9  ;;  %4143 = vmatpush.bf16.msrb.mxu3 %v6610_v19 }
 0x4bf   : > { %v3405_v62 = vpop.f32.mrf.mxu2  ;;  %v3230_v38 = vpop.f32.mrf.mxu0 }
 0x4c0   : > { %v3406_v18 = vadd.f32 %v3405_v62, %v3317_v7  ;;  %v3494_v37 = vpop.f32.mrf.mxu3  ;;  %v3319_v53 = vpop.f32.mrf.mxu1 }
 0x4c1   : > { %v3320_v28 = vadd.f32 %v3319_v53, %v3230_v38  ;;  %v6798_v38 = vld [vmem:[%s7230_s28 + $0xf4] sm:$0xf]  ;;  %v5935_v53 = vld [vmem:[%s7230_s28 + $0x10c] sm:$0xf0] }
 0x4c2   : > { %v8348_v52 = vadd.f32 %v3494_v37, %v3406_v18  ;;  %3545 = vmatmul.bf16.gmra.mxu0 %v7414_v0  ;;  %v5938_v9 = vor.u32 %v6798_v38, %v5935_v53 }
 0x4c3   : > { %3634 = vmatmul.bf16.gmra.mxu1 %v7416_v1 }
 0x4c4   : > { %11622 = vst [vmem:[#allocation143_spill] sm:$0xff] %v8348_v52  ;;  %3723 = vmatmul.bf16.gmra.mxu2 %v7418_v2  ;;  %v6854_v52 = vld [vmem:[%s7230_s28 + $0x2b4] sm:$0xf]  ;;  %3876 = vmatpush.bf16.msrb.mxu0 %v5938_v9 }
 0x4c5   : > { %3812 = vmatmul.bf16.gmra.mxu3 %v7420_v3  ;;  %v6162_v11 = vor.u32 %v6854_v52, %v6159_v39 }
 0x4c7   : > { %v3408_v60 = vpop.f32.mrf.mxu2  ;;  %v3232_v7 = vpop.f32.mrf.mxu0  ;;  %3965 = vmatpush.bf16.msrb.mxu1 %v6162_v11 }
 0x4c8   : > { %v3409_v36 = vadd.f32 %v3408_v60, %v3320_v28  ;;  %v3497_v41 = vpop.f32.mrf.mxu3  ;;  %v3321_v62 = vpop.f32.mrf.mxu1 }
 0x4c9   : > { %v3322_v37 = vadd.f32 %v3321_v62, %v3232_v7 }
 0x4ca   : > { %v8358_v18 = vadd.f32 %v3497_v41, %v3409_v36 }
 0x4cc   : > { %11623 = vst [vmem:[#allocation144_spill] sm:$0xff] %v8358_v18 }
 0x4cf   : > { %v3410_v30 = vpop.f32.mrf.mxu2  ;;  %v3235_v28 = vpop.f32.mrf.mxu0 }
 0x4d0   : > { %v3411_v10 = vadd.f32 %v3410_v30, %v3322_v37  ;;  %v3499_v31 = vpop.f32.mrf.mxu3  ;;  %v3324_v61 = vpop.f32.mrf.mxu1 }
 0x4d1   : > { %v3325_v29 = vadd.f32 %v3324_v61, %v3235_v28  ;;  %v6355_v28 = vld [vmem:[%s7230_s28 + $0x454] sm:$0xf0]  ;;  %v6959_v61 = vld [vmem:[%s7230_s28 + $0x5fc] sm:$0xf] }
 0x4d2   : > { %v8364_v60 = vadd.f32 %v3499_v31, %v3411_v10  ;;  %3550 = vmatmul.bf16.gmra.mxu0 %v7442_v32  ;;  %v6903_v31 = vld [vmem:[%s7230_s28 + $0x43c] sm:$0xf] }
 0x4d3   : > { %3639 = vmatmul.bf16.gmra.mxu1 %v7444_v33 }
 0x4d4   : > { %11624 = vst [vmem:[#allocation145_spill] sm:$0xff] %v8364_v60  ;;  %3728 = vmatmul.bf16.gmra.mxu2 %v7446_v34  ;;  %v6131_v60 = vld [vmem:[%s7230_s28 + $0x294] sm:$0xf0] }
 0x4d5   : > { %3817 = vmatmul.bf16.gmra.mxu3 %v7448_v35 }
 0x4d7   : > { %v3413_v19 = vpop.f32.mrf.mxu2  ;;  %v3237_v11 = vpop.f32.mrf.mxu0 }
 0x4d8   : > { %v3414_v39 = vadd.f32 %v3413_v19, %v3325_v29  ;;  %v3502_v9 = vpop.f32.mrf.mxu3  ;;  %v3326_v52 = vpop.f32.mrf.mxu1  ;;  %v6358_v29 = vor.u32 %v6903_v31, %v6355_v28  ;;  %v6579_v19 = vld [vmem:[%s7230_s28 + $0x614] sm:$0xf0] }
 0x4d9   : > { %v3327_v41 = vadd.f32 %v3326_v52, %v3237_v11 }
 0x4da   : > { %v8370_v36 = vadd.f32 %v3502_v9, %v3414_v39  ;;  %v6582_v9 = vor.u32 %v6959_v61, %v6579_v19  ;;  %4055 = vmatpush.bf16.msrb.mxu2 %v6358_v29 }
 0x4dc   : > { %11625 = vst [vmem:[#allocation146_spill] sm:$0xff] %v8370_v36  ;;  %4144 = vmatpush.bf16.msrb.mxu3 %v6582_v9 }
 0x4df   : > { %v3415_v7 = vpop.f32.mrf.mxu2  ;;  %v3240_v38 = vpop.f32.mrf.mxu0 }
 0x4e0   : > { %v3416_v62 = vadd.f32 %v3415_v7, %v3327_v41  ;;  %v3504_v37 = vpop.f32.mrf.mxu3  ;;  %v3329_v53 = vpop.f32.mrf.mxu1 }
 0x4e1   : > { %v3330_v10 = vadd.f32 %v3329_v53, %v3240_v38  ;;  %v6791_v38 = vld [vmem:[%s7230_s28 + $0xbc] sm:$0xf]  ;;  %v5907_v53 = vld [vmem:[%s7230_s28 + $0xd4] sm:$0xf0] }
 0x4e2   : > { %v8372_v30 = vadd.f32 %v3504_v37, %v3416_v62  ;;  %3555 = vmatmul.bf16.gmra.mxu0 %v7462_v44  ;;  %v5910_v36 = vor.u32 %v6791_v38, %v5907_v53 }
 0x4e3   : > { %3644 = vmatmul.bf16.gmra.mxu1 %v7464_v45 }
 0x4e4   : > { %11626 = vst [vmem:[#allocation147_spill] sm:$0xff] %v8372_v30  ;;  %3733 = vmatmul.bf16.gmra.mxu2 %v7466_v46  ;;  %v6847_v30 = vld [vmem:[%s7230_s28 + $0x27c] sm:$0xf]  ;;  %3877 = vmatpush.bf16.msrb.mxu0 %v5910_v36 }
 0x4e5   : > { %3822 = vmatmul.bf16.gmra.mxu3 %v7468_v48  ;;  %v6134_v18 = vor.u32 %v6847_v30, %v6131_v60 }
 0x4e7   : > { %v3418_v39 = vpop.f32.mrf.mxu2  ;;  %v3242_v41 = vpop.f32.mrf.mxu0  ;;  %3966 = vmatpush.bf16.msrb.mxu1 %v6134_v18 }
 0x4e8   : > { %v3419_v11 = vadd.f32 %v3418_v39, %v3330_v10  ;;  %v3507_v52 = vpop.f32.mrf.mxu3  ;;  %v3331_v7 = vpop.f32.mrf.mxu1 }
 0x4e9   : > { %v3332_v37 = vadd.f32 %v3331_v7, %v3242_v41 }
 0x4ea   : > { %v8382_v62 = vadd.f32 %v3507_v52, %v3419_v11 }
 0x4ec   : > { %11627 = vst [vmem:[#allocation148_spill] sm:$0xff] %v8382_v62 }
 0x4ef   : > { %v3420_v31 = vpop.f32.mrf.mxu2  ;;  %v3245_v10 = vpop.f32.mrf.mxu0 }
 0x4f0   : > { %v3421_v28 = vadd.f32 %v3420_v31, %v3332_v37  ;;  %v3509_v61 = vpop.f32.mrf.mxu3  ;;  %v3334_v19 = vpop.f32.mrf.mxu1 }
 0x4f1   : > { %v3335_v29 = vadd.f32 %v3334_v19, %v3245_v10  ;;  %v6327_v10 = vld [vmem:[%s7230_s28 + $0x41c] sm:$0xf0]  ;;  %v6952_v19 = vld [vmem:[%s7230_s28 + $0x5c4] sm:$0xf] }
 0x4f2   : > { %v8388_v39 = vadd.f32 %v3509_v61, %v3421_v28  ;;  %3560 = vmatmul.bf16.gmra.mxu0 %v7490_v20  ;;  %v6896_v61 = vld [vmem:[%s7230_s28 + $0x404] sm:$0xf] }
 0x4f3   : > { %3649 = vmatmul.bf16.gmra.mxu1 %v7492_v21 }
 0x4f4   : > { %11628 = vst [vmem:[#allocation149_spill] sm:$0xff] %v8388_v39  ;;  %3738 = vmatmul.bf16.gmra.mxu2 %v7494_v22  ;;  %v6103_v39 = vld [vmem:[%s7230_s28 + $0x25c] sm:$0xf0] }
 0x4f5   : > { %3827 = vmatmul.bf16.gmra.mxu3 %v7496_v23 }
 0x4f7   : > { %v3423_v9 = vpop.f32.mrf.mxu2  ;;  %v3247_v18 = vpop.f32.mrf.mxu0 }
 0x4f8   : > { %v3424_v60 = vadd.f32 %v3423_v9, %v3335_v29  ;;  %v3512_v36 = vpop.f32.mrf.mxu3  ;;  %v3336_v30 = vpop.f32.mrf.mxu1  ;;  %v6330_v29 = vor.u32 %v6896_v61, %v6327_v10  ;;  %v6551_v9 = vld [vmem:[%s7230_s28 + $0x5dc] sm:$0xf0] }
 0x4f9   : > { %v3337_v52 = vadd.f32 %v3336_v30, %v3247_v18 }
 0x4fa   : > { %v8394_v11 = vadd.f32 %v3512_v36, %v3424_v60  ;;  %v6554_v36 = vor.u32 %v6952_v19, %v6551_v9  ;;  %4056 = vmatpush.bf16.msrb.mxu2 %v6330_v29 }
 0x4fc   : > { %11629 = vst [vmem:[#allocation150_spill] sm:$0xff] %v8394_v11  ;;  %4145 = vmatpush.bf16.msrb.mxu3 %v6554_v36 }
 0x4ff   : > { %v3425_v41 = vpop.f32.mrf.mxu2  ;;  %v3526_v38 = vpop.f32.mrf.mxu0 }
 0x500   : > { %v3426_v7 = vadd.f32 %v3425_v41, %v3337_v52  ;;  %v3514_v37 = vpop.f32.mrf.mxu3  ;;  %v3615_v53 = vpop.f32.mrf.mxu1 }
 0x501   : > { %v3616_v28 = vadd.f32 %v3615_v53, %v3526_v38  ;;  %v6784_v38 = vld [vmem:[%s7230_s28 + $0x84] sm:$0xf]  ;;  %v5879_v53 = vld [vmem:[%s7230_s28 + $0x9c] sm:$0xf0] }
 0x502   : > { %v8396_v31 = vadd.f32 %v3514_v37, %v3426_v7  ;;  %3565 = vmatmul.bf16.gmra.mxu0 %v7510_v40  ;;  %v5882_v11 = vor.u32 %v6784_v38, %v5879_v53 }
 0x503   : > { %3654 = vmatmul.bf16.gmra.mxu1 %v7512_v42 }
 0x504   : > { %11630 = vst [vmem:[#allocation151_spill] sm:$0xff] %v8396_v31  ;;  %3743 = vmatmul.bf16.gmra.mxu2 %v7514_v43  ;;  %v6840_v31 = vld [vmem:[%s7230_s28 + $0x244] sm:$0xf]  ;;  %3878 = vmatpush.bf16.msrb.mxu0 %v5882_v11 }
 0x505   : > { %3832 = vmatmul.bf16.gmra.mxu3 %v7516_v57  ;;  %v6106_v62 = vor.u32 %v6840_v31, %v6103_v39 }
 0x507   : > { %v3704_v60 = vpop.f32.mrf.mxu2  ;;  %v3528_v52 = vpop.f32.mrf.mxu0  ;;  %3967 = vmatpush.bf16.msrb.mxu1 %v6106_v62 }
 0x508   : > { %v3705_v18 = vadd.f32 %v3704_v60, %v3616_v28  ;;  %v3793_v30 = vpop.f32.mrf.mxu3  ;;  %v3617_v41 = vpop.f32.mrf.mxu1 }
 0x509   : > { %v3618_v37 = vadd.f32 %v3617_v41, %v3528_v52 }
 0x50a   : > { %v8406_v7 = vadd.f32 %v3793_v30, %v3705_v18 }
 0x50c   : > { %11631 = vst [vmem:[#allocation152_spill] sm:$0xff] %v8406_v7 }
 0x50f   : > { %v3706_v61 = vpop.f32.mrf.mxu2  ;;  %v3531_v28 = vpop.f32.mrf.mxu0 }
 0x510   : > { %v3707_v10 = vadd.f32 %v3706_v61, %v3618_v37  ;;  %v3795_v19 = vpop.f32.mrf.mxu3  ;;  %v3620_v9 = vpop.f32.mrf.mxu1 }
 0x511   : > { %v3621_v29 = vadd.f32 %v3620_v9, %v3531_v28  ;;  %v11636_v28 = vld [vmem:[#allocation9_spill] sm:$0xff]  ;;  %v6889_v9 = vld [vmem:[%s7230_s28 + $0x3cc] sm:$0xf] }
 0x512   : > { %v8412_v60 = vadd.f32 %v3795_v19, %v3707_v10  ;;  %3570 = vmatmul.bf16.gmra.mxu0 %v7540_v59  ;;  %v11635_v19 = vld [vmem:[#allocation8_spill] sm:$0xff] }
 0x513   : > { %3659 = vmatmul.bf16.gmra.mxu1 %v7542_v63 }
 0x514   : > { %11632 = vst [vmem:[#allocation153_spill] sm:$0xff] %v8412_v60  ;;  %3748 = vmatmul.bf16.gmra.mxu2 %v7544_v4  ;;  %v6833_v60 = vld [vmem:[%s7230_s28 + $0x20c] sm:$0xf] }
 0x515   : > { %3837 = vmatmul.bf16.gmra.mxu3 %v7546_v6 }
 0x517   : > { %v3709_v36 = vpop.f32.mrf.mxu2  ;;  %v3533_v62 = vpop.f32.mrf.mxu0 }
 0x518   : > { %v3710_v39 = vadd.f32 %v3709_v36, %v3621_v29  ;;  %v3798_v11 = vpop.f32.mrf.mxu3  ;;  %v3622_v31 = vpop.f32.mrf.mxu1  ;;  %v6299_v29 = vld [vmem:[%s7230_s28 + $0x3e4] sm:$0xf0]  ;;  %v6945_v36 = vld [vmem:[%s7230_s28 + $0x58c] sm:$0xf] }
 0x519   : > { %v3623_v30 = vadd.f32 %v3622_v31, %v3533_v62 }
 0x51a   : > { %v8418_v18 = vadd.f32 %v3798_v11, %v3710_v39  ;;  %v6302_v39 = vor.u32 %v6889_v9, %v6299_v29  ;;  %v6523_v11 = vld [vmem:[%s7230_s28 + $0x5a4] sm:$0xf0] }
 0x51b   : > { %v6526_v31 = vor.u32 %v6945_v36, %v6523_v11 }
 0x51c   : > { %11633 = vst [vmem:[#allocation154_spill] sm:$0xff] %v8418_v18  ;;  %4057 = vmatpush.bf16.msrb.mxu2 %v6302_v39  ;;  %v5851_v18 = vld [vmem:[%s7230_s28 + $0x64] sm:$0xf0] }
 0x51d   : > { %4146 = vmatpush.bf16.msrb.mxu3 %v6526_v31  ;;  %v11639_v31 = vld [vmem:[#allocation12_spill] sm:$0xff] }
 0x51f   : > { %v3711_v52 = vpop.f32.mrf.mxu2  ;;  %v3536_v38 = vpop.f32.mrf.mxu0 }
 0x520   : > { %v3712_v41 = vadd.f32 %v3711_v52, %v3623_v30  ;;  %v3800_v37 = vpop.f32.mrf.mxu3  ;;  %v3625_v53 = vpop.f32.mrf.mxu1 }
 0x521   : > { %v3626_v10 = vadd.f32 %v3625_v53, %v3536_v38 }
 0x522   : > { %v8420_v61 = vadd.f32 %v3800_v37, %v3712_v41  ;;  %3575 = vmatmul.bf16.gmra.mxu0 %v7564_v58 }
 0x523   : > { %3664 = vmatmul.bf16.gmra.mxu1 %v7566_v5 }
 0x524   : > { %11634 = vst [vmem:[#allocation155_spill] sm:$0xff] %v8420_v61  ;;  %3753 = vmatmul.bf16.gmra.mxu2 %v11635_v19  ;;  %v6777_v61 = vld [vmem:[%s7230_s28 + $0x4c] sm:$0xf] }
 0x525   : > { %3842 = vmatmul.bf16.gmra.mxu3 %v11636_v28  ;;  %v5854_v7 = vor.u32 %v6777_v61, %v5851_v18  ;;  %v6075_v28 = vld [vmem:[%s7230_s28 + $0x224] sm:$0xf0] }
 0x526   : > { %v6078_v19 = vor.u32 %v6833_v60, %v6075_v28 }
 0x527   : > { %v3714_v62 = vpop.f32.mrf.mxu2  ;;  %v3538_v41 = vpop.f32.mrf.mxu0  ;;  %3879 = vmatpush.bf16.msrb.mxu0 %v5854_v7 }
 0x528   : > { %v3715_v30 = vadd.f32 %v3714_v62, %v3626_v10  ;;  %v3803_v52 = vpop.f32.mrf.mxu3  ;;  %v3627_v37 = vpop.f32.mrf.mxu1  ;;  %3968 = vmatpush.bf16.msrb.mxu1 %v6078_v19 }
 0x529   : > { %v3628_v53 = vadd.f32 %v3627_v37, %v3538_v41  ;;  %v11642_v41 = vld [vmem:[#allocation15_spill] sm:$0xff] }
 0x52a   : > { %v8430_v38 = vadd.f32 %v3803_v52, %v3715_v30  ;;  %v11640_v30 = vld [vmem:[#allocation13_spill] sm:$0xff]  ;;  %v11641_v52 = vld [vmem:[#allocation14_spill] sm:$0xff] }
 0x52c   : > { %11637 = vst [vmem:[#allocation156_spill] sm:$0xff] %v8430_v38  ;;  %v11645_v38 = vld [vmem:[#allocation18_spill] sm:$0xff] }
 0x52f   : > { %v3716_v9 = vpop.f32.mrf.mxu2  ;;  %v3541_v10 = vpop.f32.mrf.mxu0 }
 0x530   : > { %v3717_v29 = vadd.f32 %v3716_v9, %v3628_v53  ;;  %v3805_v36 = vpop.f32.mrf.mxu3  ;;  %v3630_v11 = vpop.f32.mrf.mxu1 }
 0x531   : > { %v3631_v39 = vadd.f32 %v3630_v11, %v3541_v10 }
 0x532   : > { %v8436_v62 = vadd.f32 %v3805_v36, %v3717_v29  ;;  %3580 = vmatmul.bf16.gmra.mxu0 %v11639_v31 }
 0x533   : > { %3669 = vmatmul.bf16.gmra.mxu1 %v11640_v30  ;;  %v6047_v30 = vld [vmem:[%s7230_s28 + $0x1ec] sm:$0xf0] }
 0x534   : > { %11638 = vst [vmem:[#allocation157_spill] sm:$0xff] %v8436_v62  ;;  %3758 = vmatmul.bf16.gmra.mxu2 %v11641_v52 }
 0x535   : > { %3847 = vmatmul.bf16.gmra.mxu3 %v11642_v41  ;;  %v11648_v41 = vld [vmem:[#allocation21_spill] sm:$0xff] }
 0x537   : > { %v3719_v18 = vpop.f32.mrf.mxu2  ;;  %v3543_v61 = vpop.f32.mrf.mxu0 }
 0x538   : > { %v3720_v60 = vadd.f32 %v3719_v18, %v3631_v39  ;;  %v3808_v7 = vpop.f32.mrf.mxu3  ;;  %v3632_v19 = vpop.f32.mrf.mxu1  ;;  %v11646_v39 = vld [vmem:[#allocation19_spill] sm:$0xff]  ;;  %v11647_v18 = vld [vmem:[#allocation20_spill] sm:$0xff] }
 0x539   : > { %v3633_v37 = vadd.f32 %v3632_v19, %v3543_v61  ;;  %v6938_v61 = vld [vmem:[%s7230_s28 + $0x554] sm:$0xf] }
 0x53a   : > { %v8442_v28 = vadd.f32 %v3808_v7, %v3720_v60  ;;  %v6882_v60 = vld [vmem:[%s7230_s28 + $0x394] sm:$0xf]  ;;  %v6271_v7 = vld [vmem:[%s7230_s28 + $0x3ac] sm:$0xf0] }
 0x53b   : > { %v6274_v19 = vor.u32 %v6882_v60, %v6271_v7 }
 0x53c   : > { %11643 = vst [vmem:[#allocation158_spill] sm:$0xff] %v8442_v28 }
 0x53d   : > { %4058 = vmatpush.bf16.msrb.mxu2 %v6274_v19 }
 0x53f   : > { %v3721_v53 = vpop.f32.mrf.mxu2  ;;  %v3546_v36 = vpop.f32.mrf.mxu0 }
 0x540   : > { %v3722_v9 = vadd.f32 %v3721_v53, %v3633_v37  ;;  %v3810_v29 = vpop.f32.mrf.mxu3  ;;  %v3635_v10 = vpop.f32.mrf.mxu1  ;;  %v6495_v37 = vld [vmem:[%s7230_s28 + $0x56c] sm:$0xf0] }
 0x541   : > { %v3636_v62 = vadd.f32 %v3635_v10, %v3546_v36 }
 0x542   : > { %v8444_v11 = vadd.f32 %v3810_v29, %v3722_v9  ;;  %3585 = vmatmul.bf16.gmra.mxu0 %v11645_v38  ;;  %v6498_v9 = vor.u32 %v6938_v61, %v6495_v37  ;;  %v6826_v38 = vld [vmem:[%s7230_s28 + $0x1d4] sm:$0xf] }
 0x543   : > { %3674 = vmatmul.bf16.gmra.mxu1 %v11646_v39  ;;  %v5823_v39 = vld [vmem:[%s7230_s28 + $0x2c] sm:$0xf0]  ;;  %v6050_v31 = vor.u32 %v6826_v38, %v6047_v30 }
 0x544   : > { %11644 = vst [vmem:[#allocation159_spill] sm:$0xff] %v8444_v11  ;;  %3763 = vmatmul.bf16.gmra.mxu2 %v11647_v18  ;;  %4147 = vmatpush.bf16.msrb.mxu3 %v6498_v9  ;;  %v6770_v18 = vld [vmem:[%s7230_s28 + $0x14] sm:$0xf]  ;;  %v11651_v9 = vld [vmem:[#allocation24_spill] sm:$0xff] }
 0x545   : > { %3852 = vmatmul.bf16.gmra.mxu3 %v11648_v41  ;;  %v5826_v52 = vor.u32 %v6770_v18, %v5823_v39  ;;  %3969 = vmatpush.bf16.msrb.mxu1 %v6050_v31 }
 0x547   : > { %v3724_v53 = vpop.f32.mrf.mxu2  ;;  %v3548_v10 = vpop.f32.mrf.mxu0  ;;  %3880 = vmatpush.bf16.msrb.mxu0 %v5826_v52 }
 0x548   : > { %v3725_v29 = vadd.f32 %v3724_v53, %v3636_v62  ;;  %v3813_v36 = vpop.f32.mrf.mxu3  ;;  %v3637_v11 = vpop.f32.mrf.mxu1 }
 0x549   : > { %v3638_v41 = vadd.f32 %v3637_v11, %v3548_v10  ;;  %v11653_v11 = vld [vmem:[#allocation26_spill] sm:$0xff] }
 0x54a   : > { %v8454_v28 = vadd.f32 %v3813_v36, %v3725_v29  ;;  %v11652_v29 = vld [vmem:[#allocation25_spill] sm:$0xff]  ;;  %v11654_v36 = vld [vmem:[#allocation27_spill] sm:$0xff] }
 0x54c   : > { %11649 = vst [vmem:[#allocation160_spill] sm:$0xff] %v8454_v28  ;;  %v11657_v28 = vld [vmem:[#allocation30_spill] sm:$0xff] }
 0x54f   : > { %v3726_v60 = vpop.f32.mrf.mxu2  ;;  %v3551_v62 = vpop.f32.mrf.mxu0 }
 0x550   : > { %v3727_v7 = vadd.f32 %v3726_v60, %v3638_v41  ;;  %v3815_v61 = vpop.f32.mrf.mxu3  ;;  %v3640_v37 = vpop.f32.mrf.mxu1 }
 0x551   : > { %v3641_v19 = vadd.f32 %v3640_v37, %v3551_v62 }
 0x552   : > { %v8460_v53 = vadd.f32 %v3815_v61, %v3727_v7  ;;  %3590 = vmatmul.bf16.gmra.mxu0 %v11651_v9 }
 0x553   : > { %3679 = vmatmul.bf16.gmra.mxu1 %v11652_v29  ;;  %v6879_v29 = vld [vmem:[%s7230_s28 + $0x378] sm:$0xf0] }
 0x554   : > { %11650 = vst [vmem:[#allocation161_spill] sm:$0xff] %v8460_v53  ;;  %3768 = vmatmul.bf16.gmra.mxu2 %v11653_v11 }
 0x555   : > { %3857 = vmatmul.bf16.gmra.mxu3 %v11654_v36  ;;  %v11660_v36 = vld [vmem:[#allocation33_spill] sm:$0xff] }
 0x557   : > { %v3729_v39 = vpop.f32.mrf.mxu2  ;;  %v3553_v31 = vpop.f32.mrf.mxu0 }
 0x558   : > { %v3730_v38 = vadd.f32 %v3729_v39, %v3641_v19  ;;  %v3818_v30 = vpop.f32.mrf.mxu3  ;;  %v3642_v52 = vpop.f32.mrf.mxu1  ;;  %v11658_v19 = vld [vmem:[#allocation31_spill] sm:$0xff]  ;;  %v11659_v39 = vld [vmem:[#allocation32_spill] sm:$0xff] }
 0x559   : > { %v3643_v18 = vadd.f32 %v3642_v52, %v3553_v31  ;;  %v6697_v31 = vld [vmem:[%s7230_s28 + $0x6e0] sm:$0xf] }
 0x55a   : > { %v8466_v41 = vadd.f32 %v3818_v30, %v3730_v38  ;;  %v6473_v38 = vld [vmem:[%s7230_s28 + $0x520] sm:$0xf]  ;;  %v6935_v30 = vld [vmem:[%s7230_s28 + $0x538] sm:$0xf0] }
 0x55b   : > { %v6474_v52 = vor.u32 %v6935_v30, %v6473_v38 }
 0x55c   : > { %11655 = vst [vmem:[#allocation162_spill] sm:$0xff] %v8466_v41 }
 0x55d   : > { %4407 = vmatpush.bf16.msra.mxu2 %v6474_v52 }
 0x55f   : > { %v3731_v10 = vpop.f32.mrf.mxu2  ;;  %v3556_v61 = vpop.f32.mrf.mxu0 }
 0x560   : > { %v3732_v60 = vadd.f32 %v3731_v10, %v3643_v18  ;;  %v3820_v7 = vpop.f32.mrf.mxu3  ;;  %v3645_v62 = vpop.f32.mrf.mxu1  ;;  %v6991_v18 = vld [vmem:[%s7230_s28 + $0x6f8] sm:$0xf0] }
 0x561   : > { %v3646_v53 = vadd.f32 %v3645_v62, %v3556_v61 }
 0x562   : > { %v8468_v37 = vadd.f32 %v3820_v7, %v3732_v60  ;;  %3595 = vmatmul.bf16.gmra.mxu0 %v11657_v28  ;;  %v6698_v60 = vor.u32 %v6991_v18, %v6697_v31  ;;  %v6249_v28 = vld [vmem:[%s7230_s28 + $0x360] sm:$0xf] }
 0x563   : > { %3684 = vmatmul.bf16.gmra.mxu1 %v11658_v19  ;;  %v6823_v19 = vld [vmem:[%s7230_s28 + $0x1b8] sm:$0xf0]  ;;  %v6250_v9 = vor.u32 %v6879_v29, %v6249_v28 }
 0x564   : > { %11656 = vst [vmem:[#allocation163_spill] sm:$0xff] %v8468_v37  ;;  %3773 = vmatmul.bf16.gmra.mxu2 %v11659_v39  ;;  %4496 = vmatpush.bf16.msra.mxu3 %v6698_v60  ;;  %v6025_v39 = vld [vmem:[%s7230_s28 + $0x1a0] sm:$0xf] }
 0x565   : > { %3862 = vmatmul.bf16.gmra.mxu3 %v11660_v36  ;;  %v6026_v11 = vor.u32 %v6823_v19, %v6025_v39  ;;  %4318 = vmatpush.bf16.msra.mxu1 %v6250_v9 }
 0x567   : > { %v3734_v10 = vpop.f32.mrf.mxu2  ;;  %v3558_v62 = vpop.f32.mrf.mxu0  ;;  %4229 = vmatpush.bf16.msra.mxu0 %v6026_v11 }
 0x568   : > { %v3735_v7 = vadd.f32 %v3734_v10, %v3646_v53  ;;  %v3823_v61 = vpop.f32.mrf.mxu3  ;;  %v3647_v37 = vpop.f32.mrf.mxu1 }
 0x569   : > { %v3648_v36 = vadd.f32 %v3647_v37, %v3558_v62 }
 0x56a   : > { %v8478_v41 = vadd.f32 %v3823_v61, %v3735_v7 }
 0x56c   : > { %11661 = vst [vmem:[#allocation164_spill] sm:$0xff] %v8478_v41 }
 0x56f   : > { %v3736_v38 = vpop.f32.mrf.mxu2  ;;  %v3561_v53 = vpop.f32.mrf.mxu0 }
 0x570   : > { %v3737_v30 = vadd.f32 %v3736_v38, %v3648_v36  ;;  %v3825_v31 = vpop.f32.mrf.mxu3  ;;  %v3650_v18 = vpop.f32.mrf.mxu1 }
 0x571   : > { %v3651_v52 = vadd.f32 %v3650_v18, %v3561_v53  ;;  %v11666_v53 = vld [vmem:[#allocation4_spill] sm:$0xff] }
 0x572   : > { %v8484_v10 = vadd.f32 %v3825_v31, %v3737_v30  ;;  %3600 = vmatmul.bf16.gmra.mxu0 %v7708_v16  ;;  %v11665_v31 = vld [vmem:[#allocation3_spill] sm:$0xff]  ;;  %v6445_v18 = vld [vmem:[%s7230_s28 + $0x4e8] sm:$0xf] }
 0x573   : > { %3689 = vmatmul.bf16.gmra.mxu1 %v7710_v56 }
 0x574   : > { %11662 = vst [vmem:[#allocation165_spill] sm:$0xff] %v8484_v10  ;;  %3778 = vmatmul.bf16.gmra.mxu2 %v7712_v17  ;;  %v6221_v10 = vld [vmem:[%s7230_s28 + $0x328] sm:$0xf] }
 0x575   : > { %3867 = vmatmul.bf16.gmra.mxu3 %v7714_v8 }
 0x577   : > { %v3739_v37 = vpop.f32.mrf.mxu2  ;;  %v3563_v9 = vpop.f32.mrf.mxu0 }
 0x578   : > { %v3740_v28 = vadd.f32 %v3739_v37, %v3651_v52  ;;  %v3828_v29 = vpop.f32.mrf.mxu3  ;;  %v3652_v11 = vpop.f32.mrf.mxu1  ;;  %v6928_v52 = vld [vmem:[%s7230_s28 + $0x500] sm:$0xf0]  ;;  %v6669_v37 = vld [vmem:[%s7230_s28 + $0x6a8] sm:$0xf] }
 0x579   : > { %v3653_v19 = vadd.f32 %v3652_v11, %v3563_v9 }
 0x57a   : > { %v8490_v36 = vadd.f32 %v3828_v29, %v3740_v28  ;;  %v6446_v28 = vor.u32 %v6928_v52, %v6445_v18  ;;  %v6984_v29 = vld [vmem:[%s7230_s28 + $0x6c0] sm:$0xf0] }
 0x57b   : > { %v6670_v11 = vor.u32 %v6984_v29, %v6669_v37 }
 0x57c   : > { %11663 = vst [vmem:[#allocation166_spill] sm:$0xff] %v8490_v36  ;;  %4408 = vmatpush.bf16.msra.mxu2 %v6446_v28  ;;  %v6816_v36 = vld [vmem:[%s7230_s28 + $0x180] sm:$0xf0] }
 0x57d   : > { %4497 = vmatpush.bf16.msra.mxu3 %v6670_v11 }
 0x57f   : > { %v3741_v39 = vpop.f32.mrf.mxu2  ;;  %v3566_v61 = vpop.f32.mrf.mxu0 }
 0x580   : > { %v3742_v60 = vadd.f32 %v3741_v39, %v3653_v19  ;;  %v3830_v7 = vpop.f32.mrf.mxu3  ;;  %v3655_v62 = vpop.f32.mrf.mxu1 }
 0x581   : > { %v3656_v30 = vadd.f32 %v3655_v62, %v3566_v61 }
 0x582   : > { %v8492_v38 = vadd.f32 %v3830_v7, %v3742_v60  ;;  %3881 = vmatmul.bf16.vlgmr.msrb.gmra.mxu0 %v7316_v47 }
 0x583   : > { %3970 = vmatmul.bf16.vlgmr.msrb.gmra.mxu1 %v7320_v51 }
 0x584   : > { %11664 = vst [vmem:[#allocation167_spill] sm:$0xff] %v8492_v38  ;;  %4059 = vmatmul.bf16.vlgmr.msrb.gmra.mxu2 %v11665_v31  ;;  %v5997_v38 = vld [vmem:[%s7230_s28 + $0x168] sm:$0xf] }
 0x585   : > { %4148 = vmatmul.bf16.vlgmr.msrb.gmra.mxu3 %v11666_v53  ;;  %v5998_v41 = vor.u32 %v6816_v36, %v5997_v38  ;;  %v6872_v53 = vld [vmem:[%s7230_s28 + $0x340] sm:$0xf0] }
 0x586   : > { %v6222_v31 = vor.u32 %v6872_v53, %v6221_v10 }
 0x587   : > { %v3744_v9 = vpop.f32.mrf.mxu2  ;;  %v3568_v60 = vpop.f32.mrf.mxu0  ;;  %4230 = vmatpush.bf16.msra.mxu0 %v5998_v41 }
 0x588   : > { %v3745_v19 = vadd.f32 %v3744_v9, %v3656_v30  ;;  %v3833_v39 = vpop.f32.mrf.mxu3  ;;  %v3657_v7 = vpop.f32.mrf.mxu1  ;;  %4319 = vmatpush.bf16.msra.mxu1 %v6222_v31 }
 0x589   : > { %v3658_v62 = vadd.f32 %v3657_v7, %v3568_v60 }
 0x58a   : > { %v8502_v61 = vadd.f32 %v3833_v39, %v3745_v19 }
 0x58c   : > { %11667 = vst [vmem:[#allocation168_spill] sm:$0xff] %v8502_v61 }
 0x58f   : > { %v3746_v18 = vpop.f32.mrf.mxu2  ;;  %v3571_v30 = vpop.f32.mrf.mxu0 }
 0x590   : > { %v3747_v52 = vadd.f32 %v3746_v18, %v3658_v62  ;;  %v3835_v37 = vpop.f32.mrf.mxu3  ;;  %v3660_v29 = vpop.f32.mrf.mxu1 }
 0x591   : > { %v3661_v28 = vadd.f32 %v3660_v29, %v3571_v30  ;;  %v6921_v30 = vld [vmem:[%s7230_s28 + $0x4c8] sm:$0xf0]  ;;  %v6641_v29 = vld [vmem:[%s7230_s28 + $0x670] sm:$0xf] }
 0x592   : > { %v8508_v9 = vadd.f32 %v3835_v37, %v3747_v52  ;;  %3886 = vmatmul.bf16.gmra.mxu0 %v7346_v12  ;;  %v6417_v37 = vld [vmem:[%s7230_s28 + $0x4b0] sm:$0xf] }
 0x593   : > { %3975 = vmatmul.bf16.gmra.mxu1 %v7348_v13 }
 0x594   : > { %11668 = vst [vmem:[#allocation169_spill] sm:$0xff] %v8508_v9  ;;  %4064 = vmatmul.bf16.gmra.mxu2 %v7350_v14  ;;  %v6865_v9 = vld [vmem:[%s7230_s28 + $0x308] sm:$0xf0] }
 0x595   : > { %4153 = vmatmul.bf16.gmra.mxu3 %v7352_v15 }
 0x597   : > { %v3749_v36 = vpop.f32.mrf.mxu2  ;;  %v3573_v38 = vpop.f32.mrf.mxu0 }
 0x598   : > { %v3750_v10 = vadd.f32 %v3749_v36, %v3661_v28  ;;  %v3838_v41 = vpop.f32.mrf.mxu3  ;;  %v3662_v31 = vpop.f32.mrf.mxu1  ;;  %v6418_v28 = vor.u32 %v6921_v30, %v6417_v37  ;;  %v6977_v36 = vld [vmem:[%s7230_s28 + $0x688] sm:$0xf0] }
 0x599   : > { %v3663_v11 = vadd.f32 %v3662_v31, %v3573_v38 }
 0x59a   : > { %v8514_v53 = vadd.f32 %v3838_v41, %v3750_v10  ;;  %v6642_v41 = vor.u32 %v6977_v36, %v6641_v29  ;;  %4409 = vmatpush.bf16.msra.mxu2 %v6418_v28 }
 0x59c   : > { %11669 = vst [vmem:[#allocation170_spill] sm:$0xff] %v8514_v53  ;;  %4498 = vmatpush.bf16.msra.mxu3 %v6642_v41 }
 0x59f   : > { %v3751_v19 = vpop.f32.mrf.mxu2  ;;  %v3576_v7 = vpop.f32.mrf.mxu0 }
 0x5a0   : > { %v3752_v39 = vadd.f32 %v3751_v19, %v3663_v11  ;;  %v3840_v60 = vpop.f32.mrf.mxu3  ;;  %v3665_v62 = vpop.f32.mrf.mxu1 }
 0x5a1   : > { %v3666_v52 = vadd.f32 %v3665_v62, %v3576_v7  ;;  %v5969_v7 = vld [vmem:[%s7230_s28 + $0x130] sm:$0xf]  ;;  %v6809_v62 = vld [vmem:[%s7230_s28 + $0x148] sm:$0xf0] }
 0x5a2   : > { %v8516_v18 = vadd.f32 %v3840_v60, %v3752_v39  ;;  %3891 = vmatmul.bf16.gmra.mxu0 %v7366_v24  ;;  %v5970_v53 = vor.u32 %v6809_v62, %v5969_v7 }
 0x5a3   : > { %3980 = vmatmul.bf16.gmra.mxu1 %v7368_v25 }
 0x5a4   : > { %11670 = vst [vmem:[#allocation171_spill] sm:$0xff] %v8516_v18  ;;  %4069 = vmatmul.bf16.gmra.mxu2 %v7370_v26  ;;  %v6193_v18 = vld [vmem:[%s7230_s28 + $0x2f0] sm:$0xf]  ;;  %4231 = vmatpush.bf16.msra.mxu0 %v5970_v53 }
 0x5a5   : > { %4158 = vmatmul.bf16.gmra.mxu3 %v7372_v27  ;;  %v6194_v61 = vor.u32 %v6865_v9, %v6193_v18 }
 0x5a7   : > { %v3754_v10 = vpop.f32.mrf.mxu2  ;;  %v3578_v11 = vpop.f32.mrf.mxu0  ;;  %4320 = vmatpush.bf16.msra.mxu1 %v6194_v61 }
 0x5a8   : > { %v3755_v38 = vadd.f32 %v3754_v10, %v3666_v52  ;;  %v3843_v31 = vpop.f32.mrf.mxu3  ;;  %v3667_v19 = vpop.f32.mrf.mxu1 }
 0x5a9   : > { %v3668_v60 = vadd.f32 %v3667_v19, %v3578_v11 }
 0x5aa   : > { %v8526_v39 = vadd.f32 %v3843_v31, %v3755_v38 }
 0x5ac   : > { %11671 = vst [vmem:[#allocation172_spill] sm:$0xff] %v8526_v39 }
 0x5af   : > { %v3756_v37 = vpop.f32.mrf.mxu2  ;;  %v3581_v52 = vpop.f32.mrf.mxu0 }
 0x5b0   : > { %v3757_v30 = vadd.f32 %v3756_v37, %v3668_v60  ;;  %v3845_v29 = vpop.f32.mrf.mxu3  ;;  %v3670_v36 = vpop.f32.mrf.mxu1 }
 0x5b1   : > { %v3671_v28 = vadd.f32 %v3670_v36, %v3581_v52  ;;  %v6914_v52 = vld [vmem:[%s7230_s28 + $0x490] sm:$0xf0]  ;;  %v6613_v36 = vld [vmem:[%s7230_s28 + $0x638] sm:$0xf] }
 0x5b2   : > { %v8532_v10 = vadd.f32 %v3845_v29, %v3757_v30  ;;  %3896 = vmatmul.bf16.gmra.mxu0 %v7394_v49  ;;  %v6389_v29 = vld [vmem:[%s7230_s28 + $0x478] sm:$0xf] }
 0x5b3   : > { %3985 = vmatmul.bf16.gmra.mxu1 %v7396_v50 }
 0x5b4   : > { %11672 = vst [vmem:[#allocation173_spill] sm:$0xff] %v8532_v10  ;;  %4074 = vmatmul.bf16.gmra.mxu2 %v7398_v54  ;;  %v6858_v10 = vld [vmem:[%s7230_s28 + $0x2d0] sm:$0xf0] }
 0x5b5   : > { %4163 = vmatmul.bf16.gmra.mxu3 %v7400_v55 }
 0x5b7   : > { %v3759_v41 = vpop.f32.mrf.mxu2  ;;  %v3583_v61 = vpop.f32.mrf.mxu0 }
 0x5b8   : > { %v3760_v9 = vadd.f32 %v3759_v41, %v3671_v28  ;;  %v3848_v53 = vpop.f32.mrf.mxu3  ;;  %v3672_v18 = vpop.f32.mrf.mxu1  ;;  %v6390_v28 = vor.u32 %v6914_v52, %v6389_v29  ;;  %v6970_v41 = vld [vmem:[%s7230_s28 + $0x650] sm:$0xf0] }
 0x5b9   : > { %v3673_v31 = vadd.f32 %v3672_v18, %v3583_v61 }
 0x5ba   : > { %v8538_v38 = vadd.f32 %v3848_v53, %v3760_v9  ;;  %v6614_v53 = vor.u32 %v6970_v41, %v6613_v36  ;;  %4410 = vmatpush.bf16.msra.mxu2 %v6390_v28 }
 0x5bc   : > { %11673 = vst [vmem:[#allocation174_spill] sm:$0xff] %v8538_v38  ;;  %4499 = vmatpush.bf16.msra.mxu3 %v6614_v53 }
 0x5bf   : > { %v3761_v11 = vpop.f32.mrf.mxu2  ;;  %v3586_v7 = vpop.f32.mrf.mxu0 }
 0x5c0   : > { %v3762_v19 = vadd.f32 %v3761_v11, %v3673_v31  ;;  %v3850_v60 = vpop.f32.mrf.mxu3  ;;  %v3675_v62 = vpop.f32.mrf.mxu1 }
 0x5c1   : > { %v3676_v30 = vadd.f32 %v3675_v62, %v3586_v7  ;;  %v5941_v7 = vld [vmem:[%s7230_s28 + $0xf8] sm:$0xf]  ;;  %v6802_v62 = vld [vmem:[%s7230_s28 + $0x110] sm:$0xf0] }
 0x5c2   : > { %v8540_v37 = vadd.f32 %v3850_v60, %v3762_v19  ;;  %3901 = vmatmul.bf16.gmra.mxu0 %v7414_v0  ;;  %v5942_v38 = vor.u32 %v6802_v62, %v5941_v7 }
 0x5c3   : > { %3990 = vmatmul.bf16.gmra.mxu1 %v7416_v1 }
 0x5c4   : > { %11674 = vst [vmem:[#allocation175_spill] sm:$0xff] %v8540_v37  ;;  %4079 = vmatmul.bf16.gmra.mxu2 %v7418_v2  ;;  %v6165_v37 = vld [vmem:[%s7230_s28 + $0x2b8] sm:$0xf]  ;;  %4232 = vmatpush.bf16.msra.mxu0 %v5942_v38 }
 0x5c5   : > { %4168 = vmatmul.bf16.gmra.mxu3 %v7420_v3  ;;  %v6166_v39 = vor.u32 %v6858_v10, %v6165_v37 }
 0x5c7   : > { %v3764_v9 = vpop.f32.mrf.mxu2  ;;  %v3588_v31 = vpop.f32.mrf.mxu0  ;;  %4321 = vmatpush.bf16.msra.mxu1 %v6166_v39 }
 0x5c8   : > { %v3765_v61 = vadd.f32 %v3764_v9, %v3676_v30  ;;  %v3853_v18 = vpop.f32.mrf.mxu3  ;;  %v3677_v11 = vpop.f32.mrf.mxu1 }
 0x5c9   : > { %v3678_v60 = vadd.f32 %v3677_v11, %v3588_v31 }
 0x5ca   : > { %v8550_v19 = vadd.f32 %v3853_v18, %v3765_v61 }
 0x5cc   : > { %11675 = vst [vmem:[#allocation176_spill] sm:$0xff] %v8550_v19 }
 0x5cf   : > { %v3766_v29 = vpop.f32.mrf.mxu2  ;;  %v3591_v30 = vpop.f32.mrf.mxu0 }
 0x5d0   : > { %v3767_v52 = vadd.f32 %v3766_v29, %v3678_v60  ;;  %v3855_v36 = vpop.f32.mrf.mxu3  ;;  %v3680_v41 = vpop.f32.mrf.mxu1 }
 0x5d1   : > { %v3681_v28 = vadd.f32 %v3680_v41, %v3591_v30  ;;  %v6907_v30 = vld [vmem:[%s7230_s28 + $0x458] sm:$0xf0]  ;;  %v6585_v41 = vld [vmem:[%s7230_s28 + $0x600] sm:$0xf] }
 0x5d2   : > { %v8556_v9 = vadd.f32 %v3855_v36, %v3767_v52  ;;  %3906 = vmatmul.bf16.gmra.mxu0 %v7442_v32  ;;  %v6361_v36 = vld [vmem:[%s7230_s28 + $0x440] sm:$0xf] }
 0x5d3   : > { %3995 = vmatmul.bf16.gmra.mxu1 %v7444_v33 }
 0x5d4   : > { %11676 = vst [vmem:[#allocation177_spill] sm:$0xff] %v8556_v9  ;;  %4084 = vmatmul.bf16.gmra.mxu2 %v7446_v34  ;;  %v6851_v9 = vld [vmem:[%s7230_s28 + $0x298] sm:$0xf0] }
 0x5d5   : > { %4173 = vmatmul.bf16.gmra.mxu3 %v7448_v35 }
 0x5d7   : > { %v3769_v53 = vpop.f32.mrf.mxu2  ;;  %v3593_v39 = vpop.f32.mrf.mxu0 }
 0x5d8   : > { %v3770_v10 = vadd.f32 %v3769_v53, %v3681_v28  ;;  %v3858_v38 = vpop.f32.mrf.mxu3  ;;  %v3682_v37 = vpop.f32.mrf.mxu1  ;;  %v6362_v28 = vor.u32 %v6907_v30, %v6361_v36  ;;  %v6963_v53 = vld [vmem:[%s7230_s28 + $0x618] sm:$0xf0] }
 0x5d9   : > { %v3683_v18 = vadd.f32 %v3682_v37, %v3593_v39 }
 0x5da   : > { %v8562_v61 = vadd.f32 %v3858_v38, %v3770_v10  ;;  %v6586_v38 = vor.u32 %v6963_v53, %v6585_v41  ;;  %4411 = vmatpush.bf16.msra.mxu2 %v6362_v28 }
 0x5dc   : > { %11677 = vst [vmem:[#allocation178_spill] sm:$0xff] %v8562_v61  ;;  %4500 = vmatpush.bf16.msra.mxu3 %v6586_v38 }
 0x5df   : > { %v3771_v31 = vpop.f32.mrf.mxu2  ;;  %v3596_v7 = vpop.f32.mrf.mxu0 }
 0x5e0   : > { %v3772_v11 = vadd.f32 %v3771_v31, %v3683_v18  ;;  %v3860_v60 = vpop.f32.mrf.mxu3  ;;  %v3685_v62 = vpop.f32.mrf.mxu1 }
 0x5e1   : > { %v3686_v52 = vadd.f32 %v3685_v62, %v3596_v7  ;;  %v5913_v7 = vld [vmem:[%s7230_s28 + $0xc0] sm:$0xf]  ;;  %v6795_v62 = vld [vmem:[%s7230_s28 + $0xd8] sm:$0xf0] }
 0x5e2   : > { %v8564_v29 = vadd.f32 %v3860_v60, %v3772_v11  ;;  %3911 = vmatmul.bf16.gmra.mxu0 %v7462_v44  ;;  %v5914_v61 = vor.u32 %v6795_v62, %v5913_v7 }
 0x5e3   : > { %4000 = vmatmul.bf16.gmra.mxu1 %v7464_v45 }
 0x5e4   : > { %11678 = vst [vmem:[#allocation179_spill] sm:$0xff] %v8564_v29  ;;  %4089 = vmatmul.bf16.gmra.mxu2 %v7466_v46  ;;  %v6137_v29 = vld [vmem:[%s7230_s28 + $0x280] sm:$0xf]  ;;  %4233 = vmatpush.bf16.msra.mxu0 %v5914_v61 }
 0x5e5   : > { %4178 = vmatmul.bf16.gmra.mxu3 %v7468_v48  ;;  %v6138_v19 = vor.u32 %v6851_v9, %v6137_v29 }
 0x5e7   : > { %v3774_v10 = vpop.f32.mrf.mxu2  ;;  %v3598_v18 = vpop.f32.mrf.mxu0  ;;  %4322 = vmatpush.bf16.msra.mxu1 %v6138_v19 }
 0x5e8   : > { %v3775_v39 = vadd.f32 %v3774_v10, %v3686_v52  ;;  %v3863_v37 = vpop.f32.mrf.mxu3  ;;  %v3687_v31 = vpop.f32.mrf.mxu1 }
 0x5e9   : > { %v3688_v60 = vadd.f32 %v3687_v31, %v3598_v18 }
 0x5ea   : > { %v8574_v11 = vadd.f32 %v3863_v37, %v3775_v39 }
 0x5ec   : > { %11679 = vst [vmem:[#allocation180_spill] sm:$0xff] %v8574_v11 }
 0x5ef   : > { %v3776_v36 = vpop.f32.mrf.mxu2  ;;  %v3601_v52 = vpop.f32.mrf.mxu0 }
 0x5f0   : > { %v3777_v30 = vadd.f32 %v3776_v36, %v3688_v60  ;;  %v3865_v41 = vpop.f32.mrf.mxu3  ;;  %v3690_v53 = vpop.f32.mrf.mxu1 }
 0x5f1   : > { %v3691_v28 = vadd.f32 %v3690_v53, %v3601_v52  ;;  %v6900_v52 = vld [vmem:[%s7230_s28 + $0x420] sm:$0xf0]  ;;  %v6557_v53 = vld [vmem:[%s7230_s28 + $0x5c8] sm:$0xf] }
 0x5f2   : > { %v8580_v10 = vadd.f32 %v3865_v41, %v3777_v30  ;;  %3916 = vmatmul.bf16.gmra.mxu0 %v7490_v20  ;;  %v6333_v41 = vld [vmem:[%s7230_s28 + $0x408] sm:$0xf] }
 0x5f3   : > { %4005 = vmatmul.bf16.gmra.mxu1 %v7492_v21 }
 0x5f4   : > { %11680 = vst [vmem:[#allocation181_spill] sm:$0xff] %v8580_v10  ;;  %4094 = vmatmul.bf16.gmra.mxu2 %v7494_v22  ;;  %v6844_v10 = vld [vmem:[%s7230_s28 + $0x260] sm:$0xf0] }
 0x5f5   : > { %4183 = vmatmul.bf16.gmra.mxu3 %v7496_v23 }
 0x5f7   : > { %v3779_v38 = vpop.f32.mrf.mxu2  ;;  %v3603_v19 = vpop.f32.mrf.mxu0 }
 0x5f8   : > { %v3780_v9 = vadd.f32 %v3779_v38, %v3691_v28  ;;  %v3868_v61 = vpop.f32.mrf.mxu3  ;;  %v3692_v29 = vpop.f32.mrf.mxu1  ;;  %v6334_v28 = vor.u32 %v6900_v52, %v6333_v41  ;;  %v6956_v38 = vld [vmem:[%s7230_s28 + $0x5e0] sm:$0xf0] }
 0x5f9   : > { %v3693_v37 = vadd.f32 %v3692_v29, %v3603_v19 }
 0x5fa   : > { %v8586_v39 = vadd.f32 %v3868_v61, %v3780_v9  ;;  %v6558_v61 = vor.u32 %v6956_v38, %v6557_v53  ;;  %4412 = vmatpush.bf16.msra.mxu2 %v6334_v28 }
 0x5fc   : > { %11681 = vst [vmem:[#allocation182_spill] sm:$0xff] %v8586_v39  ;;  %4501 = vmatpush.bf16.msra.mxu3 %v6558_v61 }
 0x5ff   : > { %v3781_v18 = vpop.f32.mrf.mxu2  ;;  %v3882_v7 = vpop.f32.mrf.mxu0 }
 0x600   : > { %v3782_v31 = vadd.f32 %v3781_v18, %v3693_v37  ;;  %v3870_v60 = vpop.f32.mrf.mxu3  ;;  %v3971_v62 = vpop.f32.mrf.mxu1 }
 0x601   : > { %v3972_v30 = vadd.f32 %v3971_v62, %v3882_v7  ;;  %v5885_v7 = vld [vmem:[%s7230_s28 + $0x88] sm:$0xf]  ;;  %v6788_v62 = vld [vmem:[%s7230_s28 + $0xa0] sm:$0xf0] }
 0x602   : > { %v8588_v36 = vadd.f32 %v3870_v60, %v3782_v31  ;;  %3921 = vmatmul.bf16.gmra.mxu0 %v7510_v40  ;;  %v5886_v39 = vor.u32 %v6788_v62, %v5885_v7 }
 0x603   : > { %4010 = vmatmul.bf16.gmra.mxu1 %v7512_v42 }
 0x604   : > { %11682 = vst [vmem:[#allocation183_spill] sm:$0xff] %v8588_v36  ;;  %4099 = vmatmul.bf16.gmra.mxu2 %v7514_v43  ;;  %v6109_v36 = vld [vmem:[%s7230_s28 + $0x248] sm:$0xf]  ;;  %4234 = vmatpush.bf16.msra.mxu0 %v5886_v39 }
 0x605   : > { %4188 = vmatmul.bf16.gmra.mxu3 %v7516_v57  ;;  %v6110_v11 = vor.u32 %v6844_v10, %v6109_v36 }
 0x607   : > { %v4060_v9 = vpop.f32.mrf.mxu2  ;;  %v3884_v37 = vpop.f32.mrf.mxu0  ;;  %4323 = vmatpush.bf16.msra.mxu1 %v6110_v11 }
 0x608   : > { %v4061_v19 = vadd.f32 %v4060_v9, %v3972_v30  ;;  %v4149_v29 = vpop.f32.mrf.mxu3  ;;  %v3973_v18 = vpop.f32.mrf.mxu1 }
 0x609   : > { %v3974_v60 = vadd.f32 %v3973_v18, %v3884_v37 }
 0x60a   : > { %v8598_v31 = vadd.f32 %v4149_v29, %v4061_v19 }
 0x60c   : > { %11683 = vst [vmem:[#allocation184_spill] sm:$0xff] %v8598_v31 }
 0x60f   : > { %v4062_v41 = vpop.f32.mrf.mxu2  ;;  %v3887_v30 = vpop.f32.mrf.mxu0 }
 0x610   : > { %v4063_v52 = vadd.f32 %v4062_v41, %v3974_v60  ;;  %v4151_v53 = vpop.f32.mrf.mxu3  ;;  %v3976_v38 = vpop.f32.mrf.mxu1 }
 0x611   : > { %v3977_v28 = vadd.f32 %v3976_v38, %v3887_v30  ;;  %v11688_v30 = vld [vmem:[#allocation9_spill] sm:$0xff] }
 0x612   : > { %v8604_v9 = vadd.f32 %v4151_v53, %v4063_v52  ;;  %3926 = vmatmul.bf16.gmra.mxu0 %v7540_v59  ;;  %v11687_v53 = vld [vmem:[#allocation8_spill] sm:$0xff]  ;;  %v6305_v38 = vld [vmem:[%s7230_s28 + $0x3d0] sm:$0xf] }
 0x613   : > { %4015 = vmatmul.bf16.gmra.mxu1 %v7542_v63 }
 0x614   : > { %11684 = vst [vmem:[#allocation185_spill] sm:$0xff] %v8604_v9  ;;  %4104 = vmatmul.bf16.gmra.mxu2 %v7544_v4  ;;  %v6081_v9 = vld [vmem:[%s7230_s28 + $0x210] sm:$0xf] }
 0x615   : > { %4193 = vmatmul.bf16.gmra.mxu3 %v7546_v6 }
 0x617   : > { %v4065_v61 = vpop.f32.mrf.mxu2  ;;  %v3889_v11 = vpop.f32.mrf.mxu0 }
 0x618   : > { %v4066_v10 = vadd.f32 %v4065_v61, %v3977_v28  ;;  %v4154_v39 = vpop.f32.mrf.mxu3  ;;  %v3978_v36 = vpop.f32.mrf.mxu1  ;;  %v6893_v28 = vld [vmem:[%s7230_s28 + $0x3e8] sm:$0xf0]  ;;  %v6529_v61 = vld [vmem:[%s7230_s28 + $0x590] sm:$0xf] }
 0x619   : > { %v3979_v29 = vadd.f32 %v3978_v36, %v3889_v11 }
 0x61a   : > { %v8610_v19 = vadd.f32 %v4154_v39, %v4066_v10  ;;  %v6306_v10 = vor.u32 %v6893_v28, %v6305_v38  ;;  %v6949_v39 = vld [vmem:[%s7230_s28 + $0x5a8] sm:$0xf0] }
 0x61b   : > { %v6530_v36 = vor.u32 %v6949_v39, %v6529_v61 }
 0x61c   : > { %11685 = vst [vmem:[#allocation186_spill] sm:$0xff] %v8610_v19  ;;  %4413 = vmatpush.bf16.msra.mxu2 %v6306_v10  ;;  %v6781_v19 = vld [vmem:[%s7230_s28 + $0x68] sm:$0xf0] }
 0x61d   : > { %4502 = vmatpush.bf16.msra.mxu3 %v6530_v36  ;;  %v11691_v36 = vld [vmem:[#allocation12_spill] sm:$0xff] }
 0x61f   : > { %v4067_v37 = vpop.f32.mrf.mxu2  ;;  %v3892_v7 = vpop.f32.mrf.mxu0 }
 0x620   : > { %v4068_v18 = vadd.f32 %v4067_v37, %v3979_v29  ;;  %v4156_v60 = vpop.f32.mrf.mxu3  ;;  %v3981_v62 = vpop.f32.mrf.mxu1 }
 0x621   : > { %v3982_v52 = vadd.f32 %v3981_v62, %v3892_v7 }
 0x622   : > { %v8612_v41 = vadd.f32 %v4156_v60, %v4068_v18  ;;  %3931 = vmatmul.bf16.gmra.mxu0 %v7564_v58 }
 0x623   : > { %4020 = vmatmul.bf16.gmra.mxu1 %v7566_v5 }
 0x624   : > { %11686 = vst [vmem:[#allocation187_spill] sm:$0xff] %v8612_v41  ;;  %4109 = vmatmul.bf16.gmra.mxu2 %v11687_v53  ;;  %v5857_v41 = vld [vmem:[%s7230_s28 + $0x50] sm:$0xf] }
 0x625   : > { %4198 = vmatmul.bf16.gmra.mxu3 %v11688_v30  ;;  %v5858_v31 = vor.u32 %v6781_v19, %v5857_v41  ;;  %v6837_v30 = vld [vmem:[%s7230_s28 + $0x228] sm:$0xf0] }
 0x626   : > { %v6082_v53 = vor.u32 %v6837_v30, %v6081_v9 }
 0x627   : > { %v4070_v11 = vpop.f32.mrf.mxu2  ;;  %v3894_v18 = vpop.f32.mrf.mxu0  ;;  %4235 = vmatpush.bf16.msra.mxu0 %v5858_v31 }
 0x628   : > { %v4071_v29 = vadd.f32 %v4070_v11, %v3982_v52  ;;  %v4159_v37 = vpop.f32.mrf.mxu3  ;;  %v3983_v60 = vpop.f32.mrf.mxu1  ;;  %4324 = vmatpush.bf16.msra.mxu1 %v6082_v53 }
 0x629   : > { %v3984_v62 = vadd.f32 %v3983_v60, %v3894_v18  ;;  %v11694_v18 = vld [vmem:[#allocation15_spill] sm:$0xff] }
 0x62a   : > { %v8622_v7 = vadd.f32 %v4159_v37, %v4071_v29  ;;  %v11692_v29 = vld [vmem:[#allocation13_spill] sm:$0xff]  ;;  %v11693_v37 = vld [vmem:[#allocation14_spill] sm:$0xff] }
 0x62c   : > { %11689 = vst [vmem:[#allocation188_spill] sm:$0xff] %v8622_v7  ;;  %v11697_v7 = vld [vmem:[#allocation18_spill] sm:$0xff] }
 0x62f   : > { %v4072_v38 = vpop.f32.mrf.mxu2  ;;  %v3897_v52 = vpop.f32.mrf.mxu0 }
 0x630   : > { %v4073_v28 = vadd.f32 %v4072_v38, %v3984_v62  ;;  %v4161_v61 = vpop.f32.mrf.mxu3  ;;  %v3986_v39 = vpop.f32.mrf.mxu1 }
 0x631   : > { %v3987_v10 = vadd.f32 %v3986_v39, %v3897_v52 }
 0x632   : > { %v8628_v11 = vadd.f32 %v4161_v61, %v4073_v28  ;;  %3936 = vmatmul.bf16.gmra.mxu0 %v11691_v36 }
 0x633   : > { %4025 = vmatmul.bf16.gmra.mxu1 %v11692_v29  ;;  %v6830_v29 = vld [vmem:[%s7230_s28 + $0x1f0] sm:$0xf0] }
 0x634   : > { %11690 = vst [vmem:[#allocation189_spill] sm:$0xff] %v8628_v11  ;;  %4114 = vmatmul.bf16.gmra.mxu2 %v11693_v37 }
 0x635   : > { %4203 = vmatmul.bf16.gmra.mxu3 %v11694_v18  ;;  %v11700_v18 = vld [vmem:[#allocation21_spill] sm:$0xff] }
 0x637   : > { %v4075_v19 = vpop.f32.mrf.mxu2  ;;  %v3899_v41 = vpop.f32.mrf.mxu0 }
 0x638   : > { %v4076_v9 = vadd.f32 %v4075_v19, %v3987_v10  ;;  %v4164_v31 = vpop.f32.mrf.mxu3  ;;  %v3988_v53 = vpop.f32.mrf.mxu1  ;;  %v11698_v10 = vld [vmem:[#allocation19_spill] sm:$0xff]  ;;  %v11699_v19 = vld [vmem:[#allocation20_spill] sm:$0xff] }
 0x639   : > { %v3989_v60 = vadd.f32 %v3988_v53, %v3899_v41  ;;  %v6501_v41 = vld [vmem:[%s7230_s28 + $0x558] sm:$0xf] }
 0x63a   : > { %v8634_v30 = vadd.f32 %v4164_v31, %v4076_v9  ;;  %v6277_v9 = vld [vmem:[%s7230_s28 + $0x398] sm:$0xf]  ;;  %v6886_v31 = vld [vmem:[%s7230_s28 + $0x3b0] sm:$0xf0] }
 0x63b   : > { %v6278_v53 = vor.u32 %v6886_v31, %v6277_v9 }
 0x63c   : > { %11695 = vst [vmem:[#allocation190_spill] sm:$0xff] %v8634_v30 }
 0x63d   : > { %4414 = vmatpush.bf16.msra.mxu2 %v6278_v53 }
 0x63f   : > { %v4077_v62 = vpop.f32.mrf.mxu2  ;;  %v3902_v61 = vpop.f32.mrf.mxu0 }
 0x640   : > { %v4078_v38 = vadd.f32 %v4077_v62, %v3989_v60  ;;  %v4166_v28 = vpop.f32.mrf.mxu3  ;;  %v3991_v52 = vpop.f32.mrf.mxu1  ;;  %v6942_v60 = vld [vmem:[%s7230_s28 + $0x570] sm:$0xf0] }
 0x641   : > { %v3992_v11 = vadd.f32 %v3991_v52, %v3902_v61 }
 0x642   : > { %v8636_v39 = vadd.f32 %v4166_v28, %v4078_v38  ;;  %3941 = vmatmul.bf16.gmra.mxu0 %v11697_v7  ;;  %v6502_v38 = vor.u32 %v6942_v60, %v6501_v41  ;;  %v6053_v7 = vld [vmem:[%s7230_s28 + $0x1d8] sm:$0xf] }
 0x643   : > { %4030 = vmatmul.bf16.gmra.mxu1 %v11698_v10  ;;  %v6774_v10 = vld [vmem:[%s7230_s28 + $0x30] sm:$0xf0]  ;;  %v6054_v36 = vor.u32 %v6830_v29, %v6053_v7 }
 0x644   : > { %11696 = vst [vmem:[#allocation191_spill] sm:$0xff] %v8636_v39  ;;  %4119 = vmatmul.bf16.gmra.mxu2 %v11699_v19  ;;  %4503 = vmatpush.bf16.msra.mxu3 %v6502_v38  ;;  %v5829_v19 = vld [vmem:[%s7230_s28 + $0x18] sm:$0xf]  ;;  %v11703_v38 = vld [vmem:[#allocation24_spill] sm:$0xff] }
 0x645   : > { %4208 = vmatmul.bf16.gmra.mxu3 %v11700_v18  ;;  %v5830_v37 = vor.u32 %v6774_v10, %v5829_v19  ;;  %4325 = vmatpush.bf16.msra.mxu1 %v6054_v36 }
 0x647   : > { %v4080_v62 = vpop.f32.mrf.mxu2  ;;  %v3904_v52 = vpop.f32.mrf.mxu0  ;;  %4236 = vmatpush.bf16.msra.mxu0 %v5830_v37 }
 0x648   : > { %v4081_v28 = vadd.f32 %v4080_v62, %v3992_v11  ;;  %v4169_v61 = vpop.f32.mrf.mxu3  ;;  %v3993_v39 = vpop.f32.mrf.mxu1 }
 0x649   : > { %v3994_v18 = vadd.f32 %v3993_v39, %v3904_v52  ;;  %v11705_v39 = vld [vmem:[#allocation26_spill] sm:$0xff] }
 0x64a   : > { %v8646_v30 = vadd.f32 %v4169_v61, %v4081_v28  ;;  %v11704_v28 = vld [vmem:[#allocation25_spill] sm:$0xff]  ;;  %v11706_v61 = vld [vmem:[#allocation27_spill] sm:$0xff] }
 0x64c   : > { %11701 = vst [vmem:[#allocation192_spill] sm:$0xff] %v8646_v30  ;;  %v11709_v30 = vld [vmem:[#allocation30_spill] sm:$0xff] }
 0x64f   : > { %v4082_v9 = vpop.f32.mrf.mxu2  ;;  %v3907_v11 = vpop.f32.mrf.mxu0 }
 0x650   : > { %v4083_v31 = vadd.f32 %v4082_v9, %v3994_v18  ;;  %v4171_v41 = vpop.f32.mrf.mxu3  ;;  %v3996_v60 = vpop.f32.mrf.mxu1 }
 0x651   : > { %v3997_v53 = vadd.f32 %v3996_v60, %v3907_v11 }
 0x652   : > { %v8652_v62 = vadd.f32 %v4171_v41, %v4083_v31  ;;  %3946 = vmatmul.bf16.gmra.mxu0 %v11703_v38 }
 0x653   : > { %4035 = vmatmul.bf16.gmra.mxu1 %v11704_v28 }
 0x654   : > { %11702 = vst [vmem:[#allocation193_spill] sm:$0xff] %v8652_v62  ;;  %4124 = vmatmul.bf16.gmra.mxu2 %v11705_v39  ;;  %v11710_v39 = vld [vmem:[#allocation31_spill] sm:$0xff] }
 0x655   : > { %4213 = vmatmul.bf16.gmra.mxu3 %v11706_v61  ;;  %v11711_v61 = vld [vmem:[#allocation32_spill] sm:$0xff] }
 0x657   : > { %v4085_v10 = vpop.f32.mrf.mxu2  ;;  %v3909_v36 = vpop.f32.mrf.mxu0 }
 0x658   : > { %v4086_v7 = vadd.f32 %v4085_v10, %v3997_v53  ;;  %v4174_v29 = vpop.f32.mrf.mxu3  ;;  %v3998_v37 = vpop.f32.mrf.mxu1  ;;  %v11712_v53 = vld [vmem:[#allocation33_spill] sm:$0xff] }
 0x659   : > { %v3999_v19 = vadd.f32 %v3998_v37, %v3909_v36 }
 0x65a   : > { %v8658_v18 = vadd.f32 %v4174_v29, %v4086_v7 }
 0x65c   : > { %11707 = vst [vmem:[#allocation24_spill] sm:$0xff] %v8658_v18 }
 0x65f   : > { %v4087_v52 = vpop.f32.mrf.mxu2  ;;  %v3912_v41 = vpop.f32.mrf.mxu0 }
 0x660   : > { %v4088_v9 = vadd.f32 %v4087_v52, %v3999_v19  ;;  %v4176_v31 = vpop.f32.mrf.mxu3  ;;  %v4001_v11 = vpop.f32.mrf.mxu1 }
 0x661   : > { %v4002_v62 = vadd.f32 %v4001_v11, %v3912_v41 }
 0x662   : > { %v8660_v60 = vadd.f32 %v4176_v31, %v4088_v9  ;;  %3951 = vmatmul.bf16.gmra.mxu0 %v11709_v30 }
 0x663   : > { %4040 = vmatmul.bf16.gmra.mxu1 %v11710_v39 }
 0x664   : > { %11708 = vst [vmem:[#allocation25_spill] sm:$0xff] %v8660_v60  ;;  %4129 = vmatmul.bf16.gmra.mxu2 %v11711_v61 }
 0x665   : > { %4218 = vmatmul.bf16.gmra.mxu3 %v11712_v53 }
 0x667   : > { %v4090_v10 = vpop.f32.mrf.mxu2  ;;  %v3914_v36 = vpop.f32.mrf.mxu0 }
 0x668   : > { %v4091_v7 = vadd.f32 %v4090_v10, %v4002_v62  ;;  %v4179_v29 = vpop.f32.mrf.mxu3  ;;  %v4003_v37 = vpop.f32.mrf.mxu1 }
 0x669   : > { %v4004_v52 = vadd.f32 %v4003_v37, %v3914_v36 }
 0x66a   : > { %v8666_v19 = vadd.f32 %v4179_v29, %v4091_v7 }
 0x66c   : > { %11713 = vst [vmem:[#allocation30_spill] sm:$0xff] %v8666_v19 }
 0x66f   : > { %v4092_v18 = vpop.f32.mrf.mxu2  ;;  %v3917_v41 = vpop.f32.mrf.mxu0 }
 0x670   : > { %v4093_v9 = vadd.f32 %v4092_v18, %v4004_v52  ;;  %v4181_v31 = vpop.f32.mrf.mxu3  ;;  %v4006_v11 = vpop.f32.mrf.mxu1 }
 0x671   : > { %v4007_v39 = vadd.f32 %v4006_v11, %v3917_v41 }
 0x672   : > { %v8668_v60 = vadd.f32 %v4181_v31, %v4093_v9  ;;  %3956 = vmatmul.bf16.gmra.mxu0 %v7708_v16 }
 0x673   : > { %4045 = vmatmul.bf16.gmra.mxu1 %v7710_v56 }
 0x674   : > { %11714 = vst [vmem:[#allocation32_spill] sm:$0xff] %v8668_v60  ;;  %4134 = vmatmul.bf16.gmra.mxu2 %v7712_v17 }
 0x675   : > { %4223 = vmatmul.bf16.gmra.mxu3 %v7714_v8  ;;  %v11716_v8 = vld [vmem:[#allocation3_spill] sm:$0xff] }
 0x677   : > { %v4095_v62 = vpop.f32.mrf.mxu2  ;;  %v3919_v29 = vpop.f32.mrf.mxu0 }
 0x678   : > { %v4096_v10 = vadd.f32 %v4095_v62, %v4007_v39  ;;  %v4184_v7 = vpop.f32.mrf.mxu3  ;;  %v4008_v36 = vpop.f32.mrf.mxu1  ;;  %v11717_v39 = vld [vmem:[#allocation4_spill] sm:$0xff] }
 0x679   : > { %v4009_v37 = vadd.f32 %v4008_v36, %v3919_v29 }
 0x67a   : > { %v8674_v18 = vadd.f32 %v4184_v7, %v4096_v10 }
 0x67c   : > { %11715 = vst [vmem:[#allocation33_spill] sm:$0xff] %v8674_v18 }
 0x67f   : > { %v4097_v52 = vpop.f32.mrf.mxu2  ;;  %v3922_v41 = vpop.f32.mrf.mxu0 }
 0x680   : > { %v4098_v9 = vadd.f32 %v4097_v52, %v4009_v37  ;;  %v4186_v31 = vpop.f32.mrf.mxu3  ;;  %v4011_v11 = vpop.f32.mrf.mxu1 }
 0x681   : > { %v4012_v19 = vadd.f32 %v4011_v11, %v3922_v41 }
 0x682   : > { %v8676_v60 = vadd.f32 %v4186_v31, %v4098_v9  ;;  %4237 = vmatmul.bf16.vlgmr.msra.gmra.mxu0 %v7316_v47 }
 0x683   : > { %4326 = vmatmul.bf16.vlgmr.msra.gmra.mxu1 %v7320_v51 }
 0x684   : > { %4415 = vmatmul.bf16.vlgmr.msra.gmra.mxu2 %v11716_v8 }
 0x685   : > { %4504 = vmatmul.bf16.vlgmr.msra.gmra.mxu3 %v11717_v39 }
 0x687   : > { %v4100_v62 = vpop.f32.mrf.mxu2  ;;  %v3924_v29 = vpop.f32.mrf.mxu0 }
 0x688   : > { %v4101_v10 = vadd.f32 %v4100_v62, %v4012_v19  ;;  %v4189_v7 = vpop.f32.mrf.mxu3  ;;  %v4013_v36 = vpop.f32.mrf.mxu1 }
 0x689   : > { %v4014_v52 = vadd.f32 %v4013_v36, %v3924_v29 }
 0x68a   : > { %v8682_v37 = vadd.f32 %v4189_v7, %v4101_v10 }
 0x68f   : > { %v4102_v18 = vpop.f32.mrf.mxu2  ;;  %v3927_v41 = vpop.f32.mrf.mxu0 }
 0x690   : > { %v4103_v9 = vadd.f32 %v4102_v18, %v4014_v52  ;;  %v4191_v31 = vpop.f32.mrf.mxu3  ;;  %v4016_v11 = vpop.f32.mrf.mxu1 }
 0x691   : > { %v4017_v51 = vadd.f32 %v4016_v11, %v3927_v41 }
 0x692   : > { %v8684_v47 = vadd.f32 %v4191_v31, %v4103_v9  ;;  %4242 = vmatmul.bf16.gmra.mxu0 %v7346_v12 }
 0x693   : > { %4331 = vmatmul.bf16.gmra.mxu1 %v7348_v13 }
 0x694   : > { %4420 = vmatmul.bf16.gmra.mxu2 %v7350_v14 }
 0x695   : > { %4509 = vmatmul.bf16.gmra.mxu3 %v7352_v15 }
 0x697   : > { %v4105_v8 = vpop.f32.mrf.mxu2  ;;  %v3929_v62 = vpop.f32.mrf.mxu0 }
 0x698   : > { %v4106_v19 = vadd.f32 %v4105_v8, %v4017_v51  ;;  %v4194_v39 = vpop.f32.mrf.mxu3  ;;  %v4018_v10 = vpop.f32.mrf.mxu1 }
 0x699   : > { %v4019_v7 = vadd.f32 %v4018_v10, %v3929_v62 }
 0x69a   : > { %v8690_v18 = vadd.f32 %v4194_v39, %v4106_v19 }
 0x69f   : > { %v4107_v29 = vpop.f32.mrf.mxu2  ;;  %v3932_v9 = vpop.f32.mrf.mxu0 }
 0x6a0   : > { %v4108_v36 = vadd.f32 %v4107_v29, %v4019_v7  ;;  %v4196_v52 = vpop.f32.mrf.mxu3  ;;  %v4021_v31 = vpop.f32.mrf.mxu1 }
 0x6a1   : > { %v4022_v13 = vadd.f32 %v4021_v31, %v3932_v9 }
 0x6a2   : > { %v8692_v12 = vadd.f32 %v4196_v52, %v4108_v36  ;;  %4247 = vmatmul.bf16.gmra.mxu0 %v7366_v24 }
 0x6a3   : > { %4336 = vmatmul.bf16.gmra.mxu1 %v7368_v25 }
 0x6a4   : > { %4425 = vmatmul.bf16.gmra.mxu2 %v7370_v26 }
 0x6a5   : > { %4514 = vmatmul.bf16.gmra.mxu3 %v7372_v27 }
 0x6a7   : > { %v4110_v14 = vpop.f32.mrf.mxu2  ;;  %v3934_v11 = vpop.f32.mrf.mxu0 }
 0x6a8   : > { %v4111_v15 = vadd.f32 %v4110_v14, %v4022_v13  ;;  %v4199_v41 = vpop.f32.mrf.mxu3  ;;  %v4023_v51 = vpop.f32.mrf.mxu1 }
 0x6a9   : > { %v4024_v19 = vadd.f32 %v4023_v51, %v3934_v11 }
 0x6aa   : > { %v8698_v8 = vadd.f32 %v4199_v41, %v4111_v15 }
 0x6af   : > { %v4112_v39 = vpop.f32.mrf.mxu2  ;;  %v3937_v7 = vpop.f32.mrf.mxu0 }
 0x6b0   : > { %v4113_v62 = vadd.f32 %v4112_v39, %v4024_v19  ;;  %v4201_v10 = vpop.f32.mrf.mxu3  ;;  %v4026_v29 = vpop.f32.mrf.mxu1 }
 0x6b1   : > { %v4027_v25 = vadd.f32 %v4026_v29, %v3937_v7 }
 0x6b2   : > { %v8700_v24 = vadd.f32 %v4201_v10, %v4113_v62  ;;  %4252 = vmatmul.bf16.gmra.mxu0 %v7394_v49 }
 0x6b3   : > { %4341 = vmatmul.bf16.gmra.mxu1 %v7396_v50 }
 0x6b4   : > { %4430 = vmatmul.bf16.gmra.mxu2 %v7398_v54 }
 0x6b5   : > { %4519 = vmatmul.bf16.gmra.mxu3 %v7400_v55 }
 0x6b7   : > { %v4115_v26 = vpop.f32.mrf.mxu2  ;;  %v3939_v52 = vpop.f32.mrf.mxu0 }
 0x6b8   : > { %v4116_v27 = vadd.f32 %v4115_v26, %v4027_v25  ;;  %v4204_v36 = vpop.f32.mrf.mxu3  ;;  %v4028_v9 = vpop.f32.mrf.mxu1 }
 0x6b9   : > { %v4029_v13 = vadd.f32 %v4028_v9, %v3939_v52 }
 0x6ba   : > { %v8706_v31 = vadd.f32 %v4204_v36, %v4116_v27 }
 0x6bf   : > { %v4117_v14 = vpop.f32.mrf.mxu2  ;;  %v3942_v11 = vpop.f32.mrf.mxu0 }
 0x6c0   : > { %v4118_v15 = vadd.f32 %v4117_v14, %v4029_v13  ;;  %v4206_v41 = vpop.f32.mrf.mxu3  ;;  %v4031_v51 = vpop.f32.mrf.mxu1 }
 0x6c1   : > { %v4032_v50 = vadd.f32 %v4031_v51, %v3942_v11 }
 0x6c2   : > { %v8708_v49 = vadd.f32 %v4206_v41, %v4118_v15  ;;  %4257 = vmatmul.bf16.gmra.mxu0 %v7414_v0 }
 0x6c3   : > { %4346 = vmatmul.bf16.gmra.mxu1 %v7416_v1 }
 0x6c4   : > { %4435 = vmatmul.bf16.gmra.mxu2 %v7418_v2 }
 0x6c5   : > { %4524 = vmatmul.bf16.gmra.mxu3 %v7420_v3 }
 0x6c7   : > { %v4120_v54 = vpop.f32.mrf.mxu2  ;;  %v3944_v39 = vpop.f32.mrf.mxu0 }
 0x6c8   : > { %v4121_v55 = vadd.f32 %v4120_v54, %v4032_v50  ;;  %v4209_v19 = vpop.f32.mrf.mxu3  ;;  %v4033_v62 = vpop.f32.mrf.mxu1 }
 0x6c9   : > { %v4034_v7 = vadd.f32 %v4033_v62, %v3944_v39 }
 0x6ca   : > { %v8714_v10 = vadd.f32 %v4209_v19, %v4121_v55 }
 0x6cf   : > { %v4122_v29 = vpop.f32.mrf.mxu2  ;;  %v3947_v27 = vpop.f32.mrf.mxu0 }
 0x6d0   : > { %v4123_v25 = vadd.f32 %v4122_v29, %v4034_v7  ;;  %v4211_v26 = vpop.f32.mrf.mxu3  ;;  %v4036_v36 = vpop.f32.mrf.mxu1 }
 0x6d1   : > { %v4037_v1 = vadd.f32 %v4036_v36, %v3947_v27 }
 0x6d2   : > { %v8716_v0 = vadd.f32 %v4211_v26, %v4123_v25  ;;  %4262 = vmatmul.bf16.gmra.mxu0 %v7442_v32 }
 0x6d3   : > { %4351 = vmatmul.bf16.gmra.mxu1 %v7444_v33 }
 0x6d4   : > { %4440 = vmatmul.bf16.gmra.mxu2 %v7446_v34 }
 0x6d5   : > { %4529 = vmatmul.bf16.gmra.mxu3 %v7448_v35 }
 0x6d7   : > { %v4125_v2 = vpop.f32.mrf.mxu2  ;;  %v3949_v9 = vpop.f32.mrf.mxu0 }
 0x6d8   : > { %v4126_v3 = vadd.f32 %v4125_v2, %v4037_v1  ;;  %v4214_v52 = vpop.f32.mrf.mxu3  ;;  %v4038_v13 = vpop.f32.mrf.mxu1 }
 0x6d9   : > { %v4039_v15 = vadd.f32 %v4038_v13, %v3949_v9 }
 0x6da   : > { %v8722_v14 = vadd.f32 %v4214_v52, %v4126_v3 }
 0x6df   : > { %v4127_v41 = vpop.f32.mrf.mxu2  ;;  %v3952_v50 = vpop.f32.mrf.mxu0 }
 0x6e0   : > { %v4128_v11 = vadd.f32 %v4127_v41, %v4039_v15  ;;  %v4216_v51 = vpop.f32.mrf.mxu3  ;;  %v4041_v54 = vpop.f32.mrf.mxu1 }
 0x6e1   : > { %v4042_v33 = vadd.f32 %v4041_v54, %v3952_v50 }
 0x6e2   : > { %v8724_v32 = vadd.f32 %v4216_v51, %v4128_v11  ;;  %4267 = vmatmul.bf16.gmra.mxu0 %v7462_v44 }
 0x6e3   : > { %4356 = vmatmul.bf16.gmra.mxu1 %v7464_v45 }
 0x6e4   : > { %4445 = vmatmul.bf16.gmra.mxu2 %v7466_v46 }
 0x6e5   : > { %4534 = vmatmul.bf16.gmra.mxu3 %v7468_v48 }
 0x6e7   : > { %v4130_v34 = vpop.f32.mrf.mxu2  ;;  %v3954_v19 = vpop.f32.mrf.mxu0 }
 0x6e8   : > { %v4131_v35 = vadd.f32 %v4130_v34, %v4042_v33  ;;  %v4219_v55 = vpop.f32.mrf.mxu3  ;;  %v4043_v39 = vpop.f32.mrf.mxu1 }
 0x6e9   : > { %v4044_v7 = vadd.f32 %v4043_v39, %v3954_v19 }
 0x6ea   : > { %v8730_v62 = vadd.f32 %v4219_v55, %v4131_v35 }
 0x6ef   : > { %v4132_v29 = vpop.f32.mrf.mxu2  ;;  %v3957_v27 = vpop.f32.mrf.mxu0 }
 0x6f0   : > { %v4133_v25 = vadd.f32 %v4132_v29, %v4044_v7  ;;  %v4221_v26 = vpop.f32.mrf.mxu3  ;;  %v4046_v36 = vpop.f32.mrf.mxu1 }
 0x6f1   : > { %v4047_v45 = vadd.f32 %v4046_v36, %v3957_v27 }
 0x6f2   : > { %v8732_v44 = vadd.f32 %v4221_v26, %v4133_v25  ;;  %4272 = vmatmul.bf16.gmra.mxu0 %v7490_v20 }
 0x6f3   : > { %4361 = vmatmul.bf16.gmra.mxu1 %v7492_v21 }
 0x6f4   : > { %4450 = vmatmul.bf16.gmra.mxu2 %v7494_v22 }
 0x6f5   : > { %4539 = vmatmul.bf16.gmra.mxu3 %v7496_v23 }
 0x6f7   : > { %v4135_v46 = vpop.f32.mrf.mxu2  ;;  %v3959_v2 = vpop.f32.mrf.mxu0 }
 0x6f8   : > { %v4136_v48 = vadd.f32 %v4135_v46, %v4047_v45  ;;  %v4224_v1 = vpop.f32.mrf.mxu3  ;;  %v4048_v3 = vpop.f32.mrf.mxu1 }
 0x6f9   : > { %v4049_v9 = vadd.f32 %v4048_v3, %v3959_v2 }
 0x6fa   : > { %v8738_v52 = vadd.f32 %v4224_v1, %v4136_v48 }
 0x6fc   : > { %11718 = vst [vmem:[#allocation3_spill] sm:$0xff] %v8738_v52 }
 0x6ff   : > { %v4137_v13 = vpop.f32.mrf.mxu2  ;;  %v4238_v11 = vpop.f32.mrf.mxu0 }
 0x700   : > { %v4138_v15 = vadd.f32 %v4137_v13, %v4049_v9  ;;  %v4226_v41 = vpop.f32.mrf.mxu3  ;;  %v4327_v51 = vpop.f32.mrf.mxu1 }
 0x701   : > { %v4328_v21 = vadd.f32 %v4327_v51, %v4238_v11 }
 0x702   : > { %v8740_v20 = vadd.f32 %v4226_v41, %v4138_v15  ;;  %4277 = vmatmul.bf16.gmra.mxu0 %v7510_v40 }
 0x703   : > { %4366 = vmatmul.bf16.gmra.mxu1 %v7512_v42 }
 0x704   : > { %11719 = vst [vmem:[#allocation4_spill] sm:$0xff] %v8740_v20  ;;  %4455 = vmatmul.bf16.gmra.mxu2 %v7514_v43 }
 0x705   : > { %4544 = vmatmul.bf16.gmra.mxu3 %v7516_v57 }
 0x707   : > { %v4416_v22 = vpop.f32.mrf.mxu2  ;;  %v4240_v54 = vpop.f32.mrf.mxu0 }
 0x708   : > { %v4417_v23 = vadd.f32 %v4416_v22, %v4328_v21  ;;  %v4505_v50 = vpop.f32.mrf.mxu3  ;;  %v4329_v33 = vpop.f32.mrf.mxu1 }
 0x709   : > { %v4330_v35 = vadd.f32 %v4329_v33, %v4240_v54 }
 0x70a   : > { %v8746_v34 = vadd.f32 %v4505_v50, %v4417_v23 }
 0x70f   : > { %v4418_v55 = vpop.f32.mrf.mxu2  ;;  %v4243_v7 = vpop.f32.mrf.mxu0 }
 0x710   : > { %v4419_v19 = vadd.f32 %v4418_v55, %v4330_v35  ;;  %v4507_v39 = vpop.f32.mrf.mxu3  ;;  %v4332_v29 = vpop.f32.mrf.mxu1  ;;  %v11722_v35 = vld [vmem:[#allocation12_spill] sm:$0xff]  ;;  %v11723_v55 = vld [vmem:[#allocation13_spill] sm:$0xff] }
 0x711   : > { %v4333_v42 = vadd.f32 %v4332_v29, %v4243_v7 }
 0x712   : > { %v8748_v40 = vadd.f32 %v4507_v39, %v4419_v19  ;;  %4282 = vmatmul.bf16.gmra.mxu0 %v7540_v59  ;;  %v11724_v19 = vld [vmem:[#allocation14_spill] sm:$0xff]  ;;  %v11725_v39 = vld [vmem:[#allocation15_spill] sm:$0xff] }
 0x713   : > { %4371 = vmatmul.bf16.gmra.mxu1 %v7542_v63 }
 0x714   : > { %4460 = vmatmul.bf16.gmra.mxu2 %v7544_v4  ;;  %v11720_v4 = vld [vmem:[#allocation8_spill] sm:$0xff] }
 0x715   : > { %4549 = vmatmul.bf16.gmra.mxu3 %v7546_v6  ;;  %v11721_v6 = vld [vmem:[#allocation9_spill] sm:$0xff] }
 0x717   : > { %v4421_v43 = vpop.f32.mrf.mxu2  ;;  %v4245_v26 = vpop.f32.mrf.mxu0 }
 0x718   : > { %v4422_v57 = vadd.f32 %v4421_v43, %v4333_v42  ;;  %v4510_v25 = vpop.f32.mrf.mxu3  ;;  %v4334_v27 = vpop.f32.mrf.mxu1 }
 0x719   : > { %v4335_v45 = vadd.f32 %v4334_v27, %v4245_v26 }
 0x71a   : > { %v8754_v36 = vadd.f32 %v4510_v25, %v4422_v57 }
 0x71f   : > { %v4423_v46 = vpop.f32.mrf.mxu2  ;;  %v4248_v2 = vpop.f32.mrf.mxu0 }
 0x720   : > { %v4424_v48 = vadd.f32 %v4423_v46, %v4335_v45  ;;  %v4512_v1 = vpop.f32.mrf.mxu3  ;;  %v4337_v3 = vpop.f32.mrf.mxu1 }
 0x721   : > { %v4338_v63 = vadd.f32 %v4337_v3, %v4248_v2 }
 0x722   : > { %v8756_v59 = vadd.f32 %v4512_v1, %v4424_v48  ;;  %4287 = vmatmul.bf16.gmra.mxu0 %v7564_v58 }
 0x723   : > { %4376 = vmatmul.bf16.gmra.mxu1 %v7566_v5 }
 0x724   : > { %4465 = vmatmul.bf16.gmra.mxu2 %v11720_v4  ;;  %v11727_v4 = vld [vmem:[#allocation19_spill] sm:$0xff] }
 0x725   : > { %4554 = vmatmul.bf16.gmra.mxu3 %v11721_v6  ;;  %v11728_v6 = vld [vmem:[#allocation20_spill] sm:$0xff] }
 0x727   : > { %v4426_v9 = vpop.f32.mrf.mxu2  ;;  %v4250_v41 = vpop.f32.mrf.mxu0 }
 0x728   : > { %v4427_v13 = vadd.f32 %v4426_v9, %v4338_v63  ;;  %v4515_v15 = vpop.f32.mrf.mxu3  ;;  %v4339_v11 = vpop.f32.mrf.mxu1  ;;  %v11726_v63 = vld [vmem:[#allocation18_spill] sm:$0xff]  ;;  %v11729_v9 = vld [vmem:[#allocation21_spill] sm:$0xff] }
 0x729   : > { %v4340_v21 = vadd.f32 %v4339_v11, %v4250_v41 }
 0x72a   : > { %v8762_v51 = vadd.f32 %v4515_v15, %v4427_v13 }
 0x72f   : > { %v4428_v22 = vpop.f32.mrf.mxu2  ;;  %v4253_v54 = vpop.f32.mrf.mxu0 }
 0x730   : > { %v4429_v23 = vadd.f32 %v4428_v22, %v4340_v21  ;;  %v4517_v50 = vpop.f32.mrf.mxu3  ;;  %v4342_v33 = vpop.f32.mrf.mxu1 }
 0x731   : > { %v4343_v5 = vadd.f32 %v4342_v33, %v4253_v54 }
 0x732   : > { %v8764_v58 = vadd.f32 %v4517_v50, %v4429_v23  ;;  %4292 = vmatmul.bf16.gmra.mxu0 %v11722_v35 }
 0x733   : > { %4381 = vmatmul.bf16.gmra.mxu1 %v11723_v55 }
 0x734   : > { %4470 = vmatmul.bf16.gmra.mxu2 %v11724_v19 }
 0x735   : > { %4559 = vmatmul.bf16.gmra.mxu3 %v11725_v39  ;;  %v11730_v39 = vld [vmem:[#allocation26_spill] sm:$0xff] }
 0x737   : > { %v4431_v7 = vpop.f32.mrf.mxu2  ;;  %v4255_v43 = vpop.f32.mrf.mxu0 }
 0x738   : > { %v4432_v29 = vadd.f32 %v4431_v7, %v4343_v5  ;;  %v4520_v42 = vpop.f32.mrf.mxu3  ;;  %v4344_v57 = vpop.f32.mrf.mxu1  ;;  %v11731_v7 = vld [vmem:[#allocation27_spill] sm:$0xff] }
 0x739   : > { %v4345_v26 = vadd.f32 %v4344_v57, %v4255_v43 }
 0x73a   : > { %v8770_v25 = vadd.f32 %v4520_v42, %v4432_v29 }
 0x73f   : > { %v4433_v27 = vpop.f32.mrf.mxu2  ;;  %v4258_v48 = vpop.f32.mrf.mxu0 }
 0x740   : > { %v4434_v45 = vadd.f32 %v4433_v27, %v4345_v26  ;;  %v4522_v46 = vpop.f32.mrf.mxu3  ;;  %v4347_v1 = vpop.f32.mrf.mxu1 }
 0x741   : > { %v4348_v3 = vadd.f32 %v4347_v1, %v4258_v48 }
 0x742   : > { %v8772_v2 = vadd.f32 %v4522_v46, %v4434_v45  ;;  %4297 = vmatmul.bf16.gmra.mxu0 %v11726_v63 }
 0x743   : > { %4386 = vmatmul.bf16.gmra.mxu1 %v11727_v4  ;;  %v11732_v4 = vld [vmem:[#allocation31_spill] sm:$0xff] }
 0x744   : > { %4475 = vmatmul.bf16.gmra.mxu2 %v11728_v6 }
 0x745   : > { %4564 = vmatmul.bf16.gmra.mxu3 %v11729_v9 }
 0x747   : > { %v4436_v13 = vpop.f32.mrf.mxu2  ;;  %v4260_v11 = vpop.f32.mrf.mxu0 }
 0x748   : > { %v4437_v15 = vadd.f32 %v4436_v13, %v4348_v3  ;;  %v4525_v41 = vpop.f32.mrf.mxu3  ;;  %v4349_v21 = vpop.f32.mrf.mxu1 }
 0x749   : > { %v4350_v23 = vadd.f32 %v4349_v21, %v4260_v11 }
 0x74a   : > { %v8778_v22 = vadd.f32 %v4525_v41, %v4437_v15 }
 0x74f   : > { %v4438_v50 = vpop.f32.mrf.mxu2  ;;  %v4263_v5 = vpop.f32.mrf.mxu0 }
 0x750   : > { %v4439_v54 = vadd.f32 %v4438_v50, %v4350_v23  ;;  %v4527_v33 = vpop.f32.mrf.mxu3  ;;  %v4352_v35 = vpop.f32.mrf.mxu1 }
 0x751   : > { %v4353_v19 = vadd.f32 %v4352_v35, %v4263_v5 }
 0x752   : > { %v8780_v55 = vadd.f32 %v4527_v33, %v4439_v54  ;;  %4302 = vmatmul.bf16.gmra.mxu0 %v11703_v38 }
 0x753   : > { %4391 = vmatmul.bf16.gmra.mxu1 %v11704_v28 }
 0x754   : > { %4480 = vmatmul.bf16.gmra.mxu2 %v11730_v39 }
 0x755   : > { %4569 = vmatmul.bf16.gmra.mxu3 %v11731_v7 }
 0x757   : > { %v4441_v29 = vpop.f32.mrf.mxu2  ;;  %v4265_v57 = vpop.f32.mrf.mxu0 }
 0x758   : > { %v4442_v42 = vadd.f32 %v4441_v29, %v4353_v19  ;;  %v4530_v43 = vpop.f32.mrf.mxu3  ;;  %v4354_v26 = vpop.f32.mrf.mxu1 }
 0x759   : > { %v4355_v45 = vadd.f32 %v4354_v26, %v4265_v57 }
 0x75a   : > { %v8786_v27 = vadd.f32 %v4530_v43, %v4442_v42 }
 0x75f   : > { %v4443_v46 = vpop.f32.mrf.mxu2  ;;  %v4268_v3 = vpop.f32.mrf.mxu0 }
 0x760   : > { %v4444_v48 = vadd.f32 %v4443_v46, %v4355_v45  ;;  %v4532_v1 = vpop.f32.mrf.mxu3  ;;  %v4357_v63 = vpop.f32.mrf.mxu1 }
 0x761   : > { %v4358_v28 = vadd.f32 %v4357_v63, %v4268_v3 }
 0x762   : > { %v8788_v38 = vadd.f32 %v4532_v1, %v4444_v48  ;;  %4307 = vmatmul.bf16.gmra.mxu0 %v11709_v30 }
 0x763   : > { %4396 = vmatmul.bf16.gmra.mxu1 %v11732_v4 }
 0x764   : > { %4485 = vmatmul.bf16.gmra.mxu2 %v11711_v61  ;;  %v11733_v61 = vld [vmem:[#allocation36_spill] sm:$0xff] }
 0x765   : > { %4574 = vmatmul.bf16.gmra.mxu3 %v11712_v53 }
 0x767   : > { %v4446_v6 = vpop.f32.mrf.mxu2  ;;  %v4270_v15 = vpop.f32.mrf.mxu0 }
 0x768   : > { %v4447_v9 = vadd.f32 %v4446_v6, %v4358_v28  ;;  %v4535_v13 = vpop.f32.mrf.mxu3  ;;  %v4359_v41 = vpop.f32.mrf.mxu1 }
 0x769   : > { %v4360_v21 = vadd.f32 %v4359_v41, %v4270_v15 }
 0x76a   : > { %v8794_v11 = vadd.f32 %v4535_v13, %v4447_v9 }
 0x76f   : > { %v4448_v23 = vpop.f32.mrf.mxu2  ;;  %v4273_v33 = vpop.f32.mrf.mxu0 }
 0x770   : > { %v4449_v50 = vadd.f32 %v4448_v23, %v4360_v21  ;;  %v4537_v54 = vpop.f32.mrf.mxu3  ;;  %v4362_v5 = vpop.f32.mrf.mxu1 }
 0x771   : > { %v4363_v35 = vadd.f32 %v4362_v5, %v4273_v33 }
 0x772   : > { %v8796_v30 = vadd.f32 %v4537_v54, %v4449_v50  ;;  %4312 = vmatmul.bf16.gmra.mxu0 %v7708_v16 }
 0x773   : > { %4401 = vmatmul.bf16.gmra.mxu1 %v7710_v56 }
 0x774   : > { %4490 = vmatmul.bf16.gmra.mxu2 %v7712_v17 }
 0x775   : > { %4579 = vmatmul.bf16.gmra.mxu3 %v11733_v61 }
 0x777   : > { %v4451_v53 = vpop.f32.mrf.mxu2  ;;  %v4275_v7 = vpop.f32.mrf.mxu0 }
 0x778   : > { %v4452_v19 = vadd.f32 %v4451_v53, %v4363_v35  ;;  %v4540_v39 = vpop.f32.mrf.mxu3  ;;  %v4364_v29 = vpop.f32.mrf.mxu1 }
 0x779   : > { %v4365_v43 = vadd.f32 %v4364_v29, %v4275_v7 }
 0x77a   : > { %v8802_v42 = vadd.f32 %v4540_v39, %v4452_v19 }
 0x77f   : > { %v4453_v57 = vpop.f32.mrf.mxu2  ;;  %v4278_v46 = vpop.f32.mrf.mxu0 }
 0x780   : > { %v4454_v26 = vadd.f32 %v4453_v57, %v4365_v43  ;;  %v4542_v45 = vpop.f32.mrf.mxu3  ;;  %v4367_v48 = vpop.f32.mrf.mxu1 }
 0x781   : > { %v4368_v56 = vadd.f32 %v4367_v48, %v4278_v46 }
 0x782   : > { %v8804_v16 = vadd.f32 %v4542_v45, %v4454_v26 }
 0x787   : > { %v4456_v1 = vpop.f32.mrf.mxu2  ;;  %v4280_v63 = vpop.f32.mrf.mxu0 }
 0x788   : > { %v4457_v17 = vadd.f32 %v4456_v1, %v4368_v56  ;;  %v4545_v3 = vpop.f32.mrf.mxu3  ;;  %v4369_v28 = vpop.f32.mrf.mxu1 }
 0x789   : > { %v4370_v6 = vadd.f32 %v4369_v28, %v4280_v63 }
 0x78a   : > { %v8806_v4 = vadd.f32 %v4545_v3, %v4457_v17 }
 0x78f   : > { %v4458_v9 = vpop.f32.mrf.mxu2  ;;  %v4283_v41 = vpop.f32.mrf.mxu0 }
 0x790   : > { %v4459_v13 = vadd.f32 %v4458_v9, %v4370_v6  ;;  %v4547_v15 = vpop.f32.mrf.mxu3  ;;  %v4372_v21 = vpop.f32.mrf.mxu1 }
 0x791   : > { %v4373_v50 = vadd.f32 %v4372_v21, %v4283_v41 }
 0x792   : > { %v8808_v23 = vadd.f32 %v4547_v15, %v4459_v13 }
 0x797   : > { %v4461_v54 = vpop.f32.mrf.mxu2  ;;  %v4285_v35 = vpop.f32.mrf.mxu0 }
 0x798   : > { %v4462_v33 = vadd.f32 %v4461_v54, %v4373_v50  ;;  %v4550_v5 = vpop.f32.mrf.mxu3  ;;  %v4374_v61 = vpop.f32.mrf.mxu1 }
 0x799   : > { %v4375_v19 = vadd.f32 %v4374_v61, %v4285_v35 }
 0x79a   : > { %v8810_v53 = vadd.f32 %v4550_v5, %v4462_v33 }
 0x79f   : > { %v4463_v39 = vpop.f32.mrf.mxu2  ;;  %v4288_v43 = vpop.f32.mrf.mxu0 }
 0x7a0   : > { %v4464_v7 = vadd.f32 %v4463_v39, %v4375_v19  ;;  %v4552_v29 = vpop.f32.mrf.mxu3  ;;  %v4377_v57 = vpop.f32.mrf.mxu1 }
 0x7a1   : > { %v4378_v45 = vadd.f32 %v4377_v57, %v4288_v43 }
 0x7a2   : > { %v8812_v26 = vadd.f32 %v4552_v29, %v4464_v7 }
 0x7a7   : > { %v4466_v46 = vpop.f32.mrf.mxu2  ;;  %v4290_v1 = vpop.f32.mrf.mxu0 }
 0x7a8   : > { %v4467_v48 = vadd.f32 %v4466_v46, %v4378_v45  ;;  %v4555_v56 = vpop.f32.mrf.mxu3  ;;  %v4379_v17 = vpop.f32.mrf.mxu1 }
 0x7a9   : > { %v4380_v63 = vadd.f32 %v4379_v17, %v4290_v1 }
 0x7aa   : > { %v8814_v3 = vadd.f32 %v4555_v56, %v4467_v48 }
 0x7af   : > { %v4468_v28 = vpop.f32.mrf.mxu2  ;;  %v4293_v13 = vpop.f32.mrf.mxu0 }
 0x7b0   : > { %v4469_v6 = vadd.f32 %v4468_v28, %v4380_v63  ;;  %v4557_v9 = vpop.f32.mrf.mxu3  ;;  %v4382_v15 = vpop.f32.mrf.mxu1 }
 0x7b1   : > { %v4383_v21 = vadd.f32 %v4382_v15, %v4293_v13 }
 0x7b2   : > { %v8816_v41 = vadd.f32 %v4557_v9, %v4469_v6 }
 0x7b7   : > { %v4471_v50 = vpop.f32.mrf.mxu2  ;;  %v4295_v5 = vpop.f32.mrf.mxu0 }
 0x7b8   : > { %v4472_v54 = vadd.f32 %v4471_v50, %v4383_v21  ;;  %v4560_v33 = vpop.f32.mrf.mxu3  ;;  %v4384_v35 = vpop.f32.mrf.mxu1 }
 0x7b9   : > { %v4385_v19 = vadd.f32 %v4384_v35, %v4295_v5 }
 0x7ba   : > { %v8818_v61 = vadd.f32 %v4560_v33, %v4472_v54 }
 0x7bf   : > { %v4473_v39 = vpop.f32.mrf.mxu2  ;;  %v4298_v43 = vpop.f32.mrf.mxu0 }
 0x7c0   : > { %v4474_v7 = vadd.f32 %v4473_v39, %v4385_v19  ;;  %v4562_v29 = vpop.f32.mrf.mxu3  ;;  %v4387_v57 = vpop.f32.mrf.mxu1 }
 0x7c1   : > { %v4388_v46 = vadd.f32 %v4387_v57, %v4298_v43 }
 0x7c2   : > { %v8820_v45 = vadd.f32 %v4562_v29, %v4474_v7 }
 0x7c7   : > { %v4476_v48 = vpop.f32.mrf.mxu2  ;;  %v4300_v17 = vpop.f32.mrf.mxu0 }
 0x7c8   : > { %v4477_v56 = vadd.f32 %v4476_v48, %v4388_v46  ;;  %v4565_v1 = vpop.f32.mrf.mxu3  ;;  %v4389_v63 = vpop.f32.mrf.mxu1 }
 0x7c9   : > { %v4390_v6 = vadd.f32 %v4389_v63, %v4300_v17 }
 0x7ca   : > { %v8822_v28 = vadd.f32 %v4565_v1, %v4477_v56 }
 0x7cf   : > { %v4478_v9 = vpop.f32.mrf.mxu2  ;;  %v4303_v21 = vpop.f32.mrf.mxu0 }
 0x7d0   : > { %v4479_v13 = vadd.f32 %v4478_v9, %v4390_v6  ;;  %v4567_v15 = vpop.f32.mrf.mxu3  ;;  %v4392_v50 = vpop.f32.mrf.mxu1 }
 0x7d1   : > { %v4393_v33 = vadd.f32 %v4392_v50, %v4303_v21 }
 0x7d2   : > { %v8824_v54 = vadd.f32 %v4567_v15, %v4479_v13 }
 0x7d7   : > { %v4481_v5 = vpop.f32.mrf.mxu2  ;;  %v4305_v39 = vpop.f32.mrf.mxu0 }
 0x7d8   : > { %v4482_v35 = vadd.f32 %v4481_v5, %v4393_v33  ;;  %v4570_v19 = vpop.f32.mrf.mxu3  ;;  %v4394_v7 = vpop.f32.mrf.mxu1 }
 0x7d9   : > { %v4395_v43 = vadd.f32 %v4394_v7, %v4305_v39 }
 0x7da   : > { %v8826_v29 = vadd.f32 %v4570_v19, %v4482_v35 }
 0x7df   : > { %v4483_v57 = vpop.f32.mrf.mxu2  ;;  %v4308_v56 = vpop.f32.mrf.mxu0 }
 0x7e0   : > { %v4484_v46 = vadd.f32 %v4483_v57, %v4395_v43  ;;  %v4572_v48 = vpop.f32.mrf.mxu3  ;;  %v4397_v1 = vpop.f32.mrf.mxu1 }
 0x7e1   : > { %v4398_v63 = vadd.f32 %v4397_v1, %v4308_v56 }
 0x7e2   : > { %v8828_v17 = vadd.f32 %v4572_v48, %v4484_v46 }
 0x7e7   : > { %v4486_v6 = vpop.f32.mrf.mxu2  ;;  %v4310_v15 = vpop.f32.mrf.mxu0 }
 0x7e8   : > { %v4487_v9 = vadd.f32 %v4486_v6, %v4398_v63  ;;  %v4575_v13 = vpop.f32.mrf.mxu3  ;;  %v4399_v21 = vpop.f32.mrf.mxu1 }
 0x7e9   : > { %v4400_v33 = vadd.f32 %v4399_v21, %v4310_v15 }
 0x7ea   : > { %v8830_v50 = vadd.f32 %v4575_v13, %v4487_v9 }
 0x7ef   : > { %v4488_v5 = vpop.f32.mrf.mxu2  ;;  %v4313_v39 = vpop.f32.mrf.mxu0 }
 0x7f0   : > { %v4489_v35 = vadd.f32 %v4488_v5, %v4400_v33  ;;  %v4577_v19 = vpop.f32.mrf.mxu3  ;;  %v4402_v7 = vpop.f32.mrf.mxu1 }
 0x7f1   : > { %v4403_v57 = vadd.f32 %v4402_v7, %v4313_v39 }
 0x7f2   : > { %v8832_v43 = vadd.f32 %v4577_v19, %v4489_v35 }
 0x7f7   : > { %v4491_v20 = vpop.f32.mrf.mxu2  ;;  %v4315_v1 = vpop.f32.mrf.mxu0 }
 0x7f8   : > { %v4492_v46 = vadd.f32 %v4491_v20, %v4403_v57  ;;  %v4580_v48 = vpop.f32.mrf.mxu3  ;;  %v4404_v63 = vpop.f32.mrf.mxu1 }
 0x7f9   : > { %v4405_v6 = vadd.f32 %v4404_v63, %v4315_v1 }
 0x7fa   : > { %v8834_v56 = vadd.f32 %v4580_v48, %v4492_v46 }
 0x7fe   : > { %4588 = sbr.rel (%p6699_p9) target bundleno = 2275 (0x8e3), region = 55 }
 0x7ff   : > { %v4493_v52 = vpop.f32.mrf.mxu2 }
 0x800   : > { %v4494_v9 = vadd.f32 %v4493_v52, %v4405_v6  ;;  %v4582_v13 = vpop.f32.mrf.mxu3 }
 0x802   : > { %v8836_v15 = vadd.f32 %v4582_v13, %v4494_v9 }
 0x803   : > { %v11734_v21 = vld [vmem:[#allocation5_spill] sm:$0xff]  ;;  %v11735_v20 = vld [vmem:[#allocation56_spill] sm:$0xff]  ;;  %vm4595_vm0 = vcmask 130048   ;;  %v11740_v19 = vld [vmem:[#allocation6_spill] sm:$0xff]  ;;  %4700 = vst [vmem:[%s11380_s2 + $0x370] sm:$0xff] %v8676_v60 }
 0x804   : > { %4589 = vst [vmem:[%s11380_s2] sm:$0xff] %v11734_v21  ;;  %v11736_v33 = vld [vmem:[#allocation88_spill] sm:$0xff]  ;;  %v11741_v39 = vld [vmem:[#allocation57_spill] sm:$0xff]  ;;  %v11746_v1 = vld [vmem:[#allocation7_spill] sm:$0xff] }
 0x805   : > { %4590 = vst [vmem:[%s11380_s2 + $0x8] sm:$0xff] %v11735_v20  ;;  %v11737_v52 = vld [vmem:[#allocation120_spill] sm:$0xff]  ;;  %v11742_v7 = vld [vmem:[#allocation89_spill] sm:$0xff]  ;;  %v11747_v63 = vld [vmem:[#allocation58_spill] sm:$0xff] }
 0x806   : > { %4591 = vst [vmem:[%s11380_s2 + $0x10] sm:$0xff] %v11736_v33  ;;  %v11738_v5 = vld [vmem:[#allocation152_spill] sm:$0xff]  ;;  %v11743_v57 = vld [vmem:[#allocation121_spill] sm:$0xff]  ;;  %v11748_v6 = vld [vmem:[#allocation90_spill] sm:$0xff] }
 0x807   : > { %4592 = vst [vmem:[%s11380_s2 + $0x18] sm:$0xff] %v11737_v52  ;;  %v11739_v35 = vld [vmem:[#allocation184_spill] sm:$0xff]  ;;  %v11744_v46 = vld [vmem:[#allocation153_spill] sm:$0xff]  ;;  %v11749_v9 = vld [vmem:[#allocation122_spill] sm:$0xff] }
 0x808   : > { %4593 = vst [vmem:[%s11380_s2 + $0x20] sm:$0xff] %v11738_v5  ;;  %v11745_v48 = vld [vmem:[#allocation185_spill] sm:$0xff]  ;;  %v11750_v13 = vld [vmem:[#allocation154_spill] sm:$0xff]  ;;  %v11753_v33 = vld [vmem:[#allocation59_spill] sm:$0xff] }
 0x809   : > { %4594 = vst [vmem:[%s11380_s2 + $0x28] sm:$0xff] %v11739_v35  ;;  %v11751_v21 = vld [vmem:[#allocation186_spill] sm:$0xff]  ;;  %v11754_v52 = vld [vmem:[#allocation91_spill] sm:$0xff] }
 0x80a   : > { %4596 = vst.msk [vmem:[%s11380_s2 + $0x30] sm:$0xff] %vm4595_vm0, %v8746_v34  ;;  %v11752_v20 = vld [vmem:[#allocation10_spill] sm:$0xff]  ;;  %v11755_v5 = vld [vmem:[#allocation123_spill] sm:$0xff] }
 0x80b   : > { %4603 = vst.msk [vmem:[%s11380_s2 + $0x68] sm:$0xff] %vm4595_vm0, %v8748_v40  ;;  %v11756_v35 = vld [vmem:[#allocation155_spill] sm:$0xff] }
 0x80c   : > { %4610 = vst.msk [vmem:[%s11380_s2 + $0xa0] sm:$0xff] %vm4595_vm0, %v8754_v36 }
 0x80d   : > { %4617 = vst.msk [vmem:[%s11380_s2 + $0xd8] sm:$0xff] %vm4595_vm0, %v8756_v59 }
 0x80e   : > { %4624 = vst.msk [vmem:[%s11380_s2 + $0x110] sm:$0xff] %vm4595_vm0, %v8762_v51 }
 0x80f   : > { %4631 = vst.msk [vmem:[%s11380_s2 + $0x148] sm:$0xff] %vm4595_vm0, %v8764_v58 }
 0x810   : > { %4638 = vst.msk [vmem:[%s11380_s2 + $0x180] sm:$0xff] %vm4595_vm0, %v8770_v25 }
 0x811   : > { %4645 = vst.msk [vmem:[%s11380_s2 + $0x1b8] sm:$0xff] %vm4595_vm0, %v8772_v2 }
 0x812   : > { %4652 = vst.msk [vmem:[%s11380_s2 + $0x1f0] sm:$0xff] %vm4595_vm0, %v8778_v22 }
 0x813   : > { %4659 = vst.msk [vmem:[%s11380_s2 + $0x228] sm:$0xff] %vm4595_vm0, %v8780_v55 }
 0x814   : > { %4666 = vst.msk [vmem:[%s11380_s2 + $0x260] sm:$0xff] %vm4595_vm0, %v8786_v27 }
 0x815   : > { %4673 = vst.msk [vmem:[%s11380_s2 + $0x298] sm:$0xff] %vm4595_vm0, %v8788_v38 }
 0x816   : > { %4680 = vst.msk [vmem:[%s11380_s2 + $0x2d0] sm:$0xff] %vm4595_vm0, %v8794_v11 }
 0x817   : > { %4687 = vst.msk [vmem:[%s11380_s2 + $0x308] sm:$0xff] %vm4595_vm0, %v8796_v30 }
 0x818   : > { %4694 = vst.msk [vmem:[%s11380_s2 + $0x340] sm:$0xff] %vm4595_vm0, %v8802_v42 }
 0x819   : > { %4701 = vst.msk [vmem:[%s11380_s2 + $0x378] sm:$0xff] %vm4595_vm0, %v8804_v16 }
 0x81a   : > { %4708 = vst.msk [vmem:[%s11380_s2 + $0x3b0] sm:$0xff] %vm4595_vm0, %v8806_v4 }
 0x81b   : > { %4715 = vst.msk [vmem:[%s11380_s2 + $0x3e8] sm:$0xff] %vm4595_vm0, %v8808_v23 }
 0x81c   : > { %4722 = vst.msk [vmem:[%s11380_s2 + $0x420] sm:$0xff] %vm4595_vm0, %v8810_v53 }
 0x81d   : > { %4729 = vst.msk [vmem:[%s11380_s2 + $0x458] sm:$0xff] %vm4595_vm0, %v8812_v26 }
 0x81e   : > { %4736 = vst.msk [vmem:[%s11380_s2 + $0x490] sm:$0xff] %vm4595_vm0, %v8814_v3 }
 0x81f   : > { %4743 = vst.msk [vmem:[%s11380_s2 + $0x4c8] sm:$0xff] %vm4595_vm0, %v8816_v41 }
 0x820   : > { %4750 = vst.msk [vmem:[%s11380_s2 + $0x500] sm:$0xff] %vm4595_vm0, %v8818_v61 }
 0x821   : > { %4757 = vst.msk [vmem:[%s11380_s2 + $0x538] sm:$0xff] %vm4595_vm0, %v8820_v45 }
 0x822   : > { %4764 = vst.msk [vmem:[%s11380_s2 + $0x570] sm:$0xff] %vm4595_vm0, %v8822_v28 }
 0x823   : > { %4771 = vst.msk [vmem:[%s11380_s2 + $0x5a8] sm:$0xff] %vm4595_vm0, %v8824_v54 }
 0x824   : > { %4778 = vst.msk [vmem:[%s11380_s2 + $0x5e0] sm:$0xff] %vm4595_vm0, %v8826_v29 }
 0x825   : > { %4785 = vst.msk [vmem:[%s11380_s2 + $0x618] sm:$0xff] %vm4595_vm0, %v8828_v17 }
 0x826   : > { %4792 = vst.msk [vmem:[%s11380_s2 + $0x650] sm:$0xff] %vm4595_vm0, %v8830_v50 }
 0x827   : > { %4799 = vst.msk [vmem:[%s11380_s2 + $0x688] sm:$0xff] %vm4595_vm0, %v8832_v43 }
 0x828   : > { %4806 = vst.msk [vmem:[%s11380_s2 + $0x6c0] sm:$0xff] %vm4595_vm0, %v8834_v56 }
 0x829   : > { %4813 = vst.msk [vmem:[%s11380_s2 + $0x6f8] sm:$0xff] %vm4595_vm0, %v8836_v15 }
 0x82a   : > { %4597 = vst [vmem:[%s11380_s2 + $0x38] sm:$0xff] %v11740_v19  ;;  %v11757_v19 = vld [vmem:[#allocation187_spill] sm:$0xff] }
 0x82b   : > { %4598 = vst [vmem:[%s11380_s2 + $0x40] sm:$0xff] %v11741_v39  ;;  %v11758_v39 = vld [vmem:[#allocation11_spill] sm:$0xff] }
 0x82c   : > { %4599 = vst [vmem:[%s11380_s2 + $0x48] sm:$0xff] %v11742_v7  ;;  %v11759_v7 = vld [vmem:[#allocation60_spill] sm:$0xff] }
 0x82d   : > { %4600 = vst [vmem:[%s11380_s2 + $0x50] sm:$0xff] %v11743_v57  ;;  %v11760_v57 = vld [vmem:[#allocation92_spill] sm:$0xff] }
 0x82e   : > { %4601 = vst [vmem:[%s11380_s2 + $0x58] sm:$0xff] %v11744_v46  ;;  %v11761_v46 = vld [vmem:[#allocation124_spill] sm:$0xff] }
 0x82f   : > { %4602 = vst [vmem:[%s11380_s2 + $0x60] sm:$0xff] %v11745_v48  ;;  %v11762_v48 = vld [vmem:[#allocation156_spill] sm:$0xff] }
 0x830   : > { %4604 = vst [vmem:[%s11380_s2 + $0x70] sm:$0xff] %v11746_v1  ;;  %v11763_v1 = vld [vmem:[#allocation188_spill] sm:$0xff] }
 0x831   : > { %4605 = vst [vmem:[%s11380_s2 + $0x78] sm:$0xff] %v11747_v63  ;;  %v11764_v63 = vld [vmem:[#allocation16_spill] sm:$0xff] }
 0x832   : > { %4606 = vst [vmem:[%s11380_s2 + $0x80] sm:$0xff] %v11748_v6  ;;  %v11765_v6 = vld [vmem:[#allocation61_spill] sm:$0xff] }
 0x833   : > { %4607 = vst [vmem:[%s11380_s2 + $0x88] sm:$0xff] %v11749_v9  ;;  %v11766_v9 = vld [vmem:[#allocation93_spill] sm:$0xff] }
 0x834   : > { %4608 = vst [vmem:[%s11380_s2 + $0x90] sm:$0xff] %v11750_v13  ;;  %v11767_v13 = vld [vmem:[#allocation125_spill] sm:$0xff] }
 0x835   : > { %4609 = vst [vmem:[%s11380_s2 + $0x98] sm:$0xff] %v11751_v21  ;;  %v11768_v21 = vld [vmem:[#allocation157_spill] sm:$0xff] }
 0x836   : > { %4611 = vst [vmem:[%s11380_s2 + $0xa8] sm:$0xff] %v11752_v20  ;;  %v11769_v20 = vld [vmem:[#allocation189_spill] sm:$0xff] }
 0x837   : > { %4612 = vst [vmem:[%s11380_s2 + $0xb0] sm:$0xff] %v11753_v33  ;;  %v11770_v33 = vld [vmem:[#allocation17_spill] sm:$0xff] }
 0x838   : > { %4613 = vst [vmem:[%s11380_s2 + $0xb8] sm:$0xff] %v11754_v52  ;;  %v11771_v52 = vld [vmem:[#allocation62_spill] sm:$0xff] }
 0x839   : > { %4614 = vst [vmem:[%s11380_s2 + $0xc0] sm:$0xff] %v11755_v5  ;;  %v11772_v5 = vld [vmem:[#allocation94_spill] sm:$0xff] }
 0x83a   : > { %4615 = vst [vmem:[%s11380_s2 + $0xc8] sm:$0xff] %v11756_v35  ;;  %v11773_v35 = vld [vmem:[#allocation126_spill] sm:$0xff] }
 0x83b   : > { %4616 = vst [vmem:[%s11380_s2 + $0xd0] sm:$0xff] %v11757_v19  ;;  %v11774_v19 = vld [vmem:[#allocation158_spill] sm:$0xff] }
 0x83c   : > { %4618 = vst [vmem:[%s11380_s2 + $0xe0] sm:$0xff] %v11758_v39  ;;  %v11775_v39 = vld [vmem:[#allocation190_spill] sm:$0xff] }
 0x83d   : > { %4619 = vst [vmem:[%s11380_s2 + $0xe8] sm:$0xff] %v11759_v7  ;;  %v11776_v7 = vld [vmem:[#allocation22_spill] sm:$0xff] }
 0x83e   : > { %4620 = vst [vmem:[%s11380_s2 + $0xf0] sm:$0xff] %v11760_v57  ;;  %v11777_v57 = vld [vmem:[#allocation63_spill] sm:$0xff] }
 0x83f   : > { %4621 = vst [vmem:[%s11380_s2 + $0xf8] sm:$0xff] %v11761_v46  ;;  %v11778_v46 = vld [vmem:[#allocation95_spill] sm:$0xff] }
 0x840   : > { %4622 = vst [vmem:[%s11380_s2 + $0x100] sm:$0xff] %v11762_v48  ;;  %v11779_v48 = vld [vmem:[#allocation127_spill] sm:$0xff] }
 0x841   : > { %4623 = vst [vmem:[%s11380_s2 + $0x108] sm:$0xff] %v11763_v1  ;;  %v11780_v1 = vld [vmem:[#allocation159_spill] sm:$0xff] }
 0x842   : > { %4625 = vst [vmem:[%s11380_s2 + $0x118] sm:$0xff] %v11764_v63  ;;  %v11781_v63 = vld [vmem:[#allocation191_spill] sm:$0xff] }
 0x843   : > { %4626 = vst [vmem:[%s11380_s2 + $0x120] sm:$0xff] %v11765_v6  ;;  %v11782_v6 = vld [vmem:[#allocation23_spill] sm:$0xff] }
 0x844   : > { %4627 = vst [vmem:[%s11380_s2 + $0x128] sm:$0xff] %v11766_v9  ;;  %v11783_v9 = vld [vmem:[#allocation64_spill] sm:$0xff] }
 0x845   : > { %4628 = vst [vmem:[%s11380_s2 + $0x130] sm:$0xff] %v11767_v13  ;;  %v11784_v13 = vld [vmem:[#allocation96_spill] sm:$0xff] }
 0x846   : > { %4629 = vst [vmem:[%s11380_s2 + $0x138] sm:$0xff] %v11768_v21  ;;  %v11785_v21 = vld [vmem:[#allocation128_spill] sm:$0xff] }
 0x847   : > { %4630 = vst [vmem:[%s11380_s2 + $0x140] sm:$0xff] %v11769_v20  ;;  %v11786_v20 = vld [vmem:[#allocation160_spill] sm:$0xff] }
 0x848   : > { %4632 = vst [vmem:[%s11380_s2 + $0x150] sm:$0xff] %v11770_v33  ;;  %v11787_v33 = vld [vmem:[#allocation192_spill] sm:$0xff] }
 0x849   : > { %4633 = vst [vmem:[%s11380_s2 + $0x158] sm:$0xff] %v11771_v52  ;;  %v11788_v52 = vld [vmem:[#allocation28_spill] sm:$0xff] }
 0x84a   : > { %4634 = vst [vmem:[%s11380_s2 + $0x160] sm:$0xff] %v11772_v5  ;;  %v11789_v5 = vld [vmem:[#allocation65_spill] sm:$0xff] }
 0x84b   : > { %4635 = vst [vmem:[%s11380_s2 + $0x168] sm:$0xff] %v11773_v35  ;;  %v11790_v35 = vld [vmem:[#allocation97_spill] sm:$0xff] }
 0x84c   : > { %4636 = vst [vmem:[%s11380_s2 + $0x170] sm:$0xff] %v11774_v19  ;;  %v11791_v19 = vld [vmem:[#allocation129_spill] sm:$0xff] }
 0x84d   : > { %4637 = vst [vmem:[%s11380_s2 + $0x178] sm:$0xff] %v11775_v39  ;;  %v11792_v39 = vld [vmem:[#allocation161_spill] sm:$0xff] }
 0x84e   : > { %4639 = vst [vmem:[%s11380_s2 + $0x188] sm:$0xff] %v11776_v7  ;;  %v11793_v7 = vld [vmem:[#allocation193_spill] sm:$0xff] }
 0x84f   : > { %4640 = vst [vmem:[%s11380_s2 + $0x190] sm:$0xff] %v11777_v57  ;;  %v11794_v57 = vld [vmem:[#allocation29_spill] sm:$0xff] }
 0x850   : > { %4641 = vst [vmem:[%s11380_s2 + $0x198] sm:$0xff] %v11778_v46  ;;  %v11795_v46 = vld [vmem:[#allocation66_spill] sm:$0xff] }
 0x851   : > { %4642 = vst [vmem:[%s11380_s2 + $0x1a0] sm:$0xff] %v11779_v48  ;;  %v11796_v48 = vld [vmem:[#allocation98_spill] sm:$0xff] }
 0x852   : > { %4643 = vst [vmem:[%s11380_s2 + $0x1a8] sm:$0xff] %v11780_v1  ;;  %v11797_v1 = vld [vmem:[#allocation130_spill] sm:$0xff] }
 0x853   : > { %4644 = vst [vmem:[%s11380_s2 + $0x1b0] sm:$0xff] %v11781_v63  ;;  %v11798_v63 = vld [vmem:[#allocation162_spill] sm:$0xff] }
 0x854   : > { %4646 = vst [vmem:[%s11380_s2 + $0x1c0] sm:$0xff] %v11782_v6  ;;  %v11799_v6 = vld [vmem:[#allocation24_spill] sm:$0xff] }
 0x855   : > { %4647 = vst [vmem:[%s11380_s2 + $0x1c8] sm:$0xff] %v11783_v9  ;;  %v11800_v9 = vld [vmem:[#allocation34_spill] sm:$0xff] }
 0x856   : > { %4648 = vst [vmem:[%s11380_s2 + $0x1d0] sm:$0xff] %v11784_v13  ;;  %v11801_v13 = vld [vmem:[#allocation67_spill] sm:$0xff] }
 0x857   : > { %4649 = vst [vmem:[%s11380_s2 + $0x1d8] sm:$0xff] %v11785_v21  ;;  %v11802_v21 = vld [vmem:[#allocation99_spill] sm:$0xff] }
 0x858   : > { %4650 = vst [vmem:[%s11380_s2 + $0x1e0] sm:$0xff] %v11786_v20  ;;  %v11803_v20 = vld [vmem:[#allocation131_spill] sm:$0xff] }
 0x859   : > { %4651 = vst [vmem:[%s11380_s2 + $0x1e8] sm:$0xff] %v11787_v33  ;;  %v11804_v33 = vld [vmem:[#allocation163_spill] sm:$0xff] }
 0x85a   : > { %4653 = vst [vmem:[%s11380_s2 + $0x1f8] sm:$0xff] %v11788_v52  ;;  %v11805_v52 = vld [vmem:[#allocation25_spill] sm:$0xff] }
 0x85b   : > { %4654 = vst [vmem:[%s11380_s2 + $0x200] sm:$0xff] %v11789_v5  ;;  %v11806_v5 = vld [vmem:[#allocation35_spill] sm:$0xff] }
 0x85c   : > { %4655 = vst [vmem:[%s11380_s2 + $0x208] sm:$0xff] %v11790_v35  ;;  %v11807_v35 = vld [vmem:[#allocation68_spill] sm:$0xff] }
 0x85d   : > { %4656 = vst [vmem:[%s11380_s2 + $0x210] sm:$0xff] %v11791_v19  ;;  %v11808_v19 = vld [vmem:[#allocation100_spill] sm:$0xff] }
 0x85e   : > { %4657 = vst [vmem:[%s11380_s2 + $0x218] sm:$0xff] %v11792_v39  ;;  %v11809_v39 = vld [vmem:[#allocation132_spill] sm:$0xff] }
 0x85f   : > { %4658 = vst [vmem:[%s11380_s2 + $0x220] sm:$0xff] %v11793_v7  ;;  %v11810_v7 = vld [vmem:[#allocation164_spill] sm:$0xff] }
 0x860   : > { %4660 = vst [vmem:[%s11380_s2 + $0x230] sm:$0xff] %v11794_v57  ;;  %v11811_v57 = vld [vmem:[#allocation30_spill] sm:$0xff] }
 0x861   : > { %4661 = vst [vmem:[%s11380_s2 + $0x238] sm:$0xff] %v11795_v46  ;;  %v11812_v46 = vld [vmem:[#allocation37_spill] sm:$0xff] }
 0x862   : > { %4662 = vst [vmem:[%s11380_s2 + $0x240] sm:$0xff] %v11796_v48  ;;  %v11813_v48 = vld [vmem:[#allocation69_spill] sm:$0xff] }
 0x863   : > { %4663 = vst [vmem:[%s11380_s2 + $0x248] sm:$0xff] %v11797_v1  ;;  %v11814_v1 = vld [vmem:[#allocation101_spill] sm:$0xff] }
 0x864   : > { %4664 = vst [vmem:[%s11380_s2 + $0x250] sm:$0xff] %v11798_v63  ;;  %v11815_v63 = vld [vmem:[#allocation133_spill] sm:$0xff] }
 0x865   : > { %4665 = vst [vmem:[%s11380_s2 + $0x258] sm:$0xff] %v11799_v6  ;;  %v11816_v6 = vld [vmem:[#allocation165_spill] sm:$0xff] }
 0x866   : > { %4667 = vst [vmem:[%s11380_s2 + $0x268] sm:$0xff] %v11800_v9  ;;  %v11817_v9 = vld [vmem:[#allocation32_spill] sm:$0xff] }
 0x867   : > { %4668 = vst [vmem:[%s11380_s2 + $0x270] sm:$0xff] %v11801_v13  ;;  %v11818_v13 = vld [vmem:[#allocation38_spill] sm:$0xff] }
 0x868   : > { %4669 = vst [vmem:[%s11380_s2 + $0x278] sm:$0xff] %v11802_v21  ;;  %v11819_v21 = vld [vmem:[#allocation70_spill] sm:$0xff] }
 0x869   : > { %4670 = vst [vmem:[%s11380_s2 + $0x280] sm:$0xff] %v11803_v20  ;;  %v11820_v20 = vld [vmem:[#allocation102_spill] sm:$0xff] }
 0x86a   : > { %4671 = vst [vmem:[%s11380_s2 + $0x288] sm:$0xff] %v11804_v33  ;;  %v11821_v33 = vld [vmem:[#allocation134_spill] sm:$0xff] }
 0x86b   : > { %4672 = vst [vmem:[%s11380_s2 + $0x290] sm:$0xff] %v11805_v52  ;;  %v11822_v52 = vld [vmem:[#allocation166_spill] sm:$0xff] }
 0x86c   : > { %4674 = vst [vmem:[%s11380_s2 + $0x2a0] sm:$0xff] %v11806_v5  ;;  %v11823_v5 = vld [vmem:[#allocation33_spill] sm:$0xff] }
 0x86d   : > { %4675 = vst [vmem:[%s11380_s2 + $0x2a8] sm:$0xff] %v11807_v35  ;;  %v11824_v35 = vld [vmem:[#allocation39_spill] sm:$0xff] }
 0x86e   : > { %4676 = vst [vmem:[%s11380_s2 + $0x2b0] sm:$0xff] %v11808_v19  ;;  %v11825_v19 = vld [vmem:[#allocation71_spill] sm:$0xff] }
 0x86f   : > { %4677 = vst [vmem:[%s11380_s2 + $0x2b8] sm:$0xff] %v11809_v39  ;;  %v11826_v39 = vld [vmem:[#allocation103_spill] sm:$0xff] }
 0x870   : > { %4678 = vst [vmem:[%s11380_s2 + $0x2c0] sm:$0xff] %v11810_v7  ;;  %v11827_v7 = vld [vmem:[#allocation135_spill] sm:$0xff] }
 0x871   : > { %4679 = vst [vmem:[%s11380_s2 + $0x2c8] sm:$0xff] %v11811_v57  ;;  %v11828_v57 = vld [vmem:[#allocation167_spill] sm:$0xff] }
 0x872   : > { %4681 = vst [vmem:[%s11380_s2 + $0x2d8] sm:$0xff] %v11812_v46  ;;  %v11829_v46 = vld [vmem:[#allocation40_spill] sm:$0xff] }
 0x873   : > { %4682 = vst [vmem:[%s11380_s2 + $0x2e0] sm:$0xff] %v11813_v48  ;;  %v11830_v48 = vld [vmem:[#allocation72_spill] sm:$0xff] }
 0x874   : > { %4683 = vst [vmem:[%s11380_s2 + $0x2e8] sm:$0xff] %v11814_v1  ;;  %v11831_v1 = vld [vmem:[#allocation104_spill] sm:$0xff] }
 0x875   : > { %4684 = vst [vmem:[%s11380_s2 + $0x2f0] sm:$0xff] %v11815_v63  ;;  %v11832_v63 = vld [vmem:[#allocation136_spill] sm:$0xff] }
 0x876   : > { %4685 = vst [vmem:[%s11380_s2 + $0x2f8] sm:$0xff] %v11816_v6  ;;  %v11833_v6 = vld [vmem:[#allocation168_spill] sm:$0xff] }
 0x877   : > { %4686 = vst [vmem:[%s11380_s2 + $0x300] sm:$0xff] %v11817_v9  ;;  %v11834_v9 = vld [vmem:[#allocation41_spill] sm:$0xff] }
 0x878   : > { %4688 = vst [vmem:[%s11380_s2 + $0x310] sm:$0xff] %v11818_v13  ;;  %v11835_v13 = vld [vmem:[#allocation73_spill] sm:$0xff] }
 0x879   : > { %4689 = vst [vmem:[%s11380_s2 + $0x318] sm:$0xff] %v11819_v21  ;;  %v11836_v21 = vld [vmem:[#allocation105_spill] sm:$0xff] }
 0x87a   : > { %4690 = vst [vmem:[%s11380_s2 + $0x320] sm:$0xff] %v11820_v20  ;;  %v11837_v20 = vld [vmem:[#allocation137_spill] sm:$0xff] }
 0x87b   : > { %4691 = vst [vmem:[%s11380_s2 + $0x328] sm:$0xff] %v11821_v33  ;;  %v11838_v33 = vld [vmem:[#allocation169_spill] sm:$0xff] }
 0x87c   : > { %4692 = vst [vmem:[%s11380_s2 + $0x330] sm:$0xff] %v11822_v52  ;;  %v11839_v52 = vld [vmem:[#allocation42_spill] sm:$0xff] }
 0x87d   : > { %4693 = vst [vmem:[%s11380_s2 + $0x338] sm:$0xff] %v11823_v5  ;;  %v11840_v5 = vld [vmem:[#allocation74_spill] sm:$0xff] }
 0x87e   : > { %4695 = vst [vmem:[%s11380_s2 + $0x348] sm:$0xff] %v11824_v35  ;;  %v11841_v35 = vld [vmem:[#allocation106_spill] sm:$0xff] }
 0x87f   : > { %4696 = vst [vmem:[%s11380_s2 + $0x350] sm:$0xff] %v11825_v19  ;;  %v11842_v19 = vld [vmem:[#allocation138_spill] sm:$0xff] }
 0x880   : > { %4697 = vst [vmem:[%s11380_s2 + $0x358] sm:$0xff] %v11826_v39  ;;  %v11843_v39 = vld [vmem:[#allocation170_spill] sm:$0xff] }
 0x881   : > { %4698 = vst [vmem:[%s11380_s2 + $0x360] sm:$0xff] %v11827_v7  ;;  %v11844_v7 = vld [vmem:[#allocation43_spill] sm:$0xff] }
 0x882   : > { %4699 = vst [vmem:[%s11380_s2 + $0x368] sm:$0xff] %v11828_v57  ;;  %v11845_v57 = vld [vmem:[#allocation75_spill] sm:$0xff] }
 0x883   : > { %4702 = vst [vmem:[%s11380_s2 + $0x380] sm:$0xff] %v11829_v46  ;;  %v11846_v46 = vld [vmem:[#allocation107_spill] sm:$0xff] }
 0x884   : > { %4703 = vst [vmem:[%s11380_s2 + $0x388] sm:$0xff] %v11830_v48  ;;  %v11847_v48 = vld [vmem:[#allocation139_spill] sm:$0xff] }
 0x885   : > { %4704 = vst [vmem:[%s11380_s2 + $0x390] sm:$0xff] %v11831_v1  ;;  %v11848_v1 = vld [vmem:[#allocation171_spill] sm:$0xff] }
 0x886   : > { %4705 = vst [vmem:[%s11380_s2 + $0x398] sm:$0xff] %v11832_v63  ;;  %v11849_v63 = vld [vmem:[#allocation44_spill] sm:$0xff] }
 0x887   : > { %4706 = vst [vmem:[%s11380_s2 + $0x3a0] sm:$0xff] %v11833_v6  ;;  %v11850_v6 = vld [vmem:[#allocation76_spill] sm:$0xff] }
 0x888   : > { %4707 = vst [vmem:[%s11380_s2 + $0x3a8] sm:$0xff] %v8682_v37 }
 0x889   : > { %4709 = vst [vmem:[%s11380_s2 + $0x3b8] sm:$0xff] %v11834_v9  ;;  %v11851_v9 = vld [vmem:[#allocation108_spill] sm:$0xff] }
 0x88a   : > { %4710 = vst [vmem:[%s11380_s2 + $0x3c0] sm:$0xff] %v11835_v13  ;;  %v11852_v13 = vld [vmem:[#allocation140_spill] sm:$0xff] }
 0x88b   : > { %4711 = vst [vmem:[%s11380_s2 + $0x3c8] sm:$0xff] %v11836_v21  ;;  %v11853_v21 = vld [vmem:[#allocation172_spill] sm:$0xff] }
 0x88c   : > { %4712 = vst [vmem:[%s11380_s2 + $0x3d0] sm:$0xff] %v11837_v20  ;;  %v11854_v20 = vld [vmem:[#allocation45_spill] sm:$0xff] }
 0x88d   : > { %4713 = vst [vmem:[%s11380_s2 + $0x3d8] sm:$0xff] %v11838_v33  ;;  %v11855_v33 = vld [vmem:[#allocation77_spill] sm:$0xff] }
 0x88e   : > { %4714 = vst [vmem:[%s11380_s2 + $0x3e0] sm:$0xff] %v8684_v47 }
 0x88f   : > { %4716 = vst [vmem:[%s11380_s2 + $0x3f0] sm:$0xff] %v11839_v52  ;;  %v11856_v52 = vld [vmem:[#allocation109_spill] sm:$0xff] }
 0x890   : > { %4717 = vst [vmem:[%s11380_s2 + $0x3f8] sm:$0xff] %v11840_v5  ;;  %v11857_v5 = vld [vmem:[#allocation141_spill] sm:$0xff] }
 0x891   : > { %4718 = vst [vmem:[%s11380_s2 + $0x400] sm:$0xff] %v11841_v35  ;;  %v11858_v35 = vld [vmem:[#allocation173_spill] sm:$0xff] }
 0x892   : > { %4719 = vst [vmem:[%s11380_s2 + $0x408] sm:$0xff] %v11842_v19  ;;  %v11859_v19 = vld [vmem:[#allocation46_spill] sm:$0xff] }
 0x893   : > { %4720 = vst [vmem:[%s11380_s2 + $0x410] sm:$0xff] %v11843_v39  ;;  %v11860_v39 = vld [vmem:[#allocation78_spill] sm:$0xff] }
 0x894   : > { %4721 = vst [vmem:[%s11380_s2 + $0x418] sm:$0xff] %v8690_v18 }
 0x895   : > { %4723 = vst [vmem:[%s11380_s2 + $0x428] sm:$0xff] %v11844_v7  ;;  %v11861_v7 = vld [vmem:[#allocation110_spill] sm:$0xff] }
 0x896   : > { %4724 = vst [vmem:[%s11380_s2 + $0x430] sm:$0xff] %v11845_v57  ;;  %v11862_v57 = vld [vmem:[#allocation142_spill] sm:$0xff] }
 0x897   : > { %4725 = vst [vmem:[%s11380_s2 + $0x438] sm:$0xff] %v11846_v46  ;;  %v11863_v46 = vld [vmem:[#allocation174_spill] sm:$0xff] }
 0x898   : > { %4726 = vst [vmem:[%s11380_s2 + $0x440] sm:$0xff] %v11847_v48  ;;  %v11864_v48 = vld [vmem:[#allocation47_spill] sm:$0xff] }
 0x899   : > { %4727 = vst [vmem:[%s11380_s2 + $0x448] sm:$0xff] %v11848_v1  ;;  %v11865_v1 = vld [vmem:[#allocation79_spill] sm:$0xff] }
 0x89a   : > { %4728 = vst [vmem:[%s11380_s2 + $0x450] sm:$0xff] %v8692_v12 }
 0x89b   : > { %4730 = vst [vmem:[%s11380_s2 + $0x460] sm:$0xff] %v11849_v63  ;;  %v11866_v63 = vld [vmem:[#allocation111_spill] sm:$0xff] }
 0x89c   : > { %4731 = vst [vmem:[%s11380_s2 + $0x468] sm:$0xff] %v11850_v6  ;;  %v11867_v6 = vld [vmem:[#allocation143_spill] sm:$0xff] }
 0x89d   : > { %4732 = vst [vmem:[%s11380_s2 + $0x470] sm:$0xff] %v11851_v9  ;;  %v11868_v9 = vld [vmem:[#allocation175_spill] sm:$0xff] }
 0x89e   : > { %4733 = vst [vmem:[%s11380_s2 + $0x478] sm:$0xff] %v11852_v13  ;;  %v11869_v13 = vld [vmem:[#allocation48_spill] sm:$0xff] }
 0x89f   : > { %4734 = vst [vmem:[%s11380_s2 + $0x480] sm:$0xff] %v11853_v21  ;;  %v11870_v21 = vld [vmem:[#allocation80_spill] sm:$0xff] }
 0x8a0   : > { %4735 = vst [vmem:[%s11380_s2 + $0x488] sm:$0xff] %v8698_v8 }
 0x8a1   : > { %4737 = vst [vmem:[%s11380_s2 + $0x498] sm:$0xff] %v11854_v20  ;;  %v11871_v20 = vld [vmem:[#allocation112_spill] sm:$0xff] }
 0x8a2   : > { %4738 = vst [vmem:[%s11380_s2 + $0x4a0] sm:$0xff] %v11855_v33  ;;  %v11872_v33 = vld [vmem:[#allocation144_spill] sm:$0xff] }
 0x8a3   : > { %4739 = vst [vmem:[%s11380_s2 + $0x4a8] sm:$0xff] %v11856_v52  ;;  %v11873_v52 = vld [vmem:[#allocation176_spill] sm:$0xff] }
 0x8a4   : > { %4740 = vst [vmem:[%s11380_s2 + $0x4b0] sm:$0xff] %v11857_v5  ;;  %v11874_v5 = vld [vmem:[#allocation49_spill] sm:$0xff] }
 0x8a5   : > { %4741 = vst [vmem:[%s11380_s2 + $0x4b8] sm:$0xff] %v11858_v35  ;;  %v11875_v35 = vld [vmem:[#allocation81_spill] sm:$0xff] }
 0x8a6   : > { %4742 = vst [vmem:[%s11380_s2 + $0x4c0] sm:$0xff] %v8700_v24 }
 0x8a7   : > { %4744 = vst [vmem:[%s11380_s2 + $0x4d0] sm:$0xff] %v11859_v19  ;;  %v11876_v19 = vld [vmem:[#allocation113_spill] sm:$0xff] }
 0x8a8   : > { %4745 = vst [vmem:[%s11380_s2 + $0x4d8] sm:$0xff] %v11860_v39  ;;  %v11877_v39 = vld [vmem:[#allocation145_spill] sm:$0xff] }
 0x8a9   : > { %4746 = vst [vmem:[%s11380_s2 + $0x4e0] sm:$0xff] %v11861_v7  ;;  %v11878_v7 = vld [vmem:[#allocation177_spill] sm:$0xff] }
 0x8aa   : > { %4747 = vst [vmem:[%s11380_s2 + $0x4e8] sm:$0xff] %v11862_v57  ;;  %v11879_v57 = vld [vmem:[#allocation50_spill] sm:$0xff] }
 0x8ab   : > { %4748 = vst [vmem:[%s11380_s2 + $0x4f0] sm:$0xff] %v11863_v46  ;;  %v11880_v46 = vld [vmem:[#allocation82_spill] sm:$0xff] }
 0x8ac   : > { %4749 = vst [vmem:[%s11380_s2 + $0x4f8] sm:$0xff] %v8706_v31 }
 0x8ad   : > { %4751 = vst [vmem:[%s11380_s2 + $0x508] sm:$0xff] %v11864_v48  ;;  %v11881_v48 = vld [vmem:[#allocation114_spill] sm:$0xff] }
 0x8ae   : > { %4752 = vst [vmem:[%s11380_s2 + $0x510] sm:$0xff] %v11865_v1  ;;  %v11882_v1 = vld [vmem:[#allocation146_spill] sm:$0xff] }
 0x8af   : > { %4753 = vst [vmem:[%s11380_s2 + $0x518] sm:$0xff] %v11866_v63  ;;  %v11883_v63 = vld [vmem:[#allocation178_spill] sm:$0xff] }
 0x8b0   : > { %4754 = vst [vmem:[%s11380_s2 + $0x520] sm:$0xff] %v11867_v6  ;;  %v11884_v6 = vld [vmem:[#allocation51_spill] sm:$0xff] }
 0x8b1   : > { %4755 = vst [vmem:[%s11380_s2 + $0x528] sm:$0xff] %v11868_v9  ;;  %v11885_v9 = vld [vmem:[#allocation83_spill] sm:$0xff] }
 0x8b2   : > { %4756 = vst [vmem:[%s11380_s2 + $0x530] sm:$0xff] %v8708_v49 }
 0x8b3   : > { %4758 = vst [vmem:[%s11380_s2 + $0x540] sm:$0xff] %v11869_v13  ;;  %v11886_v13 = vld [vmem:[#allocation115_spill] sm:$0xff] }
 0x8b4   : > { %4759 = vst [vmem:[%s11380_s2 + $0x548] sm:$0xff] %v11870_v21  ;;  %v11887_v21 = vld [vmem:[#allocation147_spill] sm:$0xff] }
 0x8b5   : > { %4760 = vst [vmem:[%s11380_s2 + $0x550] sm:$0xff] %v11871_v20  ;;  %v11888_v20 = vld [vmem:[#allocation179_spill] sm:$0xff] }
 0x8b6   : > { %4761 = vst [vmem:[%s11380_s2 + $0x558] sm:$0xff] %v11872_v33  ;;  %v11889_v33 = vld [vmem:[#allocation52_spill] sm:$0xff] }
 0x8b7   : > { %4762 = vst [vmem:[%s11380_s2 + $0x560] sm:$0xff] %v11873_v52  ;;  %v11890_v52 = vld [vmem:[#allocation84_spill] sm:$0xff] }
 0x8b8   : > { %4763 = vst [vmem:[%s11380_s2 + $0x568] sm:$0xff] %v8714_v10 }
 0x8b9   : > { %4765 = vst [vmem:[%s11380_s2 + $0x578] sm:$0xff] %v11874_v5  ;;  %v11891_v5 = vld [vmem:[#allocation116_spill] sm:$0xff] }
 0x8ba   : > { %4766 = vst [vmem:[%s11380_s2 + $0x580] sm:$0xff] %v11875_v35  ;;  %v11892_v35 = vld [vmem:[#allocation148_spill] sm:$0xff] }
 0x8bb   : > { %4767 = vst [vmem:[%s11380_s2 + $0x588] sm:$0xff] %v11876_v19  ;;  %v11893_v19 = vld [vmem:[#allocation180_spill] sm:$0xff] }
 0x8bc   : > { %4768 = vst [vmem:[%s11380_s2 + $0x590] sm:$0xff] %v11877_v39  ;;  %v11894_v39 = vld [vmem:[#allocation53_spill] sm:$0xff] }
 0x8bd   : > { %4769 = vst [vmem:[%s11380_s2 + $0x598] sm:$0xff] %v11878_v7  ;;  %v11895_v7 = vld [vmem:[#allocation85_spill] sm:$0xff] }
 0x8be   : > { %4770 = vst [vmem:[%s11380_s2 + $0x5a0] sm:$0xff] %v8716_v0 }
 0x8bf   : > { %4772 = vst [vmem:[%s11380_s2 + $0x5b0] sm:$0xff] %v11879_v57  ;;  %v11896_v57 = vld [vmem:[#allocation117_spill] sm:$0xff] }
 0x8c0   : > { %4773 = vst [vmem:[%s11380_s2 + $0x5b8] sm:$0xff] %v11880_v46  ;;  %v11897_v46 = vld [vmem:[#allocation149_spill] sm:$0xff] }
 0x8c1   : > { %4774 = vst [vmem:[%s11380_s2 + $0x5c0] sm:$0xff] %v11881_v48  ;;  %v11898_v48 = vld [vmem:[#allocation181_spill] sm:$0xff] }
 0x8c2   : > { %4775 = vst [vmem:[%s11380_s2 + $0x5c8] sm:$0xff] %v11882_v1  ;;  %v11899_v1 = vld [vmem:[#allocation54_spill] sm:$0xff] }
 0x8c3   : > { %4776 = vst [vmem:[%s11380_s2 + $0x5d0] sm:$0xff] %v11883_v63  ;;  %v11900_v63 = vld [vmem:[#allocation86_spill] sm:$0xff] }
 0x8c4   : > { %4777 = vst [vmem:[%s11380_s2 + $0x5d8] sm:$0xff] %v8722_v14 }
 0x8c5   : > { %4779 = vst [vmem:[%s11380_s2 + $0x5e8] sm:$0xff] %v11884_v6  ;;  %v11901_v6 = vld [vmem:[#allocation118_spill] sm:$0xff] }
 0x8c6   : > { %4780 = vst [vmem:[%s11380_s2 + $0x5f0] sm:$0xff] %v11885_v9  ;;  %v11902_v9 = vld [vmem:[#allocation150_spill] sm:$0xff] }
 0x8c7   : > { %4781 = vst [vmem:[%s11380_s2 + $0x5f8] sm:$0xff] %v11886_v13  ;;  %v11903_v13 = vld [vmem:[#allocation182_spill] sm:$0xff] }
 0x8c8   : > { %4782 = vst [vmem:[%s11380_s2 + $0x600] sm:$0xff] %v11887_v21  ;;  %v11904_v21 = vld [vmem:[#allocation3_spill] sm:$0xff] }
 0x8c9   : > { %4783 = vst [vmem:[%s11380_s2 + $0x608] sm:$0xff] %v11888_v20  ;;  %v11905_v20 = vld [vmem:[#allocation55_spill] sm:$0xff] }
 0x8ca   : > { %4784 = vst [vmem:[%s11380_s2 + $0x610] sm:$0xff] %v8724_v32 }
 0x8cb   : > { %4786 = vst [vmem:[%s11380_s2 + $0x620] sm:$0xff] %v11889_v33  ;;  %v11906_v33 = vld [vmem:[#allocation87_spill] sm:$0xff] }
 0x8cc   : > { %4787 = vst [vmem:[%s11380_s2 + $0x628] sm:$0xff] %v11890_v52  ;;  %v11907_v52 = vld [vmem:[#allocation119_spill] sm:$0xff] }
 0x8cd   : > { %4788 = vst [vmem:[%s11380_s2 + $0x630] sm:$0xff] %v11891_v5  ;;  %v11908_v5 = vld [vmem:[#allocation151_spill] sm:$0xff] }
 0x8ce   : > { %4789 = vst [vmem:[%s11380_s2 + $0x638] sm:$0xff] %v11892_v35  ;;  %v11909_v35 = vld [vmem:[#allocation183_spill] sm:$0xff] }
 0x8cf   : > { %4790 = vst [vmem:[%s11380_s2 + $0x640] sm:$0xff] %v11893_v19  ;;  %v11910_v19 = vld [vmem:[#allocation4_spill] sm:$0xff] }
 0x8d0   : > { %4791 = vst [vmem:[%s11380_s2 + $0x648] sm:$0xff] %v8730_v62 }
 0x8d1   : > { %4793 = vst [vmem:[%s11380_s2 + $0x658] sm:$0xff] %v11894_v39 }
 0x8d2   : > { %4794 = vst [vmem:[%s11380_s2 + $0x660] sm:$0xff] %v11895_v7 }
 0x8d3   : > { %4795 = vst [vmem:[%s11380_s2 + $0x668] sm:$0xff] %v11896_v57 }
 0x8d4   : > { %4796 = vst [vmem:[%s11380_s2 + $0x670] sm:$0xff] %v11897_v46 }
 0x8d5   : > { %4797 = vst [vmem:[%s11380_s2 + $0x678] sm:$0xff] %v11898_v48 }
 0x8d6   : > { %4798 = vst [vmem:[%s11380_s2 + $0x680] sm:$0xff] %v8732_v44 }
 0x8d7   : > { %4800 = vst [vmem:[%s11380_s2 + $0x690] sm:$0xff] %v11899_v1 }
 0x8d8   : > { %4801 = vst [vmem:[%s11380_s2 + $0x698] sm:$0xff] %v11900_v63 }
 0x8d9   : > { %4802 = vst [vmem:[%s11380_s2 + $0x6a0] sm:$0xff] %v11901_v6 }
 0x8da   : > { %4803 = vst [vmem:[%s11380_s2 + $0x6a8] sm:$0xff] %v11902_v9 }
 0x8db   : > { %4804 = vst [vmem:[%s11380_s2 + $0x6b0] sm:$0xff] %v11903_v13 }
 0x8dc   : > { %4805 = vst [vmem:[%s11380_s2 + $0x6b8] sm:$0xff] %v11904_v21 }
 0x8dd   : > { %4807 = vst [vmem:[%s11380_s2 + $0x6c8] sm:$0xff] %v11905_v20 }
 0x8de   : > { %4808 = vst [vmem:[%s11380_s2 + $0x6d0] sm:$0xff] %v11906_v33 }
 0x8df   : > { %4809 = vst [vmem:[%s11380_s2 + $0x6d8] sm:$0xff] %v11907_v52 }
 0x8e0   : > { %4810 = vst [vmem:[%s11380_s2 + $0x6e0] sm:$0xff] %v11908_v5 }
 0x8e1   : > { %4811 = vst [vmem:[%s11380_s2 + $0x6e8] sm:$0xff] %v11909_v35 }
 0x8e2   : > { %4812 = vst [vmem:[%s11380_s2 + $0x6f0] sm:$0xff] %v11910_v19 }
 0x8e3 PF: > { %p6700_p10 = scmp.eq.s32.totalorder %s7072_s12, 0 }
 0x8e5   : > { %4817 = sbr.rel (%p6700_p10) target bundleno = 2510 (0x9ce), region = 59 }
 0x8ea   : > { %v4818_v39 = vld [vmem:[%s11380_s2] sm:$0xff]  ;;  %v4819_v7 = vld [vmem:[%s11380_s2 + $0x8] sm:$0xff]  ;;  %v4820_v57 = vld [vmem:[%s11380_s2 + $0x10] sm:$0xff]  ;;  %vm5272_vm1 = vcmask 130048  }
 0x8eb   : > { %v11911_v46 = vld [vmem:[#allocation5_spill] sm:$0xff]  ;;  %v11912_v1 = vld [vmem:[#allocation56_spill] sm:$0xff]  ;;  %v4821_v13 = vld [vmem:[%s11380_s2 + $0x18] sm:$0xff] }
 0x8ec   : > { %v5042_v48 = vadd.f32 %v4818_v39, %v11911_v46  ;;  %v5043_v63 = vadd.f32 %v4819_v7, %v11912_v1  ;;  %v11913_v6 = vld [vmem:[#allocation88_spill] sm:$0xff]  ;;  %v4822_v21 = vld [vmem:[%s11380_s2 + $0x20] sm:$0xff]  ;;  %v4824_v5 = vld [vmem:[%s11380_s2 + $0x30] sm:$0xff] }
 0x8ed   : > { %v5044_v9 = vadd.f32 %v4820_v57, %v11913_v6  ;;  %v4823_v20 = vld [vmem:[%s11380_s2 + $0x28] sm:$0xff]  ;;  %v4825_v39 = vld [vmem:[%s11380_s2 + $0x38] sm:$0xff]  ;;  %v4826_v46 = vld [vmem:[%s11380_s2 + $0x40] sm:$0xff] }
 0x8ee   : > { %v11914_v33 = vld [vmem:[#allocation120_spill] sm:$0xff]  ;;  %5266 = vst [vmem:[%s11380_s2] sm:$0xff] %v5042_v48  ;;  %v5048_v48 = vadd.f32 %v4824_v5, %v8746_v34  ;;  %v11918_v34 = vld [vmem:[#allocation57_spill] sm:$0xff] }
 0x8ef   : > { %v5045_v52 = vadd.f32 %v4821_v13, %v11914_v33  ;;  %v11915_v35 = vld [vmem:[#allocation152_spill] sm:$0xff]  ;;  %5267 = vst [vmem:[%s11380_s2 + $0x8] sm:$0xff] %v5043_v63  ;;  %v11917_v63 = vld [vmem:[#allocation6_spill] sm:$0xff]  ;;  %v4828_v13 = vld [vmem:[%s11380_s2 + $0x50] sm:$0xff] }
 0x8f0   : > { %v5046_v19 = vadd.f32 %v4822_v21, %v11915_v35  ;;  %v11916_v7 = vld [vmem:[#allocation184_spill] sm:$0xff]  ;;  %5268 = vst [vmem:[%s11380_s2 + $0x10] sm:$0xff] %v5044_v9  ;;  %v5049_v6 = vadd.f32 %v4825_v39, %v11917_v63  ;;  %v5050_v9 = vadd.f32 %v4826_v46, %v11918_v34  ;;  %v4829_v21 = vld [vmem:[%s11380_s2 + $0x58] sm:$0xff]  ;;  %v11920_v5 = vld [vmem:[#allocation121_spill] sm:$0xff] }
 0x8f1   : > { %v5047_v57 = vadd.f32 %v4823_v20, %v11916_v7  ;;  %v4827_v1 = vld [vmem:[%s11380_s2 + $0x48] sm:$0xff]  ;;  %5269 = vst [vmem:[%s11380_s2 + $0x18] sm:$0xff] %v5045_v52  ;;  %v11919_v20 = vld [vmem:[#allocation89_spill] sm:$0xff]  ;;  %v4830_v52 = vld [vmem:[%s11380_s2 + $0x60] sm:$0xff]  ;;  %v5052_v35 = vadd.f32 %v4828_v13, %v11920_v5 }
 0x8f2   : > { %5270 = vst [vmem:[%s11380_s2 + $0x20] sm:$0xff] %v5046_v19  ;;  %v5051_v33 = vadd.f32 %v4827_v1, %v11919_v20  ;;  %v4831_v19 = vld [vmem:[%s11380_s2 + $0x68] sm:$0xff]  ;;  %v11921_v39 = vld [vmem:[#allocation153_spill] sm:$0xff]  ;;  %v4833_v1 = vld [vmem:[%s11380_s2 + $0x78] sm:$0xff] }
 0x8f3   : > { %5271 = vst [vmem:[%s11380_s2 + $0x28] sm:$0xff] %v5047_v57  ;;  %v5053_v7 = vadd.f32 %v4829_v21, %v11921_v39  ;;  %v4832_v57 = vld [vmem:[%s11380_s2 + $0x70] sm:$0xff]  ;;  %v5055_v63 = vadd.f32 %v4831_v19, %v8748_v40  ;;  %v11923_v13 = vld [vmem:[#allocation7_spill] sm:$0xff]  ;;  %v11924_v21 = vld [vmem:[#allocation58_spill] sm:$0xff] }
 0x8f4   : > { %5273 = vst.msk [vmem:[%s11380_s2 + $0x30] sm:$0xff] %vm5272_vm1, %v5048_v48  ;;  %v11922_v46 = vld [vmem:[#allocation185_spill] sm:$0xff]  ;;  %v5056_v34 = vadd.f32 %v4832_v57, %v11923_v13  ;;  %v5057_v40 = vadd.f32 %v4833_v1, %v11924_v21  ;;  %v4837_v5 = vld [vmem:[%s11380_s2 + $0x98] sm:$0xff]  ;;  %v4838_v39 = vld [vmem:[%s11380_s2 + $0xa0] sm:$0xff] }
 0x8f5   : > { %5274 = vst [vmem:[%s11380_s2 + $0x38] sm:$0xff] %v5049_v6  ;;  %v5054_v48 = vadd.f32 %v4830_v52, %v11922_v46  ;;  %v4834_v6 = vld [vmem:[%s11380_s2 + $0x80] sm:$0xff]  ;;  %v4836_v20 = vld [vmem:[%s11380_s2 + $0x90] sm:$0xff]  ;;  %v4839_v46 = vld [vmem:[%s11380_s2 + $0xa8] sm:$0xff] }
 0x8f6   : > { %5275 = vst [vmem:[%s11380_s2 + $0x40] sm:$0xff] %v5050_v9  ;;  %v4835_v9 = vld [vmem:[%s11380_s2 + $0x88] sm:$0xff]  ;;  %v4841_v13 = vld [vmem:[%s11380_s2 + $0xb8] sm:$0xff]  ;;  %v4842_v21 = vld [vmem:[%s11380_s2 + $0xc0] sm:$0xff] }
 0x8f7   : > { %5276 = vst [vmem:[%s11380_s2 + $0x48] sm:$0xff] %v5051_v33  ;;  %v11925_v33 = vld [vmem:[#allocation90_spill] sm:$0xff] }
 0x8f8   : > { %5277 = vst [vmem:[%s11380_s2 + $0x50] sm:$0xff] %v5052_v35  ;;  %v5058_v52 = vadd.f32 %v4834_v6, %v11925_v33  ;;  %v11926_v35 = vld [vmem:[#allocation122_spill] sm:$0xff]  ;;  %v5062_v6 = vadd.f32 %v4838_v39, %v8754_v36  ;;  %v11931_v33 = vld [vmem:[#allocation91_spill] sm:$0xff] }
 0x8f9   : > { %5278 = vst [vmem:[%s11380_s2 + $0x58] sm:$0xff] %v5053_v7  ;;  %v5059_v19 = vadd.f32 %v4835_v9, %v11926_v35  ;;  %v11927_v7 = vld [vmem:[#allocation154_spill] sm:$0xff]  ;;  %v11932_v35 = vld [vmem:[#allocation123_spill] sm:$0xff] }
 0x8fa   : > { %5279 = vst [vmem:[%s11380_s2 + $0x60] sm:$0xff] %v5054_v48  ;;  %v5060_v57 = vadd.f32 %v4836_v20, %v11927_v7  ;;  %v11928_v48 = vld [vmem:[#allocation186_spill] sm:$0xff]  ;;  %v4843_v20 = vld [vmem:[%s11380_s2 + $0xc8] sm:$0xff]  ;;  %v11933_v7 = vld [vmem:[#allocation155_spill] sm:$0xff] }
 0x8fb   : > { %5280 = vst.msk [vmem:[%s11380_s2 + $0x68] sm:$0xff] %vm5272_vm1, %v5055_v63  ;;  %v5061_v1 = vadd.f32 %v4837_v5, %v11928_v48  ;;  %v4840_v63 = vld [vmem:[%s11380_s2 + $0xb0] sm:$0xff]  ;;  %v4845_v39 = vld [vmem:[%s11380_s2 + $0xd8] sm:$0xff]  ;;  %v11934_v48 = vld [vmem:[#allocation187_spill] sm:$0xff] }
 0x8fc   : > { %5281 = vst [vmem:[%s11380_s2 + $0x70] sm:$0xff] %v5056_v34  ;;  %v11929_v34 = vld [vmem:[#allocation10_spill] sm:$0xff]  ;;  %v4844_v5 = vld [vmem:[%s11380_s2 + $0xd0] sm:$0xff] }
 0x8fd   : > { %5282 = vst [vmem:[%s11380_s2 + $0x78] sm:$0xff] %v5057_v40  ;;  %v5063_v9 = vadd.f32 %v4839_v46, %v11929_v34  ;;  %v11930_v40 = vld [vmem:[#allocation59_spill] sm:$0xff] }
 0x8fe   : > { %5283 = vst [vmem:[%s11380_s2 + $0x80] sm:$0xff] %v5058_v52  ;;  %v5064_v36 = vadd.f32 %v4840_v63, %v11930_v40  ;;  %v5065_v52 = vadd.f32 %v4841_v13, %v11931_v33  ;;  %v4846_v46 = vld [vmem:[%s11380_s2 + $0xe0] sm:$0xff]  ;;  %v4847_v63 = vld [vmem:[%s11380_s2 + $0xe8] sm:$0xff]  ;;  %v4848_v13 = vld [vmem:[%s11380_s2 + $0xf0] sm:$0xff] }
 0x8ff   : > { %5284 = vst [vmem:[%s11380_s2 + $0x88] sm:$0xff] %v5059_v19  ;;  %v5066_v19 = vadd.f32 %v4842_v21, %v11932_v35  ;;  %v11935_v34 = vld [vmem:[#allocation11_spill] sm:$0xff]  ;;  %v4849_v21 = vld [vmem:[%s11380_s2 + $0xf8] sm:$0xff]  ;;  %v11936_v40 = vld [vmem:[#allocation60_spill] sm:$0xff] }
 0x900   : > { %5285 = vst [vmem:[%s11380_s2 + $0x90] sm:$0xff] %v5060_v57  ;;  %v5067_v57 = vadd.f32 %v4843_v20, %v11933_v7  ;;  %v11937_v20 = vld [vmem:[#allocation92_spill] sm:$0xff] }
 0x901   : > { %5286 = vst [vmem:[%s11380_s2 + $0x98] sm:$0xff] %v5061_v1  ;;  %v5068_v1 = vadd.f32 %v4844_v5, %v11934_v48  ;;  %v5072_v33 = vadd.f32 %v4848_v13, %v11937_v20  ;;  %v11938_v5 = vld [vmem:[#allocation124_spill] sm:$0xff]  ;;  %v4858_v20 = vld [vmem:[%s11380_s2 + $0x140] sm:$0xff] }
 0x902   : > { %5287 = vst.msk [vmem:[%s11380_s2 + $0xa0] sm:$0xff] %vm5272_vm1, %v5062_v6  ;;  %v5069_v6 = vadd.f32 %v4845_v39, %v8756_v59  ;;  %v5071_v59 = vadd.f32 %v4847_v63, %v11936_v40  ;;  %v5073_v35 = vadd.f32 %v4849_v21, %v11938_v5  ;;  %v11939_v39 = vld [vmem:[#allocation156_spill] sm:$0xff]  ;;  %v11942_v21 = vld [vmem:[#allocation61_spill] sm:$0xff]  ;;  %v4857_v40 = vld [vmem:[%s11380_s2 + $0x138] sm:$0xff] }
 0x903   : > { %5288 = vst [vmem:[%s11380_s2 + $0xa8] sm:$0xff] %v5063_v9  ;;  %v5070_v9 = vadd.f32 %v4846_v46, %v11935_v34  ;;  %v11940_v46 = vld [vmem:[#allocation188_spill] sm:$0xff] }
 0x904   : > { %5289 = vst [vmem:[%s11380_s2 + $0xb0] sm:$0xff] %v5064_v36  ;;  %v4850_v36 = vld [vmem:[%s11380_s2 + $0x100] sm:$0xff]  ;;  %v11941_v13 = vld [vmem:[#allocation16_spill] sm:$0xff] }
 0x905   : > { %5290 = vst [vmem:[%s11380_s2 + $0xb8] sm:$0xff] %v5065_v52  ;;  %v4851_v52 = vld [vmem:[%s11380_s2 + $0x108] sm:$0xff]  ;;  %v5074_v7 = vadd.f32 %v4850_v36, %v11939_v39  ;;  %v4860_v39 = vld [vmem:[%s11380_s2 + $0x150] sm:$0xff] }
 0x906   : > { %5291 = vst [vmem:[%s11380_s2 + $0xc0] sm:$0xff] %v5066_v19  ;;  %v4852_v19 = vld [vmem:[%s11380_s2 + $0x110] sm:$0xff]  ;;  %v5075_v48 = vadd.f32 %v4851_v52, %v11940_v46  ;;  %v4859_v5 = vld [vmem:[%s11380_s2 + $0x148] sm:$0xff]  ;;  %v4861_v46 = vld [vmem:[%s11380_s2 + $0x158] sm:$0xff] }
 0x907   : > { %5292 = vst [vmem:[%s11380_s2 + $0xc8] sm:$0xff] %v5067_v57  ;;  %v4853_v57 = vld [vmem:[%s11380_s2 + $0x118] sm:$0xff]  ;;  %v5076_v63 = vadd.f32 %v4852_v19, %v8762_v51 }
 0x908   : > { %5293 = vst [vmem:[%s11380_s2 + $0xd0] sm:$0xff] %v5068_v1  ;;  %v4854_v1 = vld [vmem:[%s11380_s2 + $0x120] sm:$0xff]  ;;  %v5077_v34 = vadd.f32 %v4853_v57, %v11941_v13  ;;  %v4863_v13 = vld [vmem:[%s11380_s2 + $0x168] sm:$0xff] }
 0x909   : > { %5294 = vst.msk [vmem:[%s11380_s2 + $0xd8] sm:$0xff] %vm5272_vm1, %v5069_v6  ;;  %v4855_v6 = vld [vmem:[%s11380_s2 + $0x128] sm:$0xff]  ;;  %v5078_v51 = vadd.f32 %v4854_v1, %v11942_v21  ;;  %v4862_v1 = vld [vmem:[%s11380_s2 + $0x160] sm:$0xff]  ;;  %v11949_v21 = vld [vmem:[#allocation94_spill] sm:$0xff] }
 0x90a   : > { %5295 = vst [vmem:[%s11380_s2 + $0xe0] sm:$0xff] %v5070_v9  ;;  %v4856_v9 = vld [vmem:[%s11380_s2 + $0x130] sm:$0xff] }
 0x90b   : > { %5296 = vst [vmem:[%s11380_s2 + $0xe8] sm:$0xff] %v5071_v59  ;;  %v11943_v59 = vld [vmem:[#allocation93_spill] sm:$0xff] }
 0x90c   : > { %5297 = vst [vmem:[%s11380_s2 + $0xf0] sm:$0xff] %v5072_v33  ;;  %v5079_v36 = vadd.f32 %v4855_v6, %v11943_v59  ;;  %v11944_v33 = vld [vmem:[#allocation125_spill] sm:$0xff]  ;;  %v11950_v59 = vld [vmem:[#allocation126_spill] sm:$0xff] }
 0x90d   : > { %5298 = vst [vmem:[%s11380_s2 + $0xf8] sm:$0xff] %v5073_v35  ;;  %v5080_v52 = vadd.f32 %v4856_v9, %v11944_v33  ;;  %v11945_v35 = vld [vmem:[#allocation157_spill] sm:$0xff]  ;;  %v11951_v33 = vld [vmem:[#allocation158_spill] sm:$0xff] }
 0x90e   : > { %5299 = vst [vmem:[%s11380_s2 + $0x100] sm:$0xff] %v5074_v7  ;;  %v5081_v19 = vadd.f32 %v4857_v40, %v11945_v35  ;;  %v11946_v7 = vld [vmem:[#allocation189_spill] sm:$0xff]  ;;  %v4865_v40 = vld [vmem:[%s11380_s2 + $0x178] sm:$0xff] }
 0x90f   : > { %5300 = vst [vmem:[%s11380_s2 + $0x108] sm:$0xff] %v5075_v48  ;;  %v5082_v57 = vadd.f32 %v4858_v20, %v11946_v7  ;;  %v5083_v48 = vadd.f32 %v4859_v5, %v8764_v58  ;;  %v4864_v9 = vld [vmem:[%s11380_s2 + $0x170] sm:$0xff]  ;;  %v4866_v20 = vld [vmem:[%s11380_s2 + $0x180] sm:$0xff]  ;;  %v4867_v5 = vld [vmem:[%s11380_s2 + $0x188] sm:$0xff] }
 0x910   : > { %5301 = vst.msk [vmem:[%s11380_s2 + $0x110] sm:$0xff] %vm5272_vm1, %v5076_v63  ;;  %v11947_v63 = vld [vmem:[#allocation17_spill] sm:$0xff]  ;;  %v11952_v35 = vld [vmem:[#allocation190_spill] sm:$0xff]  ;;  %v5090_v7 = vadd.f32 %v4866_v20, %v8770_v25  ;;  %v11958_v20 = vld [vmem:[#allocation191_spill] sm:$0xff] }
 0x911   : > { %5302 = vst [vmem:[%s11380_s2 + $0x118] sm:$0xff] %v5077_v34  ;;  %v5084_v6 = vadd.f32 %v4860_v39, %v11947_v63  ;;  %v11948_v34 = vld [vmem:[#allocation62_spill] sm:$0xff]  ;;  %v4868_v39 = vld [vmem:[%s11380_s2 + $0x190] sm:$0xff]  ;;  %v11954_v63 = vld [vmem:[#allocation63_spill] sm:$0xff] }
 0x912   : > { %5303 = vst [vmem:[%s11380_s2 + $0x120] sm:$0xff] %v5078_v51  ;;  %v5085_v58 = vadd.f32 %v4861_v46, %v11948_v34  ;;  %v5086_v51 = vadd.f32 %v4862_v1, %v11949_v21  ;;  %v11953_v46 = vld [vmem:[#allocation22_spill] sm:$0xff]  ;;  %v4870_v1 = vld [vmem:[%s11380_s2 + $0x1a0] sm:$0xff]  ;;  %v5092_v25 = vadd.f32 %v4868_v39, %v11954_v63  ;;  %v4879_v63 = vld [vmem:[%s11380_s2 + $0x1e8] sm:$0xff] }
 0x913   : > { %5304 = vst [vmem:[%s11380_s2 + $0x128] sm:$0xff] %v5079_v36  ;;  %v5087_v36 = vadd.f32 %v4863_v13, %v11950_v59  ;;  %v11955_v13 = vld [vmem:[#allocation95_spill] sm:$0xff] }
 0x914   : > { %5305 = vst [vmem:[%s11380_s2 + $0x130] sm:$0xff] %v5080_v52  ;;  %v5088_v52 = vadd.f32 %v4864_v9, %v11951_v33  ;;  %v11956_v9 = vld [vmem:[#allocation127_spill] sm:$0xff] }
 0x915   : > { %5306 = vst [vmem:[%s11380_s2 + $0x138] sm:$0xff] %v5081_v19  ;;  %v5089_v19 = vadd.f32 %v4865_v40, %v11952_v35  ;;  %v5094_v21 = vadd.f32 %v4870_v1, %v11956_v9  ;;  %v11957_v40 = vld [vmem:[#allocation159_spill] sm:$0xff]  ;;  %v4876_v35 = vld [vmem:[%s11380_s2 + $0x1d0] sm:$0xff]  ;;  %v4881_v9 = vld [vmem:[%s11380_s2 + $0x1f8] sm:$0xff] }
 0x916   : > { %5307 = vst [vmem:[%s11380_s2 + $0x140] sm:$0xff] %v5082_v57  ;;  %v4869_v57 = vld [vmem:[%s11380_s2 + $0x198] sm:$0xff] }
 0x917   : > { %5308 = vst.msk [vmem:[%s11380_s2 + $0x148] sm:$0xff] %vm5272_vm1, %v5083_v48  ;;  %v5091_v48 = vadd.f32 %v4867_v5, %v11953_v46  ;;  %v5093_v34 = vadd.f32 %v4869_v57, %v11955_v13  ;;  %v11960_v57 = vld [vmem:[#allocation64_spill] sm:$0xff]  ;;  %v4878_v46 = vld [vmem:[%s11380_s2 + $0x1e0] sm:$0xff]  ;;  %v4880_v13 = vld [vmem:[%s11380_s2 + $0x1f0] sm:$0xff] }
 0x918   : > { %5309 = vst [vmem:[%s11380_s2 + $0x150] sm:$0xff] %v5084_v6  ;;  %v4871_v6 = vld [vmem:[%s11380_s2 + $0x1a8] sm:$0xff] }
 0x919   : > { %5310 = vst [vmem:[%s11380_s2 + $0x158] sm:$0xff] %v5085_v58  ;;  %v4872_v58 = vld [vmem:[%s11380_s2 + $0x1b0] sm:$0xff]  ;;  %v5095_v59 = vadd.f32 %v4871_v6, %v11957_v40  ;;  %v4882_v40 = vld [vmem:[%s11380_s2 + $0x200] sm:$0xff] }
 0x91a   : > { %5311 = vst [vmem:[%s11380_s2 + $0x160] sm:$0xff] %v5086_v51  ;;  %v4873_v51 = vld [vmem:[%s11380_s2 + $0x1b8] sm:$0xff]  ;;  %v5096_v33 = vadd.f32 %v4872_v58, %v11958_v20  ;;  %v11965_v20 = vld [vmem:[#allocation28_spill] sm:$0xff] }
 0x91b   : > { %5312 = vst [vmem:[%s11380_s2 + $0x168] sm:$0xff] %v5087_v36  ;;  %v4874_v36 = vld [vmem:[%s11380_s2 + $0x1c0] sm:$0xff]  ;;  %v5097_v5 = vadd.f32 %v4873_v51, %v8772_v2 }
 0x91c   : > { %5313 = vst [vmem:[%s11380_s2 + $0x170] sm:$0xff] %v5088_v52  ;;  %v4875_v52 = vld [vmem:[%s11380_s2 + $0x1c8] sm:$0xff] }
 0x91d   : > { %5314 = vst [vmem:[%s11380_s2 + $0x178] sm:$0xff] %v5089_v19  ;;  %v11959_v19 = vld [vmem:[#allocation23_spill] sm:$0xff]  ;;  %v5099_v2 = vadd.f32 %v4875_v52, %v11960_v57  ;;  %v4884_v52 = vld [vmem:[%s11380_s2 + $0x210] sm:$0xff] }
 0x91e   : > { %5315 = vst.msk [vmem:[%s11380_s2 + $0x180] sm:$0xff] %vm5272_vm1, %v5090_v7  ;;  %v5098_v39 = vadd.f32 %v4874_v36, %v11959_v19  ;;  %v4877_v7 = vld [vmem:[%s11380_s2 + $0x1d8] sm:$0xff]  ;;  %v4883_v36 = vld [vmem:[%s11380_s2 + $0x208] sm:$0xff]  ;;  %v11967_v19 = vld [vmem:[#allocation97_spill] sm:$0xff] }
 0x91f   : > { %5316 = vst [vmem:[%s11380_s2 + $0x188] sm:$0xff] %v5091_v48  ;;  %v11961_v48 = vld [vmem:[#allocation96_spill] sm:$0xff]  ;;  %v11968_v57 = vld [vmem:[#allocation129_spill] sm:$0xff] }
 0x920   : > { %5317 = vst [vmem:[%s11380_s2 + $0x190] sm:$0xff] %v5092_v25  ;;  %v5100_v1 = vadd.f32 %v4876_v35, %v11961_v48  ;;  %v11962_v25 = vld [vmem:[#allocation128_spill] sm:$0xff]  ;;  %v4885_v35 = vld [vmem:[%s11380_s2 + $0x218] sm:$0xff]  ;;  %v11969_v48 = vld [vmem:[#allocation161_spill] sm:$0xff] }
 0x921   : > { %5318 = vst [vmem:[%s11380_s2 + $0x198] sm:$0xff] %v5093_v34  ;;  %v5101_v6 = vadd.f32 %v4877_v7, %v11962_v25  ;;  %v11963_v34 = vld [vmem:[#allocation160_spill] sm:$0xff]  ;;  %v4886_v7 = vld [vmem:[%s11380_s2 + $0x220] sm:$0xff]  ;;  %v11970_v25 = vld [vmem:[#allocation193_spill] sm:$0xff] }
 0x922   : > { %5319 = vst [vmem:[%s11380_s2 + $0x1a0] sm:$0xff] %v5094_v21  ;;  %v5102_v58 = vadd.f32 %v4878_v46, %v11963_v34  ;;  %v11964_v21 = vld [vmem:[#allocation192_spill] sm:$0xff] }
 0x923   : > { %5320 = vst [vmem:[%s11380_s2 + $0x1a8] sm:$0xff] %v5095_v59  ;;  %v5103_v51 = vadd.f32 %v4879_v63, %v11964_v21  ;;  %v5104_v59 = vadd.f32 %v4880_v13, %v8778_v22  ;;  %v4887_v46 = vld [vmem:[%s11380_s2 + $0x228] sm:$0xff]  ;;  %v4888_v63 = vld [vmem:[%s11380_s2 + $0x230] sm:$0xff]  ;;  %v4889_v13 = vld [vmem:[%s11380_s2 + $0x238] sm:$0xff] }
 0x924   : > { %5321 = vst [vmem:[%s11380_s2 + $0x1b0] sm:$0xff] %v5096_v33  ;;  %v5105_v33 = vadd.f32 %v4881_v9, %v11965_v20  ;;  %v5111_v34 = vadd.f32 %v4887_v46, %v8780_v55  ;;  %v11971_v9 = vld [vmem:[#allocation29_spill] sm:$0xff] }
 0x925   : > { %5322 = vst.msk [vmem:[%s11380_s2 + $0x1b8] sm:$0xff] %vm5272_vm1, %v5097_v5  ;;  %v11966_v5 = vld [vmem:[#allocation65_spill] sm:$0xff]  ;;  %v5112_v21 = vadd.f32 %v4888_v63, %v11971_v9 }
 0x926   : > { %5323 = vst [vmem:[%s11380_s2 + $0x1c0] sm:$0xff] %v5098_v39  ;;  %v5106_v22 = vadd.f32 %v4882_v40, %v11966_v5  ;;  %v5107_v39 = vadd.f32 %v4883_v36, %v11967_v19  ;;  %v11972_v40 = vld [vmem:[#allocation66_spill] sm:$0xff]  ;;  %v4900_v9 = vld [vmem:[%s11380_s2 + $0x290] sm:$0xff] }
 0x927   : > { %5324 = vst [vmem:[%s11380_s2 + $0x1c8] sm:$0xff] %v5099_v2  ;;  %v5108_v2 = vadd.f32 %v4884_v52, %v11968_v57  ;;  %v5113_v55 = vadd.f32 %v4889_v13, %v11972_v40  ;;  %v11973_v36 = vld [vmem:[#allocation98_spill] sm:$0xff]  ;;  %v4899_v13 = vld [vmem:[%s11380_s2 + $0x288] sm:$0xff] }
 0x928   : > { %5325 = vst [vmem:[%s11380_s2 + $0x1d0] sm:$0xff] %v5100_v1  ;;  %v5109_v1 = vadd.f32 %v4885_v35, %v11969_v48  ;;  %v11974_v52 = vld [vmem:[#allocation130_spill] sm:$0xff] }
 0x929   : > { %5326 = vst [vmem:[%s11380_s2 + $0x1d8] sm:$0xff] %v5101_v6  ;;  %v5110_v6 = vadd.f32 %v4886_v7, %v11970_v25  ;;  %v11975_v35 = vld [vmem:[#allocation162_spill] sm:$0xff]  ;;  %v11976_v7 = vld [vmem:[#allocation24_spill] sm:$0xff]  ;;  %v4898_v25 = vld [vmem:[%s11380_s2 + $0x280] sm:$0xff] }
 0x92a   : > { %5327 = vst [vmem:[%s11380_s2 + $0x1e0] sm:$0xff] %v5102_v58  ;;  %v4890_v58 = vld [vmem:[%s11380_s2 + $0x240] sm:$0xff]  ;;  %v4897_v48 = vld [vmem:[%s11380_s2 + $0x278] sm:$0xff] }
 0x92b   : > { %5328 = vst [vmem:[%s11380_s2 + $0x1e8] sm:$0xff] %v5103_v51  ;;  %v4891_v51 = vld [vmem:[%s11380_s2 + $0x248] sm:$0xff]  ;;  %v5114_v20 = vadd.f32 %v4890_v58, %v11973_v36  ;;  %v4901_v40 = vld [vmem:[%s11380_s2 + $0x298] sm:$0xff]  ;;  %v4902_v36 = vld [vmem:[%s11380_s2 + $0x2a0] sm:$0xff] }
 0x92c   : > { %5329 = vst.msk [vmem:[%s11380_s2 + $0x1f0] sm:$0xff] %vm5272_vm1, %v5104_v59  ;;  %v4892_v59 = vld [vmem:[%s11380_s2 + $0x250] sm:$0xff]  ;;  %v5115_v5 = vadd.f32 %v4891_v51, %v11974_v52  ;;  %v4903_v52 = vld [vmem:[%s11380_s2 + $0x2a8] sm:$0xff] }
 0x92d   : > { %5330 = vst [vmem:[%s11380_s2 + $0x1f8] sm:$0xff] %v5105_v33  ;;  %v4893_v33 = vld [vmem:[%s11380_s2 + $0x258] sm:$0xff]  ;;  %v5116_v19 = vadd.f32 %v4892_v59, %v11975_v35  ;;  %v11983_v35 = vld [vmem:[#allocation35_spill] sm:$0xff] }
 0x92e   : > { %5331 = vst [vmem:[%s11380_s2 + $0x200] sm:$0xff] %v5106_v22  ;;  %v4894_v22 = vld [vmem:[%s11380_s2 + $0x260] sm:$0xff]  ;;  %v5117_v57 = vadd.f32 %v4893_v33, %v11976_v7  ;;  %v11984_v7 = vld [vmem:[#allocation68_spill] sm:$0xff] }
 0x92f   : > { %5332 = vst [vmem:[%s11380_s2 + $0x208] sm:$0xff] %v5107_v39  ;;  %v4895_v39 = vld [vmem:[%s11380_s2 + $0x268] sm:$0xff]  ;;  %v5118_v46 = vadd.f32 %v4894_v22, %v8786_v27  ;;  %v4904_v22 = vld [vmem:[%s11380_s2 + $0x2b0] sm:$0xff] }
 0x930   : > { %5333 = vst [vmem:[%s11380_s2 + $0x210] sm:$0xff] %v5108_v2  ;;  %v4896_v2 = vld [vmem:[%s11380_s2 + $0x270] sm:$0xff] }
 0x931   : > { %5334 = vst [vmem:[%s11380_s2 + $0x218] sm:$0xff] %v5109_v1  ;;  %v11977_v1 = vld [vmem:[#allocation34_spill] sm:$0xff] }
 0x932   : > { %5335 = vst [vmem:[%s11380_s2 + $0x220] sm:$0xff] %v5110_v6  ;;  %v5119_v63 = vadd.f32 %v4895_v39, %v11977_v1  ;;  %v11978_v6 = vld [vmem:[#allocation67_spill] sm:$0xff]  ;;  %v4905_v39 = vld [vmem:[%s11380_s2 + $0x2b8] sm:$0xff]  ;;  %v11986_v1 = vld [vmem:[#allocation132_spill] sm:$0xff] }
 0x933   : > { %5336 = vst.msk [vmem:[%s11380_s2 + $0x228] sm:$0xff] %vm5272_vm1, %v5111_v34  ;;  %v5120_v27 = vadd.f32 %v4896_v2, %v11978_v6  ;;  %v11979_v34 = vld [vmem:[#allocation99_spill] sm:$0xff]  ;;  %v11985_v2 = vld [vmem:[#allocation100_spill] sm:$0xff] }
 0x934   : > { %5337 = vst [vmem:[%s11380_s2 + $0x230] sm:$0xff] %v5112_v21  ;;  %v5121_v58 = vadd.f32 %v4897_v48, %v11979_v34  ;;  %v11980_v21 = vld [vmem:[#allocation131_spill] sm:$0xff]  ;;  %v4907_v48 = vld [vmem:[%s11380_s2 + $0x2c8] sm:$0xff]  ;;  %v11988_v34 = vld [vmem:[#allocation30_spill] sm:$0xff] }
 0x935   : > { %5338 = vst [vmem:[%s11380_s2 + $0x238] sm:$0xff] %v5113_v55  ;;  %v5122_v51 = vadd.f32 %v4898_v25, %v11980_v21  ;;  %v11981_v55 = vld [vmem:[#allocation163_spill] sm:$0xff]  ;;  %v4908_v25 = vld [vmem:[%s11380_s2 + $0x2d0] sm:$0xff]  ;;  %v11987_v6 = vld [vmem:[#allocation164_spill] sm:$0xff] }
 0x936   : > { %5339 = vst [vmem:[%s11380_s2 + $0x240] sm:$0xff] %v5114_v20  ;;  %v5123_v59 = vadd.f32 %v4899_v13, %v11981_v55  ;;  %v11982_v20 = vld [vmem:[#allocation25_spill] sm:$0xff]  ;;  %v4909_v13 = vld [vmem:[%s11380_s2 + $0x2d8] sm:$0xff]  ;;  %v5132_v21 = vadd.f32 %v4908_v25, %v8794_v11 }
 0x937   : > { %5340 = vst [vmem:[%s11380_s2 + $0x248] sm:$0xff] %v5115_v5  ;;  %v5124_v33 = vadd.f32 %v4900_v9, %v11982_v20  ;;  %v5125_v5 = vadd.f32 %v4901_v40, %v8788_v38  ;;  %v5127_v38 = vadd.f32 %v4903_v52, %v11984_v7  ;;  %v4910_v9 = vld [vmem:[%s11380_s2 + $0x2e0] sm:$0xff]  ;;  %v11989_v40 = vld [vmem:[#allocation37_spill] sm:$0xff]  ;;  %v4913_v20 = vld [vmem:[%s11380_s2 + $0x2f8] sm:$0xff] }
 0x938   : > { %5341 = vst [vmem:[%s11380_s2 + $0x250] sm:$0xff] %v5116_v19  ;;  %v5126_v19 = vadd.f32 %v4902_v36, %v11983_v35  ;;  %v5133_v55 = vadd.f32 %v4909_v13, %v11989_v40  ;;  %v11990_v36 = vld [vmem:[#allocation69_spill] sm:$0xff]  ;;  %v4922_v40 = vld [vmem:[%s11380_s2 + $0x340] sm:$0xff] }
 0x939   : > { %5342 = vst [vmem:[%s11380_s2 + $0x258] sm:$0xff] %v5117_v57  ;;  %v4906_v57 = vld [vmem:[%s11380_s2 + $0x2c0] sm:$0xff]  ;;  %v5134_v11 = vadd.f32 %v4910_v9, %v11990_v36  ;;  %v4920_v13 = vld [vmem:[%s11380_s2 + $0x330] sm:$0xff]  ;;  %v4921_v9 = vld [vmem:[%s11380_s2 + $0x338] sm:$0xff] }
 0x93a   : > { %5343 = vst.msk [vmem:[%s11380_s2 + $0x260] sm:$0xff] %vm5272_vm1, %v5118_v46  ;;  %v5128_v46 = vadd.f32 %v4904_v22, %v11985_v2  ;;  %v11992_v22 = vld [vmem:[#allocation133_spill] sm:$0xff]  ;;  %v4923_v36 = vld [vmem:[%s11380_s2 + $0x348] sm:$0xff] }
 0x93b   : > { %5344 = vst [vmem:[%s11380_s2 + $0x268] sm:$0xff] %v5119_v63  ;;  %v5129_v63 = vadd.f32 %v4905_v39, %v11986_v1  ;;  %v11993_v39 = vld [vmem:[#allocation165_spill] sm:$0xff]  ;;  %v4918_v1 = vld [vmem:[%s11380_s2 + $0x320] sm:$0xff] }
 0x93c   : > { %5345 = vst [vmem:[%s11380_s2 + $0x270] sm:$0xff] %v5120_v27  ;;  %v5130_v27 = vadd.f32 %v4906_v57, %v11987_v6  ;;  %v5137_v7 = vadd.f32 %v4913_v20, %v11993_v39  ;;  %v11994_v57 = vld [vmem:[#allocation32_spill] sm:$0xff]  ;;  %v12002_v39 = vld [vmem:[#allocation71_spill] sm:$0xff] }
 0x93d   : > { %5346 = vst [vmem:[%s11380_s2 + $0x278] sm:$0xff] %v5121_v58  ;;  %v5131_v58 = vadd.f32 %v4907_v48, %v11988_v34  ;;  %v4919_v6 = vld [vmem:[%s11380_s2 + $0x328] sm:$0xff]  ;;  %v11997_v34 = vld [vmem:[#allocation102_spill] sm:$0xff] }
 0x93e   : > { %5347 = vst [vmem:[%s11380_s2 + $0x280] sm:$0xff] %v5122_v51  ;;  %v4911_v51 = vld [vmem:[%s11380_s2 + $0x2e8] sm:$0xff] }
 0x93f   : > { %5348 = vst [vmem:[%s11380_s2 + $0x288] sm:$0xff] %v5123_v59  ;;  %v4912_v59 = vld [vmem:[%s11380_s2 + $0x2f0] sm:$0xff] }
 0x940   : > { %5349 = vst [vmem:[%s11380_s2 + $0x290] sm:$0xff] %v5124_v33  ;;  %v11991_v33 = vld [vmem:[#allocation101_spill] sm:$0xff]  ;;  %v5136_v35 = vadd.f32 %v4912_v59, %v11992_v22  ;;  %v12001_v22 = vld [vmem:[#allocation39_spill] sm:$0xff] }
 0x941   : > { %5350 = vst.msk [vmem:[%s11380_s2 + $0x298] sm:$0xff] %vm5272_vm1, %v5125_v5  ;;  %v5135_v52 = vadd.f32 %v4911_v51, %v11991_v33  ;;  %v4914_v5 = vld [vmem:[%s11380_s2 + $0x300] sm:$0xff]  ;;  %v4924_v33 = vld [vmem:[%s11380_s2 + $0x350] sm:$0xff] }
 0x942   : > { %5351 = vst [vmem:[%s11380_s2 + $0x2a0] sm:$0xff] %v5126_v19  ;;  %v4915_v19 = vld [vmem:[%s11380_s2 + $0x308] sm:$0xff]  ;;  %v5138_v2 = vadd.f32 %v4914_v5, %v11994_v57  ;;  %v4925_v5 = vld [vmem:[%s11380_s2 + $0x358] sm:$0xff] }
 0x943   : > { %5352 = vst [vmem:[%s11380_s2 + $0x2a8] sm:$0xff] %v5127_v38  ;;  %v4916_v38 = vld [vmem:[%s11380_s2 + $0x310] sm:$0xff]  ;;  %v5139_v48 = vadd.f32 %v4915_v19, %v8796_v30  ;;  %v4926_v19 = vld [vmem:[%s11380_s2 + $0x360] sm:$0xff] }
 0x944   : > { %5353 = vst [vmem:[%s11380_s2 + $0x2b0] sm:$0xff] %v5128_v46  ;;  %v4917_v46 = vld [vmem:[%s11380_s2 + $0x318] sm:$0xff] }
 0x945   : > { %5354 = vst [vmem:[%s11380_s2 + $0x2b8] sm:$0xff] %v5129_v63  ;;  %v11995_v63 = vld [vmem:[#allocation38_spill] sm:$0xff] }
 0x946   : > { %5355 = vst [vmem:[%s11380_s2 + $0x2c0] sm:$0xff] %v5130_v27  ;;  %v5140_v25 = vadd.f32 %v4916_v38, %v11995_v63  ;;  %v11996_v27 = vld [vmem:[#allocation70_spill] sm:$0xff]  ;;  %v12003_v38 = vld [vmem:[#allocation103_spill] sm:$0xff] }
 0x947   : > { %5356 = vst [vmem:[%s11380_s2 + $0x2c8] sm:$0xff] %v5131_v58  ;;  %v5141_v30 = vadd.f32 %v4917_v46, %v11996_v27  ;;  %v5142_v58 = vadd.f32 %v4918_v1, %v11997_v34  ;;  %v5149_v57 = vadd.f32 %v4925_v5, %v12003_v38  ;;  %v12004_v46 = vld [vmem:[#allocation135_spill] sm:$0xff]  ;;  %v4929_v1 = vld [vmem:[%s11380_s2 + $0x378] sm:$0xff]  ;;  %v4932_v34 = vld [vmem:[%s11380_s2 + $0x390] sm:$0xff] }
 0x948   : > { %5357 = vst.msk [vmem:[%s11380_s2 + $0x2d0] sm:$0xff] %vm5272_vm1, %v5132_v21  ;;  %v11998_v21 = vld [vmem:[#allocation134_spill] sm:$0xff]  ;;  %v12005_v63 = vld [vmem:[#allocation167_spill] sm:$0xff]  ;;  %v12012_v38 = vld [vmem:[#allocation73_spill] sm:$0xff] }
 0x949   : > { %5358 = vst [vmem:[%s11380_s2 + $0x2d8] sm:$0xff] %v5133_v55  ;;  %v5143_v51 = vadd.f32 %v4919_v6, %v11998_v21  ;;  %v11999_v55 = vld [vmem:[#allocation166_spill] sm:$0xff]  ;;  %v4930_v6 = vld [vmem:[%s11380_s2 + $0x380] sm:$0xff]  ;;  %v12007_v21 = vld [vmem:[#allocation72_spill] sm:$0xff] }
 0x94a   : > { %5359 = vst [vmem:[%s11380_s2 + $0x2e0] sm:$0xff] %v5134_v11  ;;  %v5144_v59 = vadd.f32 %v4920_v13, %v11999_v55  ;;  %v12000_v11 = vld [vmem:[#allocation33_spill] sm:$0xff]  ;;  %v5153_v13 = vadd.f32 %v4929_v1, %v8804_v16  ;;  %v4937_v5 = vld [vmem:[%s11380_s2 + $0x3b8] sm:$0xff] }
 0x94b   : > { %5360 = vst [vmem:[%s11380_s2 + $0x2e8] sm:$0xff] %v5135_v52  ;;  %v5145_v20 = vadd.f32 %v4921_v9, %v12000_v11  ;;  %v5146_v52 = vadd.f32 %v4922_v40, %v8802_v42  ;;  %v5148_v42 = vadd.f32 %v4924_v33, %v12002_v39  ;;  %v4933_v9 = vld [vmem:[%s11380_s2 + $0x398] sm:$0xff]  ;;  %v12008_v40 = vld [vmem:[#allocation104_spill] sm:$0xff]  ;;  %v12014_v1 = vld [vmem:[#allocation137_spill] sm:$0xff] }
 0x94c   : > { %5361 = vst [vmem:[%s11380_s2 + $0x2f0] sm:$0xff] %v5136_v35  ;;  %v5147_v35 = vadd.f32 %v4923_v36, %v12001_v22  ;;  %v5156_v55 = vadd.f32 %v4932_v34, %v12008_v40  ;;  %v12009_v36 = vld [vmem:[#allocation136_spill] sm:$0xff]  ;;  %v4945_v34 = vld [vmem:[%s11380_s2 + $0x3f8] sm:$0xff] }
 0x94d   : > { %5362 = vst [vmem:[%s11380_s2 + $0x2f8] sm:$0xff] %v5137_v7  ;;  %v4927_v7 = vld [vmem:[%s11380_s2 + $0x368] sm:$0xff]  ;;  %v5157_v11 = vadd.f32 %v4933_v9, %v12009_v36  ;;  %v12016_v9 = vld [vmem:[#allocation42_spill] sm:$0xff] }
 0x94e   : > { %5363 = vst [vmem:[%s11380_s2 + $0x300] sm:$0xff] %v5138_v2  ;;  %v4928_v2 = vld [vmem:[%s11380_s2 + $0x370] sm:$0xff]  ;;  %v12010_v33 = vld [vmem:[#allocation168_spill] sm:$0xff]  ;;  %v12018_v40 = vld [vmem:[#allocation106_spill] sm:$0xff] }
 0x94f   : > { %5364 = vst.msk [vmem:[%s11380_s2 + $0x308] sm:$0xff] %vm5272_vm1, %v5139_v48  ;;  %v5150_v48 = vadd.f32 %v4926_v19, %v12004_v46  ;;  %v5152_v27 = vadd.f32 %v4928_v2, %v8676_v60  ;;  %v4939_v39 = vld [vmem:[%s11380_s2 + $0x3c8] sm:$0xff]  ;;  %v12013_v2 = vld [vmem:[#allocation105_spill] sm:$0xff]  ;;  %v12019_v36 = vld [vmem:[#allocation138_spill] sm:$0xff] }
 0x950   : > { %5365 = vst [vmem:[%s11380_s2 + $0x310] sm:$0xff] %v5140_v25  ;;  %v5151_v25 = vadd.f32 %v4927_v7, %v12005_v63  ;;  %v4940_v7 = vld [vmem:[%s11380_s2 + $0x3d0] sm:$0xff]  ;;  %v5163_v46 = vadd.f32 %v4939_v39, %v12013_v2  ;;  %v4953_v39 = vld [vmem:[%s11380_s2 + $0x438] sm:$0xff] }
 0x951   : > { %5366 = vst [vmem:[%s11380_s2 + $0x318] sm:$0xff] %v5141_v30  ;;  %v4931_v30 = vld [vmem:[%s11380_s2 + $0x388] sm:$0xff]  ;;  %v5164_v63 = vadd.f32 %v4940_v7, %v12014_v1  ;;  %v12022_v7 = vld [vmem:[#allocation75_spill] sm:$0xff]  ;;  %v4956_v2 = vld [vmem:[%s11380_s2 + $0x450] sm:$0xff] }
 0x952   : > { %5367 = vst [vmem:[%s11380_s2 + $0x320] sm:$0xff] %v5142_v58  ;;  %v12006_v58 = vld [vmem:[#allocation40_spill] sm:$0xff]  ;;  %v5155_v16 = vadd.f32 %v4931_v30, %v12007_v21  ;;  %v4944_v30 = vld [vmem:[%s11380_s2 + $0x3f0] sm:$0xff]  ;;  %v4957_v1 = vld [vmem:[%s11380_s2 + $0x458] sm:$0xff] }
 0x953   : > { %5368 = vst [vmem:[%s11380_s2 + $0x328] sm:$0xff] %v5143_v51  ;;  %v5154_v60 = vadd.f32 %v4930_v6, %v12006_v58  ;;  %v4934_v51 = vld [vmem:[%s11380_s2 + $0x3a0] sm:$0xff]  ;;  %v12015_v6 = vld [vmem:[#allocation169_spill] sm:$0xff]  ;;  %v4947_v21 = vld [vmem:[%s11380_s2 + $0x408] sm:$0xff] }
 0x954   : > { %5369 = vst [vmem:[%s11380_s2 + $0x330] sm:$0xff] %v5144_v59  ;;  %v4935_v59 = vld [vmem:[%s11380_s2 + $0x3a8] sm:$0xff] }
 0x955   : > { %5370 = vst [vmem:[%s11380_s2 + $0x338] sm:$0xff] %v5145_v20  ;;  %v4936_v20 = vld [vmem:[%s11380_s2 + $0x3b0] sm:$0xff]  ;;  %v5159_v22 = vadd.f32 %v4935_v59, %v8682_v37  ;;  %v4949_v59 = vld [vmem:[%s11380_s2 + $0x418] sm:$0xff] }
 0x956   : > { %5371 = vst.msk [vmem:[%s11380_s2 + $0x340] sm:$0xff] %vm5272_vm1, %v5146_v52  ;;  %v5158_v52 = vadd.f32 %v4934_v51, %v12010_v33  ;;  %v5160_v19 = vadd.f32 %v4936_v20, %v8806_v4  ;;  %v4948_v51 = vld [vmem:[%s11380_s2 + $0x410] sm:$0xff]  ;;  %v4950_v20 = vld [vmem:[%s11380_s2 + $0x420] sm:$0xff]  ;;  %v12020_v33 = vld [vmem:[#allocation170_spill] sm:$0xff] }
 0x957   : > { %5372 = vst [vmem:[%s11380_s2 + $0x348] sm:$0xff] %v5147_v35  ;;  %v4938_v35 = vld [vmem:[%s11380_s2 + $0x3c0] sm:$0xff] }
 0x958   : > { %5373 = vst [vmem:[%s11380_s2 + $0x350] sm:$0xff] %v5148_v42  ;;  %v12011_v42 = vld [vmem:[#allocation41_spill] sm:$0xff]  ;;  %v5162_v4 = vadd.f32 %v4938_v35, %v12012_v38  ;;  %v4955_v38 = vld [vmem:[%s11380_s2 + $0x448] sm:$0xff] }
 0x959   : > { %5374 = vst [vmem:[%s11380_s2 + $0x358] sm:$0xff] %v5149_v57  ;;  %v5161_v37 = vadd.f32 %v4937_v5, %v12011_v42  ;;  %v4941_v57 = vld [vmem:[%s11380_s2 + $0x3d8] sm:$0xff]  ;;  %v4951_v5 = vld [vmem:[%s11380_s2 + $0x428] sm:$0xff]  ;;  %v4952_v35 = vld [vmem:[%s11380_s2 + $0x430] sm:$0xff] }
 0x95a   : > { %5375 = vst [vmem:[%s11380_s2 + $0x360] sm:$0xff] %v5150_v48  ;;  %v4942_v48 = vld [vmem:[%s11380_s2 + $0x3e0] sm:$0xff] }
 0x95b   : > { %5376 = vst [vmem:[%s11380_s2 + $0x368] sm:$0xff] %v5151_v25  ;;  %v4943_v25 = vld [vmem:[%s11380_s2 + $0x3e8] sm:$0xff]  ;;  %v12021_v42 = vld [vmem:[#allocation43_spill] sm:$0xff] }
 0x95c   : > { %5377 = vst [vmem:[%s11380_s2 + $0x370] sm:$0xff] %v5152_v27  ;;  %v5165_v27 = vadd.f32 %v4941_v57, %v12015_v6  ;;  %v5167_v58 = vadd.f32 %v4943_v25, %v8808_v23  ;;  %v4958_v6 = vld [vmem:[%s11380_s2 + $0x460] sm:$0xff] }
 0x95d   : > { %5378 = vst.msk [vmem:[%s11380_s2 + $0x378] sm:$0xff] %vm5272_vm1, %v5153_v13  ;;  %v5166_v13 = vadd.f32 %v4942_v48, %v8684_v47  ;;  %v5168_v47 = vadd.f32 %v4944_v30, %v12016_v9  ;;  %v4959_v30 = vld [vmem:[%s11380_s2 + $0x468] sm:$0xff] }
 0x95e   : > { %5379 = vst [vmem:[%s11380_s2 + $0x380] sm:$0xff] %v5154_v60  ;;  %v4946_v60 = vld [vmem:[%s11380_s2 + $0x400] sm:$0xff]  ;;  %v12027_v9 = vld [vmem:[#allocation76_spill] sm:$0xff] }
 0x95f   : > { %5380 = vst [vmem:[%s11380_s2 + $0x388] sm:$0xff] %v5155_v16  ;;  %v12017_v16 = vld [vmem:[#allocation74_spill] sm:$0xff] }
 0x960   : > { %5381 = vst [vmem:[%s11380_s2 + $0x390] sm:$0xff] %v5156_v55  ;;  %v5169_v23 = vadd.f32 %v4945_v34, %v12017_v16  ;;  %v5170_v55 = vadd.f32 %v4946_v60, %v12018_v40  ;;  %v4960_v34 = vld [vmem:[%s11380_s2 + $0x470] sm:$0xff]  ;;  %v4961_v60 = vld [vmem:[%s11380_s2 + $0x478] sm:$0xff] }
 0x961   : > { %5382 = vst [vmem:[%s11380_s2 + $0x398] sm:$0xff] %v5157_v11  ;;  %v5171_v11 = vadd.f32 %v4947_v21, %v12019_v36  ;;  %v12028_v21 = vld [vmem:[#allocation108_spill] sm:$0xff] }
 0x962   : > { %5383 = vst [vmem:[%s11380_s2 + $0x3a0] sm:$0xff] %v5158_v52  ;;  %v5172_v52 = vadd.f32 %v4948_v51, %v12020_v33  ;;  %v5184_v16 = vadd.f32 %v4960_v34, %v12028_v21  ;;  %v12029_v51 = vld [vmem:[#allocation140_spill] sm:$0xff]  ;;  %v4966_v33 = vld [vmem:[%s11380_s2 + $0x4a0] sm:$0xff] }
 0x963   : > { %5384 = vst [vmem:[%s11380_s2 + $0x3a8] sm:$0xff] %v5159_v22  ;;  %v5173_v22 = vadd.f32 %v4949_v59, %v8690_v18  ;;  %v5175_v18 = vadd.f32 %v4951_v5, %v12021_v42  ;;  %v5185_v40 = vadd.f32 %v4961_v60, %v12029_v51  ;;  %v12030_v59 = vld [vmem:[#allocation172_spill] sm:$0xff]  ;;  %v12033_v42 = vld [vmem:[#allocation109_spill] sm:$0xff] }
 0x964   : > { %5385 = vst.msk [vmem:[%s11380_s2 + $0x3b0] sm:$0xff] %vm5272_vm1, %v5160_v19  ;;  %v5174_v19 = vadd.f32 %v4950_v20, %v8810_v53  ;;  %v5176_v53 = vadd.f32 %v4952_v35, %v12022_v7  ;;  %v4967_v5 = vld [vmem:[%s11380_s2 + $0x4a8] sm:$0xff]  ;;  %v4968_v35 = vld [vmem:[%s11380_s2 + $0x4b0] sm:$0xff] }
 0x965   : > { %5386 = vst [vmem:[%s11380_s2 + $0x3b8] sm:$0xff] %v5161_v37  ;;  %v4954_v37 = vld [vmem:[%s11380_s2 + $0x440] sm:$0xff]  ;;  %v12034_v7 = vld [vmem:[#allocation141_spill] sm:$0xff]  ;;  %v4979_v21 = vld [vmem:[%s11380_s2 + $0x508] sm:$0xff] }
 0x966   : > { %5387 = vst [vmem:[%s11380_s2 + $0x3c0] sm:$0xff] %v5162_v4  ;;  %v12023_v4 = vld [vmem:[#allocation107_spill] sm:$0xff] }
 0x967   : > { %5388 = vst [vmem:[%s11380_s2 + $0x3c8] sm:$0xff] %v5163_v46  ;;  %v5177_v57 = vadd.f32 %v4953_v39, %v12023_v4  ;;  %v12024_v46 = vld [vmem:[#allocation139_spill] sm:$0xff]  ;;  %v4969_v39 = vld [vmem:[%s11380_s2 + $0x4b8] sm:$0xff]  ;;  %v12035_v4 = vld [vmem:[#allocation173_spill] sm:$0xff] }
 0x968   : > { %5389 = vst [vmem:[%s11380_s2 + $0x3d0] sm:$0xff] %v5164_v63  ;;  %v5178_v48 = vadd.f32 %v4954_v37, %v12024_v46  ;;  %v12025_v63 = vld [vmem:[#allocation171_spill] sm:$0xff] }
 0x969   : > { %5390 = vst [vmem:[%s11380_s2 + $0x3d8] sm:$0xff] %v5165_v27  ;;  %v5179_v25 = vadd.f32 %v4955_v38, %v12025_v63  ;;  %v5180_v27 = vadd.f32 %v4956_v2, %v8692_v12  ;;  %v4970_v37 = vld [vmem:[%s11380_s2 + $0x4c0] sm:$0xff]  ;;  %v4971_v38 = vld [vmem:[%s11380_s2 + $0x4c8] sm:$0xff]  ;;  %v4972_v2 = vld [vmem:[%s11380_s2 + $0x4d0] sm:$0xff] }
 0x96a   : > { %5391 = vst [vmem:[%s11380_s2 + $0x3e0] sm:$0xff] %v5166_v13  ;;  %v5181_v13 = vadd.f32 %v4957_v1, %v8812_v26  ;;  %v5183_v26 = vadd.f32 %v4959_v30, %v12027_v9  ;;  %v5194_v46 = vadd.f32 %v4970_v37, %v8700_v24  ;;  %v5195_v1 = vadd.f32 %v4971_v38, %v8816_v41  ;;  %v4974_v63 = vld [vmem:[%s11380_s2 + $0x4e0] sm:$0xff]  ;;  %v4976_v30 = vld [vmem:[%s11380_s2 + $0x4f0] sm:$0xff]  ;;  %v12047_v38 = vld [vmem:[#allocation80_spill] sm:$0xff] }
 0x96b   : > { %5392 = vst.msk [vmem:[%s11380_s2 + $0x3e8] sm:$0xff] %vm5272_vm1, %v5167_v58  ;;  %v12026_v58 = vld [vmem:[#allocation44_spill] sm:$0xff]  ;;  %v4978_v9 = vld [vmem:[%s11380_s2 + $0x500] sm:$0xff]  ;;  %v4988_v37 = vld [vmem:[%s11380_s2 + $0x550] sm:$0xff] }
 0x96c   : > { %5393 = vst [vmem:[%s11380_s2 + $0x3f0] sm:$0xff] %v5168_v47  ;;  %v5182_v12 = vadd.f32 %v4958_v6, %v12026_v58  ;;  %v4962_v47 = vld [vmem:[%s11380_s2 + $0x480] sm:$0xff]  ;;  %v4975_v6 = vld [vmem:[%s11380_s2 + $0x4e8] sm:$0xff]  ;;  %v4977_v58 = vld [vmem:[%s11380_s2 + $0x4f8] sm:$0xff]  ;;  %v5202_v51 = vadd.f32 %v4978_v9, %v8818_v61 }
 0x96d   : > { %5394 = vst [vmem:[%s11380_s2 + $0x3f8] sm:$0xff] %v5169_v23  ;;  %v4963_v23 = vld [vmem:[%s11380_s2 + $0x488] sm:$0xff]  ;;  %v5186_v36 = vadd.f32 %v4962_v47, %v12030_v59  ;;  %v4982_v59 = vld [vmem:[%s11380_s2 + $0x520] sm:$0xff]  ;;  %v12053_v9 = vld [vmem:[#allocation113_spill] sm:$0xff] }
 0x96e   : > { %5395 = vst [vmem:[%s11380_s2 + $0x400] sm:$0xff] %v5170_v55  ;;  %v4964_v55 = vld [vmem:[%s11380_s2 + $0x490] sm:$0xff]  ;;  %v5187_v20 = vadd.f32 %v4963_v23, %v8698_v8 }
 0x96f   : > { %5396 = vst [vmem:[%s11380_s2 + $0x408] sm:$0xff] %v5171_v11  ;;  %v4965_v11 = vld [vmem:[%s11380_s2 + $0x498] sm:$0xff]  ;;  %v4980_v23 = vld [vmem:[%s11380_s2 + $0x510] sm:$0xff] }
 0x970   : > { %5397 = vst [vmem:[%s11380_s2 + $0x410] sm:$0xff] %v5172_v52  ;;  %v5188_v52 = vadd.f32 %v4964_v55, %v8814_v3  ;;  %v12041_v55 = vld [vmem:[#allocation47_spill] sm:$0xff] }
 0x971   : > { %5398 = vst [vmem:[%s11380_s2 + $0x418] sm:$0xff] %v5173_v22  ;;  %v12031_v22 = vld [vmem:[#allocation45_spill] sm:$0xff] }
 0x972   : > { %5399 = vst.msk [vmem:[%s11380_s2 + $0x420] sm:$0xff] %vm5272_vm1, %v5174_v19  ;;  %v5189_v8 = vadd.f32 %v4965_v11, %v12031_v22  ;;  %v12032_v19 = vld [vmem:[#allocation77_spill] sm:$0xff]  ;;  %v4983_v11 = vld [vmem:[%s11380_s2 + $0x528] sm:$0xff] }
 0x973   : > { %5400 = vst [vmem:[%s11380_s2 + $0x428] sm:$0xff] %v5175_v18  ;;  %v5190_v3 = vadd.f32 %v4966_v33, %v12032_v19  ;;  %v5191_v18 = vadd.f32 %v4967_v5, %v12033_v42  ;;  %v12044_v5 = vld [vmem:[#allocation143_spill] sm:$0xff]  ;;  %v4987_v42 = vld [vmem:[%s11380_s2 + $0x548] sm:$0xff] }
 0x974   : > { %5401 = vst [vmem:[%s11380_s2 + $0x430] sm:$0xff] %v5176_v53  ;;  %v5192_v53 = vadd.f32 %v4968_v35, %v12034_v7  ;;  %v5206_v22 = vadd.f32 %v4982_v59, %v12044_v5  ;;  %v12045_v35 = vld [vmem:[#allocation175_spill] sm:$0xff]  ;;  %v12046_v7 = vld [vmem:[#allocation48_spill] sm:$0xff]  ;;  %v5001_v59 = vld [vmem:[%s11380_s2 + $0x5b8] sm:$0xff] }
 0x975   : > { %5402 = vst [vmem:[%s11380_s2 + $0x438] sm:$0xff] %v5177_v57  ;;  %v5193_v57 = vadd.f32 %v4969_v39, %v12035_v4  ;;  %v5207_v19 = vadd.f32 %v4983_v11, %v12045_v35  ;;  %v4990_v4 = vld [vmem:[%s11380_s2 + $0x560] sm:$0xff]  ;;  %v12056_v11 = vld [vmem:[#allocation50_spill] sm:$0xff] }
 0x976   : > { %5403 = vst [vmem:[%s11380_s2 + $0x440] sm:$0xff] %v5178_v48  ;;  %v4973_v48 = vld [vmem:[%s11380_s2 + $0x4d8] sm:$0xff] }
 0x977   : > { %5404 = vst [vmem:[%s11380_s2 + $0x448] sm:$0xff] %v5179_v25  ;;  %v12036_v25 = vld [vmem:[#allocation46_spill] sm:$0xff] }
 0x978   : > { %5405 = vst [vmem:[%s11380_s2 + $0x450] sm:$0xff] %v5180_v27  ;;  %v5196_v24 = vadd.f32 %v4972_v2, %v12036_v25  ;;  %v12037_v27 = vld [vmem:[#allocation78_spill] sm:$0xff]  ;;  %v12050_v25 = vld [vmem:[#allocation176_spill] sm:$0xff] }
 0x979   : > { %5406 = vst.msk [vmem:[%s11380_s2 + $0x458] sm:$0xff] %vm5272_vm1, %v5181_v13  ;;  %v5197_v41 = vadd.f32 %v4973_v48, %v12037_v27  ;;  %v12038_v13 = vld [vmem:[#allocation110_spill] sm:$0xff]  ;;  %v12049_v48 = vld [vmem:[#allocation144_spill] sm:$0xff] }
 0x97a   : > { %5407 = vst [vmem:[%s11380_s2 + $0x460] sm:$0xff] %v5182_v12  ;;  %v5198_v34 = vadd.f32 %v4974_v63, %v12038_v13  ;;  %v12039_v12 = vld [vmem:[#allocation142_spill] sm:$0xff]  ;;  %v4992_v63 = vld [vmem:[%s11380_s2 + $0x570] sm:$0xff]  ;;  %v4995_v13 = vld [vmem:[%s11380_s2 + $0x588] sm:$0xff] }
 0x97b   : > { %5408 = vst [vmem:[%s11380_s2 + $0x468] sm:$0xff] %v5183_v26  ;;  %v5199_v60 = vadd.f32 %v4975_v6, %v12039_v12  ;;  %v12040_v26 = vld [vmem:[#allocation174_spill] sm:$0xff]  ;;  %v12052_v12 = vld [vmem:[#allocation81_spill] sm:$0xff] }
 0x97c   : > { %5409 = vst [vmem:[%s11380_s2 + $0x470] sm:$0xff] %v5184_v16  ;;  %v5200_v47 = vadd.f32 %v4976_v30, %v12040_v26  ;;  %v5201_v16 = vadd.f32 %v4977_v58, %v8706_v31  ;;  %v5203_v31 = vadd.f32 %v4979_v21, %v12041_v55  ;;  %v4993_v6 = vld [vmem:[%s11380_s2 + $0x578] sm:$0xff]  ;;  %v5216_v30 = vadd.f32 %v4992_v63, %v8822_v28  ;;  %v4996_v58 = vld [vmem:[%s11380_s2 + $0x590] sm:$0xff] }
 0x97d   : > { %5410 = vst [vmem:[%s11380_s2 + $0x478] sm:$0xff] %v5185_v40  ;;  %v4981_v40 = vld [vmem:[%s11380_s2 + $0x518] sm:$0xff]  ;;  %v5219_v26 = vadd.f32 %v4995_v13, %v12053_v9  ;;  %v12054_v21 = vld [vmem:[#allocation145_spill] sm:$0xff] }
 0x97e   : > { %5411 = vst [vmem:[%s11380_s2 + $0x480] sm:$0xff] %v5186_v36  ;;  %v12042_v36 = vld [vmem:[#allocation79_spill] sm:$0xff]  ;;  %v5000_v55 = vld [vmem:[%s11380_s2 + $0x5b0] sm:$0xff]  ;;  %v12058_v5 = vld [vmem:[#allocation114_spill] sm:$0xff] }
 0x97f   : > { %5412 = vst [vmem:[%s11380_s2 + $0x488] sm:$0xff] %v5187_v20  ;;  %v5204_v61 = vadd.f32 %v4980_v23, %v12042_v36  ;;  %v12043_v20 = vld [vmem:[#allocation111_spill] sm:$0xff]  ;;  %v4999_v23 = vld [vmem:[%s11380_s2 + $0x5a8] sm:$0xff]  ;;  %v12059_v35 = vld [vmem:[#allocation146_spill] sm:$0xff] }
 0x980   : > { %5413 = vst.msk [vmem:[%s11380_s2 + $0x490] sm:$0xff] %vm5272_vm1, %v5188_v52  ;;  %v5205_v33 = vadd.f32 %v4981_v40, %v12043_v20  ;;  %v4984_v52 = vld [vmem:[%s11380_s2 + $0x530] sm:$0xff]  ;;  %v5223_v36 = vadd.f32 %v4999_v23, %v8824_v54  ;;  %v5003_v20 = vld [vmem:[%s11380_s2 + $0x5c8] sm:$0xff] }
 0x981   : > { %5414 = vst [vmem:[%s11380_s2 + $0x498] sm:$0xff] %v5189_v8  ;;  %v4985_v8 = vld [vmem:[%s11380_s2 + $0x538] sm:$0xff]  ;;  %v5208_v39 = vadd.f32 %v4984_v52, %v8708_v49  ;;  %v5004_v52 = vld [vmem:[%s11380_s2 + $0x5d0] sm:$0xff]  ;;  %v12070_v23 = vld [vmem:[#allocation180_spill] sm:$0xff] }
 0x982   : > { %5415 = vst [vmem:[%s11380_s2 + $0x4a0] sm:$0xff] %v5190_v3  ;;  %v4986_v3 = vld [vmem:[%s11380_s2 + $0x540] sm:$0xff] }
 0x983   : > { %5416 = vst [vmem:[%s11380_s2 + $0x4a8] sm:$0xff] %v5191_v18  ;;  %v5209_v18 = vadd.f32 %v4985_v8, %v8820_v45  ;;  %v5210_v49 = vadd.f32 %v4986_v3, %v12046_v7  ;;  %v5211_v45 = vadd.f32 %v4987_v42, %v12047_v38  ;;  %v5005_v8 = vld [vmem:[%s11380_s2 + $0x5d8] sm:$0xff]  ;;  %v5006_v3 = vld [vmem:[%s11380_s2 + $0x5e0] sm:$0xff]  ;;  %v5008_v7 = vld [vmem:[%s11380_s2 + $0x5f0] sm:$0xff] }
 0x984   : > { %5417 = vst [vmem:[%s11380_s2 + $0x4b0] sm:$0xff] %v5192_v53  ;;  %v4989_v53 = vld [vmem:[%s11380_s2 + $0x558] sm:$0xff]  ;;  %v12061_v38 = vld [vmem:[#allocation51_spill] sm:$0xff] }
 0x985   : > { %5418 = vst [vmem:[%s11380_s2 + $0x4b8] sm:$0xff] %v5193_v57  ;;  %v12048_v57 = vld [vmem:[#allocation112_spill] sm:$0xff] }
 0x986   : > { %5419 = vst [vmem:[%s11380_s2 + $0x4c0] sm:$0xff] %v5194_v46  ;;  %v5212_v2 = vadd.f32 %v4988_v37, %v12048_v57  ;;  %v4991_v46 = vld [vmem:[%s11380_s2 + $0x568] sm:$0xff]  ;;  %v5229_v37 = vadd.f32 %v5005_v8, %v8722_v14 }
 0x987   : > { %5420 = vst.msk [vmem:[%s11380_s2 + $0x4c8] sm:$0xff] %vm5272_vm1, %v5195_v1  ;;  %v5213_v1 = vadd.f32 %v4989_v53, %v12049_v48  ;;  %v5215_v27 = vadd.f32 %v4991_v46, %v8714_v10  ;;  %v5009_v53 = vld [vmem:[%s11380_s2 + $0x5f8] sm:$0xff]  ;;  %v5011_v57 = vld [vmem:[%s11380_s2 + $0x608] sm:$0xff]  ;;  %v5012_v48 = vld [vmem:[%s11380_s2 + $0x610] sm:$0xff] }
 0x988   : > { %5421 = vst [vmem:[%s11380_s2 + $0x4d0] sm:$0xff] %v5196_v24  ;;  %v5214_v24 = vadd.f32 %v4990_v4, %v12050_v25  ;;  %v12062_v4 = vld [vmem:[#allocation83_spill] sm:$0xff]  ;;  %v5013_v25 = vld [vmem:[%s11380_s2 + $0x618] sm:$0xff]  ;;  %v5027_v8 = vld [vmem:[%s11380_s2 + $0x688] sm:$0xff] }
 0x989   : > { %5422 = vst [vmem:[%s11380_s2 + $0x4d8] sm:$0xff] %v5197_v41  ;;  %v4994_v41 = vld [vmem:[%s11380_s2 + $0x580] sm:$0xff]  ;;  %v5237_v13 = vadd.f32 %v5013_v25, %v8828_v17 }
 0x98a   : > { %5423 = vst [vmem:[%s11380_s2 + $0x4e0] sm:$0xff] %v5198_v34  ;;  %v12051_v34 = vld [vmem:[#allocation49_spill] sm:$0xff]  ;;  %v5218_v28 = vadd.f32 %v4994_v41, %v12052_v12  ;;  %v5236_v41 = vadd.f32 %v5012_v48, %v8724_v32  ;;  %v12067_v12 = vld [vmem:[#allocation84_spill] sm:$0xff] }
 0x98b   : > { %5424 = vst [vmem:[%s11380_s2 + $0x4e8] sm:$0xff] %v5199_v60  ;;  %v5217_v10 = vadd.f32 %v4993_v6, %v12051_v34  ;;  %v4997_v60 = vld [vmem:[%s11380_s2 + $0x598] sm:$0xff]  ;;  %v5016_v34 = vld [vmem:[%s11380_s2 + $0x630] sm:$0xff] }
 0x98c   : > { %5425 = vst [vmem:[%s11380_s2 + $0x4f0] sm:$0xff] %v5200_v47  ;;  %v4998_v47 = vld [vmem:[%s11380_s2 + $0x5a0] sm:$0xff] }
 0x98d   : > { %5426 = vst [vmem:[%s11380_s2 + $0x4f8] sm:$0xff] %v5201_v16  ;;  %v5220_v16 = vadd.f32 %v4996_v58, %v12054_v21  ;;  %v5017_v58 = vld [vmem:[%s11380_s2 + $0x638] sm:$0xff] }
 0x98e   : > { %5427 = vst.msk [vmem:[%s11380_s2 + $0x500] sm:$0xff] %vm5272_vm1, %v5202_v51  ;;  %v12055_v51 = vld [vmem:[#allocation177_spill] sm:$0xff] }
 0x98f   : > { %5428 = vst [vmem:[%s11380_s2 + $0x508] sm:$0xff] %v5203_v31  ;;  %v5221_v40 = vadd.f32 %v4997_v60, %v12055_v51  ;;  %v5222_v31 = vadd.f32 %v4998_v47, %v8716_v0  ;;  %v5224_v0 = vadd.f32 %v5000_v55, %v12056_v11  ;;  %v12068_v60 = vld [vmem:[#allocation116_spill] sm:$0xff]  ;;  %v5024_v11 = vld [vmem:[%s11380_s2 + $0x670] sm:$0xff] }
 0x990   : > { %5429 = vst [vmem:[%s11380_s2 + $0x510] sm:$0xff] %v5204_v61  ;;  %v5002_v61 = vld [vmem:[%s11380_s2 + $0x5c0] sm:$0xff]  ;;  %v5240_v9 = vadd.f32 %v5016_v34, %v12068_v60  ;;  %v12069_v47 = vld [vmem:[#allocation148_spill] sm:$0xff]  ;;  %v5041_v60 = vld [vmem:[%s11380_s2 + $0x6f8] sm:$0xff] }
 0x991   : > { %5430 = vst [vmem:[%s11380_s2 + $0x518] sm:$0xff] %v5205_v33  ;;  %v12057_v33 = vld [vmem:[#allocation82_spill] sm:$0xff]  ;;  %v5241_v21 = vadd.f32 %v5017_v58, %v12069_v47  ;;  %v12083_v34 = vld [vmem:[#allocation87_spill] sm:$0xff]  ;;  %v12087_v47 = vld [vmem:[#allocation4_spill] sm:$0xff] }
 0x992   : > { %5431 = vst [vmem:[%s11380_s2 + $0x520] sm:$0xff] %v5206_v22  ;;  %v5225_v54 = vadd.f32 %v5001_v59, %v12057_v33  ;;  %v5226_v22 = vadd.f32 %v5002_v61, %v12058_v5  ;;  %v12071_v61 = vld [vmem:[#allocation53_spill] sm:$0xff] }
 0x993   : > { %5432 = vst [vmem:[%s11380_s2 + $0x528] sm:$0xff] %v5207_v19  ;;  %v5227_v19 = vadd.f32 %v5003_v20, %v12059_v35  ;;  %v5025_v20 = vld [vmem:[%s11380_s2 + $0x678] sm:$0xff]  ;;  %v12073_v33 = vld [vmem:[#allocation117_spill] sm:$0xff] }
 0x994   : > { %5433 = vst [vmem:[%s11380_s2 + $0x530] sm:$0xff] %v5208_v39  ;;  %v12060_v39 = vld [vmem:[#allocation178_spill] sm:$0xff]  ;;  %v12074_v5 = vld [vmem:[#allocation149_spill] sm:$0xff] }
 0x995   : > { %5434 = vst.msk [vmem:[%s11380_s2 + $0x538] sm:$0xff] %vm5272_vm1, %v5209_v18  ;;  %v5228_v42 = vadd.f32 %v5004_v52, %v12060_v39  ;;  %v5007_v18 = vld [vmem:[%s11380_s2 + $0x5e8] sm:$0xff]  ;;  %v5026_v52 = vld [vmem:[%s11380_s2 + $0x680] sm:$0xff]  ;;  %v12075_v35 = vld [vmem:[#allocation181_spill] sm:$0xff] }
 0x996   : > { %5435 = vst [vmem:[%s11380_s2 + $0x540] sm:$0xff] %v5210_v49  ;;  %v5230_v49 = vadd.f32 %v5006_v3, %v8826_v29  ;;  %v5231_v14 = vadd.f32 %v5007_v18, %v12061_v38  ;;  %v5232_v29 = vadd.f32 %v5008_v7, %v12062_v4  ;;  %v5028_v3 = vld [vmem:[%s11380_s2 + $0x690] sm:$0xff]  ;;  %v5250_v39 = vadd.f32 %v5026_v52, %v8732_v44  ;;  %v12076_v7 = vld [vmem:[#allocation54_spill] sm:$0xff] }
 0x997   : > { %5436 = vst [vmem:[%s11380_s2 + $0x548] sm:$0xff] %v5211_v45  ;;  %v5010_v45 = vld [vmem:[%s11380_s2 + $0x600] sm:$0xff]  ;;  %v5251_v18 = vadd.f32 %v5027_v8, %v8832_v43  ;;  %v5252_v44 = vadd.f32 %v5028_v3, %v12076_v7  ;;  %v5032_v38 = vld [vmem:[%s11380_s2 + $0x6b0] sm:$0xff]  ;;  %v5033_v4 = vld [vmem:[%s11380_s2 + $0x6b8] sm:$0xff] }
 0x998   : > { %5437 = vst [vmem:[%s11380_s2 + $0x550] sm:$0xff] %v5212_v2  ;;  %v12063_v2 = vld [vmem:[#allocation115_spill] sm:$0xff] }
 0x999   : > { %5438 = vst [vmem:[%s11380_s2 + $0x558] sm:$0xff] %v5213_v1  ;;  %v5233_v46 = vadd.f32 %v5009_v53, %v12063_v2  ;;  %v12064_v1 = vld [vmem:[#allocation147_spill] sm:$0xff]  ;;  %v12077_v53 = vld [vmem:[#allocation86_spill] sm:$0xff] }
 0x99a   : > { %5439 = vst [vmem:[%s11380_s2 + $0x560] sm:$0xff] %v5214_v24  ;;  %v5234_v63 = vadd.f32 %v5010_v45, %v12064_v1  ;;  %v12065_v24 = vld [vmem:[#allocation179_spill] sm:$0xff]  ;;  %v5035_v1 = vld [vmem:[%s11380_s2 + $0x6c8] sm:$0xff] }
 0x99b   : > { %5440 = vst [vmem:[%s11380_s2 + $0x568] sm:$0xff] %v5215_v27  ;;  %v5235_v6 = vadd.f32 %v5011_v57, %v12065_v24  ;;  %v5014_v27 = vld [vmem:[%s11380_s2 + $0x620] sm:$0xff]  ;;  %v5036_v24 = vld [vmem:[%s11380_s2 + $0x6d0] sm:$0xff] }
 0x99c   : > { %5441 = vst.msk [vmem:[%s11380_s2 + $0x570] sm:$0xff] %vm5272_vm1, %v5216_v30  ;;  %v5015_v30 = vld [vmem:[%s11380_s2 + $0x628] sm:$0xff]  ;;  %v5034_v2 = vld [vmem:[%s11380_s2 + $0x6c0] sm:$0xff] }
 0x99d   : > { %5442 = vst [vmem:[%s11380_s2 + $0x578] sm:$0xff] %v5217_v10  ;;  %v12066_v10 = vld [vmem:[#allocation52_spill] sm:$0xff]  ;;  %v5239_v17 = vadd.f32 %v5015_v30, %v12067_v12  ;;  %v5040_v12 = vld [vmem:[%s11380_s2 + $0x6f0] sm:$0xff] }
 0x99e   : > { %5443 = vst [vmem:[%s11380_s2 + $0x580] sm:$0xff] %v5218_v28  ;;  %v5238_v32 = vadd.f32 %v5014_v27, %v12066_v10  ;;  %v5018_v28 = vld [vmem:[%s11380_s2 + $0x640] sm:$0xff]  ;;  %v5037_v27 = vld [vmem:[%s11380_s2 + $0x6d8] sm:$0xff]  ;;  %v5039_v10 = vld [vmem:[%s11380_s2 + $0x6e8] sm:$0xff] }
 0x99f   : > { %5444 = vst [vmem:[%s11380_s2 + $0x588] sm:$0xff] %v5219_v26  ;;  %v5019_v26 = vld [vmem:[%s11380_s2 + $0x648] sm:$0xff]  ;;  %v5242_v51 = vadd.f32 %v5018_v28, %v12070_v23 }
 0x9a0   : > { %5445 = vst [vmem:[%s11380_s2 + $0x590] sm:$0xff] %v5220_v16  ;;  %v5020_v16 = vld [vmem:[%s11380_s2 + $0x650] sm:$0xff]  ;;  %v5243_v55 = vadd.f32 %v5019_v26, %v8730_v62 }
 0x9a1   : > { %5446 = vst [vmem:[%s11380_s2 + $0x598] sm:$0xff] %v5221_v40  ;;  %v5021_v40 = vld [vmem:[%s11380_s2 + $0x658] sm:$0xff]  ;;  %v5244_v59 = vadd.f32 %v5020_v16, %v8830_v50  ;;  %v5265_v16 = vadd.f32 %v5041_v60, %v8836_v15 }
 0x9a2   : > { %5447 = vst [vmem:[%s11380_s2 + $0x5a0] sm:$0xff] %v5222_v31  ;;  %v5022_v31 = vld [vmem:[%s11380_s2 + $0x660] sm:$0xff]  ;;  %v5245_v62 = vadd.f32 %v5021_v40, %v12071_v61 }
 0x9a3   : > { %5448 = vst.msk [vmem:[%s11380_s2 + $0x5a8] sm:$0xff] %vm5272_vm1, %v5223_v36  ;;  %v5023_v36 = vld [vmem:[%s11380_s2 + $0x668] sm:$0xff] }
 0x9a4   : > { %5449 = vst [vmem:[%s11380_s2 + $0x5b0] sm:$0xff] %v5224_v0  ;;  %v12072_v0 = vld [vmem:[#allocation85_spill] sm:$0xff] }
 0x9a5   : > { %5450 = vst [vmem:[%s11380_s2 + $0x5b8] sm:$0xff] %v5225_v54  ;;  %v5246_v50 = vadd.f32 %v5022_v31, %v12072_v0  ;;  %v5247_v54 = vadd.f32 %v5023_v36, %v12073_v33 }
 0x9a6   : > { %5451 = vst [vmem:[%s11380_s2 + $0x5c0] sm:$0xff] %v5226_v22  ;;  %v5248_v22 = vadd.f32 %v5024_v11, %v12074_v5 }
 0x9a7   : > { %5452 = vst [vmem:[%s11380_s2 + $0x5c8] sm:$0xff] %v5227_v19  ;;  %v5249_v19 = vadd.f32 %v5025_v20, %v12075_v35 }
 0x9a8   : > { %5453 = vst [vmem:[%s11380_s2 + $0x5d0] sm:$0xff] %v5228_v42  ;;  %v5029_v42 = vld [vmem:[%s11380_s2 + $0x698] sm:$0xff] }
 0x9a9   : > { %5454 = vst [vmem:[%s11380_s2 + $0x5d8] sm:$0xff] %v5229_v37  ;;  %v5030_v37 = vld [vmem:[%s11380_s2 + $0x6a0] sm:$0xff]  ;;  %v5253_v43 = vadd.f32 %v5029_v42, %v12077_v53 }
 0x9aa   : > { %5455 = vst.msk [vmem:[%s11380_s2 + $0x5e0] sm:$0xff] %vm5272_vm1, %v5230_v49  ;;  %v5031_v49 = vld [vmem:[%s11380_s2 + $0x6a8] sm:$0xff] }
 0x9ab   : > { %5456 = vst [vmem:[%s11380_s2 + $0x5e8] sm:$0xff] %v5231_v14  ;;  %v12078_v14 = vld [vmem:[#allocation118_spill] sm:$0xff] }
 0x9ac   : > { %5457 = vst [vmem:[%s11380_s2 + $0x5f0] sm:$0xff] %v5232_v29  ;;  %v5254_v45 = vadd.f32 %v5030_v37, %v12078_v14  ;;  %v12079_v29 = vld [vmem:[#allocation150_spill] sm:$0xff] }
 0x9ad   : > { %5458 = vst [vmem:[%s11380_s2 + $0x5f8] sm:$0xff] %v5233_v46  ;;  %v5255_v57 = vadd.f32 %v5031_v49, %v12079_v29  ;;  %v12080_v46 = vld [vmem:[#allocation182_spill] sm:$0xff] }
 0x9ae   : > { %5459 = vst [vmem:[%s11380_s2 + $0x600] sm:$0xff] %v5234_v63  ;;  %v5256_v48 = vadd.f32 %v5032_v38, %v12080_v46  ;;  %v12081_v63 = vld [vmem:[#allocation3_spill] sm:$0xff] }
 0x9af   : > { %5460 = vst [vmem:[%s11380_s2 + $0x608] sm:$0xff] %v5235_v6  ;;  %v5257_v25 = vadd.f32 %v5033_v4, %v12081_v63  ;;  %v5258_v6 = vadd.f32 %v5034_v2, %v8834_v56  ;;  %v5260_v56 = vadd.f32 %v5036_v24, %v12083_v34 }
 0x9b0   : > { %5461 = vst [vmem:[%s11380_s2 + $0x610] sm:$0xff] %v5236_v41  ;;  %v12082_v41 = vld [vmem:[#allocation55_spill] sm:$0xff] }
 0x9b1   : > { %5462 = vst.msk [vmem:[%s11380_s2 + $0x618] sm:$0xff] %vm5272_vm1, %v5237_v13  ;;  %v5259_v30 = vadd.f32 %v5035_v1, %v12082_v41  ;;  %v5038_v13 = vld [vmem:[%s11380_s2 + $0x6e0] sm:$0xff] }
 0x9b2   : > { %5463 = vst [vmem:[%s11380_s2 + $0x620] sm:$0xff] %v5238_v32  ;;  %v12084_v32 = vld [vmem:[#allocation119_spill] sm:$0xff] }
 0x9b3   : > { %5464 = vst [vmem:[%s11380_s2 + $0x628] sm:$0xff] %v5239_v17  ;;  %v5261_v58 = vadd.f32 %v5037_v27, %v12084_v32  ;;  %v12085_v17 = vld [vmem:[#allocation151_spill] sm:$0xff] }
 0x9b4   : > { %5465 = vst [vmem:[%s11380_s2 + $0x630] sm:$0xff] %v5240_v9  ;;  %v5262_v28 = vadd.f32 %v5038_v13, %v12085_v17  ;;  %v12086_v9 = vld [vmem:[#allocation183_spill] sm:$0xff] }
 0x9b5   : > { %5466 = vst [vmem:[%s11380_s2 + $0x638] sm:$0xff] %v5241_v21  ;;  %v5263_v26 = vadd.f32 %v5039_v10, %v12086_v9  ;;  %v5264_v21 = vadd.f32 %v5040_v12, %v12087_v47 }
 0x9b6   : > { %5467 = vst [vmem:[%s11380_s2 + $0x640] sm:$0xff] %v5242_v51 }
 0x9b7   : > { %5468 = vst [vmem:[%s11380_s2 + $0x648] sm:$0xff] %v5243_v55 }
 0x9b8   : > { %5469 = vst.msk [vmem:[%s11380_s2 + $0x650] sm:$0xff] %vm5272_vm1, %v5244_v59 }
 0x9b9   : > { %5470 = vst [vmem:[%s11380_s2 + $0x658] sm:$0xff] %v5245_v62 }
 0x9ba   : > { %5471 = vst [vmem:[%s11380_s2 + $0x660] sm:$0xff] %v5246_v50 }
 0x9bb   : > { %5472 = vst [vmem:[%s11380_s2 + $0x668] sm:$0xff] %v5247_v54 }
 0x9bc   : > { %5473 = vst [vmem:[%s11380_s2 + $0x670] sm:$0xff] %v5248_v22 }
 0x9bd   : > { %5474 = vst [vmem:[%s11380_s2 + $0x678] sm:$0xff] %v5249_v19 }
 0x9be   : > { %5475 = vst [vmem:[%s11380_s2 + $0x680] sm:$0xff] %v5250_v39 }
 0x9bf   : > { %5476 = vst.msk [vmem:[%s11380_s2 + $0x688] sm:$0xff] %vm5272_vm1, %v5251_v18 }
 0x9c0   : > { %5477 = vst [vmem:[%s11380_s2 + $0x690] sm:$0xff] %v5252_v44 }
 0x9c1   : > { %5478 = vst [vmem:[%s11380_s2 + $0x698] sm:$0xff] %v5253_v43 }
 0x9c2   : > { %5479 = vst [vmem:[%s11380_s2 + $0x6a0] sm:$0xff] %v5254_v45 }
 0x9c3   : > { %5480 = vst [vmem:[%s11380_s2 + $0x6a8] sm:$0xff] %v5255_v57 }
 0x9c4   : > { %5481 = vst [vmem:[%s11380_s2 + $0x6b0] sm:$0xff] %v5256_v48 }
 0x9c5   : > { %5482 = vst [vmem:[%s11380_s2 + $0x6b8] sm:$0xff] %v5257_v25 }
 0x9c6   : > { %5483 = vst.msk [vmem:[%s11380_s2 + $0x6c0] sm:$0xff] %vm5272_vm1, %v5258_v6 }
 0x9c7   : > { %5484 = vst [vmem:[%s11380_s2 + $0x6c8] sm:$0xff] %v5259_v30 }
 0x9c8   : > { %5485 = vst [vmem:[%s11380_s2 + $0x6d0] sm:$0xff] %v5260_v56 }
 0x9c9   : > { %5486 = vst [vmem:[%s11380_s2 + $0x6d8] sm:$0xff] %v5261_v58 }
 0x9ca   : > { %5487 = vst [vmem:[%s11380_s2 + $0x6e0] sm:$0xff] %v5262_v28 }
 0x9cb   : > { %5488 = vst [vmem:[%s11380_s2 + $0x6e8] sm:$0xff] %v5263_v26 }
 0x9cc   : > { %5489 = vst [vmem:[%s11380_s2 + $0x6f0] sm:$0xff] %v5264_v21 }
 0x9cd   : > { %5490 = vst.msk [vmem:[%s11380_s2 + $0x6f8] sm:$0xff] %vm5272_vm1, %v5265_v16 }
 0x9ce PF: > { %p9_p11 = scmp.ge.s32.totalorder %s7075_s13, 4   ;;  %s12088_s9 = smov %s7035_s10 }
 0x9cf   : > { %s12089_s10 = smov %s7084_s16  ;;  %s12090_s11 = smov %s7075_s13 }
 0x9d0   :  { %11 = sbr.rel (!%p9_p11) target bundleno = 2 (0x2), region = 93 }

</bundles_post_ra>
